<compile_context>
chip_gen: v7x
topology: tpu7x:2x2x1
jax: 0.10.0
libtpu: 0.0.40
codegen_flags: <defaults>
</compile_context>

<pallas_src>
import functools

import jax
import jax.numpy as jnp
from jax import lax
from jax.experimental import pallas as pl
from jax.experimental.pallas import tpu as pltpu


_VMEM_LIMIT_BYTES = 32 * 1024 * 1024   # safe on v5e/v6e (128 MiB) and v7x (64 MiB)
_LANE = 128                            # lane width -> lane-dense channel padding


def _round_up(n, m):
    return ((n + m - 1) // m) * m


def _pick_tile_h(h, w, c_in, c_out, *, max_tile_h=32,
                 vmem_budget_bytes=8 * 1024 * 1024):
    """Largest multiple-of-8 divisor of `h` whose double-buffered bf16 in/out
    row blocks fit the VMEM budget, capped at max_tile_h."""
    per_row = 2 * 2 * w * (c_in + c_out)          # 2 bytes * 2 buffers
    cap = min(max_tile_h, max(8, vmem_budget_bytes // max(per_row, 1)))
    best = None
    for t in range(8, h + 1, 8):
        if h % t == 0 and t <= cap:
            best = t
    return best if best is not None else h


def _compiler_params():
    return pltpu.CompilerParams(
        dimension_semantics=("parallel", "parallel"),
        vmem_limit_bytes=_VMEM_LIMIT_BYTES)


def _halo_in_specs(tile_h, H, W, Cin):
    """(top 1-row strip, middle tile, bottom 1-row strip) BlockSpecs."""
    mid = pl.BlockSpec((1, tile_h, W, Cin), lambda b, h: (b, h, 0, 0))
    top = pl.BlockSpec(
        (1, 1, W, Cin),
        lambda b, h: (b, jnp.maximum(h * tile_h - 1, 0), 0, 0))
    bot = pl.BlockSpec(
        (1, 1, W, Cin),
        lambda b, h: (b, jnp.minimum((h + 1) * tile_h, H - 1), 0, 0))
    return top, mid, bot


def _assemble_halo_tile(top_ref, mid_ref, bot_ref, dtype):
    """Build the (1, T+2, W+2, Cin) zero-padded conv input tile in VMEM."""
    h_idx = pl.program_id(1)
    n_h = pl.num_programs(1)
    keep_top = jnp.minimum(h_idx, 1).astype(jnp.float32)            # 0 on first tile
    keep_bot = jnp.minimum(n_h - 1 - h_idx, 1).astype(jnp.float32)  # 0 on last tile
    top = (top_ref[...].astype(jnp.float32) * keep_top).astype(dtype)
    bot = (bot_ref[...].astype(jnp.float32) * keep_bot).astype(dtype)
    mid = mid_ref[...].astype(dtype)
    xt = jnp.concatenate([top, mid, bot], axis=1)                    # (1, T+2, W, Cin)
    _, tp2, _, cin = xt.shape
    zcol = jnp.zeros((1, tp2, 1, cin), dtype)
    return jnp.concatenate([zcol, xt, zcol], axis=2)                 # (1, T+2, W+2, Cin)


# ---------------------------------------------------------------------------
# Fused cost volume + channel concat (cv, left) with lane-dense channel pad.
# ---------------------------------------------------------------------------
def _cost_volume_concat_kernel(l_ref, r_ref, o_ref, *, lvls, c_pad):
    left = l_ref[...].astype(jnp.float32)                  # (1, T, W, C)
    right = r_ref[...].astype(jnp.float32)
    _, bh, bw, c = left.shape

    # Pad `right` once along W (single zero concat instead of one per shift).
    # The zero fill reproduces torch's new_zeros() out-of-range columns since
    # left * 0 == 0.
    zpad = jnp.zeros((1, bh, lvls, c), jnp.float32)
    rp = jnp.concatenate([zpad, right, zpad], axis=2)      # (1, T, W + 2*lvls, C)

    parts = []
    for i in range(-lvls, lvls + 1):
        shifted = rp[:, :, lvls - i:lvls - i + bw, :]      # == right[..., w - i, :]
        parts.append(jnp.mean(left * shifted, axis=-1, keepdims=True))
    parts.append(left)                                     # fused torch.cat((cv, left))
    n_extra = c_pad - (2 * lvls + 1) - c
    if n_extra > 0:                                        # lane-dense channel pad
        parts.append(jnp.zeros((1, bh, bw, n_extra), jnp.float32))
    o_ref[...] = jnp.concatenate(parts, axis=-1).astype(o_ref.dtype)


def cost_volume_concat(left, right, lvls, c_pad, *, tile_h,
                       out_dtype=jnp.bfloat16):
    B, H, W, C = left.shape
    assert H % tile_h == 0
    in_spec = pl.BlockSpec((1, tile_h, W, C), lambda b, h: (b, h, 0, 0))
    out_spec = pl.BlockSpec((1, tile_h, W, c_pad), lambda b, h: (b, h, 0, 0))
    return pl.pallas_call(
        functools.partial(_cost_volume_concat_kernel, lvls=lvls, c_pad=c_pad),
        grid=(B, H // tile_h),
        in_specs=[in_spec, in_spec],
        out_specs=out_spec,
        out_shape=jax.ShapeDtypeStruct((B, H, W, c_pad), out_dtype),
        compiler_params=_compiler_params(),
    )(left, right)


# ---------------------------------------------------------------------------
# 3x3 conv (pad=1) + folded BatchNorm affine + LeakyReLU, bf16 MXU matmuls.
# ---------------------------------------------------------------------------
def _conv3x3_bn_lrelu_kernel(top_ref, mid_ref, bot_ref, w_ref, s_ref, b_ref,
                             o_ref, *, negative_slope):
    xw = _assemble_halo_tile(top_ref, mid_ref, bot_ref, jnp.bfloat16)
    _, tp2, wp2, cin = xw.shape
    bh, bw = tp2 - 2, wp2 - 2
    cout = w_ref.shape[-1]

    # Hoist the (unaligned) width slices out of the dy loop: 3 relayouts, not 9.
    xs = [xw[:, :, dx:dx + bw, :] for dx in range(3)]

    acc = jnp.zeros((bh * bw, cout), jnp.float32)
    for dy in range(3):
        for dx in range(3):
            patch = xs[dx][:, dy:dy + bh, :, :].reshape(bh * bw, cin)
            acc = acc + jnp.dot(patch, w_ref[dy, dx],          # bf16 x bf16 -> f32
                                preferred_element_type=jnp.float32)

    y = acc * s_ref[...] + b_ref[...]                          # folded BN (f32)
    y = jnp.where(y >= 0, y, negative_slope * y)               # LeakyReLU
    o_ref[...] = y.reshape(1, bh, bw, cout).astype(o_ref.dtype)


def conv3x3_bn_lrelu(x, w, scale, bias, *, negative_slope, tile_h,
                     out_dtype=jnp.bfloat16):
    B, H, W, Cin = x.shape
    assert w.shape[:3] == (3, 3, Cin)
    Cout = w.shape[-1]
    assert H % tile_h == 0
    top, mid, bot = _halo_in_specs(tile_h, H, W, Cin)
    w_spec = pl.BlockSpec((3, 3, Cin, Cout), lambda b, h: (0, 0, 0, 0))
    v_spec = pl.BlockSpec((1, Cout), lambda b, h: (0, 0))
    out_spec = pl.BlockSpec((1, tile_h, W, Cout), lambda b, h: (b, h, 0, 0))
    return pl.pallas_call(
        functools.partial(_conv3x3_bn_lrelu_kernel,
                          negative_slope=negative_slope),
        grid=(B, H // tile_h),
        in_specs=[top, mid, bot, w_spec, v_spec, v_spec],
        out_specs=out_spec,
        out_shape=jax.ShapeDtypeStruct((B, H, W, Cout), out_dtype),
        compiler_params=_compiler_params(),
    )(x, x, x,
      w.astype(jnp.bfloat16),
      scale.reshape(1, Cout).astype(jnp.float32),
      bias.reshape(1, Cout).astype(jnp.float32))


# ---------------------------------------------------------------------------
# Final Conv2d(Cin, 1, 3, 1, 1) with bias: VPU path + lane-dense (B, H, W) out.
# ---------------------------------------------------------------------------
def _conv3x3_cout1_kernel(top_ref, mid_ref, bot_ref, w_ref, b_ref, o_ref):
    xw = _assemble_halo_tile(top_ref, mid_ref, bot_ref, jnp.float32)
    _, tp2, wp2, cin = xw.shape
    bh, bw = tp2 - 2, wp2 - 2

    xs = [xw[:, :, dx:dx + bw, :] for dx in range(3)]

    acc = jnp.zeros((bh, bw), jnp.float32)
    for dy in range(3):
        for dx in range(3):
            patch = xs[dx][0, dy:dy + bh, :, :]                # (bh, bw, Cin)
            k = dy * 3 + dx
            tap = w_ref[k:k + 1, :].reshape(1, 1, cin)         # (1, 1, Cin)
            acc = acc + jnp.sum(patch * tap, axis=-1)          # channel reduce (XLU)

    o_ref[...] = (acc + b_ref[...])[None, :, :].astype(o_ref.dtype)


def conv3x3_cout1(x, w, bias, *, tile_h):
    B, H, W, Cin = x.shape
    assert w.shape == (3, 3, Cin, 1)
    assert H % tile_h == 0
    top, mid, bot = _halo_in_specs(tile_h, H, W, Cin)
    w_spec = pl.BlockSpec((9, Cin), lambda b, h: (0, 0))
    b_spec = pl.BlockSpec((1, 1), lambda b, h: (0, 0))
    out_spec = pl.BlockSpec((1, tile_h, W), lambda b, h: (b, h, 0))
    return pl.pallas_call(
        _conv3x3_cout1_kernel,
        grid=(B, H // tile_h),
        in_specs=[top, mid, bot, w_spec, b_spec],
        out_specs=out_spec,
        out_shape=jax.ShapeDtypeStruct((B, H, W), jnp.float32),
        compiler_params=_compiler_params(),
    )(x, x, x,
      w.reshape(9, Cin).astype(jnp.float32),
      bias.reshape(1, 1).astype(jnp.float32))


# ---------------------------------------------------------------------------
# MatchNet2 forward
# ---------------------------------------------------------------------------
def matchnet2_forward(left, right, params, max_disparity, *, tile_h=None):
    conv_params, (w_last, b_last) = params
    B, H, W, C = left.shape
    n_cv = 2 * max_disparity + 1
    c_pad = _round_up(n_cv + C, _LANE)

    if tile_h is None:
        tile_h = _pick_tile_h(H, W, c_pad, 128)
    assert H % tile_h == 0 and (tile_h % 8 == 0 or tile_h == H)

    # Fused cost volume + torch.cat((cv, left)) with lane-dense channels (bf16).
    x = cost_volume_concat(left, right, max_disparity, c_pad, tile_h=tile_h)

    for li, (w, s, b) in enumerate(conv_params):
        if li == 0:
            # zero-pad the first conv's input channels to the lane-dense c_pad
            w = jnp.pad(w, ((0, 0), (0, 0), (0, c_pad - w.shape[2]), (0, 0)))
        x = conv3x3_bn_lrelu(x, w, s, b, negative_slope=0.1, tile_h=tile_h)

    out = conv3x3_cout1(x, w_last, b_last, tile_h=tile_h)     # (B, H, W) f32
    return out[..., None]                                     # (B, H, W, 1)


def init_params(key, ch_in, max_disparity):
    """Deterministic synthetic parameters; BN folded to eval-mode scale/bias."""
    cv_ch = 2 * max_disparity + 1
    chans = [ch_in + cv_ch, 128, 128, 96, 64, 32]
    eps = 1e-5
    conv_params = []
    for li in range(5):
        key, kw, kg, kb, km, kv = jax.random.split(key, 6)
        cin, cout = chans[li], chans[li + 1]
        w = jax.random.normal(kw, (3, 3, cin, cout), jnp.float32)
        w = w * jnp.sqrt(2.0 / (9 * cin))
        gamma = jax.random.uniform(kg, (cout,), jnp.float32, 0.5, 1.5)
        beta = jax.random.normal(kb, (cout,), jnp.float32) * 0.1
        mean = jax.random.normal(km, (cout,), jnp.float32) * 0.1
        var = jax.random.uniform(kv, (cout,), jnp.float32, 0.5, 1.5)
        s = gamma * lax.rsqrt(var + eps)
        b = beta - mean * s
        conv_params.append((w, s, b))
    key, kw, kb = jax.random.split(key, 3)
    w_last = jax.random.normal(kw, (3, 3, 32, 1), jnp.float32)
    w_last = w_last * jnp.sqrt(2.0 / (9 * 32))
    b_last = jax.random.normal(kb, (1,), jnp.float32) * 0.1
    return conv_params, (w_last, b_last)


# ---------------------------------------------------------------------------
# Plain-JAX reference (f32, HIGHEST) for verification
# ---------------------------------------------------------------------------
def reference_forward(left, right, params, max_disparity):
    conv_params, (w_last, b_last) = params
    B, H, W, _ = left.shape
    cols = []
    for i in range(-max_disparity, max_disparity + 1):
        lo, hi = max(i, 0), W + min(i, 0)
        rlo, rhi = max(-i, 0), W + min(-i, 0)
        corr = jnp.mean(left[:, :, lo:hi, :] * right[:, :, rlo:rhi, :], axis=-1)
        full = jnp.zeros((B, H, W), jnp.float32)
        full = lax.dynamic_update_slice(full, corr, (0, 0, lo))
        cols.append(full[..., None])
    x = jnp.concatenate(cols + [left], axis=-1)
    for (w, s, b) in conv_params:
        y = lax.conv_general_dilated(
            x, w, window_strides=(1, 1), padding=((1, 1), (1, 1)),
            dimension_numbers=("NHWC", "HWIO", "NHWC"),
            precision=lax.Precision.HIGHEST)
        y = y * s.reshape(1, 1, 1, -1) + b.reshape(1, 1, 1, -1)
        x = jnp.where(y >= 0, y, 0.1 * y)
    y = lax.conv_general_dilated(
        x, w_last, window_strides=(1, 1), padding=((1, 1), (1, 1)),
        dimension_numbers=("NHWC", "HWIO", "NHWC"),
        precision=lax.Precision.HIGHEST)
    return y + b_last.reshape(1, 1, 1, -1)


if __name__ == "__main__":
    key = jax.random.PRNGKey(0)
    B, C, H, W = 2, 16, 16, 16          # batch, ch_in, spatial
    MAX_DISPARITY = 4                   # cost volume -> 9 channels

    k_left, k_right, k_params = jax.random.split(key, 3)
    left = jax.random.normal(k_left, (B, H, W, C), jnp.float32)
    right = jax.random.normal(k_right, (B, H, W, C), jnp.float32)
    params = init_params(k_params, C, MAX_DISPARITY)

    # tile_h=8 exercises the multi-tile halo path (H=16 -> 2 row tiles).
    fwd = jax.jit(functools.partial(matchnet2_forward,
                                    max_disparity=MAX_DISPARITY, tile_h=8))
    out = fwd(left, right, params)
    out = jax.block_until_ready(out)
    assert out.shape == (B, H, W, 1), out.shape

    ref = reference_forward(left, right, params, MAX_DISPARITY)
    max_err = float(jnp.max(jnp.abs(out - ref)))
    rel_l2 = float(jnp.linalg.norm(out - ref) / (jnp.linalg.norm(ref) + 1e-12))
    # bf16 MXU inputs / bf16 intermediate activations => loosened tolerance.
    if not (bool(jnp.all(jnp.isfinite(out))) and rel_l2 < 0.1):
        raise AssertionError(
            f"Pallas output mismatch vs reference: max_err={max_err}, "
            f"rel_l2={rel_l2}")

    print("KERNEL_OK")
</pallas_src>

<mosaic_0001>
module attributes {stable_mosaic.version = 11 : i64} {
  func.func @_cost_volume_concat_kernel(%arg0: i32, %arg1: i32, %arg2: memref<1x8x16x16xf32, #tpu.memory_space<vmem>>, %arg3: memref<1x8x16x16xf32, #tpu.memory_space<vmem>>, %arg4: memref<1x8x16x128xbf16, #tpu.memory_space<vmem>>) attributes {dimension_semantics = [#tpu.dimension_semantics<parallel>, #tpu.dimension_semantics<parallel>], iteration_bounds = array<i64: 2, 2>, scalar_prefetch = 0 : i64, scratch_operands = 0 : i64, tpu.core_type = #tpu.core_type<tc>, window_params = [{transform_indices = @transform_0, window_bounds = array<i64: 1, 8, 16, 16>}, {transform_indices = @transform_1, window_bounds = array<i64: 1, 8, 16, 16>}, {transform_indices = @transform_2, window_bounds = array<i64: 1, 8, 16, 128>}]} {
    %c0 = arith.constant 0 : index
    %c0_0 = arith.constant 0 : index
    %c0_1 = arith.constant 0 : index
    %c0_2 = arith.constant 0 : index
    %0 = vector.load %arg2[%c0, %c0_0, %c0_1, %c0_2] : memref<1x8x16x16xf32, #tpu.memory_space<vmem>>, vector<1x8x16x16xf32>
    %c0_3 = arith.constant 0 : index
    %c0_4 = arith.constant 0 : index
    %c0_5 = arith.constant 0 : index
    %c0_6 = arith.constant 0 : index
    %1 = vector.load %arg3[%c0_3, %c0_4, %c0_5, %c0_6] : memref<1x8x16x16xf32, #tpu.memory_space<vmem>>, vector<1x8x16x16xf32>
    %cst = arith.constant 0.000000e+00 : f32
    %2 = vector.broadcast %cst : f32 to vector<1x8x4x16xf32>
    %3 = tpu.concatenate %2, %1, %2 in 2 : vector<1x8x4x16xf32>, vector<1x8x16x16xf32>, vector<1x8x4x16xf32> -> vector<1x8x24x16xf32>
    %4 = vector.extract_strided_slice %3 {offsets = [0, 0, 8, 0], sizes = [1, 8, 16, 16], strides = [1, 1, 1, 1]} : vector<1x8x24x16xf32> to vector<1x8x16x16xf32>
    %5 = arith.mulf %0, %4 : vector<1x8x16x16xf32>
    %cst_7 = arith.constant dense<0.000000e+00> : vector<1x8x16xf32>
    %6 = vector.multi_reduction <add>, %5, %cst_7 [3] : vector<1x8x16x16xf32> to vector<1x8x16xf32>
    %7 = vector.shape_cast %6 : vector<1x8x16xf32> to vector<1x8x16x1xf32>
    %cst_8 = arith.constant 1.600000e+01 : f32
    %8 = vector.broadcast %cst_8 : f32 to vector<1x8x16x1xf32>
    %9 = arith.divf %7, %8 : vector<1x8x16x1xf32>
    %10 = vector.extract_strided_slice %3 {offsets = [0, 0, 7, 0], sizes = [1, 8, 16, 16], strides = [1, 1, 1, 1]} : vector<1x8x24x16xf32> to vector<1x8x16x16xf32>
    %11 = arith.mulf %0, %10 : vector<1x8x16x16xf32>
    %cst_9 = arith.constant dense<0.000000e+00> : vector<1x8x16xf32>
    %12 = vector.multi_reduction <add>, %11, %cst_9 [3] : vector<1x8x16x16xf32> to vector<1x8x16xf32>
    %13 = vector.shape_cast %12 : vector<1x8x16xf32> to vector<1x8x16x1xf32>
    %cst_10 = arith.constant 1.600000e+01 : f32
    %14 = vector.broadcast %cst_10 : f32 to vector<1x8x16x1xf32>
    %15 = arith.divf %13, %14 : vector<1x8x16x1xf32>
    %16 = vector.extract_strided_slice %3 {offsets = [0, 0, 6, 0], sizes = [1, 8, 16, 16], strides = [1, 1, 1, 1]} : vector<1x8x24x16xf32> to vector<1x8x16x16xf32>
    %17 = arith.mulf %0, %16 : vector<1x8x16x16xf32>
    %cst_11 = arith.constant dense<0.000000e+00> : vector<1x8x16xf32>
    %18 = vector.multi_reduction <add>, %17, %cst_11 [3] : vector<1x8x16x16xf32> to vector<1x8x16xf32>
    %19 = vector.shape_cast %18 : vector<1x8x16xf32> to vector<1x8x16x1xf32>
    %cst_12 = arith.constant 1.600000e+01 : f32
    %20 = vector.broadcast %cst_12 : f32 to vector<1x8x16x1xf32>
    %21 = arith.divf %19, %20 : vector<1x8x16x1xf32>
    %22 = vector.extract_strided_slice %3 {offsets = [0, 0, 5, 0], sizes = [1, 8, 16, 16], strides = [1, 1, 1, 1]} : vector<1x8x24x16xf32> to vector<1x8x16x16xf32>
    %23 = arith.mulf %0, %22 : vector<1x8x16x16xf32>
    %cst_13 = arith.constant dense<0.000000e+00> : vector<1x8x16xf32>
    %24 = vector.multi_reduction <add>, %23, %cst_13 [3] : vector<1x8x16x16xf32> to vector<1x8x16xf32>
    %25 = vector.shape_cast %24 : vector<1x8x16xf32> to vector<1x8x16x1xf32>
    %cst_14 = arith.constant 1.600000e+01 : f32
    %26 = vector.broadcast %cst_14 : f32 to vector<1x8x16x1xf32>
    %27 = arith.divf %25, %26 : vector<1x8x16x1xf32>
    %28 = vector.extract_strided_slice %3 {offsets = [0, 0, 4, 0], sizes = [1, 8, 16, 16], strides = [1, 1, 1, 1]} : vector<1x8x24x16xf32> to vector<1x8x16x16xf32>
    %29 = arith.mulf %0, %28 : vector<1x8x16x16xf32>
    %cst_15 = arith.constant dense<0.000000e+00> : vector<1x8x16xf32>
    %30 = vector.multi_reduction <add>, %29, %cst_15 [3] : vector<1x8x16x16xf32> to vector<1x8x16xf32>
    %31 = vector.shape_cast %30 : vector<1x8x16xf32> to vector<1x8x16x1xf32>
    %cst_16 = arith.constant 1.600000e+01 : f32
    %32 = vector.broadcast %cst_16 : f32 to vector<1x8x16x1xf32>
    %33 = arith.divf %31, %32 : vector<1x8x16x1xf32>
    %34 = vector.extract_strided_slice %3 {offsets = [0, 0, 3, 0], sizes = [1, 8, 16, 16], strides = [1, 1, 1, 1]} : vector<1x8x24x16xf32> to vector<1x8x16x16xf32>
    %35 = arith.mulf %0, %34 : vector<1x8x16x16xf32>
    %cst_17 = arith.constant dense<0.000000e+00> : vector<1x8x16xf32>
    %36 = vector.multi_reduction <add>, %35, %cst_17 [3] : vector<1x8x16x16xf32> to vector<1x8x16xf32>
    %37 = vector.shape_cast %36 : vector<1x8x16xf32> to vector<1x8x16x1xf32>
    %cst_18 = arith.constant 1.600000e+01 : f32
    %38 = vector.broadcast %cst_18 : f32 to vector<1x8x16x1xf32>
    %39 = arith.divf %37, %38 : vector<1x8x16x1xf32>
    %40 = vector.extract_strided_slice %3 {offsets = [0, 0, 2, 0], sizes = [1, 8, 16, 16], strides = [1, 1, 1, 1]} : vector<1x8x24x16xf32> to vector<1x8x16x16xf32>
    %41 = arith.mulf %0, %40 : vector<1x8x16x16xf32>
    %cst_19 = arith.constant dense<0.000000e+00> : vector<1x8x16xf32>
    %42 = vector.multi_reduction <add>, %41, %cst_19 [3] : vector<1x8x16x16xf32> to vector<1x8x16xf32>
    %43 = vector.shape_cast %42 : vector<1x8x16xf32> to vector<1x8x16x1xf32>
    %cst_20 = arith.constant 1.600000e+01 : f32
    %44 = vector.broadcast %cst_20 : f32 to vector<1x8x16x1xf32>
    %45 = arith.divf %43, %44 : vector<1x8x16x1xf32>
    %46 = vector.extract_strided_slice %3 {offsets = [0, 0, 1, 0], sizes = [1, 8, 16, 16], strides = [1, 1, 1, 1]} : vector<1x8x24x16xf32> to vector<1x8x16x16xf32>
    %47 = arith.mulf %0, %46 : vector<1x8x16x16xf32>
    %cst_21 = arith.constant dense<0.000000e+00> : vector<1x8x16xf32>
    %48 = vector.multi_reduction <add>, %47, %cst_21 [3] : vector<1x8x16x16xf32> to vector<1x8x16xf32>
    %49 = vector.shape_cast %48 : vector<1x8x16xf32> to vector<1x8x16x1xf32>
    %cst_22 = arith.constant 1.600000e+01 : f32
    %50 = vector.broadcast %cst_22 : f32 to vector<1x8x16x1xf32>
    %51 = arith.divf %49, %50 : vector<1x8x16x1xf32>
    %52 = vector.extract_strided_slice %3 {offsets = [0, 0, 0, 0], sizes = [1, 8, 16, 16], strides = [1, 1, 1, 1]} : vector<1x8x24x16xf32> to vector<1x8x16x16xf32>
    %53 = arith.mulf %0, %52 : vector<1x8x16x16xf32>
    %cst_23 = arith.constant dense<0.000000e+00> : vector<1x8x16xf32>
    %54 = vector.multi_reduction <add>, %53, %cst_23 [3] : vector<1x8x16x16xf32> to vector<1x8x16xf32>
    %55 = vector.shape_cast %54 : vector<1x8x16xf32> to vector<1x8x16x1xf32>
    %cst_24 = arith.constant 1.600000e+01 : f32
    %56 = vector.broadcast %cst_24 : f32 to vector<1x8x16x1xf32>
    %57 = arith.divf %55, %56 : vector<1x8x16x1xf32>
    %cst_25 = arith.constant 0.000000e+00 : f32
    %58 = vector.broadcast %cst_25 : f32 to vector<1x8x16x103xf32>
    %59 = tpu.concatenate %9, %15, %21, %27, %33, %39, %45, %51, %57, %0, %58 in 3 : vector<1x8x16x1xf32>, vector<1x8x16x1xf32>, vector<1x8x16x1xf32>, vector<1x8x16x1xf32>, vector<1x8x16x1xf32>, vector<1x8x16x1xf32>, vector<1x8x16x1xf32>, vector<1x8x16x1xf32>, vector<1x8x16x1xf32>, vector<1x8x16x16xf32>, vector<1x8x16x103xf32> -> vector<1x8x16x128xf32>
    %60 = arith.truncf %59 : vector<1x8x16x128xf32> to vector<1x8x16x128xbf16>
    %c0_26 = arith.constant 0 : index
    %c0_27 = arith.constant 0 : index
    %c0_28 = arith.constant 0 : index
    %c0_29 = arith.constant 0 : index
    %61 = vector.load %arg4[%c0_26, %c0_27, %c0_28, %c0_29] : memref<1x8x16x128xbf16, #tpu.memory_space<vmem>>, vector<1x8x16x128xbf16>
    tpu.vector_store %arg4[%c0_26, %c0_27, %c0_28, %c0_29], %60 {strides = array<i32>} : memref<1x8x16x128xbf16, #tpu.memory_space<vmem>>, vector<1x8x16x128xbf16>,
    return
  }
  func.func @transform_0(%arg0: i32, %arg1: i32) -> (i32, i32, i32, i32) {
    %c0_i32 = arith.constant 0 : i32
    %c0_i32_0 = arith.constant 0 : i32
    %c0_i32_1 = arith.constant 0 : i32
    return %arg0, %arg1, %c0_i32, %c0_i32_0 : i32, i32, i32, i32
  }
  func.func @transform_1(%arg0: i32, %arg1: i32) -> (i32, i32, i32, i32) {
    %c0_i32 = arith.constant 0 : i32
    %c0_i32_0 = arith.constant 0 : i32
    %c0_i32_1 = arith.constant 0 : i32
    return %arg0, %arg1, %c0_i32, %c0_i32_0 : i32, i32, i32, i32
  }
  func.func @transform_2(%arg0: i32, %arg1: i32) -> (i32, i32, i32, i32) {
    %c0_i32 = arith.constant 0 : i32
    %c0_i32_0 = arith.constant 0 : i32
    %c0_i32_1 = arith.constant 0 : i32
    return %arg0, %arg1, %c0_i32, %c0_i32_0 : i32, i32, i32, i32
  }
}

module attributes {stable_mosaic.version = 11 : i64} {
  func.func @_conv3x3_bn_lrelu_kernel(%arg0: i32, %arg1: i32, %arg2: memref<1x1x16x128xbf16, #tpu.memory_space<vmem>>, %arg3: memref<1x8x16x128xbf16, #tpu.memory_space<vmem>>, %arg4: memref<1x1x16x128xbf16, #tpu.memory_space<vmem>>, %arg5: memref<3x3x128x128xbf16, #tpu.memory_space<vmem>>, %arg6: memref<1x128xf32, #tpu.memory_space<vmem>>, %arg7: memref<1x128xf32, #tpu.memory_space<vmem>>, %arg8: memref<1x8x16x128xbf16, #tpu.memory_space<vmem>>) attributes {dimension_semantics = [#tpu.dimension_semantics<parallel>, #tpu.dimension_semantics<parallel>], iteration_bounds = array<i64: 2, 2>, scalar_prefetch = 0 : i64, scratch_operands = 0 : i64, tpu.core_type = #tpu.core_type<tc>, window_params = [{transform_indices = @transform_0, window_bounds = array<i64: 1, 1, 16, 128>}, {transform_indices = @transform_1, window_bounds = array<i64: 1, 8, 16, 128>}, {transform_indices = @transform_2, window_bounds = array<i64: 1, 1, 16, 128>}, {pipeline_mode = #tpu.pipeline_mode<synchronous>, transform_indices = @transform_3, window_bounds = array<i64: 3, 3, 128, 128>}, {pipeline_mode = #tpu.pipeline_mode<synchronous>, transform_indices = @transform_4, window_bounds = array<i64: 1, 128>}, {pipeline_mode = #tpu.pipeline_mode<synchronous>, transform_indices = @transform_5, window_bounds = array<i64: 1, 128>}, {transform_indices = @transform_6, window_bounds = array<i64: 1, 8, 16, 128>}]} {
    %c1_i32 = arith.constant 1 : i32
    %0 = arith.minsi %arg1, %c1_i32 : i32
    %1 = arith.sitofp %0 : i32 to f32
    %c1_i32_0 = arith.constant 1 : i32
    %2 = arith.subi %c1_i32_0, %arg1 : i32
    %c1_i32_1 = arith.constant 1 : i32
    %3 = arith.minsi %2, %c1_i32_1 : i32
    %4 = arith.sitofp %3 : i32 to f32
    %c0 = arith.constant 0 : index
    %c0_2 = arith.constant 0 : index
    %c0_3 = arith.constant 0 : index
    %c0_4 = arith.constant 0 : index
    %5 = vector.load %arg2[%c0, %c0_2, %c0_3, %c0_4] : memref<1x1x16x128xbf16, #tpu.memory_space<vmem>>, vector<1x1x16x128xbf16>
    %6 = arith.extf %5 : vector<1x1x16x128xbf16> to vector<1x1x16x128xf32>
    %7 = vector.broadcast %1 : f32 to vector<1x1x16x128xf32>
    %8 = arith.mulf %6, %7 : vector<1x1x16x128xf32>
    %9 = arith.truncf %8 : vector<1x1x16x128xf32> to vector<1x1x16x128xbf16>
    %c0_5 = arith.constant 0 : index
    %c0_6 = arith.constant 0 : index
    %c0_7 = arith.constant 0 : index
    %c0_8 = arith.constant 0 : index
    %10 = vector.load %arg4[%c0_5, %c0_6, %c0_7, %c0_8] : memref<1x1x16x128xbf16, #tpu.memory_space<vmem>>, vector<1x1x16x128xbf16>
    %11 = arith.extf %10 : vector<1x1x16x128xbf16> to vector<1x1x16x128xf32>
    %12 = vector.broadcast %4 : f32 to vector<1x1x16x128xf32>
    %13 = arith.mulf %11, %12 : vector<1x1x16x128xf32>
    %14 = arith.truncf %13 : vector<1x1x16x128xf32> to vector<1x1x16x128xbf16>
    %c0_9 = arith.constant 0 : index
    %c0_10 = arith.constant 0 : index
    %c0_11 = arith.constant 0 : index
    %c0_12 = arith.constant 0 : index
    %15 = vector.load %arg3[%c0_9, %c0_10, %c0_11, %c0_12] : memref<1x8x16x128xbf16, #tpu.memory_space<vmem>>, vector<1x8x16x128xbf16>
    %16 = tpu.concatenate %9, %15, %14 in 1 : vector<1x1x16x128xbf16>, vector<1x8x16x128xbf16>, vector<1x1x16x128xbf16> -> vector<1x10x16x128xbf16>
    %cst = arith.constant 0.000000e+00 : bf16
    %17 = vector.broadcast %cst : bf16 to vector<1x10x1x128xbf16>
    %18 = tpu.concatenate %17, %16, %17 in 2 : vector<1x10x1x128xbf16>, vector<1x10x16x128xbf16>, vector<1x10x1x128xbf16> -> vector<1x10x18x128xbf16>
    %19 = vector.extract_strided_slice %18 {offsets = [0, 0, 0, 0], sizes = [1, 10, 16, 128], strides = [1, 1, 1, 1]} : vector<1x10x18x128xbf16> to vector<1x10x16x128xbf16>
    %20 = vector.extract_strided_slice %18 {offsets = [0, 0, 1, 0], sizes = [1, 10, 16, 128], strides = [1, 1, 1, 1]} : vector<1x10x18x128xbf16> to vector<1x10x16x128xbf16>
    %21 = vector.extract_strided_slice %18 {offsets = [0, 0, 2, 0], sizes = [1, 10, 16, 128], strides = [1, 1, 1, 1]} : vector<1x10x18x128xbf16> to vector<1x10x16x128xbf16>
    %cst_13 = arith.constant 0.000000e+00 : f32
    %22 = vector.broadcast %cst_13 : f32 to vector<128x128xf32>
    %23 = vector.extract_strided_slice %19 {offsets = [0, 0, 0, 0], sizes = [1, 8, 16, 128], strides = [1, 1, 1, 1]} : vector<1x10x16x128xbf16> to vector<1x8x16x128xbf16>
    %24 = vector.shape_cast %23 : vector<1x8x16x128xbf16> to vector<128x128xbf16>
    %c0_14 = arith.constant 0 : index
    %c0_15 = arith.constant 0 : index
    %c0_16 = arith.constant 0 : index
    %c0_17 = arith.constant 0 : index
    %25 = vector.load %arg5[%c0_14, %c0_15, %c0_16, %c0_17] : memref<3x3x128x128xbf16, #tpu.memory_space<vmem>>, vector<1x1x128x128xbf16>
    %26 = vector.shape_cast %25 : vector<1x1x128x128xbf16> to vector<128x128xbf16>
    %cst_18 = arith.constant dense<0.000000e+00> : vector<128x128xf32>
    %27 = tpu.matmul %24, %26, %cst_18 {dimension_numbers = #tpu.dot_dimension_numbers<[1], [0], [0], [1], [0, 0, 1, 1], [], []>} : vector<128x128xbf16>, vector<128x128xbf16>, vector<128x128xf32> -> vector<128x128xf32>
    %28 = arith.addf %22, %27 : vector<128x128xf32>
    %29 = vector.extract_strided_slice %20 {offsets = [0, 0, 0, 0], sizes = [1, 8, 16, 128], strides = [1, 1, 1, 1]} : vector<1x10x16x128xbf16> to vector<1x8x16x128xbf16>
    %30 = vector.shape_cast %29 : vector<1x8x16x128xbf16> to vector<128x128xbf16>
    %c0_19 = arith.constant 0 : index
    %c1 = arith.constant 1 : index
    %c0_20 = arith.constant 0 : index
    %c0_21 = arith.constant 0 : index
    %31 = vector.load %arg5[%c0_19, %c1, %c0_20, %c0_21] : memref<3x3x128x128xbf16, #tpu.memory_space<vmem>>, vector<1x1x128x128xbf16>
    %32 = vector.shape_cast %31 : vector<1x1x128x128xbf16> to vector<128x128xbf16>
    %cst_22 = arith.constant dense<0.000000e+00> : vector<128x128xf32>
    %33 = tpu.matmul %30, %32, %cst_22 {dimension_numbers = #tpu.dot_dimension_numbers<[1], [0], [0], [1], [0, 0, 1, 1], [], []>} : vector<128x128xbf16>, vector<128x128xbf16>, vector<128x128xf32> -> vector<128x128xf32>
    %34 = arith.addf %28, %33 : vector<128x128xf32>
    %35 = vector.extract_strided_slice %21 {offsets = [0, 0, 0, 0], sizes = [1, 8, 16, 128], strides = [1, 1, 1, 1]} : vector<1x10x16x128xbf16> to vector<1x8x16x128xbf16>
    %36 = vector.shape_cast %35 : vector<1x8x16x128xbf16> to vector<128x128xbf16>
    %c0_23 = arith.constant 0 : index
    %c2 = arith.constant 2 : index
    %c0_24 = arith.constant 0 : index
    %c0_25 = arith.constant 0 : index
    %37 = vector.load %arg5[%c0_23, %c2, %c0_24, %c0_25] : memref<3x3x128x128xbf16, #tpu.memory_space<vmem>>, vector<1x1x128x128xbf16>
    %38 = vector.shape_cast %37 : vector<1x1x128x128xbf16> to vector<128x128xbf16>
    %cst_26 = arith.constant dense<0.000000e+00> : vector<128x128xf32>
    %39 = tpu.matmul %36, %38, %cst_26 {dimension_numbers = #tpu.dot_dimension_numbers<[1], [0], [0], [1], [0, 0, 1, 1], [], []>} : vector<128x128xbf16>, vector<128x128xbf16>, vector<128x128xf32> -> vector<128x128xf32>
    %40 = arith.addf %34, %39 : vector<128x128xf32>
    %41 = vector.extract_strided_slice %19 {offsets = [0, 1, 0, 0], sizes = [1, 8, 16, 128], strides = [1, 1, 1, 1]} : vector<1x10x16x128xbf16> to vector<1x8x16x128xbf16>
    %42 = vector.shape_cast %41 : vector<1x8x16x128xbf16> to vector<128x128xbf16>
    %c1_27 = arith.constant 1 : index
    %c0_28 = arith.constant 0 : index
    %c0_29 = arith.constant 0 : index
    %c0_30 = arith.constant 0 : index
    %43 = vector.load %arg5[%c1_27, %c0_28, %c0_29, %c0_30] : memref<3x3x128x128xbf16, #tpu.memory_space<vmem>>, vector<1x1x128x128xbf16>
    %44 = vector.shape_cast %43 : vector<1x1x128x128xbf16> to vector<128x128xbf16>
    %cst_31 = arith.constant dense<0.000000e+00> : vector<128x128xf32>
    %45 = tpu.matmul %42, %44, %cst_31 {dimension_numbers = #tpu.dot_dimension_numbers<[1], [0], [0], [1], [0, 0, 1, 1], [], []>} : vector<128x128xbf16>, vector<128x128xbf16>, vector<128x128xf32> -> vector<128x128xf32>
    %46 = arith.addf %40, %45 : vector<128x128xf32>
    %47 = vector.extract_strided_slice %20 {offsets = [0, 1, 0, 0], sizes = [1, 8, 16, 128], strides = [1, 1, 1, 1]} : vector<1x10x16x128xbf16> to vector<1x8x16x128xbf16>
    %48 = vector.shape_cast %47 : vector<1x8x16x128xbf16> to vector<128x128xbf16>
    %c1_32 = arith.constant 1 : index
    %c1_33 = arith.constant 1 : index
    %c0_34 = arith.constant 0 : index
    %c0_35 = arith.constant 0 : index
    %49 = vector.load %arg5[%c1_32, %c1_33, %c0_34, %c0_35] : memref<3x3x128x128xbf16, #tpu.memory_space<vmem>>, vector<1x1x128x128xbf16>
    %50 = vector.shape_cast %49 : vector<1x1x128x128xbf16> to vector<128x128xbf16>
    %cst_36 = arith.constant dense<0.000000e+00> : vector<128x128xf32>
    %51 = tpu.matmul %48, %50, %cst_36 {dimension_numbers = #tpu.dot_dimension_numbers<[1], [0], [0], [1], [0, 0, 1, 1], [], []>} : vector<128x128xbf16>, vector<128x128xbf16>, vector<128x128xf32> -> vector<128x128xf32>
    %52 = arith.addf %46, %51 : vector<128x128xf32>
    %53 = vector.extract_strided_slice %21 {offsets = [0, 1, 0, 0], sizes = [1, 8, 16, 128], strides = [1, 1, 1, 1]} : vector<1x10x16x128xbf16> to vector<1x8x16x128xbf16>
    %54 = vector.shape_cast %53 : vector<1x8x16x128xbf16> to vector<128x128xbf16>
    %c1_37 = arith.constant 1 : index
    %c2_38 = arith.constant 2 : index
    %c0_39 = arith.constant 0 : index
    %c0_40 = arith.constant 0 : index
    %55 = vector.load %arg5[%c1_37, %c2_38, %c0_39, %c0_40] : memref<3x3x128x128xbf16, #tpu.memory_space<vmem>>, vector<1x1x128x128xbf16>
    %56 = vector.shape_cast %55 : vector<1x1x128x128xbf16> to vector<128x128xbf16>
    %cst_41 = arith.constant dense<0.000000e+00> : vector<128x128xf32>
    %57 = tpu.matmul %54, %56, %cst_41 {dimension_numbers = #tpu.dot_dimension_numbers<[1], [0], [0], [1], [0, 0, 1, 1], [], []>} : vector<128x128xbf16>, vector<128x128xbf16>, vector<128x128xf32> -> vector<128x128xf32>
    %58 = arith.addf %52, %57 : vector<128x128xf32>
    %59 = vector.extract_strided_slice %19 {offsets = [0, 2, 0, 0], sizes = [1, 8, 16, 128], strides = [1, 1, 1, 1]} : vector<1x10x16x128xbf16> to vector<1x8x16x128xbf16>
    %60 = vector.shape_cast %59 : vector<1x8x16x128xbf16> to vector<128x128xbf16>
    %c2_42 = arith.constant 2 : index
    %c0_43 = arith.constant 0 : index
    %c0_44 = arith.constant 0 : index
    %c0_45 = arith.constant 0 : index
    %61 = vector.load %arg5[%c2_42, %c0_43, %c0_44, %c0_45] : memref<3x3x128x128xbf16, #tpu.memory_space<vmem>>, vector<1x1x128x128xbf16>
    %62 = vector.shape_cast %61 : vector<1x1x128x128xbf16> to vector<128x128xbf16>
    %cst_46 = arith.constant dense<0.000000e+00> : vector<128x128xf32>
    %63 = tpu.matmul %60, %62, %cst_46 {dimension_numbers = #tpu.dot_dimension_numbers<[1], [0], [0], [1], [0, 0, 1, 1], [], []>} : vector<128x128xbf16>, vector<128x128xbf16>, vector<128x128xf32> -> vector<128x128xf32>
    %64 = arith.addf %58, %63 : vector<128x128xf32>
    %65 = vector.extract_strided_slice %20 {offsets = [0, 2, 0, 0], sizes = [1, 8, 16, 128], strides = [1, 1, 1, 1]} : vector<1x10x16x128xbf16> to vector<1x8x16x128xbf16>
    %66 = vector.shape_cast %65 : vector<1x8x16x128xbf16> to vector<128x128xbf16>
    %c2_47 = arith.constant 2 : index
    %c1_48 = arith.constant 1 : index
    %c0_49 = arith.constant 0 : index
    %c0_50 = arith.constant 0 : index
    %67 = vector.load %arg5[%c2_47, %c1_48, %c0_49, %c0_50] : memref<3x3x128x128xbf16, #tpu.memory_space<vmem>>, vector<1x1x128x128xbf16>
    %68 = vector.shape_cast %67 : vector<1x1x128x128xbf16> to vector<128x128xbf16>
    %cst_51 = arith.constant dense<0.000000e+00> : vector<128x128xf32>
    %69 = tpu.matmul %66, %68, %cst_51 {dimension_numbers = #tpu.dot_dimension_numbers<[1], [0], [0], [1], [0, 0, 1, 1], [], []>} : vector<128x128xbf16>, vector<128x128xbf16>, vector<128x128xf32> -> vector<128x128xf32>
    %70 = arith.addf %64, %69 : vector<128x128xf32>
    %71 = vector.extract_strided_slice %21 {offsets = [0, 2, 0, 0], sizes = [1, 8, 16, 128], strides = [1, 1, 1, 1]} : vector<1x10x16x128xbf16> to vector<1x8x16x128xbf16>
    %72 = vector.shape_cast %71 : vector<1x8x16x128xbf16> to vector<128x128xbf16>
    %c2_52 = arith.constant 2 : index
    %c2_53 = arith.constant 2 : index
    %c0_54 = arith.constant 0 : index
    %c0_55 = arith.constant 0 : index
    %73 = vector.load %arg5[%c2_52, %c2_53, %c0_54, %c0_55] : memref<3x3x128x128xbf16, #tpu.memory_space<vmem>>, vector<1x1x128x128xbf16>
    %74 = vector.shape_cast %73 : vector<1x1x128x128xbf16> to vector<128x128xbf16>
    %cst_56 = arith.constant dense<0.000000e+00> : vector<128x128xf32>
    %75 = tpu.matmul %72, %74, %cst_56 {dimension_numbers = #tpu.dot_dimension_numbers<[1], [0], [0], [1], [0, 0, 1, 1], [], []>} : vector<128x128xbf16>, vector<128x128xbf16>, vector<128x128xf32> -> vector<128x128xf32>
    %76 = arith.addf %70, %75 : vector<128x128xf32>
    %c0_57 = arith.constant 0 : index
    %c0_58 = arith.constant 0 : index
    %77 = vector.load %arg6[%c0_57, %c0_58] : memref<1x128xf32, #tpu.memory_space<vmem>>, vector<1x128xf32>
    %78 = vector.broadcast %77 : vector<1x128xf32> to vector<128x128xf32>
    %79 = arith.mulf %76, %78 : vector<128x128xf32>
    %c0_59 = arith.constant 0 : index
    %c0_60 = arith.constant 0 : index
    %80 = vector.load %arg7[%c0_59, %c0_60] : memref<1x128xf32, #tpu.memory_space<vmem>>, vector<1x128xf32>
    %81 = vector.broadcast %80 : vector<1x128xf32> to vector<128x128xf32>
    %82 = arith.addf %79, %81 : vector<128x128xf32>
    %cst_61 = arith.constant 0.000000e+00 : f32
    %83 = vector.broadcast %cst_61 : f32 to vector<128x128xf32>
    %84 = arith.cmpf oge, %82, %83 : vector<128x128xf32>
    %cst_62 = arith.constant 1.000000e-01 : f32
    %85 = vector.broadcast %cst_62 : f32 to vector<128x128xf32>
    %86 = arith.mulf %85, %82 : vector<128x128xf32>
    %87 = arith.select %84, %82, %86 : vector<128x128xi1>, vector<128x128xf32>
    %88 = vector.shape_cast %87 : vector<128x128xf32> to vector<1x8x16x128xf32>
    %89 = arith.truncf %88 : vector<1x8x16x128xf32> to vector<1x8x16x128xbf16>
    %c0_63 = arith.constant 0 : index
    %c0_64 = arith.constant 0 : index
    %c0_65 = arith.constant 0 : index
    %c0_66 = arith.constant 0 : index
    %90 = vector.load %arg8[%c0_63, %c0_64, %c0_65, %c0_66] : memref<1x8x16x128xbf16, #tpu.memory_space<vmem>>, vector<1x8x16x128xbf16>
    tpu.vector_store %arg8[%c0_63, %c0_64, %c0_65, %c0_66], %89 {strides = array<i32>} : memref<1x8x16x128xbf16, #tpu.memory_space<vmem>>, vector<1x8x16x128xbf16>,
    return
  }
  func.func @transform_0(%arg0: i32, %arg1: i32) -> (i32, i32, i32, i32) {
    %c8_i32 = arith.constant 8 : i32
    %0 = arith.muli %arg1, %c8_i32 : i32
    %c1_i32 = arith.constant 1 : i32
    %1 = arith.subi %0, %c1_i32 : i32
    %c0_i32 = arith.constant 0 : i32
    %2 = arith.maxsi %1, %c0_i32 : i32
    %c0_i32_0 = arith.constant 0 : i32
    %c0_i32_1 = arith.constant 0 : i32
    %c0_i32_2 = arith.constant 0 : i32
    return %arg0, %2, %c0_i32_0, %c0_i32_1 : i32, i32, i32, i32
  }
  func.func @transform_1(%arg0: i32, %arg1: i32) -> (i32, i32, i32, i32) {
    %c0_i32 = arith.constant 0 : i32
    %c0_i32_0 = arith.constant 0 : i32
    %c0_i32_1 = arith.constant 0 : i32
    return %arg0, %arg1, %c0_i32, %c0_i32_0 : i32, i32, i32, i32
  }
  func.func @transform_2(%arg0: i32, %arg1: i32) -> (i32, i32, i32, i32) {
    %c1_i32 = arith.constant 1 : i32
    %0 = arith.addi %arg1, %c1_i32 : i32
    %c8_i32 = arith.constant 8 : i32
    %1 = arith.muli %0, %c8_i32 : i32
    %c15_i32 = arith.constant 15 : i32
    %2 = arith.minsi %1, %c15_i32 : i32
    %c0_i32 = arith.constant 0 : i32
    %c0_i32_0 = arith.constant 0 : i32
    %c0_i32_1 = arith.constant 0 : i32
    return %arg0, %2, %c0_i32, %c0_i32_0 : i32, i32, i32, i32
  }
  func.func @transform_3(%arg0: i32, %arg1: i32) -> (i32, i32, i32, i32) {
    %c0_i32 = arith.constant 0 : i32
    %c0_i32_0 = arith.constant 0 : i32
    %c0_i32_1 = arith.constant 0 : i32
    %c0_i32_2 = arith.constant 0 : i32
    %c0_i32_3 = arith.constant 0 : i32
    return %c0_i32, %c0_i32_0, %c0_i32_1, %c0_i32_2 : i32, i32, i32, i32
  }
  func.func @transform_4(%arg0: i32, %arg1: i32) -> (i32, i32) {
    %c0_i32 = arith.constant 0 : i32
    %c0_i32_0 = arith.constant 0 : i32
    %c0_i32_1 = arith.constant 0 : i32
    return %c0_i32, %c0_i32_0 : i32, i32
  }
  func.func @transform_5(%arg0: i32, %arg1: i32) -> (i32, i32) {
    %c0_i32 = arith.constant 0 : i32
    %c0_i32_0 = arith.constant 0 : i32
    %c0_i32_1 = arith.constant 0 : i32
    return %c0_i32, %c0_i32_0 : i32, i32
  }
  func.func @transform_6(%arg0: i32, %arg1: i32) -> (i32, i32, i32, i32) {
    %c0_i32 = arith.constant 0 : i32
    %c0_i32_0 = arith.constant 0 : i32
    %c0_i32_1 = arith.constant 0 : i32
    return %arg0, %arg1, %c0_i32, %c0_i32_0 : i32, i32, i32, i32
  }
}

module attributes {stable_mosaic.version = 11 : i64} {
  func.func @_conv3x3_bn_lrelu_kernel(%arg0: i32, %arg1: i32, %arg2: memref<1x1x16x128xbf16, #tpu.memory_space<vmem>>, %arg3: memref<1x8x16x128xbf16, #tpu.memory_space<vmem>>, %arg4: memref<1x1x16x128xbf16, #tpu.memory_space<vmem>>, %arg5: memref<3x3x128x96xbf16, #tpu.memory_space<vmem>>, %arg6: memref<1x96xf32, #tpu.memory_space<vmem>>, %arg7: memref<1x96xf32, #tpu.memory_space<vmem>>, %arg8: memref<1x8x16x96xbf16, #tpu.memory_space<vmem>>) attributes {dimension_semantics = [#tpu.dimension_semantics<parallel>, #tpu.dimension_semantics<parallel>], iteration_bounds = array<i64: 2, 2>, scalar_prefetch = 0 : i64, scratch_operands = 0 : i64, tpu.core_type = #tpu.core_type<tc>, window_params = [{transform_indices = @transform_0, window_bounds = array<i64: 1, 1, 16, 128>}, {transform_indices = @transform_1, window_bounds = array<i64: 1, 8, 16, 128>}, {transform_indices = @transform_2, window_bounds = array<i64: 1, 1, 16, 128>}, {pipeline_mode = #tpu.pipeline_mode<synchronous>, transform_indices = @transform_3, window_bounds = array<i64: 3, 3, 128, 96>}, {pipeline_mode = #tpu.pipeline_mode<synchronous>, transform_indices = @transform_4, window_bounds = array<i64: 1, 96>}, {pipeline_mode = #tpu.pipeline_mode<synchronous>, transform_indices = @transform_5, window_bounds = array<i64: 1, 96>}, {transform_indices = @transform_6, window_bounds = array<i64: 1, 8, 16, 96>}]} {
    %c1_i32 = arith.constant 1 : i32
    %0 = arith.minsi %arg1, %c1_i32 : i32
    %1 = arith.sitofp %0 : i32 to f32
    %c1_i32_0 = arith.constant 1 : i32
    %2 = arith.subi %c1_i32_0, %arg1 : i32
    %c1_i32_1 = arith.constant 1 : i32
    %3 = arith.minsi %2, %c1_i32_1 : i32
    %4 = arith.sitofp %3 : i32 to f32
    %c0 = arith.constant 0 : index
    %c0_2 = arith.constant 0 : index
    %c0_3 = arith.constant 0 : index
    %c0_4 = arith.constant 0 : index
    %5 = vector.load %arg2[%c0, %c0_2, %c0_3, %c0_4] : memref<1x1x16x128xbf16, #tpu.memory_space<vmem>>, vector<1x1x16x128xbf16>
    %6 = arith.extf %5 : vector<1x1x16x128xbf16> to vector<1x1x16x128xf32>
    %7 = vector.broadcast %1 : f32 to vector<1x1x16x128xf32>
    %8 = arith.mulf %6, %7 : vector<1x1x16x128xf32>
    %9 = arith.truncf %8 : vector<1x1x16x128xf32> to vector<1x1x16x128xbf16>
    %c0_5 = arith.constant 0 : index
    %c0_6 = arith.constant 0 : index
    %c0_7 = arith.constant 0 : index
    %c0_8 = arith.constant 0 : index
    %10 = vector.load %arg4[%c0_5, %c0_6, %c0_7, %c0_8] : memref<1x1x16x128xbf16, #tpu.memory_space<vmem>>, vector<1x1x16x128xbf16>
    %11 = arith.extf %10 : vector<1x1x16x128xbf16> to vector<1x1x16x128xf32>
    %12 = vector.broadcast %4 : f32 to vector<1x1x16x128xf32>
    %13 = arith.mulf %11, %12 : vector<1x1x16x128xf32>
    %14 = arith.truncf %13 : vector<1x1x16x128xf32> to vector<1x1x16x128xbf16>
    %c0_9 = arith.constant 0 : index
    %c0_10 = arith.constant 0 : index
    %c0_11 = arith.constant 0 : index
    %c0_12 = arith.constant 0 : index
    %15 = vector.load %arg3[%c0_9, %c0_10, %c0_11, %c0_12] : memref<1x8x16x128xbf16, #tpu.memory_space<vmem>>, vector<1x8x16x128xbf16>
    %16 = tpu.concatenate %9, %15, %14 in 1 : vector<1x1x16x128xbf16>, vector<1x8x16x128xbf16>, vector<1x1x16x128xbf16> -> vector<1x10x16x128xbf16>
    %cst = arith.constant 0.000000e+00 : bf16
    %17 = vector.broadcast %cst : bf16 to vector<1x10x1x128xbf16>
    %18 = tpu.concatenate %17, %16, %17 in 2 : vector<1x10x1x128xbf16>, vector<1x10x16x128xbf16>, vector<1x10x1x128xbf16> -> vector<1x10x18x128xbf16>
    %19 = vector.extract_strided_slice %18 {offsets = [0, 0, 0, 0], sizes = [1, 10, 16, 128], strides = [1, 1, 1, 1]} : vector<1x10x18x128xbf16> to vector<1x10x16x128xbf16>
    %20 = vector.extract_strided_slice %18 {offsets = [0, 0, 1, 0], sizes = [1, 10, 16, 128], strides = [1, 1, 1, 1]} : vector<1x10x18x128xbf16> to vector<1x10x16x128xbf16>
    %21 = vector.extract_strided_slice %18 {offsets = [0, 0, 2, 0], sizes = [1, 10, 16, 128], strides = [1, 1, 1, 1]} : vector<1x10x18x128xbf16> to vector<1x10x16x128xbf16>
    %cst_13 = arith.constant 0.000000e+00 : f32
    %22 = vector.broadcast %cst_13 : f32 to vector<128x96xf32>
    %23 = vector.extract_strided_slice %19 {offsets = [0, 0, 0, 0], sizes = [1, 8, 16, 128], strides = [1, 1, 1, 1]} : vector<1x10x16x128xbf16> to vector<1x8x16x128xbf16>
    %24 = vector.shape_cast %23 : vector<1x8x16x128xbf16> to vector<128x128xbf16>
    %c0_14 = arith.constant 0 : index
    %c0_15 = arith.constant 0 : index
    %c0_16 = arith.constant 0 : index
    %c0_17 = arith.constant 0 : index
    %25 = vector.load %arg5[%c0_14, %c0_15, %c0_16, %c0_17] : memref<3x3x128x96xbf16, #tpu.memory_space<vmem>>, vector<1x1x128x96xbf16>
    %26 = vector.shape_cast %25 : vector<1x1x128x96xbf16> to vector<128x96xbf16>
    %cst_18 = arith.constant dense<0.000000e+00> : vector<128x96xf32>
    %27 = tpu.matmul %24, %26, %cst_18 {dimension_numbers = #tpu.dot_dimension_numbers<[1], [0], [0], [1], [0, 0, 1, 1], [], []>} : vector<128x128xbf16>, vector<128x96xbf16>, vector<128x96xf32> -> vector<128x96xf32>
    %28 = arith.addf %22, %27 : vector<128x96xf32>
    %29 = vector.extract_strided_slice %20 {offsets = [0, 0, 0, 0], sizes = [1, 8, 16, 128], strides = [1, 1, 1, 1]} : vector<1x10x16x128xbf16> to vector<1x8x16x128xbf16>
    %30 = vector.shape_cast %29 : vector<1x8x16x128xbf16> to vector<128x128xbf16>
    %c0_19 = arith.constant 0 : index
    %c1 = arith.constant 1 : index
    %c0_20 = arith.constant 0 : index
    %c0_21 = arith.constant 0 : index
    %31 = vector.load %arg5[%c0_19, %c1, %c0_20, %c0_21] : memref<3x3x128x96xbf16, #tpu.memory_space<vmem>>, vector<1x1x128x96xbf16>
    %32 = vector.shape_cast %31 : vector<1x1x128x96xbf16> to vector<128x96xbf16>
    %cst_22 = arith.constant dense<0.000000e+00> : vector<128x96xf32>
    %33 = tpu.matmul %30, %32, %cst_22 {dimension_numbers = #tpu.dot_dimension_numbers<[1], [0], [0], [1], [0, 0, 1, 1], [], []>} : vector<128x128xbf16>, vector<128x96xbf16>, vector<128x96xf32> -> vector<128x96xf32>
    %34 = arith.addf %28, %33 : vector<128x96xf32>
    %35 = vector.extract_strided_slice %21 {offsets = [0, 0, 0, 0], sizes = [1, 8, 16, 128], strides = [1, 1, 1, 1]} : vector<1x10x16x128xbf16> to vector<1x8x16x128xbf16>
    %36 = vector.shape_cast %35 : vector<1x8x16x128xbf16> to vector<128x128xbf16>
    %c0_23 = arith.constant 0 : index
    %c2 = arith.constant 2 : index
    %c0_24 = arith.constant 0 : index
    %c0_25 = arith.constant 0 : index
    %37 = vector.load %arg5[%c0_23, %c2, %c0_24, %c0_25] : memref<3x3x128x96xbf16, #tpu.memory_space<vmem>>, vector<1x1x128x96xbf16>
    %38 = vector.shape_cast %37 : vector<1x1x128x96xbf16> to vector<128x96xbf16>
    %cst_26 = arith.constant dense<0.000000e+00> : vector<128x96xf32>
    %39 = tpu.matmul %36, %38, %cst_26 {dimension_numbers = #tpu.dot_dimension_numbers<[1], [0], [0], [1], [0, 0, 1, 1], [], []>} : vector<128x128xbf16>, vector<128x96xbf16>, vector<128x96xf32> -> vector<128x96xf32>
    %40 = arith.addf %34, %39 : vector<128x96xf32>
    %41 = vector.extract_strided_slice %19 {offsets = [0, 1, 0, 0], sizes = [1, 8, 16, 128], strides = [1, 1, 1, 1]} : vector<1x10x16x128xbf16> to vector<1x8x16x128xbf16>
    %42 = vector.shape_cast %41 : vector<1x8x16x128xbf16> to vector<128x128xbf16>
    %c1_27 = arith.constant 1 : index
    %c0_28 = arith.constant 0 : index
    %c0_29 = arith.constant 0 : index
    %c0_30 = arith.constant 0 : index
    %43 = vector.load %arg5[%c1_27, %c0_28, %c0_29, %c0_30] : memref<3x3x128x96xbf16, #tpu.memory_space<vmem>>, vector<1x1x128x96xbf16>
    %44 = vector.shape_cast %43 : vector<1x1x128x96xbf16> to vector<128x96xbf16>
    %cst_31 = arith.constant dense<0.000000e+00> : vector<128x96xf32>
    %45 = tpu.matmul %42, %44, %cst_31 {dimension_numbers = #tpu.dot_dimension_numbers<[1], [0], [0], [1], [0, 0, 1, 1], [], []>} : vector<128x128xbf16>, vector<128x96xbf16>, vector<128x96xf32> -> vector<128x96xf32>
    %46 = arith.addf %40, %45 : vector<128x96xf32>
    %47 = vector.extract_strided_slice %20 {offsets = [0, 1, 0, 0], sizes = [1, 8, 16, 128], strides = [1, 1, 1, 1]} : vector<1x10x16x128xbf16> to vector<1x8x16x128xbf16>
    %48 = vector.shape_cast %47 : vector<1x8x16x128xbf16> to vector<128x128xbf16>
    %c1_32 = arith.constant 1 : index
    %c1_33 = arith.constant 1 : index
    %c0_34 = arith.constant 0 : index
    %c0_35 = arith.constant 0 : index
    %49 = vector.load %arg5[%c1_32, %c1_33, %c0_34, %c0_35] : memref<3x3x128x96xbf16, #tpu.memory_space<vmem>>, vector<1x1x128x96xbf16>
    %50 = vector.shape_cast %49 : vector<1x1x128x96xbf16> to vector<128x96xbf16>
    %cst_36 = arith.constant dense<0.000000e+00> : vector<128x96xf32>
    %51 = tpu.matmul %48, %50, %cst_36 {dimension_numbers = #tpu.dot_dimension_numbers<[1], [0], [0], [1], [0, 0, 1, 1], [], []>} : vector<128x128xbf16>, vector<128x96xbf16>, vector<128x96xf32> -> vector<128x96xf32>
    %52 = arith.addf %46, %51 : vector<128x96xf32>
    %53 = vector.extract_strided_slice %21 {offsets = [0, 1, 0, 0], sizes = [1, 8, 16, 128], strides = [1, 1, 1, 1]} : vector<1x10x16x128xbf16> to vector<1x8x16x128xbf16>
    %54 = vector.shape_cast %53 : vector<1x8x16x128xbf16> to vector<128x128xbf16>
    %c1_37 = arith.constant 1 : index
    %c2_38 = arith.constant 2 : index
    %c0_39 = arith.constant 0 : index
    %c0_40 = arith.constant 0 : index
    %55 = vector.load %arg5[%c1_37, %c2_38, %c0_39, %c0_40] : memref<3x3x128x96xbf16, #tpu.memory_space<vmem>>, vector<1x1x128x96xbf16>
    %56 = vector.shape_cast %55 : vector<1x1x128x96xbf16> to vector<128x96xbf16>
    %cst_41 = arith.constant dense<0.000000e+00> : vector<128x96xf32>
    %57 = tpu.matmul %54, %56, %cst_41 {dimension_numbers = #tpu.dot_dimension_numbers<[1], [0], [0], [1], [0, 0, 1, 1], [], []>} : vector<128x128xbf16>, vector<128x96xbf16>, vector<128x96xf32> -> vector<128x96xf32>
    %58 = arith.addf %52, %57 : vector<128x96xf32>
    %59 = vector.extract_strided_slice %19 {offsets = [0, 2, 0, 0], sizes = [1, 8, 16, 128], strides = [1, 1, 1, 1]} : vector<1x10x16x128xbf16> to vector<1x8x16x128xbf16>
    %60 = vector.shape_cast %59 : vector<1x8x16x128xbf16> to vector<128x128xbf16>
    %c2_42 = arith.constant 2 : index
    %c0_43 = arith.constant 0 : index
    %c0_44 = arith.constant 0 : index
    %c0_45 = arith.constant 0 : index
    %61 = vector.load %arg5[%c2_42, %c0_43, %c0_44, %c0_45] : memref<3x3x128x96xbf16, #tpu.memory_space<vmem>>, vector<1x1x128x96xbf16>
    %62 = vector.shape_cast %61 : vector<1x1x128x96xbf16> to vector<128x96xbf16>
    %cst_46 = arith.constant dense<0.000000e+00> : vector<128x96xf32>
    %63 = tpu.matmul %60, %62, %cst_46 {dimension_numbers = #tpu.dot_dimension_numbers<[1], [0], [0], [1], [0, 0, 1, 1], [], []>} : vector<128x128xbf16>, vector<128x96xbf16>, vector<128x96xf32> -> vector<128x96xf32>
    %64 = arith.addf %58, %63 : vector<128x96xf32>
    %65 = vector.extract_strided_slice %20 {offsets = [0, 2, 0, 0], sizes = [1, 8, 16, 128], strides = [1, 1, 1, 1]} : vector<1x10x16x128xbf16> to vector<1x8x16x128xbf16>
    %66 = vector.shape_cast %65 : vector<1x8x16x128xbf16> to vector<128x128xbf16>
    %c2_47 = arith.constant 2 : index
    %c1_48 = arith.constant 1 : index
    %c0_49 = arith.constant 0 : index
    %c0_50 = arith.constant 0 : index
    %67 = vector.load %arg5[%c2_47, %c1_48, %c0_49, %c0_50] : memref<3x3x128x96xbf16, #tpu.memory_space<vmem>>, vector<1x1x128x96xbf16>
    %68 = vector.shape_cast %67 : vector<1x1x128x96xbf16> to vector<128x96xbf16>
    %cst_51 = arith.constant dense<0.000000e+00> : vector<128x96xf32>
    %69 = tpu.matmul %66, %68, %cst_51 {dimension_numbers = #tpu.dot_dimension_numbers<[1], [0], [0], [1], [0, 0, 1, 1], [], []>} : vector<128x128xbf16>, vector<128x96xbf16>, vector<128x96xf32> -> vector<128x96xf32>
    %70 = arith.addf %64, %69 : vector<128x96xf32>
    %71 = vector.extract_strided_slice %21 {offsets = [0, 2, 0, 0], sizes = [1, 8, 16, 128], strides = [1, 1, 1, 1]} : vector<1x10x16x128xbf16> to vector<1x8x16x128xbf16>
    %72 = vector.shape_cast %71 : vector<1x8x16x128xbf16> to vector<128x128xbf16>
    %c2_52 = arith.constant 2 : index
    %c2_53 = arith.constant 2 : index
    %c0_54 = arith.constant 0 : index
    %c0_55 = arith.constant 0 : index
    %73 = vector.load %arg5[%c2_52, %c2_53, %c0_54, %c0_55] : memref<3x3x128x96xbf16, #tpu.memory_space<vmem>>, vector<1x1x128x96xbf16>
    %74 = vector.shape_cast %73 : vector<1x1x128x96xbf16> to vector<128x96xbf16>
    %cst_56 = arith.constant dense<0.000000e+00> : vector<128x96xf32>
    %75 = tpu.matmul %72, %74, %cst_56 {dimension_numbers = #tpu.dot_dimension_numbers<[1], [0], [0], [1], [0, 0, 1, 1], [], []>} : vector<128x128xbf16>, vector<128x96xbf16>, vector<128x96xf32> -> vector<128x96xf32>
    %76 = arith.addf %70, %75 : vector<128x96xf32>
    %c0_57 = arith.constant 0 : index
    %c0_58 = arith.constant 0 : index
    %77 = vector.load %arg6[%c0_57, %c0_58] : memref<1x96xf32, #tpu.memory_space<vmem>>, vector<1x96xf32>
    %78 = vector.broadcast %77 : vector<1x96xf32> to vector<128x96xf32>
    %79 = arith.mulf %76, %78 : vector<128x96xf32>
    %c0_59 = arith.constant 0 : index
    %c0_60 = arith.constant 0 : index
    %80 = vector.load %arg7[%c0_59, %c0_60] : memref<1x96xf32, #tpu.memory_space<vmem>>, vector<1x96xf32>
    %81 = vector.broadcast %80 : vector<1x96xf32> to vector<128x96xf32>
    %82 = arith.addf %79, %81 : vector<128x96xf32>
    %cst_61 = arith.constant 0.000000e+00 : f32
    %83 = vector.broadcast %cst_61 : f32 to vector<128x96xf32>
    %84 = arith.cmpf oge, %82, %83 : vector<128x96xf32>
    %cst_62 = arith.constant 1.000000e-01 : f32
    %85 = vector.broadcast %cst_62 : f32 to vector<128x96xf32>
    %86 = arith.mulf %85, %82 : vector<128x96xf32>
    %87 = arith.select %84, %82, %86 : vector<128x96xi1>, vector<128x96xf32>
    %88 = vector.shape_cast %87 : vector<128x96xf32> to vector<1x8x16x96xf32>
    %89 = arith.truncf %88 : vector<1x8x16x96xf32> to vector<1x8x16x96xbf16>
    %c0_63 = arith.constant 0 : index
    %c0_64 = arith.constant 0 : index
    %c0_65 = arith.constant 0 : index
    %c0_66 = arith.constant 0 : index
    %90 = vector.load %arg8[%c0_63, %c0_64, %c0_65, %c0_66] : memref<1x8x16x96xbf16, #tpu.memory_space<vmem>>, vector<1x8x16x96xbf16>
    tpu.vector_store %arg8[%c0_63, %c0_64, %c0_65, %c0_66], %89 {strides = array<i32>} : memref<1x8x16x96xbf16, #tpu.memory_space<vmem>>, vector<1x8x16x96xbf16>,
    return
  }
  func.func @transform_0(%arg0: i32, %arg1: i32) -> (i32, i32, i32, i32) {
    %c8_i32 = arith.constant 8 : i32
    %0 = arith.muli %arg1, %c8_i32 : i32
    %c1_i32 = arith.constant 1 : i32
    %1 = arith.subi %0, %c1_i32 : i32
    %c0_i32 = arith.constant 0 : i32
    %2 = arith.maxsi %1, %c0_i32 : i32
    %c0_i32_0 = arith.constant 0 : i32
    %c0_i32_1 = arith.constant 0 : i32
    %c0_i32_2 = arith.constant 0 : i32
    return %arg0, %2, %c0_i32_0, %c0_i32_1 : i32, i32, i32, i32
  }
  func.func @transform_1(%arg0: i32, %arg1: i32) -> (i32, i32, i32, i32) {
    %c0_i32 = arith.constant 0 : i32
    %c0_i32_0 = arith.constant 0 : i32
    %c0_i32_1 = arith.constant 0 : i32
    return %arg0, %arg1, %c0_i32, %c0_i32_0 : i32, i32, i32, i32
  }
  func.func @transform_2(%arg0: i32, %arg1: i32) -> (i32, i32, i32, i32) {
    %c1_i32 = arith.constant 1 : i32
    %0 = arith.addi %arg1, %c1_i32 : i32
    %c8_i32 = arith.constant 8 : i32
    %1 = arith.muli %0, %c8_i32 : i32
    %c15_i32 = arith.constant 15 : i32
    %2 = arith.minsi %1, %c15_i32 : i32
    %c0_i32 = arith.constant 0 : i32
    %c0_i32_0 = arith.constant 0 : i32
    %c0_i32_1 = arith.constant 0 : i32
    return %arg0, %2, %c0_i32, %c0_i32_0 : i32, i32, i32, i32
  }
  func.func @transform_3(%arg0: i32, %arg1: i32) -> (i32, i32, i32, i32) {
    %c0_i32 = arith.constant 0 : i32
    %c0_i32_0 = arith.constant 0 : i32
    %c0_i32_1 = arith.constant 0 : i32
    %c0_i32_2 = arith.constant 0 : i32
    %c0_i32_3 = arith.constant 0 : i32
    return %c0_i32, %c0_i32_0, %c0_i32_1, %c0_i32_2 : i32, i32, i32, i32
  }
  func.func @transform_4(%arg0: i32, %arg1: i32) -> (i32, i32) {
    %c0_i32 = arith.constant 0 : i32
    %c0_i32_0 = arith.constant 0 : i32
    %c0_i32_1 = arith.constant 0 : i32
    return %c0_i32, %c0_i32_0 : i32, i32
  }
  func.func @transform_5(%arg0: i32, %arg1: i32) -> (i32, i32) {
    %c0_i32 = arith.constant 0 : i32
    %c0_i32_0 = arith.constant 0 : i32
    %c0_i32_1 = arith.constant 0 : i32
    return %c0_i32, %c0_i32_0 : i32, i32
  }
  func.func @transform_6(%arg0: i32, %arg1: i32) -> (i32, i32, i32, i32) {
    %c0_i32 = arith.constant 0 : i32
    %c0_i32_0 = arith.constant 0 : i32
    %c0_i32_1 = arith.constant 0 : i32
    return %arg0, %arg1, %c0_i32, %c0_i32_0 : i32, i32, i32, i32
  }
}

module attributes {stable_mosaic.version = 11 : i64} {
  func.func @_conv3x3_bn_lrelu_kernel(%arg0: i32, %arg1: i32, %arg2: memref<1x1x16x96xbf16, #tpu.memory_space<vmem>>, %arg3: memref<1x8x16x96xbf16, #tpu.memory_space<vmem>>, %arg4: memref<1x1x16x96xbf16, #tpu.memory_space<vmem>>, %arg5: memref<3x3x96x64xbf16, #tpu.memory_space<vmem>>, %arg6: memref<1x64xf32, #tpu.memory_space<vmem>>, %arg7: memref<1x64xf32, #tpu.memory_space<vmem>>, %arg8: memref<1x8x16x64xbf16, #tpu.memory_space<vmem>>) attributes {dimension_semantics = [#tpu.dimension_semantics<parallel>, #tpu.dimension_semantics<parallel>], iteration_bounds = array<i64: 2, 2>, scalar_prefetch = 0 : i64, scratch_operands = 0 : i64, tpu.core_type = #tpu.core_type<tc>, window_params = [{transform_indices = @transform_0, window_bounds = array<i64: 1, 1, 16, 96>}, {transform_indices = @transform_1, window_bounds = array<i64: 1, 8, 16, 96>}, {transform_indices = @transform_2, window_bounds = array<i64: 1, 1, 16, 96>}, {pipeline_mode = #tpu.pipeline_mode<synchronous>, transform_indices = @transform_3, window_bounds = array<i64: 3, 3, 96, 64>}, {pipeline_mode = #tpu.pipeline_mode<synchronous>, transform_indices = @transform_4, window_bounds = array<i64: 1, 64>}, {pipeline_mode = #tpu.pipeline_mode<synchronous>, transform_indices = @transform_5, window_bounds = array<i64: 1, 64>}, {transform_indices = @transform_6, window_bounds = array<i64: 1, 8, 16, 64>}]} {
    %c1_i32 = arith.constant 1 : i32
    %0 = arith.minsi %arg1, %c1_i32 : i32
    %1 = arith.sitofp %0 : i32 to f32
    %c1_i32_0 = arith.constant 1 : i32
    %2 = arith.subi %c1_i32_0, %arg1 : i32
    %c1_i32_1 = arith.constant 1 : i32
    %3 = arith.minsi %2, %c1_i32_1 : i32
    %4 = arith.sitofp %3 : i32 to f32
    %c0 = arith.constant 0 : index
    %c0_2 = arith.constant 0 : index
    %c0_3 = arith.constant 0 : index
    %c0_4 = arith.constant 0 : index
    %5 = vector.load %arg2[%c0, %c0_2, %c0_3, %c0_4] : memref<1x1x16x96xbf16, #tpu.memory_space<vmem>>, vector<1x1x16x96xbf16>
    %6 = arith.extf %5 : vector<1x1x16x96xbf16> to vector<1x1x16x96xf32>
    %7 = vector.broadcast %1 : f32 to vector<1x1x16x96xf32>
    %8 = arith.mulf %6, %7 : vector<1x1x16x96xf32>
    %9 = arith.truncf %8 : vector<1x1x16x96xf32> to vector<1x1x16x96xbf16>
    %c0_5 = arith.constant 0 : index
    %c0_6 = arith.constant 0 : index
    %c0_7 = arith.constant 0 : index
    %c0_8 = arith.constant 0 : index
    %10 = vector.load %arg4[%c0_5, %c0_6, %c0_7, %c0_8] : memref<1x1x16x96xbf16, #tpu.memory_space<vmem>>, vector<1x1x16x96xbf16>
    %11 = arith.extf %10 : vector<1x1x16x96xbf16> to vector<1x1x16x96xf32>
    %12 = vector.broadcast %4 : f32 to vector<1x1x16x96xf32>
    %13 = arith.mulf %11, %12 : vector<1x1x16x96xf32>
    %14 = arith.truncf %13 : vector<1x1x16x96xf32> to vector<1x1x16x96xbf16>
    %c0_9 = arith.constant 0 : index
    %c0_10 = arith.constant 0 : index
    %c0_11 = arith.constant 0 : index
    %c0_12 = arith.constant 0 : index
    %15 = vector.load %arg3[%c0_9, %c0_10, %c0_11, %c0_12] : memref<1x8x16x96xbf16, #tpu.memory_space<vmem>>, vector<1x8x16x96xbf16>
    %16 = tpu.concatenate %9, %15, %14 in 1 : vector<1x1x16x96xbf16>, vector<1x8x16x96xbf16>, vector<1x1x16x96xbf16> -> vector<1x10x16x96xbf16>
    %cst = arith.constant 0.000000e+00 : bf16
    %17 = vector.broadcast %cst : bf16 to vector<1x10x1x96xbf16>
    %18 = tpu.concatenate %17, %16, %17 in 2 : vector<1x10x1x96xbf16>, vector<1x10x16x96xbf16>, vector<1x10x1x96xbf16> -> vector<1x10x18x96xbf16>
    %19 = vector.extract_strided_slice %18 {offsets = [0, 0, 0, 0], sizes = [1, 10, 16, 96], strides = [1, 1, 1, 1]} : vector<1x10x18x96xbf16> to vector<1x10x16x96xbf16>
    %20 = vector.extract_strided_slice %18 {offsets = [0, 0, 1, 0], sizes = [1, 10, 16, 96], strides = [1, 1, 1, 1]} : vector<1x10x18x96xbf16> to vector<1x10x16x96xbf16>
    %21 = vector.extract_strided_slice %18 {offsets = [0, 0, 2, 0], sizes = [1, 10, 16, 96], strides = [1, 1, 1, 1]} : vector<1x10x18x96xbf16> to vector<1x10x16x96xbf16>
    %cst_13 = arith.constant 0.000000e+00 : f32
    %22 = vector.broadcast %cst_13 : f32 to vector<128x64xf32>
    %23 = vector.extract_strided_slice %19 {offsets = [0, 0, 0, 0], sizes = [1, 8, 16, 96], strides = [1, 1, 1, 1]} : vector<1x10x16x96xbf16> to vector<1x8x16x96xbf16>
    %24 = vector.shape_cast %23 : vector<1x8x16x96xbf16> to vector<128x96xbf16>
    %c0_14 = arith.constant 0 : index
    %c0_15 = arith.constant 0 : index
    %c0_16 = arith.constant 0 : index
    %c0_17 = arith.constant 0 : index
    %25 = vector.load %arg5[%c0_14, %c0_15, %c0_16, %c0_17] : memref<3x3x96x64xbf16, #tpu.memory_space<vmem>>, vector<1x1x96x64xbf16>
    %26 = vector.shape_cast %25 : vector<1x1x96x64xbf16> to vector<96x64xbf16>
    %cst_18 = arith.constant dense<0.000000e+00> : vector<128x64xf32>
    %27 = tpu.matmul %24, %26, %cst_18 {dimension_numbers = #tpu.dot_dimension_numbers<[1], [0], [0], [1], [0, 0, 1, 1], [], []>} : vector<128x96xbf16>, vector<96x64xbf16>, vector<128x64xf32> -> vector<128x64xf32>
    %28 = arith.addf %22, %27 : vector<128x64xf32>
    %29 = vector.extract_strided_slice %20 {offsets = [0, 0, 0, 0], sizes = [1, 8, 16, 96], strides = [1, 1, 1, 1]} : vector<1x10x16x96xbf16> to vector<1x8x16x96xbf16>
    %30 = vector.shape_cast %29 : vector<1x8x16x96xbf16> to vector<128x96xbf16>
    %c0_19 = arith.constant 0 : index
    %c1 = arith.constant 1 : index
    %c0_20 = arith.constant 0 : index
    %c0_21 = arith.constant 0 : index
    %31 = vector.load %arg5[%c0_19, %c1, %c0_20, %c0_21] : memref<3x3x96x64xbf16, #tpu.memory_space<vmem>>, vector<1x1x96x64xbf16>
    %32 = vector.shape_cast %31 : vector<1x1x96x64xbf16> to vector<96x64xbf16>
    %cst_22 = arith.constant dense<0.000000e+00> : vector<128x64xf32>
    %33 = tpu.matmul %30, %32, %cst_22 {dimension_numbers = #tpu.dot_dimension_numbers<[1], [0], [0], [1], [0, 0, 1, 1], [], []>} : vector<128x96xbf16>, vector<96x64xbf16>, vector<128x64xf32> -> vector<128x64xf32>
    %34 = arith.addf %28, %33 : vector<128x64xf32>
    %35 = vector.extract_strided_slice %21 {offsets = [0, 0, 0, 0], sizes = [1, 8, 16, 96], strides = [1, 1, 1, 1]} : vector<1x10x16x96xbf16> to vector<1x8x16x96xbf16>
    %36 = vector.shape_cast %35 : vector<1x8x16x96xbf16> to vector<128x96xbf16>
    %c0_23 = arith.constant 0 : index
    %c2 = arith.constant 2 : index
    %c0_24 = arith.constant 0 : index
    %c0_25 = arith.constant 0 : index
    %37 = vector.load %arg5[%c0_23, %c2, %c0_24, %c0_25] : memref<3x3x96x64xbf16, #tpu.memory_space<vmem>>, vector<1x1x96x64xbf16>
    %38 = vector.shape_cast %37 : vector<1x1x96x64xbf16> to vector<96x64xbf16>
    %cst_26 = arith.constant dense<0.000000e+00> : vector<128x64xf32>
    %39 = tpu.matmul %36, %38, %cst_26 {dimension_numbers = #tpu.dot_dimension_numbers<[1], [0], [0], [1], [0, 0, 1, 1], [], []>} : vector<128x96xbf16>, vector<96x64xbf16>, vector<128x64xf32> -> vector<128x64xf32>
    %40 = arith.addf %34, %39 : vector<128x64xf32>
    %41 = vector.extract_strided_slice %19 {offsets = [0, 1, 0, 0], sizes = [1, 8, 16, 96], strides = [1, 1, 1, 1]} : vector<1x10x16x96xbf16> to vector<1x8x16x96xbf16>
    %42 = vector.shape_cast %41 : vector<1x8x16x96xbf16> to vector<128x96xbf16>
    %c1_27 = arith.constant 1 : index
    %c0_28 = arith.constant 0 : index
    %c0_29 = arith.constant 0 : index
    %c0_30 = arith.constant 0 : index
    %43 = vector.load %arg5[%c1_27, %c0_28, %c0_29, %c0_30] : memref<3x3x96x64xbf16, #tpu.memory_space<vmem>>, vector<1x1x96x64xbf16>
    %44 = vector.shape_cast %43 : vector<1x1x96x64xbf16> to vector<96x64xbf16>
    %cst_31 = arith.constant dense<0.000000e+00> : vector<128x64xf32>
    %45 = tpu.matmul %42, %44, %cst_31 {dimension_numbers = #tpu.dot_dimension_numbers<[1], [0], [0], [1], [0, 0, 1, 1], [], []>} : vector<128x96xbf16>, vector<96x64xbf16>, vector<128x64xf32> -> vector<128x64xf32>
    %46 = arith.addf %40, %45 : vector<128x64xf32>
    %47 = vector.extract_strided_slice %20 {offsets = [0, 1, 0, 0], sizes = [1, 8, 16, 96], strides = [1, 1, 1, 1]} : vector<1x10x16x96xbf16> to vector<1x8x16x96xbf16>
    %48 = vector.shape_cast %47 : vector<1x8x16x96xbf16> to vector<128x96xbf16>
    %c1_32 = arith.constant 1 : index
    %c1_33 = arith.constant 1 : index
    %c0_34 = arith.constant 0 : index
    %c0_35 = arith.constant 0 : index
    %49 = vector.load %arg5[%c1_32, %c1_33, %c0_34, %c0_35] : memref<3x3x96x64xbf16, #tpu.memory_space<vmem>>, vector<1x1x96x64xbf16>
    %50 = vector.shape_cast %49 : vector<1x1x96x64xbf16> to vector<96x64xbf16>
    %cst_36 = arith.constant dense<0.000000e+00> : vector<128x64xf32>
    %51 = tpu.matmul %48, %50, %cst_36 {dimension_numbers = #tpu.dot_dimension_numbers<[1], [0], [0], [1], [0, 0, 1, 1], [], []>} : vector<128x96xbf16>, vector<96x64xbf16>, vector<128x64xf32> -> vector<128x64xf32>
    %52 = arith.addf %46, %51 : vector<128x64xf32>
    %53 = vector.extract_strided_slice %21 {offsets = [0, 1, 0, 0], sizes = [1, 8, 16, 96], strides = [1, 1, 1, 1]} : vector<1x10x16x96xbf16> to vector<1x8x16x96xbf16>
    %54 = vector.shape_cast %53 : vector<1x8x16x96xbf16> to vector<128x96xbf16>
    %c1_37 = arith.constant 1 : index
    %c2_38 = arith.constant 2 : index
    %c0_39 = arith.constant 0 : index
    %c0_40 = arith.constant 0 : index
    %55 = vector.load %arg5[%c1_37, %c2_38, %c0_39, %c0_40] : memref<3x3x96x64xbf16, #tpu.memory_space<vmem>>, vector<1x1x96x64xbf16>
    %56 = vector.shape_cast %55 : vector<1x1x96x64xbf16> to vector<96x64xbf16>
    %cst_41 = arith.constant dense<0.000000e+00> : vector<128x64xf32>
    %57 = tpu.matmul %54, %56, %cst_41 {dimension_numbers = #tpu.dot_dimension_numbers<[1], [0], [0], [1], [0, 0, 1, 1], [], []>} : vector<128x96xbf16>, vector<96x64xbf16>, vector<128x64xf32> -> vector<128x64xf32>
    %58 = arith.addf %52, %57 : vector<128x64xf32>
    %59 = vector.extract_strided_slice %19 {offsets = [0, 2, 0, 0], sizes = [1, 8, 16, 96], strides = [1, 1, 1, 1]} : vector<1x10x16x96xbf16> to vector<1x8x16x96xbf16>
    %60 = vector.shape_cast %59 : vector<1x8x16x96xbf16> to vector<128x96xbf16>
    %c2_42 = arith.constant 2 : index
    %c0_43 = arith.constant 0 : index
    %c0_44 = arith.constant 0 : index
    %c0_45 = arith.constant 0 : index
    %61 = vector.load %arg5[%c2_42, %c0_43, %c0_44, %c0_45] : memref<3x3x96x64xbf16, #tpu.memory_space<vmem>>, vector<1x1x96x64xbf16>
    %62 = vector.shape_cast %61 : vector<1x1x96x64xbf16> to vector<96x64xbf16>
    %cst_46 = arith.constant dense<0.000000e+00> : vector<128x64xf32>
    %63 = tpu.matmul %60, %62, %cst_46 {dimension_numbers = #tpu.dot_dimension_numbers<[1], [0], [0], [1], [0, 0, 1, 1], [], []>} : vector<128x96xbf16>, vector<96x64xbf16>, vector<128x64xf32> -> vector<128x64xf32>
    %64 = arith.addf %58, %63 : vector<128x64xf32>
    %65 = vector.extract_strided_slice %20 {offsets = [0, 2, 0, 0], sizes = [1, 8, 16, 96], strides = [1, 1, 1, 1]} : vector<1x10x16x96xbf16> to vector<1x8x16x96xbf16>
    %66 = vector.shape_cast %65 : vector<1x8x16x96xbf16> to vector<128x96xbf16>
    %c2_47 = arith.constant 2 : index
    %c1_48 = arith.constant 1 : index
    %c0_49 = arith.constant 0 : index
    %c0_50 = arith.constant 0 : index
    %67 = vector.load %arg5[%c2_47, %c1_48, %c0_49, %c0_50] : memref<3x3x96x64xbf16, #tpu.memory_space<vmem>>, vector<1x1x96x64xbf16>
    %68 = vector.shape_cast %67 : vector<1x1x96x64xbf16> to vector<96x64xbf16>
    %cst_51 = arith.constant dense<0.000000e+00> : vector<128x64xf32>
    %69 = tpu.matmul %66, %68, %cst_51 {dimension_numbers = #tpu.dot_dimension_numbers<[1], [0], [0], [1], [0, 0, 1, 1], [], []>} : vector<128x96xbf16>, vector<96x64xbf16>, vector<128x64xf32> -> vector<128x64xf32>
    %70 = arith.addf %64, %69 : vector<128x64xf32>
    %71 = vector.extract_strided_slice %21 {offsets = [0, 2, 0, 0], sizes = [1, 8, 16, 96], strides = [1, 1, 1, 1]} : vector<1x10x16x96xbf16> to vector<1x8x16x96xbf16>
    %72 = vector.shape_cast %71 : vector<1x8x16x96xbf16> to vector<128x96xbf16>
    %c2_52 = arith.constant 2 : index
    %c2_53 = arith.constant 2 : index
    %c0_54 = arith.constant 0 : index
    %c0_55 = arith.constant 0 : index
    %73 = vector.load %arg5[%c2_52, %c2_53, %c0_54, %c0_55] : memref<3x3x96x64xbf16, #tpu.memory_space<vmem>>, vector<1x1x96x64xbf16>
    %74 = vector.shape_cast %73 : vector<1x1x96x64xbf16> to vector<96x64xbf16>
    %cst_56 = arith.constant dense<0.000000e+00> : vector<128x64xf32>
    %75 = tpu.matmul %72, %74, %cst_56 {dimension_numbers = #tpu.dot_dimension_numbers<[1], [0], [0], [1], [0, 0, 1, 1], [], []>} : vector<128x96xbf16>, vector<96x64xbf16>, vector<128x64xf32> -> vector<128x64xf32>
    %76 = arith.addf %70, %75 : vector<128x64xf32>
    %c0_57 = arith.constant 0 : index
    %c0_58 = arith.constant 0 : index
    %77 = vector.load %arg6[%c0_57, %c0_58] : memref<1x64xf32, #tpu.memory_space<vmem>>, vector<1x64xf32>
    %78 = vector.broadcast %77 : vector<1x64xf32> to vector<128x64xf32>
    %79 = arith.mulf %76, %78 : vector<128x64xf32>
    %c0_59 = arith.constant 0 : index
    %c0_60 = arith.constant 0 : index
    %80 = vector.load %arg7[%c0_59, %c0_60] : memref<1x64xf32, #tpu.memory_space<vmem>>, vector<1x64xf32>
    %81 = vector.broadcast %80 : vector<1x64xf32> to vector<128x64xf32>
    %82 = arith.addf %79, %81 : vector<128x64xf32>
    %cst_61 = arith.constant 0.000000e+00 : f32
    %83 = vector.broadcast %cst_61 : f32 to vector<128x64xf32>
    %84 = arith.cmpf oge, %82, %83 : vector<128x64xf32>
    %cst_62 = arith.constant 1.000000e-01 : f32
    %85 = vector.broadcast %cst_62 : f32 to vector<128x64xf32>
    %86 = arith.mulf %85, %82 : vector<128x64xf32>
    %87 = arith.select %84, %82, %86 : vector<128x64xi1>, vector<128x64xf32>
    %88 = vector.shape_cast %87 : vector<128x64xf32> to vector<1x8x16x64xf32>
    %89 = arith.truncf %88 : vector<1x8x16x64xf32> to vector<1x8x16x64xbf16>
    %c0_63 = arith.constant 0 : index
    %c0_64 = arith.constant 0 : index
    %c0_65 = arith.constant 0 : index
    %c0_66 = arith.constant 0 : index
    %90 = vector.load %arg8[%c0_63, %c0_64, %c0_65, %c0_66] : memref<1x8x16x64xbf16, #tpu.memory_space<vmem>>, vector<1x8x16x64xbf16>
    tpu.vector_store %arg8[%c0_63, %c0_64, %c0_65, %c0_66], %89 {strides = array<i32>} : memref<1x8x16x64xbf16, #tpu.memory_space<vmem>>, vector<1x8x16x64xbf16>,
    return
  }
  func.func @transform_0(%arg0: i32, %arg1: i32) -> (i32, i32, i32, i32) {
    %c8_i32 = arith.constant 8 : i32
    %0 = arith.muli %arg1, %c8_i32 : i32
    %c1_i32 = arith.constant 1 : i32
    %1 = arith.subi %0, %c1_i32 : i32
    %c0_i32 = arith.constant 0 : i32
    %2 = arith.maxsi %1, %c0_i32 : i32
    %c0_i32_0 = arith.constant 0 : i32
    %c0_i32_1 = arith.constant 0 : i32
    %c0_i32_2 = arith.constant 0 : i32
    return %arg0, %2, %c0_i32_0, %c0_i32_1 : i32, i32, i32, i32
  }
  func.func @transform_1(%arg0: i32, %arg1: i32) -> (i32, i32, i32, i32) {
    %c0_i32 = arith.constant 0 : i32
    %c0_i32_0 = arith.constant 0 : i32
    %c0_i32_1 = arith.constant 0 : i32
    return %arg0, %arg1, %c0_i32, %c0_i32_0 : i32, i32, i32, i32
  }
  func.func @transform_2(%arg0: i32, %arg1: i32) -> (i32, i32, i32, i32) {
    %c1_i32 = arith.constant 1 : i32
    %0 = arith.addi %arg1, %c1_i32 : i32
    %c8_i32 = arith.constant 8 : i32
    %1 = arith.muli %0, %c8_i32 : i32
    %c15_i32 = arith.constant 15 : i32
    %2 = arith.minsi %1, %c15_i32 : i32
    %c0_i32 = arith.constant 0 : i32
    %c0_i32_0 = arith.constant 0 : i32
    %c0_i32_1 = arith.constant 0 : i32
    return %arg0, %2, %c0_i32, %c0_i32_0 : i32, i32, i32, i32
  }
  func.func @transform_3(%arg0: i32, %arg1: i32) -> (i32, i32, i32, i32) {
    %c0_i32 = arith.constant 0 : i32
    %c0_i32_0 = arith.constant 0 : i32
    %c0_i32_1 = arith.constant 0 : i32
    %c0_i32_2 = arith.constant 0 : i32
    %c0_i32_3 = arith.constant 0 : i32
    return %c0_i32, %c0_i32_0, %c0_i32_1, %c0_i32_2 : i32, i32, i32, i32
  }
  func.func @transform_4(%arg0: i32, %arg1: i32) -> (i32, i32) {
    %c0_i32 = arith.constant 0 : i32
    %c0_i32_0 = arith.constant 0 : i32
    %c0_i32_1 = arith.constant 0 : i32
    return %c0_i32, %c0_i32_0 : i32, i32
  }
  func.func @transform_5(%arg0: i32, %arg1: i32) -> (i32, i32) {
    %c0_i32 = arith.constant 0 : i32
    %c0_i32_0 = arith.constant 0 : i32
    %c0_i32_1 = arith.constant 0 : i32
    return %c0_i32, %c0_i32_0 : i32, i32
  }
  func.func @transform_6(%arg0: i32, %arg1: i32) -> (i32, i32, i32, i32) {
    %c0_i32 = arith.constant 0 : i32
    %c0_i32_0 = arith.constant 0 : i32
    %c0_i32_1 = arith.constant 0 : i32
    return %arg0, %arg1, %c0_i32, %c0_i32_0 : i32, i32, i32, i32
  }
}

module attributes {stable_mosaic.version = 11 : i64} {
  func.func @_conv3x3_bn_lrelu_kernel(%arg0: i32, %arg1: i32, %arg2: memref<1x1x16x64xbf16, #tpu.memory_space<vmem>>, %arg3: memref<1x8x16x64xbf16, #tpu.memory_space<vmem>>, %arg4: memref<1x1x16x64xbf16, #tpu.memory_space<vmem>>, %arg5: memref<3x3x64x32xbf16, #tpu.memory_space<vmem>>, %arg6: memref<1x32xf32, #tpu.memory_space<vmem>>, %arg7: memref<1x32xf32, #tpu.memory_space<vmem>>, %arg8: memref<1x8x16x32xbf16, #tpu.memory_space<vmem>>) attributes {dimension_semantics = [#tpu.dimension_semantics<parallel>, #tpu.dimension_semantics<parallel>], iteration_bounds = array<i64: 2, 2>, scalar_prefetch = 0 : i64, scratch_operands = 0 : i64, tpu.core_type = #tpu.core_type<tc>, window_params = [{transform_indices = @transform_0, window_bounds = array<i64: 1, 1, 16, 64>}, {transform_indices = @transform_1, window_bounds = array<i64: 1, 8, 16, 64>}, {transform_indices = @transform_2, window_bounds = array<i64: 1, 1, 16, 64>}, {pipeline_mode = #tpu.pipeline_mode<synchronous>, transform_indices = @transform_3, window_bounds = array<i64: 3, 3, 64, 32>}, {pipeline_mode = #tpu.pipeline_mode<synchronous>, transform_indices = @transform_4, window_bounds = array<i64: 1, 32>}, {pipeline_mode = #tpu.pipeline_mode<synchronous>, transform_indices = @transform_5, window_bounds = array<i64: 1, 32>}, {transform_indices = @transform_6, window_bounds = array<i64: 1, 8, 16, 32>}]} {
    %c1_i32 = arith.constant 1 : i32
    %0 = arith.minsi %arg1, %c1_i32 : i32
    %1 = arith.sitofp %0 : i32 to f32
    %c1_i32_0 = arith.constant 1 : i32
    %2 = arith.subi %c1_i32_0, %arg1 : i32
    %c1_i32_1 = arith.constant 1 : i32
    %3 = arith.minsi %2, %c1_i32_1 : i32
    %4 = arith.sitofp %3 : i32 to f32
    %c0 = arith.constant 0 : index
    %c0_2 = arith.constant 0 : index
    %c0_3 = arith.constant 0 : index
    %c0_4 = arith.constant 0 : index
    %5 = vector.load %arg2[%c0, %c0_2, %c0_3, %c0_4] : memref<1x1x16x64xbf16, #tpu.memory_space<vmem>>, vector<1x1x16x64xbf16>
    %6 = arith.extf %5 : vector<1x1x16x64xbf16> to vector<1x1x16x64xf32>
    %7 = vector.broadcast %1 : f32 to vector<1x1x16x64xf32>
    %8 = arith.mulf %6, %7 : vector<1x1x16x64xf32>
    %9 = arith.truncf %8 : vector<1x1x16x64xf32> to vector<1x1x16x64xbf16>
    %c0_5 = arith.constant 0 : index
    %c0_6 = arith.constant 0 : index
    %c0_7 = arith.constant 0 : index
    %c0_8 = arith.constant 0 : index
    %10 = vector.load %arg4[%c0_5, %c0_6, %c0_7, %c0_8] : memref<1x1x16x64xbf16, #tpu.memory_space<vmem>>, vector<1x1x16x64xbf16>
    %11 = arith.extf %10 : vector<1x1x16x64xbf16> to vector<1x1x16x64xf32>
    %12 = vector.broadcast %4 : f32 to vector<1x1x16x64xf32>
    %13 = arith.mulf %11, %12 : vector<1x1x16x64xf32>
    %14 = arith.truncf %13 : vector<1x1x16x64xf32> to vector<1x1x16x64xbf16>
    %c0_9 = arith.constant 0 : index
    %c0_10 = arith.constant 0 : index
    %c0_11 = arith.constant 0 : index
    %c0_12 = arith.constant 0 : index
    %15 = vector.load %arg3[%c0_9, %c0_10, %c0_11, %c0_12] : memref<1x8x16x64xbf16, #tpu.memory_space<vmem>>, vector<1x8x16x64xbf16>
    %16 = tpu.concatenate %9, %15, %14 in 1 : vector<1x1x16x64xbf16>, vector<1x8x16x64xbf16>, vector<1x1x16x64xbf16> -> vector<1x10x16x64xbf16>
    %cst = arith.constant 0.000000e+00 : bf16
    %17 = vector.broadcast %cst : bf16 to vector<1x10x1x64xbf16>
    %18 = tpu.concatenate %17, %16, %17 in 2 : vector<1x10x1x64xbf16>, vector<1x10x16x64xbf16>, vector<1x10x1x64xbf16> -> vector<1x10x18x64xbf16>
    %19 = vector.extract_strided_slice %18 {offsets = [0, 0, 0, 0], sizes = [1, 10, 16, 64], strides = [1, 1, 1, 1]} : vector<1x10x18x64xbf16> to vector<1x10x16x64xbf16>
    %20 = vector.extract_strided_slice %18 {offsets = [0, 0, 1, 0], sizes = [1, 10, 16, 64], strides = [1, 1, 1, 1]} : vector<1x10x18x64xbf16> to vector<1x10x16x64xbf16>
    %21 = vector.extract_strided_slice %18 {offsets = [0, 0, 2, 0], sizes = [1, 10, 16, 64], strides = [1, 1, 1, 1]} : vector<1x10x18x64xbf16> to vector<1x10x16x64xbf16>
    %cst_13 = arith.constant 0.000000e+00 : f32
    %22 = vector.broadcast %cst_13 : f32 to vector<128x32xf32>
    %23 = vector.extract_strided_slice %19 {offsets = [0, 0, 0, 0], sizes = [1, 8, 16, 64], strides = [1, 1, 1, 1]} : vector<1x10x16x64xbf16> to vector<1x8x16x64xbf16>
    %24 = vector.shape_cast %23 : vector<1x8x16x64xbf16> to vector<128x64xbf16>
    %c0_14 = arith.constant 0 : index
    %c0_15 = arith.constant 0 : index
    %c0_16 = arith.constant 0 : index
    %c0_17 = arith.constant 0 : index
    %25 = vector.load %arg5[%c0_14, %c0_15, %c0_16, %c0_17] : memref<3x3x64x32xbf16, #tpu.memory_space<vmem>>, vector<1x1x64x32xbf16>
    %26 = vector.shape_cast %25 : vector<1x1x64x32xbf16> to vector<64x32xbf16>
    %cst_18 = arith.constant dense<0.000000e+00> : vector<128x32xf32>
    %27 = tpu.matmul %24, %26, %cst_18 {dimension_numbers = #tpu.dot_dimension_numbers<[1], [0], [0], [1], [0, 0, 1, 1], [], []>} : vector<128x64xbf16>, vector<64x32xbf16>, vector<128x32xf32> -> vector<128x32xf32>
    %28 = arith.addf %22, %27 : vector<128x32xf32>
    %29 = vector.extract_strided_slice %20 {offsets = [0, 0, 0, 0], sizes = [1, 8, 16, 64], strides = [1, 1, 1, 1]} : vector<1x10x16x64xbf16> to vector<1x8x16x64xbf16>
    %30 = vector.shape_cast %29 : vector<1x8x16x64xbf16> to vector<128x64xbf16>
    %c0_19 = arith.constant 0 : index
    %c1 = arith.constant 1 : index
    %c0_20 = arith.constant 0 : index
    %c0_21 = arith.constant 0 : index
    %31 = vector.load %arg5[%c0_19, %c1, %c0_20, %c0_21] : memref<3x3x64x32xbf16, #tpu.memory_space<vmem>>, vector<1x1x64x32xbf16>
    %32 = vector.shape_cast %31 : vector<1x1x64x32xbf16> to vector<64x32xbf16>
    %cst_22 = arith.constant dense<0.000000e+00> : vector<128x32xf32>
    %33 = tpu.matmul %30, %32, %cst_22 {dimension_numbers = #tpu.dot_dimension_numbers<[1], [0], [0], [1], [0, 0, 1, 1], [], []>} : vector<128x64xbf16>, vector<64x32xbf16>, vector<128x32xf32> -> vector<128x32xf32>
    %34 = arith.addf %28, %33 : vector<128x32xf32>
    %35 = vector.extract_strided_slice %21 {offsets = [0, 0, 0, 0], sizes = [1, 8, 16, 64], strides = [1, 1, 1, 1]} : vector<1x10x16x64xbf16> to vector<1x8x16x64xbf16>
    %36 = vector.shape_cast %35 : vector<1x8x16x64xbf16> to vector<128x64xbf16>
    %c0_23 = arith.constant 0 : index
    %c2 = arith.constant 2 : index
    %c0_24 = arith.constant 0 : index
    %c0_25 = arith.constant 0 : index
    %37 = vector.load %arg5[%c0_23, %c2, %c0_24, %c0_25] : memref<3x3x64x32xbf16, #tpu.memory_space<vmem>>, vector<1x1x64x32xbf16>
    %38 = vector.shape_cast %37 : vector<1x1x64x32xbf16> to vector<64x32xbf16>
    %cst_26 = arith.constant dense<0.000000e+00> : vector<128x32xf32>
    %39 = tpu.matmul %36, %38, %cst_26 {dimension_numbers = #tpu.dot_dimension_numbers<[1], [0], [0], [1], [0, 0, 1, 1], [], []>} : vector<128x64xbf16>, vector<64x32xbf16>, vector<128x32xf32> -> vector<128x32xf32>
    %40 = arith.addf %34, %39 : vector<128x32xf32>
    %41 = vector.extract_strided_slice %19 {offsets = [0, 1, 0, 0], sizes = [1, 8, 16, 64], strides = [1, 1, 1, 1]} : vector<1x10x16x64xbf16> to vector<1x8x16x64xbf16>
    %42 = vector.shape_cast %41 : vector<1x8x16x64xbf16> to vector<128x64xbf16>
    %c1_27 = arith.constant 1 : index
    %c0_28 = arith.constant 0 : index
    %c0_29 = arith.constant 0 : index
    %c0_30 = arith.constant 0 : index
    %43 = vector.load %arg5[%c1_27, %c0_28, %c0_29, %c0_30] : memref<3x3x64x32xbf16, #tpu.memory_space<vmem>>, vector<1x1x64x32xbf16>
    %44 = vector.shape_cast %43 : vector<1x1x64x32xbf16> to vector<64x32xbf16>
    %cst_31 = arith.constant dense<0.000000e+00> : vector<128x32xf32>
    %45 = tpu.matmul %42, %44, %cst_31 {dimension_numbers = #tpu.dot_dimension_numbers<[1], [0], [0], [1], [0, 0, 1, 1], [], []>} : vector<128x64xbf16>, vector<64x32xbf16>, vector<128x32xf32> -> vector<128x32xf32>
    %46 = arith.addf %40, %45 : vector<128x32xf32>
    %47 = vector.extract_strided_slice %20 {offsets = [0, 1, 0, 0], sizes = [1, 8, 16, 64], strides = [1, 1, 1, 1]} : vector<1x10x16x64xbf16> to vector<1x8x16x64xbf16>
    %48 = vector.shape_cast %47 : vector<1x8x16x64xbf16> to vector<128x64xbf16>
    %c1_32 = arith.constant 1 : index
    %c1_33 = arith.constant 1 : index
    %c0_34 = arith.constant 0 : index
    %c0_35 = arith.constant 0 : index
    %49 = vector.load %arg5[%c1_32, %c1_33, %c0_34, %c0_35] : memref<3x3x64x32xbf16, #tpu.memory_space<vmem>>, vector<1x1x64x32xbf16>
    %50 = vector.shape_cast %49 : vector<1x1x64x32xbf16> to vector<64x32xbf16>
    %cst_36 = arith.constant dense<0.000000e+00> : vector<128x32xf32>
    %51 = tpu.matmul %48, %50, %cst_36 {dimension_numbers = #tpu.dot_dimension_numbers<[1], [0], [0], [1], [0, 0, 1, 1], [], []>} : vector<128x64xbf16>, vector<64x32xbf16>, vector<128x32xf32> -> vector<128x32xf32>
    %52 = arith.addf %46, %51 : vector<128x32xf32>
    %53 = vector.extract_strided_slice %21 {offsets = [0, 1, 0, 0], sizes = [1, 8, 16, 64], strides = [1, 1, 1, 1]} : vector<1x10x16x64xbf16> to vector<1x8x16x64xbf16>
    %54 = vector.shape_cast %53 : vector<1x8x16x64xbf16> to vector<128x64xbf16>
    %c1_37 = arith.constant 1 : index
    %c2_38 = arith.constant 2 : index
    %c0_39 = arith.constant 0 : index
    %c0_40 = arith.constant 0 : index
    %55 = vector.load %arg5[%c1_37, %c2_38, %c0_39, %c0_40] : memref<3x3x64x32xbf16, #tpu.memory_space<vmem>>, vector<1x1x64x32xbf16>
    %56 = vector.shape_cast %55 : vector<1x1x64x32xbf16> to vector<64x32xbf16>
    %cst_41 = arith.constant dense<0.000000e+00> : vector<128x32xf32>
    %57 = tpu.matmul %54, %56, %cst_41 {dimension_numbers = #tpu.dot_dimension_numbers<[1], [0], [0], [1], [0, 0, 1, 1], [], []>} : vector<128x64xbf16>, vector<64x32xbf16>, vector<128x32xf32> -> vector<128x32xf32>
    %58 = arith.addf %52, %57 : vector<128x32xf32>
    %59 = vector.extract_strided_slice %19 {offsets = [0, 2, 0, 0], sizes = [1, 8, 16, 64], strides = [1, 1, 1, 1]} : vector<1x10x16x64xbf16> to vector<1x8x16x64xbf16>
    %60 = vector.shape_cast %59 : vector<1x8x16x64xbf16> to vector<128x64xbf16>
    %c2_42 = arith.constant 2 : index
    %c0_43 = arith.constant 0 : index
    %c0_44 = arith.constant 0 : index
    %c0_45 = arith.constant 0 : index
    %61 = vector.load %arg5[%c2_42, %c0_43, %c0_44, %c0_45] : memref<3x3x64x32xbf16, #tpu.memory_space<vmem>>, vector<1x1x64x32xbf16>
    %62 = vector.shape_cast %61 : vector<1x1x64x32xbf16> to vector<64x32xbf16>
    %cst_46 = arith.constant dense<0.000000e+00> : vector<128x32xf32>
    %63 = tpu.matmul %60, %62, %cst_46 {dimension_numbers = #tpu.dot_dimension_numbers<[1], [0], [0], [1], [0, 0, 1, 1], [], []>} : vector<128x64xbf16>, vector<64x32xbf16>, vector<128x32xf32> -> vector<128x32xf32>
    %64 = arith.addf %58, %63 : vector<128x32xf32>
    %65 = vector.extract_strided_slice %20 {offsets = [0, 2, 0, 0], sizes = [1, 8, 16, 64], strides = [1, 1, 1, 1]} : vector<1x10x16x64xbf16> to vector<1x8x16x64xbf16>
    %66 = vector.shape_cast %65 : vector<1x8x16x64xbf16> to vector<128x64xbf16>
    %c2_47 = arith.constant 2 : index
    %c1_48 = arith.constant 1 : index
    %c0_49 = arith.constant 0 : index
    %c0_50 = arith.constant 0 : index
    %67 = vector.load %arg5[%c2_47, %c1_48, %c0_49, %c0_50] : memref<3x3x64x32xbf16, #tpu.memory_space<vmem>>, vector<1x1x64x32xbf16>
    %68 = vector.shape_cast %67 : vector<1x1x64x32xbf16> to vector<64x32xbf16>
    %cst_51 = arith.constant dense<0.000000e+00> : vector<128x32xf32>
    %69 = tpu.matmul %66, %68, %cst_51 {dimension_numbers = #tpu.dot_dimension_numbers<[1], [0], [0], [1], [0, 0, 1, 1], [], []>} : vector<128x64xbf16>, vector<64x32xbf16>, vector<128x32xf32> -> vector<128x32xf32>
    %70 = arith.addf %64, %69 : vector<128x32xf32>
    %71 = vector.extract_strided_slice %21 {offsets = [0, 2, 0, 0], sizes = [1, 8, 16, 64], strides = [1, 1, 1, 1]} : vector<1x10x16x64xbf16> to vector<1x8x16x64xbf16>
    %72 = vector.shape_cast %71 : vector<1x8x16x64xbf16> to vector<128x64xbf16>
    %c2_52 = arith.constant 2 : index
    %c2_53 = arith.constant 2 : index
    %c0_54 = arith.constant 0 : index
    %c0_55 = arith.constant 0 : index
    %73 = vector.load %arg5[%c2_52, %c2_53, %c0_54, %c0_55] : memref<3x3x64x32xbf16, #tpu.memory_space<vmem>>, vector<1x1x64x32xbf16>
    %74 = vector.shape_cast %73 : vector<1x1x64x32xbf16> to vector<64x32xbf16>
    %cst_56 = arith.constant dense<0.000000e+00> : vector<128x32xf32>
    %75 = tpu.matmul %72, %74, %cst_56 {dimension_numbers = #tpu.dot_dimension_numbers<[1], [0], [0], [1], [0, 0, 1, 1], [], []>} : vector<128x64xbf16>, vector<64x32xbf16>, vector<128x32xf32> -> vector<128x32xf32>
    %76 = arith.addf %70, %75 : vector<128x32xf32>
    %c0_57 = arith.constant 0 : index
    %c0_58 = arith.constant 0 : index
    %77 = vector.load %arg6[%c0_57, %c0_58] : memref<1x32xf32, #tpu.memory_space<vmem>>, vector<1x32xf32>
    %78 = vector.broadcast %77 : vector<1x32xf32> to vector<128x32xf32>
    %79 = arith.mulf %76, %78 : vector<128x32xf32>
    %c0_59 = arith.constant 0 : index
    %c0_60 = arith.constant 0 : index
    %80 = vector.load %arg7[%c0_59, %c0_60] : memref<1x32xf32, #tpu.memory_space<vmem>>, vector<1x32xf32>
    %81 = vector.broadcast %80 : vector<1x32xf32> to vector<128x32xf32>
    %82 = arith.addf %79, %81 : vector<128x32xf32>
    %cst_61 = arith.constant 0.000000e+00 : f32
    %83 = vector.broadcast %cst_61 : f32 to vector<128x32xf32>
    %84 = arith.cmpf oge, %82, %83 : vector<128x32xf32>
    %cst_62 = arith.constant 1.000000e-01 : f32
    %85 = vector.broadcast %cst_62 : f32 to vector<128x32xf32>
    %86 = arith.mulf %85, %82 : vector<128x32xf32>
    %87 = arith.select %84, %82, %86 : vector<128x32xi1>, vector<128x32xf32>
    %88 = vector.shape_cast %87 : vector<128x32xf32> to vector<1x8x16x32xf32>
    %89 = arith.truncf %88 : vector<1x8x16x32xf32> to vector<1x8x16x32xbf16>
    %c0_63 = arith.constant 0 : index
    %c0_64 = arith.constant 0 : index
    %c0_65 = arith.constant 0 : index
    %c0_66 = arith.constant 0 : index
    %90 = vector.load %arg8[%c0_63, %c0_64, %c0_65, %c0_66] : memref<1x8x16x32xbf16, #tpu.memory_space<vmem>>, vector<1x8x16x32xbf16>
    tpu.vector_store %arg8[%c0_63, %c0_64, %c0_65, %c0_66], %89 {strides = array<i32>} : memref<1x8x16x32xbf16, #tpu.memory_space<vmem>>, vector<1x8x16x32xbf16>,
    return
  }
  func.func @transform_0(%arg0: i32, %arg1: i32) -> (i32, i32, i32, i32) {
    %c8_i32 = arith.constant 8 : i32
    %0 = arith.muli %arg1, %c8_i32 : i32
    %c1_i32 = arith.constant 1 : i32
    %1 = arith.subi %0, %c1_i32 : i32
    %c0_i32 = arith.constant 0 : i32
    %2 = arith.maxsi %1, %c0_i32 : i32
    %c0_i32_0 = arith.constant 0 : i32
    %c0_i32_1 = arith.constant 0 : i32
    %c0_i32_2 = arith.constant 0 : i32
    return %arg0, %2, %c0_i32_0, %c0_i32_1 : i32, i32, i32, i32
  }
  func.func @transform_1(%arg0: i32, %arg1: i32) -> (i32, i32, i32, i32) {
    %c0_i32 = arith.constant 0 : i32
    %c0_i32_0 = arith.constant 0 : i32
    %c0_i32_1 = arith.constant 0 : i32
    return %arg0, %arg1, %c0_i32, %c0_i32_0 : i32, i32, i32, i32
  }
  func.func @transform_2(%arg0: i32, %arg1: i32) -> (i32, i32, i32, i32) {
    %c1_i32 = arith.constant 1 : i32
    %0 = arith.addi %arg1, %c1_i32 : i32
    %c8_i32 = arith.constant 8 : i32
    %1 = arith.muli %0, %c8_i32 : i32
    %c15_i32 = arith.constant 15 : i32
    %2 = arith.minsi %1, %c15_i32 : i32
    %c0_i32 = arith.constant 0 : i32
    %c0_i32_0 = arith.constant 0 : i32
    %c0_i32_1 = arith.constant 0 : i32
    return %arg0, %2, %c0_i32, %c0_i32_0 : i32, i32, i32, i32
  }
  func.func @transform_3(%arg0: i32, %arg1: i32) -> (i32, i32, i32, i32) {
    %c0_i32 = arith.constant 0 : i32
    %c0_i32_0 = arith.constant 0 : i32
    %c0_i32_1 = arith.constant 0 : i32
    %c0_i32_2 = arith.constant 0 : i32
    %c0_i32_3 = arith.constant 0 : i32
    return %c0_i32, %c0_i32_0, %c0_i32_1, %c0_i32_2 : i32, i32, i32, i32
  }
  func.func @transform_4(%arg0: i32, %arg1: i32) -> (i32, i32) {
    %c0_i32 = arith.constant 0 : i32
    %c0_i32_0 = arith.constant 0 : i32
    %c0_i32_1 = arith.constant 0 : i32
    return %c0_i32, %c0_i32_0 : i32, i32
  }
  func.func @transform_5(%arg0: i32, %arg1: i32) -> (i32, i32) {
    %c0_i32 = arith.constant 0 : i32
    %c0_i32_0 = arith.constant 0 : i32
    %c0_i32_1 = arith.constant 0 : i32
    return %c0_i32, %c0_i32_0 : i32, i32
  }
  func.func @transform_6(%arg0: i32, %arg1: i32) -> (i32, i32, i32, i32) {
    %c0_i32 = arith.constant 0 : i32
    %c0_i32_0 = arith.constant 0 : i32
    %c0_i32_1 = arith.constant 0 : i32
    return %arg0, %arg1, %c0_i32, %c0_i32_0 : i32, i32, i32, i32
  }
}

module attributes {stable_mosaic.version = 11 : i64} {
  func.func @_conv3x3_cout1_kernel(%arg0: i32, %arg1: i32, %arg2: memref<1x1x16x32xbf16, #tpu.memory_space<vmem>>, %arg3: memref<1x8x16x32xbf16, #tpu.memory_space<vmem>>, %arg4: memref<1x1x16x32xbf16, #tpu.memory_space<vmem>>, %arg5: memref<9x32xf32, #tpu.memory_space<vmem>>, %arg6: memref<1x1xf32, #tpu.memory_space<vmem>>, %arg7: memref<1x8x16xf32, #tpu.memory_space<vmem>>) attributes {dimension_semantics = [#tpu.dimension_semantics<parallel>, #tpu.dimension_semantics<parallel>], iteration_bounds = array<i64: 2, 2>, scalar_prefetch = 0 : i64, scratch_operands = 0 : i64, tpu.core_type = #tpu.core_type<tc>, window_params = [{transform_indices = @transform_0, window_bounds = array<i64: 1, 1, 16, 32>}, {transform_indices = @transform_1, window_bounds = array<i64: 1, 8, 16, 32>}, {transform_indices = @transform_2, window_bounds = array<i64: 1, 1, 16, 32>}, {pipeline_mode = #tpu.pipeline_mode<synchronous>, transform_indices = @transform_3, window_bounds = array<i64: 9, 32>}, {pipeline_mode = #tpu.pipeline_mode<synchronous>, transform_indices = @transform_4, window_bounds = array<i64: 1, 1>}, {transform_indices = @transform_5, window_bounds = array<i64: 1, 8, 16>}]} {
    %c1_i32 = arith.constant 1 : i32
    %0 = arith.minsi %arg1, %c1_i32 : i32
    %1 = arith.sitofp %0 : i32 to f32
    %c1_i32_0 = arith.constant 1 : i32
    %2 = arith.subi %c1_i32_0, %arg1 : i32
    %c1_i32_1 = arith.constant 1 : i32
    %3 = arith.minsi %2, %c1_i32_1 : i32
    %4 = arith.sitofp %3 : i32 to f32
    %c0 = arith.constant 0 : index
    %c0_2 = arith.constant 0 : index
    %c0_3 = arith.constant 0 : index
    %c0_4 = arith.constant 0 : index
    %5 = vector.load %arg2[%c0, %c0_2, %c0_3, %c0_4] : memref<1x1x16x32xbf16, #tpu.memory_space<vmem>>, vector<1x1x16x32xbf16>
    %6 = arith.extf %5 : vector<1x1x16x32xbf16> to vector<1x1x16x32xf32>
    %7 = vector.broadcast %1 : f32 to vector<1x1x16x32xf32>
    %8 = arith.mulf %6, %7 : vector<1x1x16x32xf32>
    %c0_5 = arith.constant 0 : index
    %c0_6 = arith.constant 0 : index
    %c0_7 = arith.constant 0 : index
    %c0_8 = arith.constant 0 : index
    %9 = vector.load %arg4[%c0_5, %c0_6, %c0_7, %c0_8] : memref<1x1x16x32xbf16, #tpu.memory_space<vmem>>, vector<1x1x16x32xbf16>
    %10 = arith.extf %9 : vector<1x1x16x32xbf16> to vector<1x1x16x32xf32>
    %11 = vector.broadcast %4 : f32 to vector<1x1x16x32xf32>
    %12 = arith.mulf %10, %11 : vector<1x1x16x32xf32>
    %c0_9 = arith.constant 0 : index
    %c0_10 = arith.constant 0 : index
    %c0_11 = arith.constant 0 : index
    %c0_12 = arith.constant 0 : index
    %13 = vector.load %arg3[%c0_9, %c0_10, %c0_11, %c0_12] : memref<1x8x16x32xbf16, #tpu.memory_space<vmem>>, vector<1x8x16x32xbf16>
    %14 = arith.extf %13 : vector<1x8x16x32xbf16> to vector<1x8x16x32xf32>
    %15 = tpu.concatenate %8, %14, %12 in 1 : vector<1x1x16x32xf32>, vector<1x8x16x32xf32>, vector<1x1x16x32xf32> -> vector<1x10x16x32xf32>
    %cst = arith.constant 0.000000e+00 : f32
    %16 = vector.broadcast %cst : f32 to vector<1x10x1x32xf32>
    %17 = tpu.concatenate %16, %15, %16 in 2 : vector<1x10x1x32xf32>, vector<1x10x16x32xf32>, vector<1x10x1x32xf32> -> vector<1x10x18x32xf32>
    %18 = vector.extract_strided_slice %17 {offsets = [0, 0, 0, 0], sizes = [1, 10, 16, 32], strides = [1, 1, 1, 1]} : vector<1x10x18x32xf32> to vector<1x10x16x32xf32>
    %19 = vector.extract_strided_slice %17 {offsets = [0, 0, 1, 0], sizes = [1, 10, 16, 32], strides = [1, 1, 1, 1]} : vector<1x10x18x32xf32> to vector<1x10x16x32xf32>
    %20 = vector.extract_strided_slice %17 {offsets = [0, 0, 2, 0], sizes = [1, 10, 16, 32], strides = [1, 1, 1, 1]} : vector<1x10x18x32xf32> to vector<1x10x16x32xf32>
    %cst_13 = arith.constant 0.000000e+00 : f32
    %21 = vector.broadcast %cst_13 : f32 to vector<8x16xf32>
    %22 = vector.extract_strided_slice %18 {offsets = [0, 0, 0, 0], sizes = [1, 8, 16, 32], strides = [1, 1, 1, 1]} : vector<1x10x16x32xf32> to vector<1x8x16x32xf32>
    %23 = vector.shape_cast %22 : vector<1x8x16x32xf32> to vector<8x16x32xf32>
    %c0_14 = arith.constant 0 : index
    %c0_15 = arith.constant 0 : index
    %24 = vector.load %arg5[%c0_14, %c0_15] : memref<9x32xf32, #tpu.memory_space<vmem>>, vector<1x32xf32>
    %25 = vector.shape_cast %24 : vector<1x32xf32> to vector<1x1x32xf32>
    %26 = vector.broadcast %25 : vector<1x1x32xf32> to vector<8x16x32xf32>
    %27 = arith.mulf %23, %26 : vector<8x16x32xf32>
    %cst_16 = arith.constant dense<0.000000e+00> : vector<8x16xf32>
    %28 = vector.multi_reduction <add>, %27, %cst_16 [2] : vector<8x16x32xf32> to vector<8x16xf32>
    %29 = arith.addf %21, %28 : vector<8x16xf32>
    %30 = vector.extract_strided_slice %19 {offsets = [0, 0, 0, 0], sizes = [1, 8, 16, 32], strides = [1, 1, 1, 1]} : vector<1x10x16x32xf32> to vector<1x8x16x32xf32>
    %31 = vector.shape_cast %30 : vector<1x8x16x32xf32> to vector<8x16x32xf32>
    %c1 = arith.constant 1 : index
    %c0_17 = arith.constant 0 : index
    %32 = vector.load %arg5[%c1, %c0_17] : memref<9x32xf32, #tpu.memory_space<vmem>>, vector<1x32xf32>
    %33 = vector.shape_cast %32 : vector<1x32xf32> to vector<1x1x32xf32>
    %34 = vector.broadcast %33 : vector<1x1x32xf32> to vector<8x16x32xf32>
    %35 = arith.mulf %31, %34 : vector<8x16x32xf32>
    %cst_18 = arith.constant dense<0.000000e+00> : vector<8x16xf32>
    %36 = vector.multi_reduction <add>, %35, %cst_18 [2] : vector<8x16x32xf32> to vector<8x16xf32>
    %37 = arith.addf %29, %36 : vector<8x16xf32>
    %38 = vector.extract_strided_slice %20 {offsets = [0, 0, 0, 0], sizes = [1, 8, 16, 32], strides = [1, 1, 1, 1]} : vector<1x10x16x32xf32> to vector<1x8x16x32xf32>
    %39 = vector.shape_cast %38 : vector<1x8x16x32xf32> to vector<8x16x32xf32>
    %c2 = arith.constant 2 : index
    %c0_19 = arith.constant 0 : index
    %40 = vector.load %arg5[%c2, %c0_19] : memref<9x32xf32, #tpu.memory_space<vmem>>, vector<1x32xf32>
    %41 = vector.shape_cast %40 : vector<1x32xf32> to vector<1x1x32xf32>
    %42 = vector.broadcast %41 : vector<1x1x32xf32> to vector<8x16x32xf32>
    %43 = arith.mulf %39, %42 : vector<8x16x32xf32>
    %cst_20 = arith.constant dense<0.000000e+00> : vector<8x16xf32>
    %44 = vector.multi_reduction <add>, %43, %cst_20 [2] : vector<8x16x32xf32> to vector<8x16xf32>
    %45 = arith.addf %37, %44 : vector<8x16xf32>
    %46 = vector.extract_strided_slice %18 {offsets = [0, 1, 0, 0], sizes = [1, 8, 16, 32], strides = [1, 1, 1, 1]} : vector<1x10x16x32xf32> to vector<1x8x16x32xf32>
    %47 = vector.shape_cast %46 : vector<1x8x16x32xf32> to vector<8x16x32xf32>
    %c3 = arith.constant 3 : index
    %c0_21 = arith.constant 0 : index
    %48 = vector.load %arg5[%c3, %c0_21] : memref<9x32xf32, #tpu.memory_space<vmem>>, vector<1x32xf32>
    %49 = vector.shape_cast %48 : vector<1x32xf32> to vector<1x1x32xf32>
    %50 = vector.broadcast %49 : vector<1x1x32xf32> to vector<8x16x32xf32>
    %51 = arith.mulf %47, %50 : vector<8x16x32xf32>
    %cst_22 = arith.constant dense<0.000000e+00> : vector<8x16xf32>
    %52 = vector.multi_reduction <add>, %51, %cst_22 [2] : vector<8x16x32xf32> to vector<8x16xf32>
    %53 = arith.addf %45, %52 : vector<8x16xf32>
    %54 = vector.extract_strided_slice %19 {offsets = [0, 1, 0, 0], sizes = [1, 8, 16, 32], strides = [1, 1, 1, 1]} : vector<1x10x16x32xf32> to vector<1x8x16x32xf32>
    %55 = vector.shape_cast %54 : vector<1x8x16x32xf32> to vector<8x16x32xf32>
    %c4 = arith.constant 4 : index
    %c0_23 = arith.constant 0 : index
    %56 = vector.load %arg5[%c4, %c0_23] : memref<9x32xf32, #tpu.memory_space<vmem>>, vector<1x32xf32>
    %57 = vector.shape_cast %56 : vector<1x32xf32> to vector<1x1x32xf32>
    %58 = vector.broadcast %57 : vector<1x1x32xf32> to vector<8x16x32xf32>
    %59 = arith.mulf %55, %58 : vector<8x16x32xf32>
    %cst_24 = arith.constant dense<0.000000e+00> : vector<8x16xf32>
    %60 = vector.multi_reduction <add>, %59, %cst_24 [2] : vector<8x16x32xf32> to vector<8x16xf32>
    %61 = arith.addf %53, %60 : vector<8x16xf32>
    %62 = vector.extract_strided_slice %20 {offsets = [0, 1, 0, 0], sizes = [1, 8, 16, 32], strides = [1, 1, 1, 1]} : vector<1x10x16x32xf32> to vector<1x8x16x32xf32>
    %63 = vector.shape_cast %62 : vector<1x8x16x32xf32> to vector<8x16x32xf32>
    %c5 = arith.constant 5 : index
    %c0_25 = arith.constant 0 : index
    %64 = vector.load %arg5[%c5, %c0_25] : memref<9x32xf32, #tpu.memory_space<vmem>>, vector<1x32xf32>
    %65 = vector.shape_cast %64 : vector<1x32xf32> to vector<1x1x32xf32>
    %66 = vector.broadcast %65 : vector<1x1x32xf32> to vector<8x16x32xf32>
    %67 = arith.mulf %63, %66 : vector<8x16x32xf32>
    %cst_26 = arith.constant dense<0.000000e+00> : vector<8x16xf32>
    %68 = vector.multi_reduction <add>, %67, %cst_26 [2] : vector<8x16x32xf32> to vector<8x16xf32>
    %69 = arith.addf %61, %68 : vector<8x16xf32>
    %70 = vector.extract_strided_slice %18 {offsets = [0, 2, 0, 0], sizes = [1, 8, 16, 32], strides = [1, 1, 1, 1]} : vector<1x10x16x32xf32> to vector<1x8x16x32xf32>
    %71 = vector.shape_cast %70 : vector<1x8x16x32xf32> to vector<8x16x32xf32>
    %c6 = arith.constant 6 : index
    %c0_27 = arith.constant 0 : index
    %72 = vector.load %arg5[%c6, %c0_27] : memref<9x32xf32, #tpu.memory_space<vmem>>, vector<1x32xf32>
    %73 = vector.shape_cast %72 : vector<1x32xf32> to vector<1x1x32xf32>
    %74 = vector.broadcast %73 : vector<1x1x32xf32> to vector<8x16x32xf32>
    %75 = arith.mulf %71, %74 : vector<8x16x32xf32>
    %cst_28 = arith.constant dense<0.000000e+00> : vector<8x16xf32>
    %76 = vector.multi_reduction <add>, %75, %cst_28 [2] : vector<8x16x32xf32> to vector<8x16xf32>
    %77 = arith.addf %69, %76 : vector<8x16xf32>
    %78 = vector.extract_strided_slice %19 {offsets = [0, 2, 0, 0], sizes = [1, 8, 16, 32], strides = [1, 1, 1, 1]} : vector<1x10x16x32xf32> to vector<1x8x16x32xf32>
    %79 = vector.shape_cast %78 : vector<1x8x16x32xf32> to vector<8x16x32xf32>
    %c7 = arith.constant 7 : index
    %c0_29 = arith.constant 0 : index
    %80 = vector.load %arg5[%c7, %c0_29] : memref<9x32xf32, #tpu.memory_space<vmem>>, vector<1x32xf32>
    %81 = vector.shape_cast %80 : vector<1x32xf32> to vector<1x1x32xf32>
    %82 = vector.broadcast %81 : vector<1x1x32xf32> to vector<8x16x32xf32>
    %83 = arith.mulf %79, %82 : vector<8x16x32xf32>
    %cst_30 = arith.constant dense<0.000000e+00> : vector<8x16xf32>
    %84 = vector.multi_reduction <add>, %83, %cst_30 [2] : vector<8x16x32xf32> to vector<8x16xf32>
    %85 = arith.addf %77, %84 : vector<8x16xf32>
    %86 = vector.extract_strided_slice %20 {offsets = [0, 2, 0, 0], sizes = [1, 8, 16, 32], strides = [1, 1, 1, 1]} : vector<1x10x16x32xf32> to vector<1x8x16x32xf32>
    %87 = vector.shape_cast %86 : vector<1x8x16x32xf32> to vector<8x16x32xf32>
    %c8 = arith.constant 8 : index
    %c0_31 = arith.constant 0 : index
    %88 = vector.load %arg5[%c8, %c0_31] : memref<9x32xf32, #tpu.memory_space<vmem>>, vector<1x32xf32>
    %89 = vector.shape_cast %88 : vector<1x32xf32> to vector<1x1x32xf32>
    %90 = vector.broadcast %89 : vector<1x1x32xf32> to vector<8x16x32xf32>
    %91 = arith.mulf %87, %90 : vector<8x16x32xf32>
    %cst_32 = arith.constant dense<0.000000e+00> : vector<8x16xf32>
    %92 = vector.multi_reduction <add>, %91, %cst_32 [2] : vector<8x16x32xf32> to vector<8x16xf32>
    %93 = arith.addf %85, %92 : vector<8x16xf32>
    %c0_33 = arith.constant 0 : index
    %c0_34 = arith.constant 0 : index
    %94 = vector.load %arg6[%c0_33, %c0_34] : memref<1x1xf32, #tpu.memory_space<vmem>>, vector<1x1xf32>
    %95 = vector.broadcast %94 : vector<1x1xf32> to vector<8x16xf32>
    %96 = arith.addf %93, %95 : vector<8x16xf32>
    %97 = vector.shape_cast %96 : vector<8x16xf32> to vector<1x8x16xf32>
    %c0_35 = arith.constant 0 : index
    %c0_36 = arith.constant 0 : index
    %c0_37 = arith.constant 0 : index
    %98 = vector.load %arg7[%c0_35, %c0_36, %c0_37] : memref<1x8x16xf32, #tpu.memory_space<vmem>>, vector<1x8x16xf32>
    tpu.vector_store %arg7[%c0_35, %c0_36, %c0_37], %97 {strides = array<i32>} : memref<1x8x16xf32, #tpu.memory_space<vmem>>, vector<1x8x16xf32>,
    return
  }
  func.func @transform_0(%arg0: i32, %arg1: i32) -> (i32, i32, i32, i32) {
    %c8_i32 = arith.constant 8 : i32
    %0 = arith.muli %arg1, %c8_i32 : i32
    %c1_i32 = arith.constant 1 : i32
    %1 = arith.subi %0, %c1_i32 : i32
    %c0_i32 = arith.constant 0 : i32
    %2 = arith.maxsi %1, %c0_i32 : i32
    %c0_i32_0 = arith.constant 0 : i32
    %c0_i32_1 = arith.constant 0 : i32
    %c0_i32_2 = arith.constant 0 : i32
    return %arg0, %2, %c0_i32_0, %c0_i32_1 : i32, i32, i32, i32
  }
  func.func @transform_1(%arg0: i32, %arg1: i32) -> (i32, i32, i32, i32) {
    %c0_i32 = arith.constant 0 : i32
    %c0_i32_0 = arith.constant 0 : i32
    %c0_i32_1 = arith.constant 0 : i32
    return %arg0, %arg1, %c0_i32, %c0_i32_0 : i32, i32, i32, i32
  }
  func.func @transform_2(%arg0: i32, %arg1: i32) -> (i32, i32, i32, i32) {
    %c1_i32 = arith.constant 1 : i32
    %0 = arith.addi %arg1, %c1_i32 : i32
    %c8_i32 = arith.constant 8 : i32
    %1 = arith.muli %0, %c8_i32 : i32
    %c15_i32 = arith.constant 15 : i32
    %2 = arith.minsi %1, %c15_i32 : i32
    %c0_i32 = arith.constant 0 : i32
    %c0_i32_0 = arith.constant 0 : i32
    %c0_i32_1 = arith.constant 0 : i32
    return %arg0, %2, %c0_i32, %c0_i32_0 : i32, i32, i32, i32
  }
  func.func @transform_3(%arg0: i32, %arg1: i32) -> (i32, i32) {
    %c0_i32 = arith.constant 0 : i32
    %c0_i32_0 = arith.constant 0 : i32
    %c0_i32_1 = arith.constant 0 : i32
    return %c0_i32, %c0_i32_0 : i32, i32
  }
  func.func @transform_4(%arg0: i32, %arg1: i32) -> (i32, i32) {
    %c0_i32 = arith.constant 0 : i32
    %c0_i32_0 = arith.constant 0 : i32
    %c0_i32_1 = arith.constant 0 : i32
    return %c0_i32, %c0_i32_0 : i32, i32
  }
  func.func @transform_5(%arg0: i32, %arg1: i32) -> (i32, i32, i32) {
    %c0_i32 = arith.constant 0 : i32
    %c0_i32_0 = arith.constant 0 : i32
    return %arg0, %arg1, %c0_i32 : i32, i32, i32
  }
}

</mosaic_0001>

<bundles_post_ra>
// kernel: matchnet2_forward.7
= control target key start
LH: loop header
LB: loop body
LE: loop exit
PB: predicated region body
PF: predicated region fallthrough
CT: control target
= control target key end

     0   :  { %s2161_s9 = smov 0   ;;  %s2163_s10 = smov 0   ;;  %s3572_s0 = inlined_call_operand.vmem [shape: f32[2,16,16,16], index: 0, kind: input, shape index: {}]   ;;  %s3573_s1 = inlined_call_operand.vmem [shape: f32[2,16,16,16], index: 1, kind: input, shape index: {}]   ;;  %s3574_s2 = inlined_call_operand.vmem [shape: bf16[2,16,16,128], index: 2, kind: output, shape index: {}]  }
   0x1   :  { %s2165_s11 = smov 0   ;;  %s2167_s12 = smov 0  }
   0x2   :  { %s2169_s13 = smov 0  }
   0x3 LB: > { %s21_s14 = sadd.s32 1, %s2135_s11  ;;  %s24_s15 = sadd.s32 1, %s2139_s12  ;;  %s2143_s13 = sphi %s2169_s13, %s12_s13   ;;  %s2139_s12 = sphi %s2167_s12, %s3615_s12   ;;  %s2135_s11 = sphi %s2165_s11, %s3614_s11   ;;  %s2131_s10 = sphi %s2163_s10, %s3613_s10   ;;  %s2127_s9 = sphi %s2161_s9, %s3612_s9  }
   0x4   : > { %p22_p0 = scmp.ge.s32.totalorder %s21_s14, 2  ;;  %p1914_p1 = scmp.ge.s32.totalorder %s2143_s13, 1 }
   0x5   : > { %p152_p2 = scmp.lt.s32.totalorder %s2143_s13, 5 }
   0x6   : > { %s3617_s14 = smov (%p22_p0, %s21_s14), 0  ;;  %s3619_s15 = smov (!%p22_p0, %s24_s15), %s2139_s12 }
   0x7   : > { %p153_p3 = pnand %p1914_p1, %p152_p2  ;;  %p26_p4 = scmp.ge.s32.totalorder %s3619_s15, 2 }
   0x9   : > { %s3621_s15 = smov (%p26_p4, %s3619_s15), 0  ;;  %156 = sbr.rel (%p153_p3) target bundleno = 484 (0x1e4), region = 28 }
  0x10   : > { %s1915_s16 = sshll.u32 %s2127_s9, 3  ;;  %p195_p5 = scmp.lt.s32.totalorder %s2131_s10, 1  ;;  %vm275_vm0 = vcmask 1043456   ;;  %vm356_vm1 = vcmask 130048   ;;  %vm438_vm2 = vcmask 1040384   ;;  %vm575_vm3 = vcmask 1041408  }
  0x11   : > { %p197_p6 = scmp.lt.s32.totalorder %s1915_s16, 15  ;;  %vm712_vm4 = vcmask 1042432   ;;  %vm985_vm5 = vcmask 1044480   ;;  %vm1540_vm6 = vcmask 7168   ;;  %vm1122_vm7 = vcmask 1045504   ;;  %s2145_s27 = smov 9  }
  0x12   : > { %s3623_s10 = smov (!%p195_p5, %s2131_s10), 1  ;;  %vm1557_vm8 = vcmask 15360   ;;  %vm1259_vm9 = vcmask 1046528   ;;  %vm1574_vm10 = vcmask 23552   ;;  %vm1591_vm11 = vcmask 31744  }
  0x13   : > { %s3625_s16 = smov (!%p197_p6, %s1915_s16), 15  ;;  %s1917_s17 = sshll.u32 %s3623_s10, 5  ;;  %vm1608_vm12 = vcmask 39936   ;;  %vm1625_vm13 = vcmask 48128   ;;  %vm1642_vm14 = vcmask 56320   ;;  %vm1659_vm15 = vcmask 64512  }
  0x14   : > { %s1916_s18 = sshll.u32 %s3625_s16, 1 }
  0x15   : > { %s2191_s19 = sadd.s32 %s1917_s17, %s1916_s18 }
  0x16   : > { %s1918_s20 = sshll.u32 %s2191_s19, 3  ;;  %s1926_s28 = sshll.u32 %s2191_s19, 2 }
  0x17   : > { %s2197_s23 = scalar_lea.vmem %s3572_s0, %s1918_s20  ;;  %s2202_s26 = scalar_lea.vmem %s3573_s1, %s1918_s20 }
  0x18   : > { %v2205_v0 = vld [vmem:[%s2202_s26 + $0x10] sm:$0xff]  ;;  %v246_v1 = vld [vmem:[%s2202_s26 + $0x18] sm:$0xff]  ;;  %v2213_v5 = vld [vmem:[%s2202_s26] sm:$0xff]  ;;  %s3498_s3 = scalar_lea.vmem %s3574_s2, %s1926_s28 }
  0x19   : > { %v2209_v2 = vld [vmem:[%s2197_s23 + $0x10] sm:$0xff]  ;;  %v279_v3 = vrot.slane %v2205_v0, 4  ;;  %v280_v4 = vrot.slane %v246_v1, 4  ;;  %v244_v6 = vld [vmem:[%s2202_s26 + $0x8] sm:$0xff]  ;;  %v2217_v7 = vld [vmem:[%s2197_s23] sm:$0xff]  ;;  %v276_v8 = vrot.slane %v2213_v5, 4 }
  0x1a   : > { %v277_v9 = vrot.slane %v244_v6, 4  ;;  %v2221_v10 = vld [vmem:[%s2197_s23 + $0x18] sm:$0xff]  ;;  %v2224_v11 = vld [vmem:[%s2197_s23 + $0x8] sm:$0xff]  ;;  %v2236_v15 = vld [vmem:[%s2202_s26 + $0x20] sm:$0xff] }
  0x1b   : > { %v2229_v12 = vsel %vm275_vm0, %v279_v3, %v280_v4  ;;  %v2232_v13 = vsel %vm275_vm0, %v280_v4, 0.0  ;;  %v248_v14 = vld [vmem:[%s2202_s26 + $0x28] sm:$0xff]  ;;  %v250_v20 = vld [vmem:[%s2202_s26 + $0x38] sm:$0xff]  ;;  %v2259_v25 = vld [vmem:[%s2197_s23 + $0x20] sm:$0xff]  ;;  %v282_v26 = vrot.slane %v2236_v15, 4 }
  0x1c   : > { %v342_v16 = vmul.f32 %v2229_v12, %v2209_v2  ;;  %v2243_v17 = vsel %vm275_vm0, %v276_v8, %v277_v9  ;;  %v343_v18 = vmul.f32 %v2232_v13, %v2221_v10  ;;  %v2248_v19 = vsel %vm275_vm0, %v277_v9, 0.0  ;;  %v2256_v23 = vld [vmem:[%s2197_s23 + $0x28] sm:$0xff]  ;;  %v2263_v27 = vld [vmem:[%s2202_s26 + $0x30] sm:$0xff]  ;;  %v2269_v32 = vld [vmem:[%s2202_s26 + $0x40] sm:$0xff] }
  0x1d   : > { %v340_v21 = vmul.f32 %v2243_v17, %v2217_v7  ;;  %v341_v22 = vmul.f32 %v2248_v19, %v2224_v11  ;;  %v283_v24 = vrot.slane %v248_v14, 4  ;;  %v286_v29 = vrot.slane %v250_v20, 4  ;;  %v252_v31 = vld [vmem:[%s2202_s26 + $0x48] sm:$0xff]  ;;  %v2287_v40 = vld [vmem:[%s2197_s23 + $0x38] sm:$0xff]  ;;  %v2293_v42 = vld [vmem:[%s2197_s23 + $0x30] sm:$0xff] }
  0x1e   : > { %v363_v28 = vsel %vm356_vm1, %v342_v16, 0.0  ;;  %v285_v30 = vrot.slane %v2263_v27, 4  ;;  %v366_v36 = vsel %vm356_vm1, %v343_v18, 0.0  ;;  %v289_v44 = vrot.slane %v252_v31, 4  ;;  %v254_v46 = vld [vmem:[%s2202_s26 + $0x58] sm:$0xff]  ;;  %v2303_v47 = vld [vmem:[%s2202_s26 + $0x50] sm:$0xff] }
  0x1f   : > { %364 = vadd.xlane.f32.xlu1 %v363_v28  ;;  %v357_v33 = vsel %vm356_vm1, %v340_v21, 0.0  ;;  %v2273_v34 = vsel %vm275_vm0, %v283_v24, 0.0  ;;  %v2278_v35 = vsel %vm275_vm0, %v282_v26, %v283_v24  ;;  %v360_v37 = vsel %vm356_vm1, %v341_v22, 0.0  ;;  %v2312_v52 = vld [vmem:[%s2197_s23 + $0x48] sm:$0xff]  ;;  %v2318_v54 = vld [vmem:[%s2197_s23 + $0x40] sm:$0xff]  ;;  %v2337_v1 = vld [vmem:[%s2197_s23 + $0x58] sm:$0xff] }
  0x20   : > { %358 = vadd.xlane.f32.xlu0 %v357_v33  ;;  %v345_v38 = vmul.f32 %v2273_v34, %v2256_v23  ;;  %v344_v39 = vmul.f32 %v2278_v35, %v2259_v25  ;;  %v2290_v41 = vsel %vm275_vm0, %v286_v29, 0.0  ;;  %v2298_v43 = vsel %vm275_vm0, %v285_v30, %v286_v29  ;;  %v256_v58 = vld [vmem:[%s2202_s26 + $0x68] sm:$0xff]  ;;  %v2328_v59 = vld [vmem:[%s2202_s26 + $0x60] sm:$0xff]  ;;  %v2343_v6 = vld [vmem:[%s2197_s23 + $0x50] sm:$0xff] }
  0x21   : > { %v288_v45 = vrot.slane %v2269_v32, 4  ;;  %v347_v50 = vmul.f32 %v2290_v41, %v2287_v40  ;;  %v346_v51 = vmul.f32 %v2298_v43, %v2293_v42  ;;  %v2315_v53 = vsel %vm275_vm0, %v289_v44, 0.0  ;;  %v258_v18 = vld [vmem:[%s2202_s26 + $0x78] sm:$0xff]  ;;  %v2353_v20 = vld [vmem:[%s2202_s26 + $0x70] sm:$0xff]  ;;  %v2362_v31 = vld [vmem:[%s2197_s23 + $0x68] sm:$0xff] }
  0x22   : > { %v372_v48 = vsel %vm356_vm1, %v345_v38, 0.0  ;;  %v369_v49 = vsel %vm356_vm1, %v344_v39, 0.0  ;;  %3580 = vst [vmem:[#allocation2_spill] sm:$0xff] %v2315_v53  ;;  %v292_v56 = vrot.slane %v254_v46, 4  ;;  %v291_v57 = vrot.slane %v2303_v47, 4  ;;  %v2394_v5 = vld [vmem:[%s2197_s23 + $0x70] sm:$0xff] }
  0x23   : > { %367 = vadd.xlane.f32.xlu1 %v366_v36  ;;  %v2323_v55 = vsel %vm275_vm0, %v288_v45, %v289_v44  ;;  %v378_v60 = vsel %vm356_vm1, %v347_v50, 0.0  ;;  %v375_v61 = vsel %vm356_vm1, %v346_v51, 0.0  ;;  %v349_v62 = vmul.f32 %v2315_v53, %v2312_v52  ;;  %v2368_v36 = vld [vmem:[%s2197_s23 + $0x60] sm:$0xff] }
  0x24   : > { %361 = vadd.xlane.f32.xlu0 %v360_v37  ;;  %v348_v63 = vmul.f32 %v2323_v55, %v2318_v54  ;;  %v2340_v4 = vsel %vm275_vm0, %v292_v56, 0.0  ;;  %v2348_v9 = vsel %vm275_vm0, %v291_v57, %v292_v56  ;;  %v295_v14 = vrot.slane %v256_v58, 4 }
  0x25   : > { %3581 = vst [vmem:[#allocation3_spill] sm:$0xff] %v2340_v4  ;;  %v294_v16 = vrot.slane %v2328_v59, 4  ;;  %v384_v21 = vsel %vm356_vm1, %v349_v62, 0.0  ;;  %v351_v22 = vmul.f32 %v2340_v4, %v2337_v1  ;;  %v350_v24 = vmul.f32 %v2348_v9, %v2343_v6 }
  0x26   : > { %v298_v28 = vrot.slane %v258_v18, 4  ;;  %v381_v29 = vsel %vm356_vm1, %v348_v63, 0.0  ;;  %v2365_v33 = vsel %vm275_vm0, %v295_v14, 0.0  ;;  %v297_v38 = vrot.slane %v2353_v20, 4 }
  0x27   : > { %373 = vadd.xlane.f32.xlu1 %v372_v48  ;;  %3582 = vst [vmem:[#allocation4_spill] sm:$0xff] %v2365_v33  ;;  %v2373_v37 = vsel %vm275_vm0, %v294_v16, %v295_v14  ;;  %v2379_v39 = vsel %vm275_vm0, 0.0, %v276_v8  ;;  %v390_v44 = vsel %vm356_vm1, %v351_v22, 0.0  ;;  %v353_v46 = vmul.f32 %v2365_v33, %v2362_v31 }
  0x28   : > { %370 = vadd.xlane.f32.xlu0 %v369_v49  ;;  %v352_v48 = vmul.f32 %v2373_v37, %v2368_v36  ;;  %v2387_v49 = vld [vmem:[%s2197_s23 + $0x78] sm:$0xff]  ;;  %v2390_v50 = vsel %vm275_vm0, %v298_v28, 0.0  ;;  %v387_v51 = vsel %vm356_vm1, %v350_v24, 0.0  ;;  %v2399_v8 = vsel %vm275_vm0, %v297_v38, %v298_v28 }
  0x29   : > { %v440_v56 = vrot.slane %v2243_v17, 7  ;;  %v442_v58 = vrot.slane %v2248_v19, 7  ;;  %v355_v62 = vmul.f32 %v2390_v50, %v2387_v49  ;;  %v396_v63 = vsel %vm356_vm1, %v353_v46, 0.0 }
  0x2a   : > { %v393_v14 = vsel %vm356_vm1, %v352_v48, 0.0  ;;  %v354_v18 = vmul.f32 %v2399_v8, %v2394_v5  ;;  %v445_v22 = vrot.slane %v2229_v12, 7  ;;  %v447_v0 = vrot.slane %v2232_v13, 7 }
  0x2b   : > { %379 = vadd.xlane.f32.xlu1 %v378_v60  ;;  %v439_v60 = vrot.slane %v2379_v39, 7  ;;  %v2423_v28 = vsel %vm275_vm0, 0.0, %v282_v26  ;;  %v450_v48 = vrot.slane %v2278_v35, 7  ;;  %v457_v27 = vrot.slane %v2290_v41, 7 }
  0x2c   : > { %376 = vadd.xlane.f32.xlu0 %v375_v61  ;;  %v2407_v61 = vsel %vm275_vm0, 0.0, %v279_v3  ;;  %v449_v26 = vrot.slane %v2423_v28, 7  ;;  %v467_v47 = vrot.slane %v2340_v4, 7 }
  0x2d   : > { %v444_v3 = vrot.slane %v2407_v61, 7  ;;  %v441_v24 = vsel %vm438_vm2, %v439_v60, %v440_v56  ;;  %v2437_v60 = vsel %vm275_vm0, 0.0, %v285_v30 }
  0x2e   : > { %v454_v30 = vrot.slane %v2437_v60, 7 }
  0x2f   : > { %385 = vadd.xlane.f32.xlu1 %v384_v21  ;;  %v443_v21 = vsel %vm438_vm2, %v440_v56, %v442_v58  ;;  %v495_v58 = vmul.f32 %v441_v24, %v2217_v7  ;;  %v448_v56 = vsel %vm438_vm2, %v445_v22, %v447_v0  ;;  %v446_v15 = vsel %vm438_vm2, %v444_v3, %v445_v22 }
  0x30   : > { %382 = vadd.xlane.f32.xlu0 %v381_v29  ;;  %v402_v29 = vsel %vm356_vm1, %v355_v62, 0.0  ;;  %v496_v46 = vmul.f32 %v443_v21, %v2224_v11  ;;  %v455_v62 = vrot.slane %v2298_v43, 7  ;;  %v451_v0 = vsel %vm438_vm2, %v449_v26, %v450_v48 }
  0x31   : > { %v511_v22 = vsel %vm356_vm1, %v495_v58, 0.0  ;;  %v2451_v3 = vsel %vm275_vm0, 0.0, %v288_v45 }
  0x32   : > { %v458_v58 = vsel %vm438_vm2, %v455_v62, %v457_v27  ;;  %v456_v32 = vsel %vm438_vm2, %v454_v30, %v455_v62  ;;  %v459_v45 = vrot.slane %v2451_v3, 7 }
  0x33   : > { %391 = vadd.xlane.f32.xlu1 %v390_v44  ;;  %v399_v44 = vsel %vm356_vm1, %v354_v18, 0.0  ;;  %v497_v18 = vmul.f32 %v446_v15, %v2209_v2 }
  0x34   : > { %388 = vadd.xlane.f32.xlu0 %v387_v51  ;;  %v452_v51 = vrot.slane %v2273_v34, 7 }
  0x36   : > { %v453_v21 = vsel %vm438_vm2, %v450_v48, %v452_v51  ;;  %v462_v48 = vrot.slane %v2315_v53, 7  ;;  %v517_v51 = vsel %vm356_vm1, %v497_v18, 0.0 }
  0x37   : > { %397 = vadd.xlane.f32.xlu1 %v396_v63  ;;  %v514_v63 = vsel %vm356_vm1, %v496_v46, 0.0  ;;  %v500_v24 = vmul.f32 %v453_v21, %v2256_v23  ;;  %v460_v46 = vrot.slane %v2323_v55, 7  ;;  %v465_v21 = vrot.slane %v2348_v9, 7 }
  0x38   : > { %394 = vadd.xlane.f32.xlu0 %v393_v14  ;;  %v498_v14 = vmul.f32 %v448_v56, %v2221_v10  ;;  %v2465_v56 = vsel %vm275_vm0, 0.0, %v291_v57 }
  0x39   : > { %3583 = vst [vmem:[#allocation5_spill] sm:$0xff] %v2465_v56  ;;  %v526_v15 = vsel %vm356_vm1, %v500_v24, 0.0  ;;  %v463_v18 = vsel %vm438_vm2, %v460_v46, %v462_v48  ;;  %v461_v62 = vsel %vm438_vm2, %v459_v45, %v460_v46  ;;  %v464_v57 = vrot.slane %v2465_v56, 7 }
  0x3a   : > { %v503_v24 = vmul.f32 %v461_v62, %v2318_v54  ;;  %v470_v46 = vrot.slane %v2373_v37, 7  ;;  %v472_v48 = vrot.slane %v2365_v33, 7  ;;  %v475_v45 = vrot.slane %v2399_v8, 7 }
  0x3b   : > { %403 = vadd.xlane.f32.xlu1 %v402_v29  ;;  %v520_v29 = vsel %vm356_vm1, %v498_v14, 0.0  ;;  %v501_v14 = vmul.f32 %v456_v32, %v2293_v42 }
  0x3c   : > { %400 = vadd.xlane.f32.xlu0 %v399_v44  ;;  %v499_v44 = vmul.f32 %v451_v0, %v2259_v25  ;;  %v2480_v0 = vsel %vm275_vm0, 0.0, %v294_v16 }
  0x3d   : > { %v529_v30 = vsel %vm356_vm1, %v501_v14, 0.0  ;;  %v469_v59 = vrot.slane %v2480_v0, 7 }
  0x3e   : > { %v523_v26 = vsel %vm356_vm1, %v499_v44, 0.0  ;;  %v466_v44 = vsel %vm438_vm2, %v464_v57, %v465_v21  ;;  %v577_v57 = vrot.slane %v2243_v17, 6 }
  0x3f   : > { %515 = vadd.xlane.f32.xlu1 %v514_v63  ;;  %v502_v63 = vmul.f32 %v458_v58, %v2287_v40  ;;  %v505_v32 = vmul.f32 %v466_v44, %v2343_v6  ;;  %v471_v14 = vsel %vm438_vm2, %v469_v59, %v470_v46  ;;  %v582_v44 = vrot.slane %v2229_v12, 6 }
  0x40   : > { %512 = vadd.xlane.f32.xlu0 %v511_v22  ;;  %v504_v22 = vmul.f32 %v463_v18, %v2312_v52 }
  0x41   : > { %v532_v27 = vsel %vm356_vm1, %v502_v63, 0.0  ;;  %v473_v63 = vsel %vm438_vm2, %v470_v46, %v472_v48  ;;  %v541_v18 = vsel %vm356_vm1, %v505_v32, 0.0  ;;  %v584_v46 = vrot.slane %v2232_v13, 6 }
  0x42   : > { %v538_v16 = vsel %vm356_vm1, %v504_v22, 0.0  ;;  %v508_v62 = vmul.f32 %v473_v63, %v2362_v31  ;;  %v579_v22 = vrot.slane %v2248_v19, 6  ;;  %v581_v48 = vrot.slane %v2407_v61, 6 }
  0x43   : > { %521 = vadd.xlane.f32.xlu1 %v520_v29  ;;  %v468_v29 = vsel %vm438_vm2, %v465_v21, %v467_v47  ;;  %v507_v47 = vmul.f32 %v471_v14, %v2368_v36  ;;  %v585_v63 = vsel %vm575_vm3, %v582_v44, %v584_v46 }
  0x44   : > { %518 = vadd.xlane.f32.xlu0 %v517_v51  ;;  %v2494_v51 = vsel %vm275_vm0, 0.0, %v297_v38  ;;  %v506_v58 = vmul.f32 %v468_v29, %v2337_v1  ;;  %v550_v29 = vsel %vm356_vm1, %v508_v62, 0.0  ;;  %v583_v14 = vsel %vm575_vm3, %v581_v48, %v582_v44 }
  0x45   : > { %v474_v20 = vrot.slane %v2494_v51, 7  ;;  %v547_v59 = vsel %vm356_vm1, %v507_v47, 0.0  ;;  %v586_v62 = vrot.slane %v2423_v28, 6  ;;  %v591_v44 = vrot.slane %v2437_v60, 6 }
  0x46   : > { %v544_v38 = vsel %vm356_vm1, %v506_v58, 0.0  ;;  %v580_v58 = vsel %vm575_vm3, %v577_v57, %v579_v22  ;;  %v634_v22 = vmul.f32 %v583_v14, %v2209_v2 }
  0x47   : > { %527 = vadd.xlane.f32.xlu1 %v526_v15  ;;  %v477_v15 = vrot.slane %v2390_v50, 7 }
  0x48   : > { %524 = vadd.xlane.f32.xlu0 %v523_v26  ;;  %v535_v26 = vsel %vm356_vm1, %v503_v24, 0.0  ;;  %v654_v48 = vsel %vm356_vm1, %v634_v22, 0.0 }
  0x49   : > { %v478_v21 = vsel %vm438_vm2, %v475_v45, %v477_v15  ;;  %v633_v15 = vmul.f32 %v580_v58, %v2224_v11 }
  0x4a   : > { %v510_v24 = vmul.f32 %v478_v21, %v2387_v49 }
  0x4b   : > { %533 = vadd.xlane.f32.xlu1 %v532_v27  ;;  %v576_v27 = vrot.slane %v2379_v39, 6  ;;  %v651_v21 = vsel %vm356_vm1, %v633_v15, 0.0  ;;  %v596_v15 = vrot.slane %v2451_v3, 6 }
  0x4c   : > { %530 = vadd.xlane.f32.xlu0 %v529_v30  ;;  %v476_v30 = vsel %vm438_vm2, %v474_v20, %v475_v45  ;;  %v556_v45 = vsel %vm356_vm1, %v510_v24, 0.0  ;;  %v592_v24 = vrot.slane %v2298_v43, 6 }
  0x4d   : > { %v578_v32 = vsel %vm575_vm3, %v576_v27, %v577_v57  ;;  %v635_v57 = vmul.f32 %v585_v63, %v2221_v10 }
  0x4f   : > { %539 = vadd.xlane.f32.xlu1 %v538_v16  ;;  %v509_v16 = vmul.f32 %v476_v30, %v2394_v5  ;;  %v657_v46 = vsel %vm356_vm1, %v635_v57, 0.0  ;;  %v601_v57 = vrot.slane %v2465_v56, 6 }
  0x50   : > { %536 = vadd.xlane.f32.xlu0 %v535_v26  ;;  %v632_v26 = vmul.f32 %v578_v32, %v2217_v7  ;;  %v597_v32 = vrot.slane %v2323_v55, 6 }
  0x51   : > { %v553_v20 = vsel %vm356_vm1, %v509_v16, 0.0 }
  0x52   : > { %v648_v47 = vsel %vm356_vm1, %v632_v26, 0.0  ;;  %v593_v26 = vsel %vm575_vm3, %v591_v44, %v592_v24  ;;  %v607_v44 = vrot.slane %v2373_v37, 6 }
  0x53   : > { %545 = vadd.xlane.f32.xlu1 %v544_v38  ;;  %v587_v38 = vrot.slane %v2278_v35, 6 }
  0x54   : > { %542 = vadd.xlane.f32.xlu0 %v541_v18  ;;  %v589_v18 = vrot.slane %v2273_v34, 6 }
  0x55   : > { %v588_v30 = vsel %vm575_vm3, %v586_v62, %v587_v38 }
  0x56   : > { %v590_v27 = vsel %vm575_vm3, %v587_v38, %v589_v18  ;;  %v636_v16 = vmul.f32 %v588_v30, %v2259_v25  ;;  %v602_v38 = vrot.slane %v2348_v9, 6  ;;  %v638_v18 = vmul.f32 %v593_v26, %v2293_v42 }
  0x57   : > { %551 = vadd.xlane.f32.xlu1 %v550_v29  ;;  %v594_v29 = vrot.slane %v2290_v41, 6  ;;  %v612_v26 = vrot.slane %v2399_v8, 6 }
  0x58   : > { %548 = vadd.xlane.f32.xlu0 %v547_v59  ;;  %v637_v59 = vmul.f32 %v590_v27, %v2256_v23  ;;  %v660_v14 = vsel %vm356_vm1, %v636_v16, 0.0 }
  0x59   : > { %v595_v58 = vsel %vm575_vm3, %v592_v24, %v594_v29  ;;  %v666_v24 = vsel %vm356_vm1, %v638_v18, 0.0 }
  0x5a   : > { %v663_v63 = vsel %vm356_vm1, %v637_v59, 0.0  ;;  %v606_v59 = vrot.slane %v2480_v0, 6 }
  0x5b   : > { %557 = vadd.xlane.f32.xlu1 %v556_v45  ;;  %v599_v45 = vrot.slane %v2315_v53, 6 }
  0x5c   : > { %554 = vadd.xlane.f32.xlu0 %v553_v20  ;;  %v639_v20 = vmul.f32 %v595_v58, %v2287_v40 }
  0x5d   : > { %v600_v62 = vsel %vm575_vm3, %v597_v32, %v599_v45 }
  0x5e   : > { %v669_v22 = vsel %vm356_vm1, %v639_v20, 0.0  ;;  %v641_v27 = vmul.f32 %v600_v62, %v2312_v52  ;;  %v611_v20 = vrot.slane %v2494_v51, 6  ;;  %v714_v62 = vrot.slane %v2243_v17, 5 }
  0x5f   : > { %652 = vadd.xlane.f32.xlu1 %v651_v21  ;;  %v598_v21 = vsel %vm575_vm3, %v596_v15, %v597_v32 }
  0x60   : > { %649 = vadd.xlane.f32.xlu0 %v648_v47  ;;  %v604_v47 = vrot.slane %v2340_v4, 6  ;;  %v640_v30 = vmul.f32 %v598_v21, %v2318_v54  ;;  %v675_v16 = vsel %vm356_vm1, %v641_v27, 0.0  ;;  %v716_v21 = vrot.slane %v2248_v19, 5 }
  0x61   : > { %v613_v27 = vsel %vm575_vm3, %v611_v20, %v612_v26 }
  0x62   : > { %v605_v29 = vsel %vm575_vm3, %v602_v38, %v604_v47  ;;  %v672_v58 = vsel %vm356_vm1, %v640_v30, 0.0  ;;  %v713_v30 = vrot.slane %v2379_v39, 5 }
  0x63   : > { %658 = vadd.xlane.f32.xlu1 %v657_v46  ;;  %v609_v46 = vrot.slane %v2365_v33, 6  ;;  %v643_v32 = vmul.f32 %v605_v29, %v2337_v1 }
  0x64   : > { %655 = vadd.xlane.f32.xlu0 %v654_v48  ;;  %v603_v48 = vsel %vm575_vm3, %v601_v57, %v602_v38 }
  0x65   : > { %v642_v45 = vmul.f32 %v603_v48, %v2343_v6  ;;  %v610_v15 = vsel %vm575_vm3, %v607_v44, %v609_v46  ;;  %v681_v38 = vsel %vm356_vm1, %v643_v32, 0.0  ;;  %v646_v48 = vmul.f32 %v613_v27, %v2394_v5 }
  0x66   : > { %v645_v18 = vmul.f32 %v610_v15, %v2362_v31  ;;  %v718_v32 = vrot.slane %v2407_v61, 5  ;;  %v731_v27 = vrot.slane %v2290_v41, 5 }
  0x67   : > { %664 = vadd.xlane.f32.xlu1 %v663_v63  ;;  %v614_v63 = vrot.slane %v2390_v50, 6  ;;  %v678_v47 = vsel %vm356_vm1, %v642_v45, 0.0 }
  0x68   : > { %661 = vadd.xlane.f32.xlu0 %v660_v14  ;;  %v608_v14 = vsel %vm575_vm3, %v606_v59, %v607_v44  ;;  %v717_v44 = vsel %vm712_vm4, %v714_v62, %v716_v21  ;;  %v719_v59 = vrot.slane %v2229_v12, 5 }
  0x69   : > { %v644_v57 = vmul.f32 %v608_v14, %v2368_v36  ;;  %v770_v45 = vmul.f32 %v717_v44, %v2224_v11  ;;  %v690_v14 = vsel %vm356_vm1, %v646_v48, 0.0  ;;  %v728_v44 = vrot.slane %v2437_v60, 5 }
  0x6b   : > { %670 = vadd.xlane.f32.xlu1 %v669_v22  ;;  %v615_v22 = vsel %vm575_vm3, %v612_v26, %v614_v63  ;;  %v684_v46 = vsel %vm356_vm1, %v644_v57, 0.0  ;;  %v724_v26 = vrot.slane %v2278_v35, 5  ;;  %v726_v63 = vrot.slane %v2273_v34, 5 }
  0x6c   : > { %667 = vadd.xlane.f32.xlu0 %v666_v24  ;;  %v687_v24 = vsel %vm356_vm1, %v645_v18, 0.0  ;;  %v647_v29 = vmul.f32 %v615_v22, %v2387_v49  ;;  %v720_v18 = vsel %vm712_vm4, %v718_v32, %v719_v59  ;;  %v788_v21 = vsel %vm356_vm1, %v770_v45, 0.0 }
  0x6d   : > { %v727_v57 = vsel %vm712_vm4, %v724_v26, %v726_v63  ;;  %v729_v22 = vrot.slane %v2298_v43, 5 }
  0x6e   : > { %v693_v15 = vsel %vm356_vm1, %v647_v29, 0.0 }
  0x6f   : > { %676 = vadd.xlane.f32.xlu1 %v675_v16  ;;  %v721_v16 = vrot.slane %v2232_v13, 5 }
  0x70   : > { %673 = vadd.xlane.f32.xlu0 %v672_v58  ;;  %v715_v58 = vsel %vm712_vm4, %v713_v30, %v714_v62  ;;  %v723_v62 = vrot.slane %v2423_v28, 5 }
  0x71   : > { %v769_v20 = vmul.f32 %v715_v58, %v2217_v7  ;;  %v736_v58 = vrot.slane %v2315_v53, 5 }
  0x72   : > { %v725_v29 = vsel %vm712_vm4, %v723_v62, %v724_v26  ;;  %v730_v26 = vsel %vm712_vm4, %v728_v44, %v729_v22  ;;  %v746_v44 = vrot.slane %v2365_v33, 5 }
  0x73   : > { %682 = vadd.xlane.f32.xlu1 %v681_v38  ;;  %v722_v38 = vsel %vm712_vm4, %v719_v59, %v721_v16  ;;  %v785_v30 = vsel %vm356_vm1, %v769_v20, 0.0  ;;  %v732_v59 = vsel %vm712_vm4, %v729_v22, %v731_v27  ;;  %v734_v16 = vrot.slane %v2323_v55, 5 }
  0x74   : > { %679 = vadd.xlane.f32.xlu0 %v678_v47  ;;  %v772_v47 = vmul.f32 %v722_v38, %v2221_v10  ;;  %v773_v45 = vmul.f32 %v725_v29, %v2259_v25  ;;  %v776_v63 = vmul.f32 %v732_v59, %v2287_v40  ;;  %v739_v38 = vrot.slane %v2348_v9, 5 }
  0x75   : > { %v737_v20 = vsel %vm712_vm4, %v734_v16, %v736_v58  ;;  %v744_v29 = vrot.slane %v2373_v37, 5  ;;  %v743_v59 = vrot.slane %v2480_v0, 5 }
  0x76   : > { %v794_v48 = vsel %vm356_vm1, %v772_v47, 0.0  ;;  %v797_v62 = vsel %vm356_vm1, %v773_v45, 0.0  ;;  %v806_v22 = vsel %vm356_vm1, %v776_v63, 0.0  ;;  %v778_v27 = vmul.f32 %v737_v20, %v2312_v52 }
  0x77   : > { %688 = vadd.xlane.f32.xlu1 %v687_v24  ;;  %v771_v24 = vmul.f32 %v720_v18, %v2209_v2  ;;  %v741_v18 = vrot.slane %v2340_v4, 5  ;;  %v749_v63 = vrot.slane %v2399_v8, 5  ;;  %v748_v20 = vrot.slane %v2494_v51, 5 }
  0x78   : > { %685 = vadd.xlane.f32.xlu0 %v684_v46  ;;  %v774_v46 = vmul.f32 %v727_v57, %v2256_v23  ;;  %v738_v57 = vrot.slane %v2465_v56, 5  ;;  %v812_v58 = vsel %vm356_vm1, %v778_v27, 0.0 }
  0x79   : > { %v791_v32 = vsel %vm356_vm1, %v771_v24, 0.0  ;;  %v742_v24 = vsel %vm712_vm4, %v739_v38, %v741_v18  ;;  %v750_v27 = vsel %vm712_vm4, %v748_v20, %v749_v63 }
  0x7b   : > { %694 = vadd.xlane.f32.xlu1 %v693_v15  ;;  %v733_v15 = vrot.slane %v2451_v3, 5 }
  0x7c   : > { %691 = vadd.xlane.f32.xlu0 %v690_v14  ;;  %v800_v14 = vsel %vm356_vm1, %v774_v46, 0.0 }
  0x7d   : > { %v735_v47 = vsel %vm712_vm4, %v733_v15, %v734_v16  ;;  %v780_v16 = vmul.f32 %v742_v24, %v2337_v1  ;;  %v747_v15 = vsel %vm712_vm4, %v744_v29, %v746_v44 }
  0x7f   : > { %789 = vadd.xlane.f32.xlu1 %v788_v21  ;;  %v775_v21 = vmul.f32 %v730_v26, %v2293_v42  ;;  %v745_v26 = vsel %vm712_vm4, %v743_v59, %v744_v29  ;;  %v818_v18 = vsel %vm356_vm1, %v780_v16, 0.0  ;;  %v855_v16 = vrot.slane %v2229_v12, 4 }
  0x80   : > { %786 = vadd.xlane.f32.xlu0 %v785_v30  ;;  %v777_v30 = vmul.f32 %v735_v47, %v2318_v54  ;;  %v852_v47 = vrot.slane %v2248_v19, 4 }
  0x81   : > { %v803_v46 = vsel %vm356_vm1, %v775_v21, 0.0  ;;  %v850_v21 = vrot.slane %v2243_v17, 4 }
  0x83   : > { %795 = vadd.xlane.f32.xlu1 %v794_v48  ;;  %v740_v48 = vsel %vm712_vm4, %v738_v57, %v739_v38  ;;  %v782_v38 = vmul.f32 %v747_v15, %v2362_v31 }
  0x84   : > { %792 = vadd.xlane.f32.xlu0 %v791_v32  ;;  %v809_v32 = vsel %vm356_vm1, %v777_v30, 0.0  ;;  %v779_v45 = vmul.f32 %v740_v48, %v2343_v6  ;;  %v849_v30 = vrot.slane %v2379_v39, 4  ;;  %v853_v48 = vsel %vm275_vm0, %v850_v21, %v852_v47 }
  0x85   : > { %v824_v24 = vsel %vm356_vm1, %v782_v38, 0.0 }
  0x86   : > { %v815_v57 = vsel %vm356_vm1, %v779_v45, 0.0  ;;  %v851_v59 = vsel %vm275_vm0, %v849_v30, %v850_v21  ;;  %v906_v45 = vmul.f32 %v853_v48, %v2224_v11 }
  0x87   : > { %801 = vadd.xlane.f32.xlu1 %v800_v14  ;;  %v751_v14 = vrot.slane %v2390_v50, 5 }
  0x88   : > { %798 = vadd.xlane.f32.xlu0 %v797_v62  ;;  %v781_v62 = vmul.f32 %v745_v26, %v2368_v36  ;;  %v924_v21 = vsel %vm356_vm1, %v906_v45, 0.0  ;;  %v870_v45 = vrot.slane %v2323_v55, 4 }
  0x8a   : > { %v821_v29 = vsel %vm356_vm1, %v781_v62, 0.0  ;;  %v859_v62 = vrot.slane %v2423_v28, 4 }
  0x8b   : > { %807 = vadd.xlane.f32.xlu1 %v806_v22  ;;  %v752_v22 = vsel %vm712_vm4, %v749_v63, %v751_v14  ;;  %v905_v63 = vmul.f32 %v851_v59, %v2217_v7  ;;  %v860_v14 = vrot.slane %v2278_v35, 4 }
  0x8c   : > { %804 = vadd.xlane.f32.xlu0 %v803_v46  ;;  %v784_v44 = vmul.f32 %v752_v22, %v2387_v49  ;;  %v783_v46 = vmul.f32 %v750_v27, %v2394_v5  ;;  %v865_v27 = vrot.slane %v2298_v43, 4 }
  0x8d   : > { %v921_v47 = vsel %vm356_vm1, %v905_v63, 0.0 }
  0x8e   : > { %v830_v15 = vsel %vm356_vm1, %v784_v44, 0.0  ;;  %v827_v26 = vsel %vm356_vm1, %v783_v46, 0.0  ;;  %v864_v44 = vrot.slane %v2437_v60, 4 }
  0x8f   : > { %813 = vadd.xlane.f32.xlu1 %v812_v58  ;;  %v857_v58 = vrot.slane %v2232_v13, 4 }
  0x90   : > { %810 = vadd.xlane.f32.xlu0 %v809_v32  ;;  %v854_v32 = vrot.slane %v2407_v61, 4 }
  0x91   : > { %v858_v20 = vsel %vm275_vm0, %v855_v16, %v857_v58 }
  0x92   : > { %v856_v38 = vsel %vm275_vm0, %v854_v32, %v855_v16  ;;  %v866_v32 = vsel %vm275_vm0, %v864_v44, %v865_v27 }
  0x93   : > { %819 = vadd.xlane.f32.xlu1 %v818_v18  ;;  %v862_v18 = vrot.slane %v2273_v34, 4  ;;  %v907_v22 = vmul.f32 %v856_v38, %v2209_v2  ;;  %v911_v38 = vmul.f32 %v866_v32, %v2293_v42 }
  0x94   : > { %816 = vadd.xlane.f32.xlu0 %v815_v57  ;;  %v908_v57 = vmul.f32 %v858_v20, %v2221_v10 }
  0x95   : > { %v863_v30 = vsel %vm275_vm0, %v860_v14, %v862_v18  ;;  %v927_v48 = vsel %vm356_vm1, %v907_v22, 0.0 }
  0x96   : > { %v930_v46 = vsel %vm356_vm1, %v908_v57, 0.0  ;;  %v910_v59 = vmul.f32 %v863_v30, %v2256_v23 }
  0x97   : > { %825 = vadd.xlane.f32.xlu1 %v824_v24  ;;  %v861_v24 = vsel %vm275_vm0, %v859_v62, %v860_v14  ;;  %v875_v62 = vrot.slane %v2348_v9, 4 }
  0x98   : > { %822 = vadd.xlane.f32.xlu0 %v821_v29  ;;  %v867_v29 = vrot.slane %v2290_v41, 4  ;;  %v909_v16 = vmul.f32 %v861_v24, %v2259_v25  ;;  %v936_v63 = vsel %vm356_vm1, %v910_v59, 0.0  ;;  %v880_v24 = vrot.slane %v2373_v37, 4 }
  0x99   : > { %v879_v59 = vrot.slane %v2480_v0, 4 }
  0x9a   : > { %v868_v58 = vsel %vm275_vm0, %v865_v27, %v867_v29  ;;  %v933_v14 = vsel %vm356_vm1, %v909_v16, 0.0  ;;  %v939_v27 = vsel %vm356_vm1, %v911_v38, 0.0 }
  0x9b   : > { %831 = vadd.xlane.f32.xlu1 %v830_v15  ;;  %v872_v15 = vrot.slane %v2315_v53, 4  ;;  %v912_v20 = vmul.f32 %v868_v58, %v2287_v40  ;;  %v881_v38 = vsel %vm275_vm0, %v879_v59, %v880_v24 }
  0x9c   : > { %828 = vadd.xlane.f32.xlu0 %v827_v26  ;;  %v869_v26 = vrot.slane %v2451_v3, 4 }
  0x9d   : > { %v873_v18 = vsel %vm275_vm0, %v870_v45, %v872_v15  ;;  %v942_v22 = vsel %vm356_vm1, %v912_v20, 0.0  ;;  %v887_v20 = vrot.slane %v2390_v50, 4 }
  0x9e   : > { %v871_v57 = vsel %vm275_vm0, %v869_v26, %v870_v45  ;;  %v914_v30 = vmul.f32 %v873_v18, %v2312_v52  ;;  %v884_v18 = vrot.slane %v2494_v51, 4 }
  0x9f   : > { %925 = vadd.xlane.f32.xlu1 %v924_v21  ;;  %v877_v21 = vrot.slane %v2340_v4, 4  ;;  %v913_v29 = vmul.f32 %v871_v57, %v2318_v54  ;;  %v987_v57 = vrot.slane %v2243_v17, 3 }
  0xa0   : > { %922 = vadd.xlane.f32.xlu0 %v921_v47  ;;  %v874_v47 = vrot.slane %v2465_v56, 4  ;;  %v948_v58 = vsel %vm356_vm1, %v914_v30, 0.0 }
  0xa1   : > { %v878_v44 = vsel %vm275_vm0, %v875_v62, %v877_v21  ;;  %v945_v26 = vsel %vm356_vm1, %v913_v29, 0.0 }
  0xa2   : > { %v916_v32 = vmul.f32 %v878_v44, %v2337_v1 }
  0xa3   : > { %931 = vadd.xlane.f32.xlu1 %v930_v46  ;;  %v876_v46 = vsel %vm275_vm0, %v874_v47, %v875_v62 }
  0xa4   : > { %928 = vadd.xlane.f32.xlu0 %v927_v48  ;;  %v882_v48 = vrot.slane %v2365_v33, 4  ;;  %v915_v45 = vmul.f32 %v876_v46, %v2343_v6  ;;  %v954_v21 = vsel %vm356_vm1, %v916_v32, 0.0  ;;  %v986_v46 = vrot.slane %v2379_v39, 3 }
  0xa6   : > { %v951_v30 = vsel %vm356_vm1, %v915_v45, 0.0 }
  0xa7   : > { %937 = vadd.xlane.f32.xlu1 %v936_v63  ;;  %v883_v63 = vsel %vm275_vm0, %v880_v24, %v882_v48  ;;  %v917_v24 = vmul.f32 %v881_v38, %v2368_v36  ;;  %v988_v38 = vsel %vm985_vm5, %v986_v46, %v987_v57 }
  0xa8   : > { %934 = vadd.xlane.f32.xlu0 %v933_v14  ;;  %v885_v14 = vrot.slane %v2399_v8, 4  ;;  %v918_v47 = vmul.f32 %v883_v63, %v2362_v31 }
  0xaa   : > { %v888_v29 = vsel %vm275_vm0, %v885_v14, %v887_v20  ;;  %v886_v44 = vsel %vm275_vm0, %v884_v18, %v885_v14  ;;  %v960_v59 = vsel %vm356_vm1, %v918_v47, 0.0  ;;  %v992_v14 = vrot.slane %v2229_v12, 3 }
  0xab   : > { %943 = vadd.xlane.f32.xlu1 %v942_v22  ;;  %v989_v22 = vrot.slane %v2248_v19, 3  ;;  %v919_v63 = vmul.f32 %v886_v44, %v2394_v5  ;;  %v994_v20 = vrot.slane %v2232_v13, 3  ;;  %v991_v18 = vrot.slane %v2407_v61, 3 }
  0xac   : > { %940 = vadd.xlane.f32.xlu0 %v939_v27  ;;  %v2711_v16 = vpop.xlane.xlu1 %364  ;;  %vm1676_vm0 = vcmask 72704  }
  0xad   : > { %v2716_v15 = vpop.xlane.xlu0 %358  ;;  %v990_v32 = vsel %vm985_vm5, %v987_v57, %v989_v22  ;;  %v963_v44 = vsel %vm356_vm1, %v919_v63, 0.0  ;;  %v1042_v57 = vmul.f32 %v988_v38, %v2217_v7  ;;  %v995_v46 = vsel %vm985_vm5, %v992_v14, %v994_v20 }
  0xae   : > { %v1002_v63 = vrot.slane %v2298_v43, 3  ;;  %v1004_v7 = vrot.slane %v2290_v41, 3 }
  0xaf   : > { %949 = vadd.xlane.f32.xlu1 %v948_v58  ;;  %v920_v58 = vmul.f32 %v888_v29, %v2387_v49 }
  0xb0   : > { %946 = vadd.xlane.f32.xlu0 %v945_v26  ;;  %v2724_v62 = vpop.xlane.xlu1 %367  ;;  %v957_v26 = vsel %vm356_vm1, %v917_v24, 0.0  ;;  %v999_v24 = vrot.slane %v2273_v34, 3 }
  0xb1   : > { %v2730_v27 = vpop.xlane.xlu0 %361  ;;  %v966_v22 = vsel %vm356_vm1, %v920_v58, 0.0 }
  0xb3   : > { %955 = vadd.xlane.f32.xlu1 %v954_v21  ;;  %v1043_v21 = vmul.f32 %v990_v32, %v2224_v11  ;;  %v996_v11 = vrot.slane %v2423_v28, 3 }
  0xb4   : > { %952 = vadd.xlane.f32.xlu0 %v951_v30  ;;  %v2737_v48 = vpop.xlane.xlu1 %373  ;;  %v997_v30 = vrot.slane %v2278_v35, 3 }
  0xb5   : > { %v2742_v45 = vpop.xlane.xlu0 %370  ;;  %v1061_v32 = vsel %vm356_vm1, %v1043_v21, 0.0  ;;  %v1001_v21 = vrot.slane %v2437_v60, 3 }
  0xb7   : > { %961 = vadd.xlane.f32.xlu1 %v960_v59  ;;  %v993_v59 = vsel %vm985_vm5, %v991_v18, %v992_v14  ;;  %v1058_v14 = vsel %vm356_vm1, %v1042_v57, 0.0  ;;  %v998_v18 = vsel %vm985_vm5, %v996_v11, %v997_v30  ;;  %v1009_v57 = vrot.slane %v2315_v53, 3 }
  0xb8   : > { %958 = vadd.xlane.f32.xlu0 %v957_v26  ;;  %v2751_v47 = vpop.xlane.xlu1 %379  ;;  %v1045_v26 = vmul.f32 %v995_v46, %v2221_v10  ;;  %v1044_v20 = vmul.f32 %v993_v59, %v2209_v2  ;;  %v1007_v46 = vrot.slane %v2323_v55, 3  ;;  %v1003_v59 = vsel %vm985_vm5, %v1001_v21, %v1002_v63 }
  0xb9   : > { %v2756_v29 = vpop.xlane.xlu0 %376 }
  0xba   : > { %3584 = vst [vmem:[#allocation6_spill] sm:$0xff] %v2756_v29  ;;  %v1000_v29 = vsel %vm985_vm5, %v997_v30, %v999_v24  ;;  %v1067_v24 = vsel %vm356_vm1, %v1045_v26, 0.0  ;;  %v1064_v2 = vsel %vm356_vm1, %v1044_v20, 0.0  ;;  %v1046_v30 = vmul.f32 %v998_v18, %v2259_v25 }
  0xbb   : > { %967 = vadd.xlane.f32.xlu1 %v966_v22  ;;  %v1047_v22 = vmul.f32 %v1000_v29, %v2256_v23  ;;  %v1006_v23 = vrot.slane %v2451_v3, 3  ;;  %v1010_v26 = vsel %vm985_vm5, %v1007_v46, %v1009_v57  ;;  %v1011_v25 = vrot.slane %v2465_v56, 3 }
  0xbc   : > { %964 = vadd.xlane.f32.xlu0 %v963_v44  ;;  %v2764_v58 = vpop.xlane.xlu1 %385  ;;  %v1005_v44 = vsel %vm985_vm5, %v1002_v63, %v1004_v7  ;;  %v1012_v7 = vrot.slane %v2348_v9, 3  ;;  %v1070_v63 = vsel %vm356_vm1, %v1046_v30, 0.0  ;;  %v1048_v18 = vmul.f32 %v1003_v59, %v2293_v42 }
  0xbd   : > { %v2770_v38 = vpop.xlane.xlu0 %382  ;;  %v1073_v29 = vsel %vm356_vm1, %v1047_v22, 0.0  ;;  %v1049_v11 = vmul.f32 %v1005_v44, %v2287_v40  ;;  %v1008_v21 = vsel %vm985_vm5, %v1006_v23, %v1007_v46  ;;  %v1051_v22 = vmul.f32 %v1010_v26, %v2312_v52 }
  0xbe   : > { %3585 = vst [vmem:[#allocation7_spill] sm:$0xff] %v2770_v38  ;;  %v1013_v57 = vsel %vm985_vm5, %v1011_v25, %v1012_v7  ;;  %v1019_v30 = vrot.slane %v2365_v33, 3  ;;  %v1076_v42 = vsel %vm356_vm1, %v1048_v18, 0.0  ;;  %v1050_v46 = vmul.f32 %v1008_v21, %v2318_v54 }
  0xbf   : > { %1062 = vadd.xlane.f32.xlu1 %v1061_v32  ;;  %v1079_v40 = vsel %vm356_vm1, %v1049_v11, 0.0  ;;  %v1016_v59 = vrot.slane %v2480_v0, 3  ;;  %v1052_v23 = vmul.f32 %v1013_v57, %v2343_v6  ;;  %v1085_v11 = vsel %vm356_vm1, %v1051_v22, 0.0 }
  0xc0   : > { %1059 = vadd.xlane.f32.xlu0 %v1058_v14  ;;  %v2777_v10 = vpop.xlane.xlu1 %391  ;;  %v1014_v14 = vrot.slane %v2340_v4, 3  ;;  %v407_v54 = vmul.f32 0.0625, %v2730_v27  ;;  %v1082_v18 = vsel %vm356_vm1, %v1050_v46, 0.0  ;;  %v1126_v46 = vrot.slane %v2248_v19, 2 }
  0xc1   : > { %v2783_v38 = vpop.xlane.xlu0 %388  ;;  %v1088_v57 = vsel %vm356_vm1, %v1052_v23, 0.0 }
  0xc2   : > { %v1015_v44 = vsel %vm985_vm5, %v1012_v7, %v1014_v14  ;;  %v1022_v7 = vrot.slane %v2399_v8, 3  ;;  %v1024_v14 = vrot.slane %v2390_v50, 3 }
  0xc3   : > { %1068 = vadd.xlane.f32.xlu1 %v1067_v24  ;;  %v1053_v52 = vmul.f32 %v1015_v44, %v2337_v1  ;;  %v406_v1 = vmul.f32 0.0625, %v2716_v15 }
  0xc4   : > { %1065 = vadd.xlane.f32.xlu0 %v1064_v2  ;;  %v2791_v32 = vpop.xlane.xlu1 %397  ;;  %v1017_v2 = vrot.slane %v2373_v37, 3 }
  0xc5   : > { %v2797_v20 = vpop.xlane.xlu0 %394  ;;  %v1091_v44 = vsel %vm356_vm1, %v1053_v52, 0.0 }
  0xc6   : > { %v1020_v26 = vsel %vm985_vm5, %v1017_v2, %v1019_v30  ;;  %v1018_v6 = vsel %vm985_vm5, %v1016_v59, %v1017_v2  ;;  %v1124_v2 = vrot.slane %v2243_v17, 2  ;;  %v409_v59 = vmul.f32 0.0625, %v2724_v62 }
  0xc7   : > { %1074 = vadd.xlane.f32.xlu1 %v1073_v29  ;;  %v1055_v27 = vmul.f32 %v1020_v26, %v2362_v31  ;;  %v1054_v52 = vmul.f32 %v1018_v6, %v2368_v36  ;;  %v408_v31 = vmul.f32 0.0625, %v2711_v16 }
  0xc8   : > { %1071 = vadd.xlane.f32.xlu0 %v1070_v63  ;;  %v2804_v24 = vpop.xlane.xlu1 %403  ;;  %v1127_v16 = vsel %vm1122_vm7, %v1124_v2, %v1126_v46  ;;  %v2865_v46 = vld [vmem:[%s2197_s23 + $0x8] sm:$0xff] }
  0xc9   : > { %v2810_v56 = vpop.xlane.xlu0 %400 }
  0xcb   : > { %1080 = vadd.xlane.f32.xlu1 %v1079_v40  ;;  %v1021_v40 = vrot.slane %v2494_v51, 3 }
  0xcc   : > { %1077 = vadd.xlane.f32.xlu0 %v1076_v42  ;;  %v516_v29 = vpop.xlane.xlu1 %515  ;;  %v1025_v42 = vsel %vm985_vm5, %v1022_v7, %v1024_v14 }
  0xcd   : > { %v560_v25 = vmul.f32 0.0625, %v516_v29  ;;  %v513_v63 = vpop.xlane.xlu0 %512  ;;  %v1023_v26 = vsel %vm985_vm5, %v1021_v40, %v1022_v7  ;;  %v1057_v62 = vmul.f32 %v1025_v42, %v2387_v49  ;;  %v1129_v7 = vrot.slane %v2229_v12, 2 }
  0xce   : > { %v559_v21 = vmul.f32 0.0625, %v513_v63  ;;  %v1094_v40 = vsel %vm356_vm1, %v1054_v52, 0.0  ;;  %v1056_v49 = vmul.f32 %v1023_v26, %v2394_v5  ;;  %v413_v52 = vmul.f32 0.0625, %v2751_v47 }
  0xcf   : > { %v2827_v22 = vsel %vm1540_vm6, %v407_v54, %v560_v25  ;;  %1086 = vadd.xlane.f32.xlu1 %v1085_v11  ;;  %v1123_v54 = vrot.slane %v2379_v39, 2  ;;  %v1097_v25 = vsel %vm356_vm1, %v1055_v27, 0.0 }
  0xd0   : > { %v2833_v30 = vsel %vm1540_vm6, %v406_v1, %v559_v21  ;;  %1083 = vadd.xlane.f32.xlu0 %v1082_v18  ;;  %v522_v15 = vpop.xlane.xlu1 %521  ;;  %v1131_v18 = vrot.slane %v2232_v13, 2  ;;  %v411_v1 = vmul.f32 0.0625, %v2737_v48  ;;  %v1103_v48 = vsel %vm356_vm1, %v1057_v62, 0.0  ;;  %v3586_v62 = vld [vmem:[#allocation6_spill] sm:$0xff] }
  0xd1   : > { %v562_v29 = vmul.f32 0.0625, %v522_v15  ;;  %v519_v11 = vpop.xlane.xlu0 %518  ;;  %v1128_v15 = vrot.slane %v2407_v61, 2  ;;  %v1100_v26 = vsel %vm356_vm1, %v1056_v49, 0.0 }
  0xd2   : > { %v561_v23 = vmul.f32 0.0625, %v519_v11  ;;  %v1136_v11 = vrot.slane %v2273_v34, 2 }
  0xd3   : > { %v2844_v14 = vsel %vm1540_vm6, %v409_v59, %v562_v29  ;;  %1092 = vadd.xlane.f32.xlu1 %v1091_v44  ;;  %v410_v44 = vmul.f32 0.0625, %v2742_v45  ;;  %v1180_v59 = vmul.f32 %v2865_v46, %v1127_v16  ;;  %v1134_v29 = vrot.slane %v2278_v35, 2 }
  0xd4   : > { %v2849_v63 = vsel %vm1540_vm6, %v408_v31, %v561_v23  ;;  %1089 = vadd.xlane.f32.xlu0 %v1088_v57  ;;  %v528_v36 = vpop.xlane.xlu1 %527  ;;  %v1125_v57 = vsel %vm1122_vm7, %v1123_v54, %v1124_v2  ;;  %v1132_v2 = vsel %vm1122_vm7, %v1129_v7, %v1131_v18  ;;  %v2877_v54 = vld [vmem:[%s2197_s23] sm:$0xff]  ;;  %v1130_v18 = vsel %vm1122_vm7, %v1128_v15, %v1129_v7 }
  0xd5   : > { %v564_v21 = vmul.f32 0.0625, %v528_v36  ;;  %v525_v6 = vpop.xlane.xlu0 %524  ;;  %v412_v36 = vmul.f32 0.0625, %v3586_v62  ;;  %v1198_v47 = vsel %vm356_vm1, %v1180_v59, 0.0  ;;  %v1137_v7 = vsel %vm1122_vm7, %v1134_v29, %v1136_v11 }
  0xd6   : > { %v563_v27 = vmul.f32 0.0625, %v525_v6  ;;  %v2888_v6 = vld [vmem:[%s2197_s23 + $0x18] sm:$0xff]  ;;  %v415_v15 = vmul.f32 0.0625, %v2764_v58  ;;  %v1138_v62 = vrot.slane %v2437_v60, 2 }
  0xd7   : > { %v2861_v42 = vsel %vm1540_vm6, %v411_v1, %v564_v21  ;;  %1098 = vadd.xlane.f32.xlu1 %v1097_v25  ;;  %v1179_v25 = vmul.f32 %v2877_v54, %v1125_v57  ;;  %v1133_v1 = vrot.slane %v2423_v28, 2  ;;  %v1141_v57 = vrot.slane %v2290_v41, 2 }
  0xd8   : > { %v2869_v5 = vsel %vm1540_vm6, %v410_v44, %v563_v27  ;;  %1095 = vadd.xlane.f32.xlu0 %v1094_v40  ;;  %v534_v45 = vpop.xlane.xlu1 %533  ;;  %v1182_v40 = vmul.f32 %v2888_v6, %v1132_v2  ;;  %v1139_v27 = vrot.slane %v2298_v43, 2 }
  0xd9   : > { %v566_v31 = vmul.f32 0.0625, %v534_v45  ;;  %v531_v23 = vpop.xlane.xlu0 %530  ;;  %v1195_v45 = vsel %vm356_vm1, %v1179_v25, 0.0  ;;  %v1135_v11 = vsel %vm1122_vm7, %v1133_v1, %v1134_v29  ;;  %v1144_v1 = vrot.slane %v2323_v55, 2 }
  0xda   : > { %v565_v16 = vmul.f32 0.0625, %v531_v23  ;;  %v1204_v58 = vsel %vm356_vm1, %v1182_v40, 0.0  ;;  %v1142_v29 = vsel %vm1122_vm7, %v1139_v27, %v1141_v57  ;;  %v1140_v57 = vsel %vm1122_vm7, %v1138_v62, %v1139_v27 }
  0xdb   : > { %v2884_v21 = vsel %vm1540_vm6, %v413_v52, %v566_v31  ;;  %1104 = vadd.xlane.f32.xlu1 %v1103_v48  ;;  %v2900_v52 = vld [vmem:[%s2197_s23 + $0x10] sm:$0xff]  ;;  %v3587_v31 = vld [vmem:[#allocation7_spill] sm:$0xff]  ;;  %v1149_v62 = vrot.slane %v2348_v9, 2 }
  0xdc   : > { %v2892_v49 = vsel %vm1540_vm6, %v412_v36, %v565_v16  ;;  %1101 = vadd.xlane.f32.xlu0 %v1100_v26  ;;  %v540_v44 = vpop.xlane.xlu1 %539  ;;  %v1181_v2 = vmul.f32 %v2900_v52, %v1130_v18  ;;  %v414_v23 = vmul.f32 0.0625, %v3587_v31  ;;  %v2911_v16 = vld [vmem:[%s2197_s23 + $0x28] sm:$0xff]  ;;  %v2923_v31 = vld [vmem:[%s2197_s23 + $0x20] sm:$0xff] }
  0xdd   : > { %v568_v48 = vmul.f32 0.0625, %v540_v44  ;;  %v537_v59 = vpop.xlane.xlu0 %536  ;;  %v1184_v25 = vmul.f32 %v2911_v16, %v1137_v7  ;;  %v1183_v7 = vmul.f32 %v2923_v31, %v1135_v11 }
  0xde   : > { %v567_v26 = vmul.f32 0.0625, %v537_v59  ;;  %v1201_v59 = vsel %vm356_vm1, %v1181_v2, 0.0 }
  0xdf   : > { %v2907_v36 = vsel %vm1540_vm6, %v415_v15, %v568_v48  ;;  %1199 = vadd.xlane.f32.xlu1 %v1198_v47  ;;  %v1146_v15 = vrot.slane %v2315_v53, 2  ;;  %v417_v47 = vmul.f32 0.0625, %v2777_v10  ;;  %v1210_v10 = vsel %vm356_vm1, %v1184_v25, 0.0 }
  0xe0   : > { %v2915_v18 = vsel %vm1540_vm6, %v414_v23, %v567_v26  ;;  %1196 = vadd.xlane.f32.xlu0 %v1195_v45  ;;  %v546_v44 = vpop.xlane.xlu1 %545  ;;  %v416_v45 = vmul.f32 0.0625, %v2783_v38  ;;  %v1143_v26 = vrot.slane %v2451_v3, 2 }
  0xe1   : > { %v570_v48 = vmul.f32 0.0625, %v546_v44  ;;  %v543_v40 = vpop.xlane.xlu0 %542  ;;  %v2934_v44 = vld [vmem:[%s2197_s23 + $0x38] sm:$0xff]  ;;  %v1147_v27 = vsel %vm1122_vm7, %v1144_v1, %v1146_v15 }
  0xe2   : > { %v569_v23 = vmul.f32 0.0625, %v543_v40  ;;  %v1186_v2 = vmul.f32 %v2934_v44, %v1142_v29  ;;  %v1207_v40 = vsel %vm356_vm1, %v1183_v7, 0.0  ;;  %v1145_v15 = vsel %vm1122_vm7, %v1143_v26, %v1144_v1 }
  0xe3   : > { %v2930_v53 = vsel %vm1540_vm6, %v417_v47, %v570_v48  ;;  %1205 = vadd.xlane.f32.xlu1 %v1204_v58  ;;  %v1151_v47 = vrot.slane %v2340_v4, 2  ;;  %v419_v58 = vmul.f32 0.0625, %v2791_v32  ;;  %v1154_v26 = vrot.slane %v2373_v37, 2 }
  0xe4   : > { %3588 = vst [vmem:[#allocation6_spill] sm:$0xff] %v2930_v53  ;;  %v2938_v11 = vsel %vm1540_vm6, %v416_v45, %v569_v23  ;;  %1202 = vadd.xlane.f32.xlu0 %v1201_v59  ;;  %v552_v38 = vpop.xlane.xlu1 %551  ;;  %v2946_v53 = vld [vmem:[%s2197_s23 + $0x30] sm:$0xff]  ;;  %v418_v59 = vmul.f32 0.0625, %v2797_v20  ;;  %v3590_v23 = vld [vmem:[#allocation5_spill] sm:$0xff]  ;;  %v1216_v32 = vsel %vm356_vm1, %v1186_v2, 0.0 }
  0xe5   : > { %3589 = vst [vmem:[#allocation7_spill] sm:$0xff] %v2938_v11  ;;  %v572_v48 = vmul.f32 0.0625, %v552_v38  ;;  %v549_v25 = vpop.xlane.xlu0 %548  ;;  %v1185_v29 = vmul.f32 %v2946_v53, %v1140_v57  ;;  %v1148_v11 = vrot.slane %v3590_v23, 2  ;;  %v2957_v38 = vld [vmem:[%s2197_s23 + $0x48] sm:$0xff]  ;;  %v1152_v1 = vsel %vm1122_vm7, %v1149_v62, %v1151_v47 }
  0xe6   : > { %v571_v45 = vmul.f32 0.0625, %v549_v25  ;;  %v1188_v7 = vmul.f32 %v2957_v38, %v1147_v27 }
  0xe7   : > { %v2953_v4 = vsel %vm1540_vm6, %v419_v58, %v572_v48  ;;  %1211 = vadd.xlane.f32.xlu1 %v1210_v10  ;;  %v1156_v58 = vrot.slane %v2365_v33, 2  ;;  %v421_v10 = vmul.f32 0.0625, %v2804_v24  ;;  %v1213_v25 = vsel %vm356_vm1, %v1185_v29, 0.0  ;;  %v2980_v29 = vld [vmem:[%s2197_s23 + $0x58] sm:$0xff] }
  0xe8   : > { %3591 = vst [vmem:[#allocation5_spill] sm:$0xff] %v2953_v4  ;;  %v2961_v57 = vsel %vm1540_vm6, %v418_v59, %v571_v45  ;;  %1208 = vadd.xlane.f32.xlu0 %v1207_v40  ;;  %v558_v20 = vpop.xlane.xlu1 %557  ;;  %v2969_v4 = vld [vmem:[%s2197_s23 + $0x40] sm:$0xff]  ;;  %v420_v40 = vmul.f32 0.0625, %v2810_v56  ;;  %v1150_v47 = vsel %vm1122_vm7, %v1148_v11, %v1149_v62  ;;  %v1153_v45 = vrot.slane %v2480_v0, 2 }
  0xe9   : > { %v574_v48 = vmul.f32 0.0625, %v558_v20  ;;  %v555_v2 = vpop.xlane.xlu0 %554  ;;  %v1187_v27 = vmul.f32 %v2969_v4, %v1145_v15  ;;  %v1222_v24 = vsel %vm356_vm1, %v1188_v7, 0.0  ;;  %v1190_v20 = vmul.f32 %v2980_v29, %v1152_v1 }
  0xea   : > { %v573_v59 = vmul.f32 0.0625, %v555_v2  ;;  %v1157_v11 = vsel %vm1122_vm7, %v1154_v26, %v1156_v58  ;;  %v1159_v62 = vrot.slane %v2399_v8, 2  ;;  %v2991_v2 = vld [vmem:[%s2197_s23 + $0x50] sm:$0xff] }
  0xeb   : > { %v2976_v33 = vsel %vm1540_vm6, %v421_v10, %v574_v48  ;;  %1217 = vadd.xlane.f32.xlu1 %v1216_v32  ;;  %v1161_v10 = vrot.slane %v2390_v50, 2  ;;  %v1219_v7 = vsel %vm356_vm1, %v1187_v27, 0.0  ;;  %v1189_v1 = vmul.f32 %v2991_v2, %v1150_v47 }
  0xec   : > { %3592 = vst [vmem:[#allocation8_spill] sm:$0xff] %v2976_v33  ;;  %v2984_v15 = vsel %vm1540_vm6, %v420_v40, %v573_v59  ;;  %1214 = vadd.xlane.f32.xlu0 %v1213_v25  ;;  %v653_v56 = vpop.xlane.xlu1 %652  ;;  %v1155_v40 = vsel %vm1122_vm7, %v1153_v45, %v1154_v26  ;;  %v1158_v25 = vrot.slane %v2494_v51, 2  ;;  %v1228_v59 = vsel %vm356_vm1, %v1190_v20, 0.0 }
  0xed   : > { %3593 = vst [vmem:[#allocation9_spill] sm:$0xff] %v2984_v15  ;;  %v697_v32 = vmul.f32 0.0625, %v653_v56  ;;  %v650_v48 = vpop.xlane.xlu0 %649  ;;  %v3002_v56 = vld [vmem:[%s2197_s23 + $0x68] sm:$0xff]  ;;  %v1162_v45 = vsel %vm1122_vm7, %v1159_v62, %v1161_v10  ;;  %v1225_v20 = vsel %vm356_vm1, %v1189_v1, 0.0 }
  0xee   : > { %v696_v33 = vmul.f32 0.0625, %v650_v48  ;;  %v1192_v27 = vmul.f32 %v3002_v56, %v1157_v11  ;;  %v1261_v48 = vrot.slane %v2243_v17, 1 }
  0xef   : > { %v2998_v58 = vsel %vm1557_vm8, %v2827_v22, %v697_v32  ;;  %1223 = vadd.xlane.f32.xlu1 %v1222_v24  ;;  %v1263_v22 = vrot.slane %v2248_v19, 1 }
  0xf0   : > { %3594 = vst [vmem:[#allocation10_spill] sm:$0xff] %v2998_v58  ;;  %v3007_v47 = vsel %vm1557_vm8, %v2833_v30, %v696_v33  ;;  %1220 = vadd.xlane.f32.xlu0 %v1219_v7  ;;  %v659_v26 = vpop.xlane.xlu1 %658  ;;  %v3014_v58 = vld [vmem:[%s2197_s23 + $0x60] sm:$0xff]  ;;  %v1160_v30 = vsel %vm1122_vm7, %v1158_v25, %v1159_v62  ;;  %v1260_v7 = vrot.slane %v2379_v39, 1  ;;  %v1234_v19 = vsel %vm356_vm1, %v1192_v27, 0.0 }
  0xf1   : > { %3595 = vst [vmem:[#allocation11_spill] sm:$0xff] %v3007_v47  ;;  %v699_v24 = vmul.f32 0.0625, %v659_v26  ;;  %v656_v32 = vpop.xlane.xlu0 %655  ;;  %v1191_v11 = vmul.f32 %v3014_v58, %v1155_v40  ;;  %v3025_v26 = vld [vmem:[%s2197_s23 + $0x78] sm:$0xff]  ;;  %v1266_v40 = vrot.slane %v2229_v12, 1  ;;  %v1264_v25 = vsel %vm1259_vm9, %v1261_v48, %v1263_v22  ;;  %v3038_v47 = vld [vmem:[%s2197_s23 + $0x70] sm:$0xff] }
  0xf2   : > { %v698_v33 = vmul.f32 0.0625, %v656_v32  ;;  %v1194_v1 = vmul.f32 %v3025_v26, %v1162_v45  ;;  %v1193_v45 = vmul.f32 %v3038_v47, %v1160_v30  ;;  %v1317_v22 = vmul.f32 %v2865_v46, %v1264_v25 }
  0xf3   : > { %v3021_v10 = vsel %vm1557_vm8, %v2844_v14, %v699_v24  ;;  %1229 = vadd.xlane.f32.xlu1 %v1228_v59  ;;  %v1268_v14 = vrot.slane %v2232_v13, 1  ;;  %v1265_v59 = vrot.slane %v2407_v61, 1 }
  0xf4   : > { %3596 = vst [vmem:[#allocation12_spill] sm:$0xff] %v3021_v10  ;;  %v3031_v32 = vsel %vm1557_vm8, %v2849_v63, %v698_v33  ;;  %1226 = vadd.xlane.f32.xlu0 %v1225_v20  ;;  %v665_v62 = vpop.xlane.xlu1 %664  ;;  %v1231_v10 = vsel %vm356_vm1, %v1191_v11, 0.0  ;;  %v1262_v63 = vsel %vm1259_vm9, %v1260_v7, %v1261_v48  ;;  %v1240_v13 = vsel %vm356_vm1, %v1194_v1, 0.0 }
  0xf5   : > { %v701_v24 = vmul.f32 0.0625, %v665_v62  ;;  %v662_v27 = vpop.xlane.xlu0 %661  ;;  %v1271_v33 = vrot.slane %v2278_v35, 1  ;;  %v1269_v62 = vsel %vm1259_vm9, %v1266_v40, %v1268_v14  ;;  %v1267_v48 = vsel %vm1259_vm9, %v1265_v59, %v1266_v40 }
  0xf6   : > { %v700_v15 = vmul.f32 0.0625, %v662_v27  ;;  %v1237_v1 = vsel %vm356_vm1, %v1193_v45, 0.0  ;;  %v1316_v25 = vmul.f32 %v2877_v54, %v1262_v63  ;;  %v1276_v45 = vrot.slane %v2298_v43, 1 }
  0xf7   : > { %v3044_v20 = vsel %vm1557_vm8, %v2861_v42, %v701_v24  ;;  %1235 = vadd.xlane.f32.xlu1 %v1234_v19  ;;  %v1273_v42 = vrot.slane %v2273_v34, 1  ;;  %v1270_v24 = vrot.slane %v2423_v28, 1  ;;  %v1318_v34 = vmul.f32 %v2900_v52, %v1267_v48 }
  0xf8   : > { %3597 = vst [vmem:[#allocation13_spill] sm:$0xff] %v3044_v20  ;;  %v3051_v11 = vsel %vm1557_vm8, %v2869_v5, %v700_v15  ;;  %1232 = vadd.xlane.f32.xlu0 %v1231_v10  ;;  %v671_v30 = vpop.xlane.xlu1 %670  ;;  %v1335_v15 = vsel %vm356_vm1, %v1317_v22, 0.0  ;;  %v1319_v10 = vmul.f32 %v2888_v6, %v1269_v62  ;;  %v1332_v22 = vsel %vm356_vm1, %v1316_v25, 0.0 }
  0xf9   : > { %v703_v7 = vmul.f32 0.0625, %v671_v30  ;;  %v668_v19 = vpop.xlane.xlu0 %667  ;;  %v1274_v59 = vsel %vm1259_vm9, %v1271_v33, %v1273_v42  ;;  %v1272_v30 = vsel %vm1259_vm9, %v1270_v24, %v1271_v33  ;;  %v1275_v62 = vrot.slane %v2437_v60, 1 }
  0xfa   : > { %v702_v27 = vmul.f32 0.0625, %v668_v19  ;;  %v1341_v42 = vsel %vm356_vm1, %v1319_v10, 0.0  ;;  %v3599_v10 = vld [vmem:[#allocation2_spill] sm:$0xff] }
  0xfb   : > { %v3061_v5 = vsel %vm1557_vm8, %v2884_v21, %v703_v7  ;;  %1241 = vadd.xlane.f32.xlu1 %v1240_v13  ;;  %v1278_v21 = vrot.slane %v2290_v41, 1  ;;  %v1338_v7 = vsel %vm356_vm1, %v1318_v34, 0.0  ;;  %v1321_v41 = vmul.f32 %v2911_v16, %v1274_v59 }
  0xfc   : > { %3598 = vst [vmem:[#allocation14_spill] sm:$0xff] %v3061_v5  ;;  %v3068_v40 = vsel %vm1557_vm8, %v2892_v49, %v702_v27  ;;  %1238 = vadd.xlane.f32.xlu0 %v1237_v1  ;;  %v677_v14 = vpop.xlane.xlu1 %676  ;;  %v1320_v1 = vmul.f32 %v2923_v31, %v1272_v30  ;;  %v1283_v34 = vrot.slane %v3599_v10, 1  ;;  %v3602_v10 = vld [vmem:[#allocation3_spill] sm:$0xff] }
  0xfd   : > { %v705_v63 = vmul.f32 0.0625, %v677_v14  ;;  %v674_v13 = vpop.xlane.xlu0 %673  ;;  %v1279_v25 = vsel %vm1259_vm9, %v1276_v45, %v1278_v21  ;;  %v1280_v14 = vrot.slane %v2451_v3, 1 }
  0xfe   : > { %v704_v48 = vmul.f32 0.0625, %v674_v13  ;;  %v1347_v13 = vsel %vm356_vm1, %v1321_v41, 0.0  ;;  %v1323_v21 = vmul.f32 %v2934_v44, %v1279_v25  ;;  %v1288_v25 = vrot.slane %v3602_v10, 1  ;;  %v3604_v10 = vld [vmem:[#allocation4_spill] sm:$0xff] }
  0xff   : > { %v3078_v49 = vsel %vm1557_vm8, %v2907_v36, %v705_v63  ;;  %1336 = vadd.xlane.f32.xlu1 %v1335_v15  ;;  %v1281_v36 = vrot.slane %v2323_v55, 1  ;;  %v1277_v15 = vsel %vm1259_vm9, %v1275_v62, %v1276_v45  ;;  %v3600_v63 = vld [vmem:[#allocation6_spill] sm:$0xff]  ;;  %v1344_v62 = vsel %vm356_vm1, %v1320_v1, 0.0 }
 0x100   : > { %v3085_v19 = vsel %vm1557_vm8, %v2915_v18, %v704_v48  ;;  %1333 = vadd.xlane.f32.xlu0 %v1332_v22  ;;  %v683_v33 = vpop.xlane.xlu1 %682  ;;  %v3601_v22 = vld [vmem:[#allocation7_spill] sm:$0xff]  ;;  %v1322_v48 = vmul.f32 %v2946_v53, %v1277_v15 }
 0x101   : > { %v707_v24 = vmul.f32 0.0625, %v683_v33  ;;  %v680_v27 = vpop.xlane.xlu0 %679  ;;  %v1286_v33 = vrot.slane %v2348_v9, 1  ;;  %v1282_v41 = vsel %vm1259_vm9, %v1280_v14, %v1281_v36 }
 0x102   : > { %v706_v59 = vmul.f32 0.0625, %v680_v27  ;;  %v1324_v14 = vmul.f32 %v2969_v4, %v1282_v41 }
 0x103   : > { %v3095_v18 = vsel %vm1557_vm8, %v3600_v63, %v707_v24  ;;  %1342 = vadd.xlane.f32.xlu1 %v1341_v42  ;;  %v1284_v42 = vsel %vm1259_vm9, %v1281_v36, %v1283_v34  ;;  %v1353_v34 = vsel %vm356_vm1, %v1323_v21, 0.0 }
 0x104   : > { %v3101_v30 = vsel %vm1557_vm8, %v3601_v22, %v706_v59  ;;  %1339 = vadd.xlane.f32.xlu0 %v1338_v7  ;;  %v689_v45 = vpop.xlane.xlu1 %688  ;;  %v1285_v59 = vrot.slane %v3590_v23, 1  ;;  %v3603_v22 = vld [vmem:[#allocation5_spill] sm:$0xff]  ;;  %v1325_v36 = vmul.f32 %v2957_v38, %v1284_v42  ;;  %v1356_v41 = vsel %vm356_vm1, %v1324_v14, 0.0 }
 0x105   : > { %v709_v27 = vmul.f32 0.0625, %v689_v45  ;;  %v686_v24 = vpop.xlane.xlu0 %685 }
 0x106   : > { %v708_v63 = vmul.f32 0.0625, %v686_v24  ;;  %v1350_v24 = vsel %vm356_vm1, %v1322_v48, 0.0  ;;  %v1359_v42 = vsel %vm356_vm1, %v1325_v36, 0.0 }
 0x107   : > { %v3112_v7 = vsel %vm1557_vm8, %v3603_v22, %v709_v27  ;;  %1348 = vadd.xlane.f32.xlu1 %v1347_v13  ;;  %v1289_v27 = vsel %vm1259_vm9, %v1286_v33, %v1288_v25  ;;  %v1291_v13 = vrot.slane %v2373_v37, 1 }
 0x108   : > { %v3116_v1 = vsel %vm1557_vm8, %v2961_v57, %v708_v63  ;;  %1345 = vadd.xlane.f32.xlu0 %v1344_v62  ;;  %v3118_v15 = vpop.xlane.xlu1 %694  ;;  %v1293_v57 = vrot.slane %v3604_v10, 1  ;;  %v1287_v62 = vsel %vm1259_vm9, %v1285_v59, %v1286_v33  ;;  %v1290_v63 = vrot.slane %v2480_v0, 1 }
 0x109   : > { %v3123_v45 = vpop.xlane.xlu0 %691  ;;  %v1327_v48 = vmul.f32 %v2980_v29, %v1289_v27  ;;  %v1326_v25 = vmul.f32 %v2991_v2, %v1287_v62  ;;  %v1296_v33 = vrot.slane %v2399_v8, 1  ;;  %v1298_v59 = vrot.slane %v2390_v50, 1 }
 0x10a   : > { %v1294_v10 = vsel %vm1259_vm9, %v1291_v13, %v1293_v57 }
 0x10b   : > { %1354 = vadd.xlane.f32.xlu1 %v1353_v34  ;;  %v1292_v34 = vsel %vm1259_vm9, %v1290_v63, %v1291_v13  ;;  %v1365_v14 = vsel %vm356_vm1, %v1327_v48, 0.0  ;;  %v1329_v27 = vmul.f32 %v3002_v56, %v1294_v10  ;;  %v1362_v57 = vsel %vm356_vm1, %v1326_v25, 0.0 }
 0x10c   : > { %1351 = vadd.xlane.f32.xlu0 %v1350_v24  ;;  %v3131_v21 = vpop.xlane.xlu1 %789  ;;  %v1295_v24 = vrot.slane %v2494_v51, 1  ;;  %v1328_v62 = vmul.f32 %v3014_v58, %v1292_v34  ;;  %v1299_v50 = vsel %vm1259_vm9, %v1296_v33, %v1298_v59 }
 0x10d   : > { %v3136_v22 = vpop.xlane.xlu0 %786 }
 0x10e   : > { %v1297_v13 = vsel %vm1259_vm9, %v1295_v24, %v1296_v33  ;;  %v1368_v10 = vsel %vm356_vm1, %v1328_v62, 0.0  ;;  %v1397_v24 = vmul.f32 %v2865_v46, %v2243_v17 }
 0x10f   : > { %1360 = vadd.xlane.f32.xlu1 %v1359_v42  ;;  %v1371_v42 = vsel %vm356_vm1, %v1329_v27, 0.0  ;;  %v1330_v20 = vmul.f32 %v3038_v47, %v1297_v13 }
 0x110   : > { %1357 = vadd.xlane.f32.xlu0 %v1356_v41  ;;  %v3144_v36 = vpop.xlane.xlu1 %795  ;;  %v1331_v41 = vmul.f32 %v3025_v26, %v1299_v50  ;;  %v1415_v13 = vsel %vm356_vm1, %v1397_v24, 0.0 }
 0x111   : > { %v3148_v5 = vpop.xlane.xlu0 %792  ;;  %v1374_v27 = vsel %vm356_vm1, %v1330_v20, 0.0 }
 0x112   : > { %v1377_v34 = vsel %vm356_vm1, %v1331_v41, 0.0 }
 0x113   : > { %1366 = vadd.xlane.f32.xlu1 %v1365_v14 }
 0x114   : > { %1363 = vadd.xlane.f32.xlu0 %v1362_v57  ;;  %v3154_v63 = vpop.xlane.xlu1 %801  ;;  %v1396_v57 = vmul.f32 %v2877_v54, %v2379_v39  ;;  %v1398_v39 = vmul.f32 %v2900_v52, %v2407_v61 }
 0x115   : > { %v799_v48 = vpop.xlane.xlu0 %798 }
 0x116   : > { %v837_v25 = vmul.f32 0.0625, %v799_v48  ;;  %v1412_v20 = vsel %vm356_vm1, %v1396_v57, 0.0  ;;  %v1418_v61 = vsel %vm356_vm1, %v1398_v39, 0.0 }
 0x117   : > { %1372 = vadd.xlane.f32.xlu1 %v1371_v42  ;;  %v1399_v42 = vmul.f32 %v2888_v6, %v2229_v12 }
 0x118   : > { %v3162_v59 = vsel %vm1574_vm10, %v3051_v11, %v837_v25  ;;  %1369 = vadd.xlane.f32.xlu0 %v1368_v10  ;;  %v3164_v33 = vpop.xlane.xlu1 %807 }
 0x119   : > { %v805_v14 = vpop.xlane.xlu0 %804  ;;  %v1421_v12 = vsel %vm356_vm1, %v1399_v42, 0.0 }
 0x11a   : > { %v839_v62 = vmul.f32 0.0625, %v805_v14 }
 0x11b   : > { %1378 = vadd.xlane.f32.xlu1 %v1377_v34  ;;  %v1401_v34 = vmul.f32 %v2911_v16, %v2278_v35 }
 0x11c   : > { %v3174_v11 = vsel %vm1574_vm10, %v3068_v40, %v839_v62  ;;  %1375 = vadd.xlane.f32.xlu0 %v1374_v27  ;;  %v814_v50 = vpop.xlane.xlu1 %813 }
 0x11d   : > { %v842_v17 = vmul.f32 0.0625, %v814_v50  ;;  %v811_v41 = vpop.xlane.xlu0 %810  ;;  %v1427_v35 = vsel %vm356_vm1, %v1401_v34, 0.0  ;;  %v1403_v50 = vmul.f32 %v2934_v44, %v2298_v43 }
 0x11e   : > { %v841_v48 = vmul.f32 0.0625, %v811_v41 }
 0x11f   : > { %v3184_v10 = vsel %vm1574_vm10, %v3078_v49, %v842_v17  ;;  %1416 = vadd.xlane.f32.xlu1 %v1415_v13  ;;  %v1400_v49 = vmul.f32 %v2923_v31, %v2423_v28  ;;  %v711_v17 = vmul.f32 0.0625, %v3118_v15 }
 0x120   : > { %v3188_v40 = vsel %vm1574_vm10, %v3085_v19, %v841_v48  ;;  %1413 = vadd.xlane.f32.xlu0 %v1412_v20  ;;  %v820_v25 = vpop.xlane.xlu1 %819  ;;  %v1433_v48 = vsel %vm356_vm1, %v1403_v50, 0.0 }
 0x121   : > { %v844_v24 = vmul.f32 0.0625, %v820_v25  ;;  %v817_v14 = vpop.xlane.xlu0 %816  ;;  %v1424_v28 = vsel %vm356_vm1, %v1400_v49, 0.0  ;;  %v833_v49 = vmul.f32 0.0625, %v3136_v22  ;;  %v1406_v22 = vmul.f32 %v2991_v2, %v3590_v23 }
 0x122   : > { %v843_v27 = vmul.f32 0.0625, %v817_v14  ;;  %v3606_v14 = vld [vmem:[#allocation9_spill] sm:$0xff] }
 0x123   : > { %v3198_v57 = vsel %vm1574_vm10, %v3095_v18, %v844_v24  ;;  %1422 = vadd.xlane.f32.xlu1 %v1421_v12  ;;  %v1402_v18 = vmul.f32 %v2946_v53, %v2437_v60  ;;  %v1405_v60 = vmul.f32 %v2957_v38, %v2323_v55  ;;  %v3605_v12 = vld [vmem:[#allocation8_spill] sm:$0xff] }
 0x124   : > { %v3202_v19 = vsel %vm1574_vm10, %v3101_v30, %v843_v27  ;;  %1419 = vadd.xlane.f32.xlu0 %v1418_v61  ;;  %v826_v62 = vpop.xlane.xlu1 %825  ;;  %v710_v30 = vmul.f32 0.0625, %v3123_v45  ;;  %v1573_v34 = vsel %vm1557_vm8, %v3605_v12, %v711_v17 }
 0x125   : > { %v846_v13 = vmul.f32 0.0625, %v826_v62  ;;  %v823_v42 = vpop.xlane.xlu0 %822  ;;  %v1430_v45 = vsel %vm356_vm1, %v1402_v18, 0.0  ;;  %v1439_v62 = vsel %vm356_vm1, %v1405_v60, 0.0  ;;  %v836_v18 = vmul.f32 0.0625, %v3144_v36 }
 0x126   : > { %v845_v41 = vmul.f32 0.0625, %v823_v42  ;;  %v1572_v61 = vsel %vm1557_vm8, %v3606_v14, %v710_v30  ;;  %v3607_v42 = vld [vmem:[#allocation10_spill] sm:$0xff]  ;;  %v1409_v36 = vmul.f32 %v3002_v56, %v2373_v37 }
 0x127   : > { %v3214_v20 = vsel %vm1574_vm10, %v3112_v7, %v846_v13  ;;  %1428 = vadd.xlane.f32.xlu1 %v1427_v35  ;;  %v1404_v7 = vmul.f32 %v2969_v4, %v2451_v3 }
 0x128   : > { %v3218_v43 = vsel %vm1574_vm10, %v3116_v1, %v845_v41  ;;  %1425 = vadd.xlane.f32.xlu0 %v1424_v28  ;;  %v832_v39 = vpop.xlane.xlu1 %831  ;;  %v834_v1 = vmul.f32 0.0625, %v3131_v21  ;;  %v1407_v21 = vmul.f32 %v2980_v29, %v2348_v9  ;;  %v3608_v41 = vld [vmem:[#allocation11_spill] sm:$0xff] }
 0x129   : > { %v848_v15 = vmul.f32 0.0625, %v832_v39  ;;  %v829_v25 = vpop.xlane.xlu0 %828  ;;  %v1436_v13 = vsel %vm356_vm1, %v1404_v7, 0.0  ;;  %v1575_v30 = vsel %vm1574_vm10, %v3608_v41, %v833_v49  ;;  %v835_v39 = vmul.f32 0.0625, %v3148_v5  ;;  %v3609_v7 = vld [vmem:[#allocation12_spill] sm:$0xff]  ;;  %v3611_v41 = vld [vmem:[#allocation14_spill] sm:$0xff] }
 0x12a   : > { %v847_v24 = vmul.f32 0.0625, %v829_v25  ;;  %v1576_v28 = vsel %vm1574_vm10, %v3607_v42, %v834_v1  ;;  %v1445_v60 = vsel %vm356_vm1, %v1407_v21, 0.0  ;;  %v1408_v5 = vmul.f32 %v3014_v58, %v2480_v0  ;;  %v3610_v21 = vld [vmem:[#allocation13_spill] sm:$0xff] }
 0x12b   : > { %v3233_v55 = vsel %vm1574_vm10, %v1573_v34, %v848_v15  ;;  %1434 = vadd.xlane.f32.xlu1 %v1433_v48  ;;  %v1578_v12 = vsel %vm1574_vm10, %v3609_v7, %v836_v18  ;;  %v838_v34 = vmul.f32 0.0625, %v3154_v63  ;;  %v1451_v0 = vsel %vm356_vm1, %v1409_v36, 0.0 }
 0x12c   : > { %v3236_v27 = vsel %vm1574_vm10, %v1572_v61, %v847_v24  ;;  %1431 = vadd.xlane.f32.xlu0 %v1430_v45  ;;  %v926_v3 = vpop.xlane.xlu1 %925  ;;  %v1442_v45 = vsel %vm356_vm1, %v1406_v22, 0.0  ;;  %v1577_v24 = vsel %vm1574_vm10, %v3031_v32, %v835_v39  ;;  %v1411_v49 = vmul.f32 %v3025_v26, %v2399_v8 }
 0x12d   : > { %v970_v35 = vmul.f32 0.0625, %v926_v3  ;;  %v923_v50 = vpop.xlane.xlu0 %922  ;;  %v1410_v32 = vmul.f32 %v3038_v47, %v2494_v51 }
 0x12e   : > { %v969_v17 = vmul.f32 0.0625, %v923_v50  ;;  %v840_v50 = vmul.f32 0.0625, %v3164_v33 }
 0x12f   : > { %v3251_v9 = vsel %vm1591_vm11, %v1576_v28, %v970_v35  ;;  %1440 = vadd.xlane.f32.xlu1 %v1439_v62  ;;  %v1448_v62 = vsel %vm356_vm1, %v1408_v5, 0.0  ;;  %v1580_v35 = vsel %vm1574_vm10, %v3610_v21, %v838_v34  ;;  %v1457_v28 = vsel %vm356_vm1, %v1411_v49, 0.0 }
 0x130   : > { %v3254_v48 = vsel %vm1591_vm11, %v1575_v30, %v969_v17  ;;  %1437 = vadd.xlane.f32.xlu0 %v1436_v13  ;;  %v932_v23 = vpop.xlane.xlu1 %931  ;;  %v1454_v17 = vsel %vm356_vm1, %v1410_v32, 0.0  ;;  %v1582_v33 = vsel %vm1574_vm10, %v3611_v41, %v840_v50  ;;  %v2049_v50 = vpack.i.bf16 %v2865_v46, %v2877_v54 }
 0x131   : > { %v972_v15 = vmul.f32 0.0625, %v932_v23  ;;  %v929_v25 = vpop.xlane.xlu0 %928  ;;  %v2069_v46 = vpack.i.bf16 %v2957_v38, %v2969_v4  ;;  %v2079_v4 = vpack.i.bf16 %v3002_v56, %v3014_v58  ;;  %vm1693_vm1 = vcmask 203776  }
 0x132   : > { %v971_v1 = vmul.f32 0.0625, %v929_v25 }
 0x133   : > { %v3268_v14 = vsel %vm1591_vm11, %v1578_v12, %v972_v15  ;;  %1446 = vadd.xlane.f32.xlu1 %v1445_v60 }
 0x134   : > { %v3271_v37 = vsel %vm1591_vm11, %v1577_v24, %v971_v1  ;;  %1443 = vadd.xlane.f32.xlu0 %v1442_v45  ;;  %v938_v61 = vpop.xlane.xlu1 %937 }
 0x135   : > { %v974_v3 = vmul.f32 0.0625, %v938_v61  ;;  %v935_v63 = vpop.xlane.xlu0 %934 }
 0x136   : > { %v973_v13 = vmul.f32 0.0625, %v935_v63 }
 0x137   : > { %v3283_v22 = vsel %vm1591_vm11, %v1580_v35, %v974_v3  ;;  %1452 = vadd.xlane.f32.xlu1 %v1451_v0 }
 0x138   : > { %v3287_v8 = vsel %vm1591_vm11, %v3162_v59, %v973_v13  ;;  %1449 = vadd.xlane.f32.xlu0 %v1448_v62  ;;  %v944_v42 = vpop.xlane.xlu1 %943 }
 0x139   : > { %v976_v18 = vmul.f32 0.0625, %v944_v42  ;;  %v941_v51 = vpop.xlane.xlu0 %940  ;;  %v2064_v42 = vpack.i.bf16 %v2934_v44, %v2946_v53  ;;  %v2074_v53 = vpack.i.bf16 %v2980_v29, %v2991_v2  ;;  %v2084_v29 = vpack.i.bf16 %v3025_v26, %v3038_v47 }
 0x13a   : > { %v975_v30 = vmul.f32 0.0625, %v941_v51 }
 0x13b   : > { %v3294_v39 = vsel %vm1591_vm11, %v1582_v33, %v976_v18  ;;  %1458 = vadd.xlane.f32.xlu1 %v1457_v28 }
 0x13c   : > { %v3298_v59 = vsel %vm1591_vm11, %v3174_v11, %v975_v30  ;;  %1455 = vadd.xlane.f32.xlu0 %v1454_v17  ;;  %v950_v23 = vpop.xlane.xlu1 %949 }
 0x13d   : > { %v978_v60 = vmul.f32 0.0625, %v950_v23  ;;  %v947_v36 = vpop.xlane.xlu0 %946 }
 0x13e   : > { %v977_v15 = vmul.f32 0.0625, %v947_v36 }
 0x13f   : > { %v3302_v25 = vsel %vm1591_vm11, %v3184_v10, %v978_v60 }
 0x140   : > { %v3306_v45 = vsel %vm1591_vm11, %v3188_v40, %v977_v15  ;;  %v956_v5 = vpop.xlane.xlu1 %955 }
 0x141   : > { %v980_v7 = vmul.f32 0.0625, %v956_v5  ;;  %v953_v12 = vpop.xlane.xlu0 %952 }
 0x142   : > { %v979_v34 = vmul.f32 0.0625, %v953_v12 }
 0x143   : > { %v3310_v11 = vsel %vm1591_vm11, %v3198_v57, %v980_v7  ;;  %v2054_v57 = vpack.i.bf16 %v2888_v6, %v2900_v52 }
 0x144   : > { %v3314_v1 = vsel %vm1591_vm11, %v3202_v19, %v979_v34  ;;  %v962_v24 = vpop.xlane.xlu1 %961 }
 0x145   : > { %v982_v61 = vmul.f32 0.0625, %v962_v24  ;;  %v959_v10 = vpop.xlane.xlu0 %958 }
 0x146   : > { %v981_v0 = vmul.f32 0.0625, %v959_v10 }
 0x147   : > { %v3318_v40 = vsel %vm1591_vm11, %v3214_v20, %v982_v61 }
 0x148   : > { %v3322_v49 = vsel %vm1591_vm11, %v3218_v43, %v981_v0  ;;  %v968_v3 = vpop.xlane.xlu1 %967  ;;  %v2059_v43 = vpack.i.bf16 %v2911_v16, %v2923_v31 }
 0x149   : > { %v984_v63 = vmul.f32 0.0625, %v968_v3  ;;  %v965_v62 = vpop.xlane.xlu0 %964 }
 0x14a   : > { %v983_v19 = vmul.f32 0.0625, %v965_v62 }
 0x14b   : > { %v3328_v32 = vsel %vm1591_vm11, %v3233_v55, %v984_v63 }
 0x14c   : > { %v3332_v21 = vsel %vm1591_vm11, %v3236_v27, %v983_v19  ;;  %v1063_v20 = vpop.xlane.xlu1 %1062  ;;  %2055 = vrot.lane.b32.xlu1 %v2054_v57, %s2145_s27 }
 0x14d   : > { %v1107_v6 = vmul.f32 0.0625, %v1063_v20  ;;  %v1060_v52 = vpop.xlane.xlu0 %1059 }
 0x14e   : > { %v1106_v35 = vmul.f32 0.0625, %v1060_v52 }
 0x14f   : > { %v1610_v55 = vsel %vm1608_vm12, %v3251_v9, %v1107_v6 }
 0x150   : > { %v1609_v27 = vsel %vm1608_vm12, %v3254_v48, %v1106_v35  ;;  %v1069_v13 = vpop.xlane.xlu1 %1068  ;;  %2060 = vrot.lane.b32.xlu1 %v2059_v43, %s2145_s27 }
 0x151   : > { %v1109_v28 = vmul.f32 0.0625, %v1069_v13  ;;  %v1066_v16 = vpop.xlane.xlu0 %1065 }
 0x152   : > { %v1108_v31 = vmul.f32 0.0625, %v1066_v16  ;;  %2050 = vrot.lane.b32.xlu0 %v2049_v50, %s2145_s27 }
 0x153   : > { %v1612_v54 = vsel %vm1608_vm12, %v3268_v14, %v1109_v28 }
 0x154   : > { %v1611_v9 = vsel %vm1608_vm12, %v3271_v37, %v1108_v31  ;;  %v1075_v48 = vpop.xlane.xlu1 %1074  ;;  %2065 = vrot.lane.b32.xlu1 %v2064_v42, %s2145_s27 }
 0x155   : > { %v1111_v44 = vmul.f32 0.0625, %v1075_v48  ;;  %v1072_v18 = vpop.xlane.xlu0 %1071 }
 0x156   : > { %v1110_v51 = vmul.f32 0.0625, %v1072_v18  ;;  %2070 = vrot.lane.b32.xlu0 %v2069_v46, %s2145_s27 }
 0x157   : > { %v1614_v38 = vsel %vm1608_vm12, %v3283_v22, %v1111_v44 }
 0x158   : > { %v1613_v14 = vsel %vm1608_vm12, %v3287_v8, %v1110_v51  ;;  %v1081_v37 = vpop.xlane.xlu1 %1080  ;;  %2075 = vrot.lane.b32.xlu1 %v2074_v53, %s2145_s27 }
 0x159   : > { %v1113_v2 = vmul.f32 0.0625, %v1081_v37  ;;  %v1078_v17 = vpop.xlane.xlu0 %1077 }
 0x15a   : > { %v1112_v41 = vmul.f32 0.0625, %v1078_v17  ;;  %2080 = vrot.lane.b32.xlu0 %v2079_v4, %s2145_s27 }
 0x15b   : > { %v1616_v58 = vsel %vm1608_vm12, %v3294_v39, %v1113_v2 }
 0x15c   : > { %v1615_v56 = vsel %vm1608_vm12, %v3298_v59, %v1112_v41  ;;  %v1087_v22 = vpop.xlane.xlu1 %1086  ;;  %2085 = vrot.lane.b32.xlu1 %v2084_v29, %s2145_s27 }
 0x15d   : > { %v1115_v8 = vmul.f32 0.0625, %v1087_v22  ;;  %v1084_v33 = vpop.xlane.xlu0 %1083 }
 0x15e   : > { %v1114_v30 = vmul.f32 0.0625, %v1084_v33 }
 0x15f   : > { %v1618_v47 = vsel %vm1608_vm12, %v3302_v25, %v1115_v8 }
 0x160   : > { %v1617_v26 = vsel %vm1608_vm12, %v3306_v45, %v1114_v30  ;;  %v1093_v23 = vpop.xlane.xlu1 %1092 }
 0x161   : > { %v1117_v60 = vmul.f32 0.0625, %v1093_v23  ;;  %v1090_v36 = vpop.xlane.xlu0 %1089 }
 0x162   : > { %v1116_v15 = vmul.f32 0.0625, %v1090_v36 }
 0x163   : > { %v1620_v39 = vsel %vm1608_vm12, %v3310_v11, %v1117_v60 }
 0x164   : > { %v1619_v59 = vsel %vm1608_vm12, %v3314_v1, %v1116_v15  ;;  %v1099_v5 = vpop.xlane.xlu1 %1098 }
 0x165   : > { %v1119_v7 = vmul.f32 0.0625, %v1099_v5  ;;  %v1096_v12 = vpop.xlane.xlu0 %1095 }
 0x166   : > { %v1118_v34 = vmul.f32 0.0625, %v1096_v12 }
 0x167   : > { %v1622_v25 = vsel %vm1608_vm12, %v3318_v40, %v1119_v7 }
 0x168   : > { %v1621_v45 = vsel %vm1608_vm12, %v3322_v49, %v1118_v34  ;;  %v1105_v24 = vpop.xlane.xlu1 %1104 }
 0x169   : > { %v1121_v61 = vmul.f32 0.0625, %v1105_v24  ;;  %v1102_v10 = vpop.xlane.xlu0 %1101 }
 0x16a   : > { %v1120_v0 = vmul.f32 0.0625, %v1102_v10 }
 0x16b   : > { %v1624_v11 = vsel %vm1608_vm12, %v3328_v32, %v1121_v61 }
 0x16c   : > { %v1623_v1 = vsel %vm1608_vm12, %v3332_v21, %v1120_v0  ;;  %v1200_v3 = vpop.xlane.xlu1 %1199 }
 0x16d   : > { %v1244_v57 = vmul.f32 0.0625, %v1200_v3  ;;  %v1197_v63 = vpop.xlane.xlu0 %1196 }
 0x16e   : > { %v1243_v62 = vmul.f32 0.0625, %v1197_v63 }
 0x16f   : > { %v3389_v40 = vsel %vm1625_vm13, %v1610_v55, %v1244_v57 }
 0x170   : > { %v3392_v49 = vsel %vm1625_vm13, %v1609_v27, %v1243_v62  ;;  %v1206_v19 = vpop.xlane.xlu1 %1205 }
 0x171   : > { %v1246_v20 = vmul.f32 0.0625, %v1206_v19  ;;  %v1203_v43 = vpop.xlane.xlu0 %1202 }
 0x172   : > { %v1245_v6 = vmul.f32 0.0625, %v1203_v43 }
 0x173   : > { %v3395_v32 = vsel %vm1625_vm13, %v1612_v54, %v1246_v20 }
 0x174   : > { %v3398_v21 = vsel %vm1625_vm13, %v1611_v9, %v1245_v6  ;;  %v1212_v52 = vpop.xlane.xlu1 %1211 }
 0x175   : > { %v1248_v35 = vmul.f32 0.0625, %v1212_v52  ;;  %v1209_v50 = vpop.xlane.xlu0 %1208 }
 0x176   : > { %v1247_v13 = vmul.f32 0.0625, %v1209_v50 }
 0x177   : > { %v3401_v55 = vsel %vm1625_vm13, %v1614_v38, %v1248_v35 }
 0x178   : > { %v3404_v27 = vsel %vm1625_vm13, %v1613_v14, %v1247_v13  ;;  %v1218_v42 = vpop.xlane.xlu1 %1217 }
 0x179   : > { %v1250_v28 = vmul.f32 0.0625, %v1218_v42  ;;  %v1215_v16 = vpop.xlane.xlu0 %1214 }
 0x17a   : > { %v1249_v31 = vmul.f32 0.0625, %v1215_v16 }
 0x17b   : > { %v3407_v46 = vsel %vm1625_vm13, %v1616_v58, %v1250_v28 }
 0x17c   : > { %v3410_v54 = vsel %vm1625_vm13, %v1615_v56, %v1249_v31  ;;  %v1224_v9 = vpop.xlane.xlu1 %1223 }
 0x17d   : > { %v1252_v48 = vmul.f32 0.0625, %v1224_v9  ;;  %v1221_v53 = vpop.xlane.xlu0 %1220 }
 0x17e   : > { %v1251_v44 = vmul.f32 0.0625, %v1221_v53 }
 0x17f   : > { %v3413_v18 = vsel %vm1625_vm13, %v1618_v47, %v1252_v48 }
 0x180   : > { %v3416_v51 = vsel %vm1625_vm13, %v1617_v26, %v1251_v44  ;;  %v1230_v4 = vpop.xlane.xlu1 %1229 }
 0x181   : > { %v1254_v38 = vmul.f32 0.0625, %v1230_v4  ;;  %v1227_v14 = vpop.xlane.xlu0 %1226 }
 0x182   : > { %v1253_v37 = vmul.f32 0.0625, %v1227_v14 }
 0x183   : > { %v3419_v29 = vsel %vm1625_vm13, %v1620_v39, %v1254_v38 }
 0x184   : > { %v3422_v2 = vsel %vm1625_vm13, %v1619_v59, %v1253_v37  ;;  %v1236_v17 = vpop.xlane.xlu1 %1235 }
 0x185   : > { %v1256_v41 = vmul.f32 0.0625, %v1236_v17  ;;  %v1233_v58 = vpop.xlane.xlu0 %1232 }
 0x186   : > { %v1255_v56 = vmul.f32 0.0625, %v1233_v58 }
 0x187   : > { %v3425_v22 = vsel %vm1625_vm13, %v1622_v25, %v1256_v41 }
 0x188   : > { %v3428_v8 = vsel %vm1625_vm13, %v1621_v45, %v1255_v56  ;;  %v1242_v33 = vpop.xlane.xlu1 %1241 }
 0x189   : > { %v1258_v30 = vmul.f32 0.0625, %v1242_v33  ;;  %v1239_v47 = vpop.xlane.xlu0 %1238 }
 0x18a   : > { %v1257_v26 = vmul.f32 0.0625, %v1239_v47 }
 0x18b   : > { %v3431_v23 = vsel %vm1625_vm13, %v1624_v11, %v1258_v30 }
 0x18c   : > { %v3434_v60 = vsel %vm1625_vm13, %v1623_v1, %v1257_v26  ;;  %v1337_v36 = vpop.xlane.xlu1 %1336 }
 0x18d   : > { %v1334_v15 = vpop.xlane.xlu0 %1333  ;;  %v1381_v50 = vmul.f32 0.0625, %v1337_v36 }
 0x18e   : > { %v1380_v13 = vmul.f32 0.0625, %v1334_v15 }
 0x18f   : > { %v1644_v14 = vsel %vm1642_vm14, %v3389_v40, %v1381_v50 }
 0x190   : > { %v1343_v39 = vpop.xlane.xlu1 %1342  ;;  %v1643_v37 = vsel %vm1642_vm14, %v3392_v49, %v1380_v13 }
 0x191   : > { %v1340_v59 = vpop.xlane.xlu0 %1339  ;;  %v1383_v42 = vmul.f32 0.0625, %v1343_v39 }
 0x192   : > { %v1382_v28 = vmul.f32 0.0625, %v1340_v59 }
 0x193   : > { %v1646_v17 = vsel %vm1642_vm14, %v3395_v32, %v1383_v42 }
 0x194   : > { %v1349_v5 = vpop.xlane.xlu1 %1348  ;;  %v1645_v41 = vsel %vm1642_vm14, %v3398_v21, %v1382_v28 }
 0x195   : > { %v1346_v7 = vpop.xlane.xlu0 %1345  ;;  %v1385_v31 = vmul.f32 0.0625, %v1349_v5 }
 0x196   : > { %v1384_v9 = vmul.f32 0.0625, %v1346_v7 }
 0x197   : > { %v1648_v56 = vsel %vm1642_vm14, %v3401_v55, %v1385_v31 }
 0x198   : > { %v1355_v12 = vpop.xlane.xlu1 %1354  ;;  %v1647_v33 = vsel %vm1642_vm14, %v3404_v27, %v1384_v9 }
 0x199   : > { %v1352_v34 = vpop.xlane.xlu0 %1351  ;;  %v1387_v53 = vmul.f32 0.0625, %v1355_v12 }
 0x19a   : > { %v1386_v44 = vmul.f32 0.0625, %v1352_v34 }
 0x19b   : > { %v1650_v49 = vsel %vm1642_vm14, %v3407_v46, %v1387_v53 }
 0x19c   : > { %v1361_v25 = vpop.xlane.xlu1 %1360  ;;  %v1649_v32 = vsel %vm1642_vm14, %v3410_v54, %v1386_v44 }
 0x19d   : > { %v1358_v45 = vpop.xlane.xlu0 %1357  ;;  %v1389_v4 = vmul.f32 0.0625, %v1361_v25 }
 0x19e   : > { %v1388_v38 = vmul.f32 0.0625, %v1358_v45 }
 0x19f   : > { %v1652_v36 = vsel %vm1642_vm14, %v3413_v18, %v1389_v4 }
 0x1a0   : > { %v1367_v24 = vpop.xlane.xlu1 %1366  ;;  %v1651_v55 = vsel %vm1642_vm14, %v3416_v51, %v1388_v38 }
 0x1a1   : > { %v1364_v61 = vpop.xlane.xlu0 %1363  ;;  %v1391_v30 = vmul.f32 0.0625, %v1367_v24 }
 0x1a2   : > { %v1390_v40 = vmul.f32 0.0625, %v1364_v61 }
 0x1a3   : > { %v1654_v46 = vsel %vm1642_vm14, %v3419_v29, %v1391_v30 }
 0x1a4   : > { %v1373_v10 = vpop.xlane.xlu1 %1372  ;;  %v3466_v54 = vsel %vm1642_vm14, %v3422_v2, %v1390_v40 }
 0x1a5   : > { %v1370_v0 = vpop.xlane.xlu0 %1369  ;;  %v1393_v21 = vmul.f32 0.0625, %v1373_v10 }
 0x1a6   : > { %v1392_v26 = vmul.f32 0.0625, %v1370_v0 }
 0x1a7   : > { %v3472_v51 = vsel %vm1642_vm14, %v3425_v22, %v1393_v21 }
 0x1a8   : > { %v1379_v3 = vpop.xlane.xlu1 %1378  ;;  %v3476_v45 = vsel %vm1642_vm14, %v3428_v8, %v1392_v26 }
 0x1a9   : > { %v1376_v11 = vpop.xlane.xlu0 %1375  ;;  %v3478_v29 = vmul.f32 0.0625, %v1379_v3 }
 0x1aa   : > { %v3480_v10 = vmul.f32 0.0625, %v1376_v11 }
 0x1ac   : > { %v1417_v57 = vpop.xlane.xlu1 %1416 }
 0x1ad   : > { %v1414_v63 = vpop.xlane.xlu0 %1413  ;;  %v1461_v27 = vmul.f32 0.0625, %v1417_v57 }
 0x1ae   : > { %v1460_v15 = vmul.f32 0.0625, %v1414_v63 }
 0x1af   : > { %v1661_v2 = vsel %vm1659_vm15, %v1644_v14, %v1461_v27 }
 0x1b0   : > { %v1423_v1 = vpop.xlane.xlu1 %1422  ;;  %v1660_v0 = vsel %vm1659_vm15, %v1643_v37, %v1460_v15 }
 0x1b1   : > { %v1420_v62 = vpop.xlane.xlu0 %1419  ;;  %v1463_v39 = vmul.f32 0.0625, %v1423_v1 }
 0x1b2   : > { %v1462_v59 = vmul.f32 0.0625, %v1420_v62 }
 0x1b3   : > { %v1663_v57 = vsel %vm1659_vm15, %v1646_v17, %v1463_v39 }
 0x1b4   : > { %v1429_v19 = vpop.xlane.xlu1 %1428  ;;  %v1662_v63 = vsel %vm1659_vm15, %v1645_v41, %v1462_v59 }
 0x1b5   : > { %v1426_v20 = vpop.xlane.xlu0 %1425  ;;  %v1465_v5 = vmul.f32 0.0625, %v1429_v19 }
 0x1b6   : > { %v1464_v7 = vmul.f32 0.0625, %v1426_v20 }
 0x1b7   : > { %v1665_v22 = vsel %vm1659_vm15, %v1648_v56, %v1465_v5 }
 0x1b8   : > { %v1435_v43 = vpop.xlane.xlu1 %1434  ;;  %v1664_v1 = vsel %vm1659_vm15, %v1647_v33, %v1464_v7 }
 0x1b9   : > { %v1432_v6 = vpop.xlane.xlu0 %1431  ;;  %v1467_v34 = vmul.f32 0.0625, %v1435_v43 }
 0x1ba   : > { %v1466_v18 = vmul.f32 0.0625, %v1432_v6 }
 0x1bb   : > { %v1667_v62 = vsel %vm1659_vm15, %v1650_v49, %v1467_v34 }
 0x1bc   : > { %v1441_v52 = vpop.xlane.xlu1 %1440  ;;  %v1666_v3 = vsel %vm1659_vm15, %v1649_v32, %v1466_v18 }
 0x1bd   : > { %v1438_v35 = vpop.xlane.xlu0 %1437  ;;  %v1469_v24 = vmul.f32 0.0625, %v1441_v52 }
 0x1be   : > { %v1468_v61 = vmul.f32 0.0625, %v1438_v35 }
 0x1bf   : > { %v1669_v43 = vsel %vm1659_vm15, %v1652_v36, %v1469_v24 }
 0x1c0   : > { %v1447_v16 = vpop.xlane.xlu1 %1446  ;;  %v1668_v6 = vsel %vm1659_vm15, %v1651_v55, %v1468_v61 }
 0x1c1   : > { %v1444_v48 = vpop.xlane.xlu0 %1443  ;;  %v1471_v50 = vmul.f32 0.0625, %v1447_v16 }
 0x1c2   : > { %v1470_v13 = vmul.f32 0.0625, %v1444_v48 }
 0x1c3   : > { %v1671_v30 = vsel %vm1659_vm15, %v1654_v46, %v1471_v50 }
 0x1c4   : > { %v3444_v58 = vpop.xlane.xlu1 %1452 }
 0x1c5   : > { %v3450_v47 = vpop.xlane.xlu0 %1449  ;;  %v1473_v40 = vmul.f32 0.0625, %v3444_v58 }
 0x1c6   : > { %v1472_v49 = vmul.f32 0.0625, %v3450_v47 }
 0x1c7   : > { %v1673_v18 = vsel %vm1659_vm15, %v3472_v51, %v1473_v40 }
 0x1c8   : > { %v3460_v12 = vpop.xlane.xlu1 %1458  ;;  %v1672_v24 = vsel %vm1659_vm15, %v3476_v45, %v1472_v49 }
 0x1c9   : > { %v3468_v25 = vpop.xlane.xlu0 %1455 }
 0x1cc   : > { %v2056_v8 = vpop.permute.xlu1 %2055 }
 0x1cd   : > { %v2058_v11 = vunpack.i.h.bf16 %v2056_v8  ;;  %v2057_v19 = vunpack.i.l.bf16 %v2056_v8  ;;  %v2051_v20 = vpop.permute.xlu0 %2050 }
 0x1ce   : > { %v2053_v52 = vunpack.i.h.bf16 %v2051_v20  ;;  %v2052_v35 = vunpack.i.l.bf16 %v2051_v20 }
 0x1cf   : > { %v1680_v42 = vsel %vm1676_vm0, %v1663_v57, %v2058_v11  ;;  %v1679_v28 = vsel %vm1676_vm0, %v1662_v63, %v2057_v19 }
 0x1d0   : > { %v1697_v31 = vsel %vm1693_vm1, %v1680_v42, 0.0  ;;  %v1696_v9 = vsel %vm1693_vm1, %v1679_v28, 0.0  ;;  %v1678_v53 = vsel %vm1676_vm0, %v1661_v2, %v2053_v52  ;;  %v1677_v44 = vsel %vm1676_vm0, %v1660_v0, %v2052_v35  ;;  %v2061_v16 = vpop.permute.xlu1 %2060 }
 0x1d1   : > { %v1969_v48 = vpack.c.bf16 %v1697_v31, %v1696_v9  ;;  %v1695_v4 = vsel %vm1693_vm1, %v1678_v53, 0.0  ;;  %v1694_v38 = vsel %vm1693_vm1, %v1677_v44, 0.0  ;;  %v2063_v14 = vunpack.i.h.bf16 %v2061_v16  ;;  %v2071_v37 = vpop.permute.xlu0 %2070 }
 0x1d2   : > { %v1964_v17 = vpack.c.bf16 %v1695_v4, %v1694_v38  ;;  %v2062_v41 = vunpack.i.l.bf16 %v2061_v16  ;;  %v2073_v56 = vunpack.i.h.bf16 %v2071_v37  ;;  %v2072_v33 = vunpack.i.l.bf16 %v2071_v37 }
 0x1d3   : > { %2001 = vst [vmem:[%s3498_s3 + $0x8] sm:$0xff] %v1969_v48   ;;  %v1682_v32 = vsel %vm1676_vm0, %v1665_v22, %v2063_v14  ;;  %v1475_v0 = vmul.f32 0.0625, %v3460_v12  ;;  %v1474_v12 = vmul.f32 0.0625, %v3468_v25  ;;  %v1658_v52 = vsel %vm1642_vm14, %v3431_v23, %v3478_v29 }
 0x1d4   : > { %1965 = vst [vmem:[%s3498_s3] sm:$0xff] %v1964_v17   ;;  %v1699_v21 = vsel %vm1693_vm1, %v1682_v32, 0.0  ;;  %v1681_v26 = vsel %vm1676_vm0, %v1664_v1, %v2062_v41  ;;  %v1686_v36 = vsel %vm1676_vm0, %v1669_v43, %v2073_v56  ;;  %v1685_v55 = vsel %vm1676_vm0, %v1668_v6, %v2072_v33  ;;  %v2066_v27 = vpop.permute.xlu1 %2065 }
 0x1d5   : > { %v1698_v15 = vsel %vm1693_vm1, %v1681_v26, 0.0  ;;  %v1703_v58 = vsel %vm1693_vm1, %v1686_v36, 0.0  ;;  %v1702_v47 = vsel %vm1693_vm1, %v1685_v55, 0.0  ;;  %v2068_v39 = vunpack.i.h.bf16 %v2066_v27  ;;  %v2081_v59 = vpop.permute.xlu0 %2080 }
 0x1d6   : > { %v1974_v5 = vpack.c.bf16 %v1699_v21, %v1698_v15  ;;  %v1984_v7 = vpack.c.bf16 %v1703_v58, %v1702_v47  ;;  %v2067_v46 = vunpack.i.l.bf16 %v2066_v27  ;;  %v2083_v34 = vunpack.i.h.bf16 %v2081_v59 }
 0x1d7   : > { %v1684_v61 = vsel %vm1676_vm0, %v1667_v62, %v2068_v39  ;;  %v2082_v2 = vunpack.i.l.bf16 %v2081_v59  ;;  %v1657_v42 = vsel %vm1642_vm14, %v3434_v60, %v3480_v10  ;;  %v1675_v31 = vsel %vm1659_vm15, %v1658_v52, %v1475_v0 }
 0x1d8   : > { %2002 = vst [vmem:[%s3498_s3 + $0x10] sm:$0xff] %v1974_v5   ;;  %2004 = vst [vmem:[%s3498_s3 + $0x20] sm:$0xff] %v1984_v7   ;;  %v1701_v57 = vsel %vm1693_vm1, %v1684_v61, 0.0  ;;  %v1683_v63 = vsel %vm1676_vm0, %v1666_v3, %v2067_v46  ;;  %v1690_v22 = vsel %vm1676_vm0, %v1673_v18, %v2083_v34  ;;  %v2076_v1 = vpop.permute.xlu1 %2075  ;;  %v1670_v3 = vsel %vm1659_vm15, %v3466_v54, %v1470_v13 }
 0x1d9   : > { %v1700_v51 = vsel %vm1693_vm1, %v1683_v63, 0.0  ;;  %v1707_v8 = vsel %vm1693_vm1, %v1690_v22, 0.0  ;;  %v1689_v45 = vsel %vm1676_vm0, %v1672_v24, %v2082_v2  ;;  %v2078_v62 = vunpack.i.h.bf16 %v2076_v1 }
 0x1da   : > { %v1979_v11 = vpack.c.bf16 %v1701_v57, %v1700_v51  ;;  %v1706_v19 = vsel %vm1693_vm1, %v1689_v45, 0.0  ;;  %v2077_v20 = vunpack.i.l.bf16 %v2076_v1  ;;  %v1674_v23 = vsel %vm1659_vm15, %v1657_v42, %v1474_v12 }
 0x1db   : > { %v1994_v43 = vpack.c.bf16 %v1707_v8, %v1706_v19  ;;  %v1688_v6 = vsel %vm1676_vm0, %v1671_v30, %v2078_v62 }
 0x1dc   : > { %2003 = vst [vmem:[%s3498_s3 + $0x18] sm:$0xff] %v1979_v11   ;;  %v1705_v35 = vsel %vm1693_vm1, %v1688_v6, 0.0  ;;  %v1687_v25 = vsel %vm1676_vm0, %v1670_v3, %v2077_v20  ;;  %v2086_v50 = vpop.permute.xlu1 %2085 }
 0x1dd   : > { %2006 = vst [vmem:[%s3498_s3 + $0x30] sm:$0xff] %v1994_v43   ;;  %v1704_v54 = vsel %vm1693_vm1, %v1687_v25, 0.0  ;;  %v2088_v13 = vunpack.i.h.bf16 %v2086_v50  ;;  %v2087_v28 = vunpack.i.l.bf16 %v2086_v50 }
 0x1de   : > { %v1989_v29 = vpack.c.bf16 %v1705_v35, %v1704_v54 }
 0x1df   : > { %v1692_v9 = vsel %vm1676_vm0, %v1675_v31, %v2088_v13  ;;  %v1691_v53 = vsel %vm1676_vm0, %v1674_v23, %v2087_v28 }
 0x1e0   : > { %2005 = vst [vmem:[%s3498_s3 + $0x28] sm:$0xff] %v1989_v29   ;;  %v1709_v44 = vsel %vm1693_vm1, %v1692_v9, 0.0  ;;  %v1708_v16 = vsel %vm1693_vm1, %v1691_v53, 0.0 }
 0x1e1   : > { %v1999_v60 = vpack.c.bf16 %v1709_v44, %v1708_v16 }
 0x1e3   : > { %2007 = vst [vmem:[%s3498_s3 + $0x38] sm:$0xff] %v1999_v60  }
 0x1e4 PF: > { %s12_s13 = sadd.s32 1, %s2143_s13   ;;  %s3612_s9 = smov %s2135_s11 }
 0x1e5   : > { %p9_p7 = scmp.ge.s32.totalorder %s12_s13, 6   ;;  %s3613_s10 = smov %s2139_s12 }
 0x1e6   : > { %s3614_s11 = smov %s3617_s14  ;;  %s3615_s12 = smov %s3621_s15 }
 0x1e7   :  { %11 = sbr.rel (!%p9_p7) target bundleno = 3 (0x3), region = 61 }

// kernel: matchnet2_forward.8
= control target key start
LH: loop header
LB: loop body
LE: loop exit
PB: predicated region body
PF: predicated region fallthrough
CT: control target
= control target key end

     0   :  { %s3803_s21 = smov 0   ;;  %s3805_s22 = smov 0   ;;  %s4456_s0 = inlined_call_operand.vmem [shape: bf16[2,16,16,128], index: 0, kind: input, shape index: {}, may-alias: {0,1,2}]   ;;  %s4457_s1 = inlined_call_operand.vmem [shape: bf16[2,16,16,128], index: 1, kind: input, shape index: {}, may-alias: {0,1,2}]   ;;  %s4458_s2 = inlined_call_operand.vmem [shape: bf16[2,16,16,128], index: 2, kind: input, shape index: {}, may-alias: {0,1,2}]   ;;  %s4459_s3 = inlined_call_operand.vmem [shape: bf16[3,3,128,128], index: 3, kind: input, shape index: {}]   ;;  %s4460_s4 = inlined_call_operand.vmem [shape: f32[1,128], index: 4, kind: input, shape index: {}]   ;;  %s4461_s5 = inlined_call_operand.vmem [shape: f32[1,128], index: 5, kind: input, shape index: {}]   ;;  %s4462_s6 = inlined_call_operand.vmem [shape: bf16[2,16,16,128], index: 6, kind: output, shape index: {}]  }
   0x1   :  { %s3807_s23 = smov 0   ;;  %s3809_s24 = smov 0  }
   0x2   :  { %s3811_s25 = smov 0  }
   0x3 LB: > { %s25_s26 = sadd.s32 1, %s3758_s23  ;;  %s28_s27 = sadd.s32 1, %s3762_s24  ;;  %s3766_s25 = sphi %s3811_s25, %s16_s25   ;;  %s3762_s24 = sphi %s3809_s24, %s4469_s24   ;;  %s3758_s23 = sphi %s3807_s23, %s4468_s23   ;;  %s3754_s22 = sphi %s3805_s22, %s4467_s22   ;;  %s3750_s21 = sphi %s3803_s21, %s4466_s21  }
   0x4   : > { %p26_p0 = scmp.ge.s32.totalorder %s25_s26, 2  ;;  %p2699_p1 = scmp.ge.s32.totalorder %s3766_s25, 1 }
   0x5   : > { %p298_p2 = scmp.lt.s32.totalorder %s3766_s25, 5 }
   0x6   : > { %s4471_s26 = smov (%p26_p0, %s25_s26), 0  ;;  %s4473_s27 = smov (!%p26_p0, %s28_s27), %s3762_s24 }
   0x7   : > { %p299_p3 = pnand %p2699_p1, %p298_p2  ;;  %p30_p4 = scmp.ge.s32.totalorder %s4473_s27, 2 }
   0x8   : > { %v3648_v0 = vld [vmem:[%s4459_s3 + $0x40] sm:$0xff] (!%p299_p3)   ;;  %s3841_s30 = sshll.u32 (!%p299_p3), %s3750_s21, 3  ;;  %v3650_v2 = vld [vmem:[%s4459_s3 + $0x48] sm:$0xff] (!%p299_p3)   ;;  %p368_p6 = scmp.lt.s32.totalorder (!%p299_p3), %s3754_s22, 1  ;;  %v3652_v4 = vld [vmem:[%s4459_s3 + $0x50] sm:$0xff] (!%p299_p3)   ;;  %vm590_vm0 = vcmask (!%p299_p3), 1040384  }
   0x9   : > { %s4475_s27 = smov (%p30_p4, %s4473_s27), 0  ;;  %302 = sbr.rel (%p299_p3) target bundleno = 419 (0x1a3), region = 44 }
   0xa   : > { %v3649_v1 = vld [vmem:[%s4459_s3 + $0x100] sm:$0xff] (!%p299_p3)   ;;  %s2701_s9 = sadd.s32 (!%p299_p3), 4294967295, %s3841_s30  ;;  %3176 = vmatprep.subr.bf16.mxu1 (!%p299_p3), %v3648_v0  ;;  %v3651_v3 = vld [vmem:[%s4459_s3 + $0x108] sm:$0xff] (!%p299_p3)   ;;  %v3653_v5 = vld [vmem:[%s4459_s3 + $0x110] sm:$0xff] (!%p299_p3)   ;;  %p384_p8 = scmp.lt.s32.totalorder (!%p299_p3), %s3841_s30, 15  ;;  %vm1057_vm4 = vcmask (!%p299_p3), 1046528  }
   0xb   : > { %p366_p5 = scmp.gt.s32.totalorder (!%p299_p3), %s2701_s9, 0  ;;  %3304 = vmatprep.subr.bf16.mxu0 (!%p299_p3), %v3649_v1  ;;  %3177 = vmatpush3.bf16.msra.mxu1 (!%p299_p3), %v3648_v0  ;;  %p2702_p7 = scmp.lt.s32.totalorder (!%p299_p3), %s2701_s9, 15  ;;  %v3654_v6 = vld [vmem:[%s4459_s3 + $0x58] sm:$0xff] (!%p299_p3)   ;;  %v3656_v8 = vld [vmem:[%s4459_s3 + $0x60] sm:$0xff] (!%p299_p3)   ;;  %v3658_v10 = vld [vmem:[%s4459_s3 + $0x68] sm:$0xff] (!%p299_p3)  }
   0xc   : > { %3305 = vmatpush3.bf16.msra.mxu0 (!%p299_p3), %v3649_v1  ;;  %3178 = vmatprep.subr.bf16.mxu1 (!%p299_p3), %v3650_v2  ;;  %v3655_v7 = vld [vmem:[%s4459_s3 + $0x118] sm:$0xff] (!%p299_p3)   ;;  %p421_p9 = scmp.lt.s32.totalorder (!%p299_p3), %s3750_s21, 1  ;;  %v3657_v9 = vld [vmem:[%s4459_s3 + $0x120] sm:$0xff] (!%p299_p3)   ;;  %v3659_v12 = vld [vmem:[%s4459_s3 + $0x128] sm:$0xff] (!%p299_p3)   ;;  %vm591_vm1 = vsmask.f32 (!%p299_p3), 256 }
   0xd   : > { %3306 = vmatprep.subr.bf16.mxu0 (!%p299_p3), %v3651_v3  ;;  %v3660_v15 = vld [vmem:[%s4459_s3 + $0x70] sm:$0xff] (!%p299_p3)   ;;  %v3662_v22 = vld [vmem:[%s4459_s3 + $0x78] sm:$0xff] (!%p299_p3)   ;;  %vm3916_vm2 = vmand (!%p299_p3), %vm590_vm0, %vm591_vm1  ;;  %vm629_vm3 = vsmask.f32 (!%p299_p3), 7424 }
   0xe   : > { %v3661_v16 = vld [vmem:[%s4459_s3 + $0x130] sm:$0xff] (!%p299_p3)   ;;  %v3663_v26 = vld [vmem:[%s4459_s3 + $0x138] sm:$0xff] (!%p299_p3)   ;;  %v3928_v39 = vld [vmem:[%s4459_s3] sm:$0xff] (!%p299_p3)  }
   0xf   : > { %3179 = vmatpush3.bf16.msra.mxu1 (!%p299_p3), %v3650_v2  ;;  %v3667_v51 = vld [vmem:[%s4459_s3 + $0x140] sm:$0xff] (!%p299_p3)  }
  0x10   : > { %s367_s16 = scalar_select %p366_p5, %s2701_s9, 0  ;;  %3307 = vmatpush3.bf16.msra.mxu0 %v3651_v3  ;;  %3180 = vmatprep.subr.bf16.mxu1 %v3652_v4 }
  0x11   : > { %s4477_s22 = smov (!%p368_p6, %s3754_s22), 1  ;;  %3308 = vmatprep.subr.bf16.mxu0 %v3653_v5 }
  0x12   : > { %s3861_s19 = sshll.u32 %s4477_s22, 5  ;;  %s4479_s16 = smov (!%p2702_p7, %s367_s16), 15 }
  0x13   : > { %s2707_s8 = sshll.u32 %s4479_s16, 1  ;;  %3181 = vmatpush3.bf16.msra.mxu1 %v3652_v4 }
  0x14   : > { %s374_s22 = sadd.s32 %s3861_s19, %s2707_s8  ;;  %3309 = vmatpush3.bf16.msra.mxu0 %v3653_v5  ;;  %3182 = vmatprep.subr.bf16.mxu1 %v3654_v6 }
  0x15   : > { %s2709_s11 = sshll.u32 %s374_s22, 2  ;;  %3310 = vmatprep.subr.bf16.mxu0 %v3655_v7 }
  0x16   : > { %s376_s16 = scalar_lea.vmem %s4456_s0, %s2709_s11 }
  0x17   : > { %s385_s17 = scalar_select %p384_p8, %s3841_s30, 15  ;;  %3183 = vmatpush3.bf16.msra.mxu1 %v3654_v6  ;;  %v2978_v11 = vld [vmem:[%s376_s16] sm:$0xff]  }
  0x18   : > { %s422_s18 = scalar_select %p421_p9, %s3750_s21, 1  ;;  %3311 = vmatpush3.bf16.msra.mxu0 %v3655_v7  ;;  %3184 = vmatprep.subr.bf16.mxu1 %v3656_v8  ;;  %v2979_v13 = vunpack.c.l.bf16 %v2978_v11  ;;  %v2980_v14 = vunpack.c.h.bf16 %v2978_v11  ;;  %v3668_v11 = vld [vmem:[%s4459_s3 + $0x8] sm:$0xff]  }
  0x19   : > { %s2711_s29 = sshll.u32 %s385_s17, 1  ;;  %3312 = vmatprep.subr.bf16.mxu0 %v3657_v9 }
  0x1a   : > { %s3890_s22 = sadd.s32 %s2711_s29, %s3861_s19  ;;  %s423_s9 = scvt.s32.f32 %s422_s18 }
  0x1b   : > { %s2713_s12 = sshll.u32 %s3890_s22, 2  ;;  %3185 = vmatpush3.bf16.msra.mxu1 %v3656_v8 }
  0x1c   : > { %s3904_s17 = scalar_lea.vmem %s4457_s1, %s2713_s12  ;;  %v432_v17 = vstv %s423_s9  ;;  %3313 = vmatpush3.bf16.msra.mxu0 %v3657_v9  ;;  %3186 = vmatprep.subr.bf16.mxu1 %v3658_v10  ;;  %s424_s9 = ssub.s32 1, %s3750_s21 }
  0x1d   : > { %v433_v18 = vmul.f32 %v2979_v13, %v432_v17  ;;  %v434_v19 = vmul.f32 %v2980_v14, %v432_v17  ;;  %v3664_v20 = vld [vmem:[%s3904_s17] sm:$0xff]   ;;  %3314 = vmatprep.subr.bf16.mxu0 %v3659_v12  ;;  %v3666_v21 = vld [vmem:[%s3904_s17 + $0x8] sm:$0xff]   ;;  %v3670_v32 = vld [vmem:[%s3904_s17 + $0x10] sm:$0xff]   ;;  %p425_p11 = scmp.lt.s32.totalorder %s424_s9, 1  ;;  %s4407_s8 = scalar_lea.vmem %s4462_s6, %s2713_s12 }
  0x1e   : > { %v508_v24 = vshrl.u32 %v3664_v20, 16  ;;  %v511_v25 = vshll.u32 %v3664_v20, 16  ;;  %v515_v27 = vshrl.u32 %v3666_v21, 16  ;;  %v518_v28 = vshll.u32 %v3666_v21, 16  ;;  %v3672_v47 = vld [vmem:[%s3904_s17 + $0x18] sm:$0xff]   ;;  %v3676_v4 = vld [vmem:[%s3904_s17 + $0x20] sm:$0xff]  }
  0x1f   : > { %v435_v23 = vpack.c.bf16 %v434_v19, %v433_v18  ;;  %3187 = vmatpush3.bf16.msra.mxu1 %v3658_v10  ;;  %v522_v42 = vshrl.u32 %v3670_v32, 16  ;;  %v525_v55 = vshll.u32 %v3670_v32, 16  ;;  %v529_v63 = vshrl.u32 %v3672_v47, 16  ;;  %s4485_s9 = smov (!%p425_p11, %s424_s9), 1 }
  0x20   : > { %3315 = vmatpush3.bf16.msra.mxu0 %v3659_v12  ;;  %3188 = vmatprep.subr.bf16.mxu1 %v3660_v15  ;;  %v510_v31 = vrot.slane %v508_v24, 7  ;;  %v517_v34 = vrot.slane %v515_v27, 7  ;;  %v532_v3 = vshll.u32 %v3672_v47, 16  ;;  %v3669_v12 = vld [vmem:[%s4459_s3 + $0x148] sm:$0xff]   ;;  %v536_v14 = vshrl.u32 %v3676_v4, 16  ;;  %s427_s7 = scvt.s32.f32 %s4485_s9 }
  0x21   : > { %v501_v29 = vshrl.u32 %v435_v23, 16  ;;  %v504_v30 = vshll.u32 %v435_v23, 16  ;;  %3316 = vmatprep.subr.bf16.mxu0 %v3661_v16  ;;  %v524_v62 = vrot.slane %v522_v42, 7  ;;  %v531_v8 = vrot.slane %v529_v63, 7  ;;  %v3678_v23 = vld [vmem:[%s3904_s17 + $0x28] sm:$0xff]  }
  0x22   : > { %v513_v36 = vor.u32 %v511_v25, %v510_v31  ;;  %v3922_v37 = vsel %vm3916_vm2, %v510_v31, 0  ;;  %v520_v40 = vor.u32 %v518_v28, %v517_v34  ;;  %v3932_v41 = vsel %vm3916_vm2, %v517_v34, 0 }
  0x23   : > { %v503_v35 = vrot.slane %v501_v29, 7  ;;  %3189 = vmatpush3.bf16.msra.mxu1 %v3660_v15  ;;  %v650_v38 = vshll.u32 %v3922_v37, 16  ;;  %v662_v46 = vshll.u32 %v3932_v41, 16  ;;  %v527_v6 = vor.u32 %v525_v55, %v524_v62 }
  0x24   : > { %3317 = vmatpush3.bf16.msra.mxu0 %v3661_v16  ;;  %3190 = vmatprep.subr.bf16.mxu1 %v3662_v22  ;;  %v3940_v45 = vsel %vm3916_vm2, 0, %v513_v36  ;;  %v3956_v54 = vsel %vm3916_vm2, 0, %v520_v40  ;;  %v3966_v7 = vsel %vm3916_vm2, %v524_v62, 0  ;;  %v534_v17 = vor.u32 %v532_v3, %v531_v8  ;;  %v3671_v40 = vld [vmem:[%s4459_s3 + $0x10] sm:$0xff]  }
  0x25   : > { %v506_v43 = vor.u32 %v504_v30, %v503_v35  ;;  %v3936_v44 = vsel %vm3916_vm2, %v503_v35, 0  ;;  %3318 = vmatprep.subr.bf16.mxu0 %v3663_v26  ;;  %v643_v49 = vshrl.u32 %v3940_v45, 16  ;;  %v645_v50 = vshll.u32 %v3940_v45, 16 }
  0x26   : > { %v638_v48 = vshll.u32 %v3936_v44, 16  ;;  %v652_v53 = vrot.slane %v650_v38, 1  ;;  %v664_v59 = vrot.slane %v662_v46, 1  ;;  %v655_v60 = vshrl.u32 %v3956_v54, 16 }
  0x27   : > { %v3952_v52 = vsel %vm3916_vm2, 0, %v506_v43  ;;  %3191 = vmatpush3.bf16.msra.mxu1 %v3662_v22  ;;  %v647_v58 = vrot.slane %v645_v50, 1  ;;  %v657_v61 = vshll.u32 %v3956_v54, 16  ;;  %v674_v13 = vshll.u32 %v3966_v7, 16 }
  0x28   : > { %v631_v56 = vshrl.u32 %v3952_v52, 16  ;;  %v633_v57 = vshll.u32 %v3952_v52, 16  ;;  %3319 = vmatpush3.bf16.msra.mxu0 %v3663_v26  ;;  %3208 = vmatprep.subr.bf16.mxu1 %v3928_v39  ;;  %v640_v1 = vrot.slane %v638_v48, 1  ;;  %v3978_v16 = vsel %vm3916_vm2, 0, %v527_v6  ;;  %v3682_v48 = vld [vmem:[%s3904_s17 + $0x30] sm:$0xff]  }
  0x29   : > { %v648_v2 = vor.u32 %v647_v58, %v643_v49  ;;  %3336 = vmatprep.subr.bf16.mxu0 %v3667_v51  ;;  %v659_v5 = vrot.slane %v657_v61, 1  ;;  %v3982_v18 = vsel %vm3916_vm2, %v531_v8, 0  ;;  %v667_v20 = vshrl.u32 %v3978_v16, 16 }
  0x2a   : > { %v635_v0 = vrot.slane %v633_v57, 1  ;;  %v669_v21 = vshll.u32 %v3978_v16, 16  ;;  %v676_v22 = vrot.slane %v674_v13, 1  ;;  %v3993_v25 = vsel %vm3916_vm2, 0, %v534_v17 }
  0x2b   : > { %v653_v10 = vsel %vm629_vm3, %v648_v2, %v652_v53  ;;  %v660_v15 = vor.u32 %v659_v5, %v655_v60  ;;  %v686_v26 = vshll.u32 %v3982_v18, 16  ;;  %v538_v27 = vrot.slane %v536_v14, 7 }
  0x2c   : > { %v636_v9 = vor.u32 %v635_v0, %v631_v56  ;;  %3320 = vmatprep.mubr.bf16.mxu0 %v653_v10  ;;  %v671_v28 = vrot.slane %v669_v21, 1  ;;  %v679_v29 = vshrl.u32 %v3993_v25, 16  ;;  %v681_v30 = vshll.u32 %v3993_v25, 16  ;;  %v3675_v56 = vld [vmem:[%s4459_s3 + $0x158] sm:$0xff]  }
  0x2d   : > { %v3989_v24 = vsel %vm629_vm3, %v660_v15, %v664_v59  ;;  %v539_v31 = vshll.u32 %v3676_v4, 16  ;;  %v688_v32 = vrot.slane %v686_v26, 1  ;;  %v4002_v34 = vsel %vm3916_vm2, %v538_v27, 0  ;;  %v3677_v4 = vld [vmem:[%s4459_s3 + $0x20] sm:$0xff]   ;;  %v3680_v26 = vld [vmem:[%s4459_s3 + $0x28] sm:$0xff]  }
  0x2e   : > { %v641_v19 = vsel %vm629_vm3, %v636_v9, %v640_v1  ;;  %3321 = vmatmul.mubr.bf16.vlgmr.msra.gmra.mrb[0].mxu0 %v3989_v24  ;;  %v543_v35 = vshrl.u32 %v3678_v23, 16  ;;  %v546_v36 = vshll.u32 %v3678_v23, 16  ;;  %v672_v38 = vor.u32 %v671_v28, %v667_v20  ;;  %v3684_v1 = vld [vmem:[%s3904_s17 + $0x38] sm:$0xff]   ;;  %s2960_s17 = sadd.s32 8, %s3841_s30 }
  0x2f   : > { %3192 = vmatprep.mubr.bf16.mxu1 %v641_v19  ;;  %3337 = vmatpush3.bf16.msra.mxu0 %v3667_v51  ;;  %v683_v42 = vrot.slane %v681_v30, 1  ;;  %v541_v43 = vor.u32 %v539_v31, %v538_v27  ;;  %v698_v46 = vshll.u32 %v4002_v34, 16  ;;  %v3674_v51 = vld [vmem:[%s4459_s3 + $0x18] sm:$0xff]   ;;  %v550_v63 = vshrl.u32 %v3682_v48, 16  ;;  %v3681_v31 = vld [vmem:[%s4459_s3 + $0x168] sm:$0xff]   ;;  %p4130_p10 = scmp.lt.s32.totalorder %s2960_s17, 15 }
  0x30   : > { %3193 = vmatmul.mubr.bf16.vlgmr.msra.gmra.mrb[0].mxu1 %v653_v10  ;;  %3338 = vmatprep.subr.bf16.mxu0 %v3669_v12  ;;  %v545_v47 = vrot.slane %v543_v35, 7  ;;  %v4014_v49 = vsel %vm629_vm3, %v672_v38, %v676_v22  ;;  %v553_v0 = vshll.u32 %v3682_v48, 16  ;;  %v560_v13 = vshll.u32 %v3684_v1, 16 }
  0x31   : > { %3209 = vmatpush3.bf16.msra.mxu1 %v3928_v39  ;;  %v3673_v39 = vld [vmem:[%s4459_s3 + $0x150] sm:$0xff]   ;;  %3196 = vmatprep.mubr.bf16.mxu1 %v3989_v24  ;;  %v684_v50 = vor.u32 %v683_v42, %v679_v29  ;;  %v4021_v53 = vsel %vm3916_vm2, 0, %v541_v43  ;;  %v700_v55 = vrot.slane %v698_v46, 1  ;;  %v552_v8 = vrot.slane %v550_v63, 7  ;;  %s4481_s17 = smov (!%p4130_p10, %s2960_s17), 15 }
  0x32   : > { %3210 = vmatprep.subr.bf16.mxu1 %v3668_v11  ;;  %v691_v57 = vshrl.u32 %v4021_v53, 16  ;;  %v693_v58 = vshll.u32 %v4021_v53, 16  ;;  %v548_v59 = vor.u32 %v546_v36, %v545_v47  ;;  %v4030_v60 = vsel %vm3916_vm2, %v545_v47, 0  ;;  %3324 = vmatprep.mubr.bf16.mxu0 %v4014_v49  ;;  %v3683_v42 = vld [vmem:[%s4459_s3 + $0x30] sm:$0xff]   ;;  %s4483_s17 = smov (!%p4130_p10, %s4481_s17), 15 }
  0x33   : > { %3339 = vmatpush3.bf16.msra.mxu0 %v3669_v12  ;;  %v4034_v61 = vsel %vm629_vm3, %v684_v50, %v688_v32  ;;  %v710_v62 = vshll.u32 %v4030_v60, 16  ;;  %v557_v12 = vshrl.u32 %v3684_v1, 16  ;;  %v555_v15 = vor.u32 %v553_v0, %v552_v8  ;;  %v3685_v47 = vld [vmem:[%s4459_s3 + $0x170] sm:$0xff]   ;;  %v3688_v0 = vld [vmem:[%s4459_s3 + $0x80] sm:$0xff]   ;;  %s2718_s13 = sshll.u32 %s4483_s17, 1 }
  0x34   : > { %3340 = vmatprep.subr.bf16.mxu0 %v3673_v39  ;;  %v695_v2 = vrot.slane %v693_v58, 1  ;;  %v4040_v3 = vsel %vm3916_vm2, 0, %v548_v59  ;;  %v4054_v17 = vsel %vm3916_vm2, %v552_v8, 0  ;;  %v3686_v58 = vld [vmem:[%s4459_s3 + $0x38] sm:$0xff]   ;;  %v1064_v1 = vrot.slane %v3956_v54, 1  ;;  %s402_s21 = sadd.s32 %s2718_s13, %s3861_s19 }
  0x35   : > { %3211 = vmatpush3.bf16.msra.mxu1 %v3668_v11  ;;  %v703_v5 = vshrl.u32 %v4040_v3, 16  ;;  %v705_v6 = vshll.u32 %v4040_v3, 16  ;;  %v712_v10 = vrot.slane %v710_v62, 1  ;;  %v3679_v11 = vld [vmem:[%s4459_s3 + $0x160] sm:$0xff]   ;;  %v722_v20 = vshll.u32 %v4054_v17, 16  ;;  %v3687_v62 = vld [vmem:[%s4459_s3 + $0x178] sm:$0xff]  }
  0x36   : > { %3212 = vmatprep.subr.bf16.mxu1 %v3671_v40  ;;  %3325 = vmatmul.mubr.bf16.gmra.mrb[4].mxu0 %v4034_v61  ;;  %v696_v9 = vor.u32 %v695_v2, %v691_v57  ;;  %v559_v21 = vrot.slane %v557_v12, 7  ;;  %v4064_v23 = vsel %vm3916_vm2, 0, %v555_v15  ;;  %v1067_v2 = vrot.slane %v3978_v16, 1  ;;  %v3693_v12 = vld [vmem:[%s4459_s3 + $0x190] sm:$0xff]   ;;  %v3694_v15 = vld [vmem:[%s4459_s3 + $0x98] sm:$0xff]   ;;  %s2720_s16 = sshll.u32 %s402_s21, 2 }
  0x37   : > { %3341 = vmatpush3.bf16.msra.mxu0 %v3673_v39  ;;  %v707_v14 = vrot.slane %v705_v6, 1  ;;  %v715_v27 = vshrl.u32 %v4064_v23, 16  ;;  %v717_v28 = vshll.u32 %v4064_v23, 16  ;;  %v724_v36 = vrot.slane %v722_v20, 1  ;;  %v3690_v6 = vld [vmem:[%s4459_s3 + $0x88] sm:$0xff]   ;;  %v3695_v20 = vld [vmem:[%s4459_s3 + $0x198] sm:$0xff]   ;;  %s404_s29 = scalar_lea.vmem %s4458_s2, %s2720_s16 }
  0x38   : > { %3197 = vmatmul.mubr.bf16.gmra.mrb[4].mxu1 %v4014_v49  ;;  %3342 = vmatprep.subr.bf16.mxu0 %v3675_v56  ;;  %v4058_v19 = vsel %vm629_vm3, %v696_v9, %v700_v55  ;;  %v562_v29 = vor.u32 %v560_v13, %v559_v21  ;;  %v4079_v32 = vsel %vm3916_vm2, %v559_v21, 0  ;;  %v1061_v55 = vrot.slane %v3940_v45, 1  ;;  %v3692_v9 = vld [vmem:[%s4459_s3 + $0x90] sm:$0xff]   ;;  %v3696_v21 = vld [vmem:[%s4459_s3 + $0xa0] sm:$0xff]  }
  0x39   : > { %3213 = vmatpush3.bf16.msra.mxu1 %v3671_v40  ;;  %3200 = vmatprep.mubr.bf16.mxu1 %v4034_v61  ;;  %v708_v22 = vor.u32 %v707_v14, %v703_v5  ;;  %v719_v35 = vrot.slane %v717_v28, 1  ;;  %v1454_v40 = vshll.u32 %v4079_v32, 16  ;;  %v1073_v13 = vrot.slane %v4021_v53, 1  ;;  %v2982_v28 = vld [vmem:[%s404_s29] sm:$0xff]  }
  0x3a   : > { %3214 = vmatprep.subr.bf16.mxu1 %v3674_v51  ;;  %3328 = vmatprep.mubr.bf16.mxu0 %v4058_v19  ;;  %v4083_v38 = vsel %vm3916_vm2, 0, %v562_v29  ;;  %v1074_v14 = vrot.slane %v4002_v34, 1  ;;  %v440_v29 = vstv %s427_s7 }
  0x3b   : > { %3343 = vmatpush3.bf16.msra.mxu0 %v3675_v56  ;;  %v4072_v30 = vsel %vm629_vm3, %v708_v22, %v712_v10  ;;  %v1447_v39 = vshrl.u32 %v4083_v38, 16  ;;  %v1449_v43 = vshll.u32 %v4083_v38, 16  ;;  %v720_v46 = vor.u32 %v719_v35, %v715_v27  ;;  %v3697_v27 = vld [vmem:[%s4459_s3 + $0x1a0] sm:$0xff]  }
  0x3c   : > { %3344 = vmatprep.subr.bf16.mxu0 %v3679_v11  ;;  %v1456_v50 = vrot.slane %v1454_v40, 1  ;;  %v1062_v56 = vrot.slane %v3922_v37, 1  ;;  %v1065_v37 = vrot.slane %v3932_v41, 1  ;;  %v3689_v41 = vld [vmem:[%s4459_s3 + $0x180] sm:$0xff]   ;;  %v1070_v10 = vrot.slane %v3993_v25, 1 }
  0x3d   : > { %3215 = vmatpush3.bf16.msra.mxu1 %v3674_v51  ;;  %v1451_v48 = vrot.slane %v1449_v43, 1  ;;  %v4098_v51 = vsel %vm629_vm3, %v720_v46, %v724_v36  ;;  %v4178_v34 = vsel %vm1057_vm4, %v1073_v13, %v1074_v14  ;;  %v1076_v22 = vrot.slane %v4040_v3, 1  ;;  %v3708_v13 = vld [vmem:[%s4459_s3 + $0xd0] sm:$0xff]  }
  0x3e   : > { %3216 = vmatprep.subr.bf16.mxu1 %v3677_v4  ;;  %3329 = vmatmul.mubr.bf16.gmra.mrb[8].mxu0 %v4072_v30  ;;  %v4117_v63 = vsel %vm1057_vm4, %v1061_v55, %v1062_v56  ;;  %v4135_v5 = vsel %vm1057_vm4, %v1064_v1, %v1065_v37  ;;  %v1080_v35 = vrot.slane %v4054_v17, 1  ;;  %v2983_v36 = vunpack.c.l.bf16 %v2982_v28  ;;  %v3701_v56 = vld [vmem:[%s4459_s3 + $0x1b0] sm:$0xff]   ;;  %v3703_v1 = vld [vmem:[%s4459_s3 + $0x1b8] sm:$0xff]  }
  0x3f   : > { %3345 = vmatpush3.bf16.msra.mxu0 %v3679_v11  ;;  %3332 = vmatprep.mubr.bf16.mxu0 %v4098_v51  ;;  %v1452_v57 = vor.u32 %v1451_v48, %v1447_v39  ;;  %v1071_v11 = vrot.slane %v3982_v18, 1  ;;  %v2984_v40 = vunpack.c.h.bf16 %v2982_v28  ;;  %v3699_v39 = vld [vmem:[%s4459_s3 + $0x1a8] sm:$0xff]   ;;  %v1640_v55 = vrot.slane %v4079_v32, 1  ;;  %v3709_v14 = vld [vmem:[%s4459_s3 + $0x1d0] sm:$0xff]  }
  0x40   : > { %3201 = vmatmul.mubr.bf16.gmra.mrb[8].mxu1 %v4058_v19  ;;  %3346 = vmatprep.subr.bf16.mxu0 %v3681_v31  ;;  %v441_v43 = vmul.f32 %v2983_v36, %v440_v29  ;;  %v1059_v37 = vrot.slane %v3936_v44, 1  ;;  %v3717_v28 = vld [vmem:[%s4459_s3 + $0x1f0] sm:$0xff]   ;;  %v3721_v36 = vld [vmem:[%s4459_s3 + $0x208] sm:$0xff]  }
  0x41   : > { %3217 = vmatpush3.bf16.msra.mxu1 %v3677_v4  ;;  %3204 = vmatprep.mubr.bf16.mxu1 %v4072_v30  ;;  %v4107_v59 = vsel %vm629_vm3, %v1452_v57, %v1456_v50  ;;  %v1068_v4 = vrot.slane %v3966_v7, 1  ;;  %v3691_v7 = vld [vmem:[%s4459_s3 + $0x188] sm:$0xff]   ;;  %v4167_v18 = vsel %vm1057_vm4, %v1070_v10, %v1071_v11  ;;  %v442_v46 = vmul.f32 %v2984_v40, %v440_v29  ;;  %v3705_v10 = vld [vmem:[%s4459_s3 + $0x1c0] sm:$0xff]   ;;  %v3718_v29 = vld [vmem:[%s4459_s3 + $0xf8] sm:$0xff]  }
  0x42   : > { %3218 = vmatprep.subr.bf16.mxu1 %v3680_v26  ;;  %v1639_v50 = vrot.slane %v4083_v38, 1  ;;  %v1058_v57 = vrot.slane %v3952_v52, 1  ;;  %v3706_v11 = vld [vmem:[%s4459_s3 + $0xc8] sm:$0xff]   ;;  %v3726_v40 = vld [vmem:[%s4459_s3 + $0x230] sm:$0xff]  }
  0x43   : > { %3347 = vmatpush3.bf16.msra.mxu0 %v3681_v31  ;;  %v4148_v8 = vsel %vm1057_vm4, %v1067_v2, %v1068_v4  ;;  %v1079_v31 = vrot.slane %v4064_v23, 1  ;;  %v443_v48 = vpack.c.bf16 %v442_v46, %v441_v43 }
  0x44   : > { %3348 = vmatprep.subr.bf16.mxu0 %v3685_v47  ;;  %v4222_v32 = vsel %vm1057_vm4, %v1639_v50, %v1640_v55  ;;  %v1060_v4 = vsel %vm1057_vm4, %v1058_v57, %v1059_v37 }
  0x45   : > { %3219 = vmatpush3.bf16.msra.mxu1 %v3680_v26  ;;  %v1077_v26 = vrot.slane %v4030_v60, 1  ;;  %v4207_v17 = vsel %vm1057_vm4, %v1079_v31, %v1080_v35  ;;  %v3719_v31 = vld [vmem:[%s4459_s3 + $0x1f8] sm:$0xff]   ;;  %v3720_v35 = vld [vmem:[%s4459_s3 + $0x200] sm:$0xff]  }
  0x46   : > { %3220 = vmatprep.subr.bf16.mxu1 %v3683_v42  ;;  %3333 = vmatmul.mubr.bf16.gmra.mrb[12].mxu0 %v4107_v59 }
  0x47   : > { %3349 = vmatpush3.bf16.msra.mxu0 %v3685_v47  ;;  %3352 = vmatprep.mubr.bf16.mxu0 %v4117_v63  ;;  %v4196_v60 = vsel %vm1057_vm4, %v1076_v22, %v1077_v26  ;;  %v3700_v47 = vld [vmem:[%s4459_s3 + $0xb0] sm:$0xff]   ;;  %v3714_v22 = vld [vmem:[%s4459_s3 + $0xe8] sm:$0xff]  }
  0x48   : > { %3205 = vmatmul.mubr.bf16.gmra.mrb[12].mxu1 %v4098_v51  ;;  %3350 = vmatprep.subr.bf16.mxu0 %v3687_v62  ;;  %v3715_v26 = vld [vmem:[%s4459_s3 + $0x1e8] sm:$0xff]  }
  0x49   : > { %3221 = vmatpush3.bf16.msra.mxu1 %v3683_v42  ;;  %3224 = vmatprep.mubr.bf16.mxu1 %v3952_v52  ;;  %v3698_v42 = vld [vmem:[%s4459_s3 + $0xa8] sm:$0xff]   ;;  %v3702_v52 = vld [vmem:[%s4459_s3 + $0xb8] sm:$0xff]  }
  0x4a   : > { %3222 = vmatprep.subr.bf16.mxu1 %v3686_v58 }
  0x4b   : > { %3351 = vmatpush3.bf16.msra.mxu0 %v3687_v62  ;;  %v567_v62 = vshll.u32 %v443_v48, 16 }
  0x4c   : > { %3368 = vmatprep.subr.bf16.mxu0 %v3689_v41 }
  0x4d   : > { %3223 = vmatpush3.bf16.msra.mxu1 %v3686_v58  ;;  %v564_v58 = vshrl.u32 %v443_v48, 16 }
  0x4e   : > { %3240 = vmatprep.subr.bf16.mxu1 %v3688_v0  ;;  %3353 = vmatmul.mubr.bf16.vlgmr.msra.gmra.mrb[0].mxu0 %v4135_v5 }
  0x4f   : > { %3369 = vmatpush3.bf16.msra.mxu0 %v3689_v41  ;;  %3356 = vmatprep.mubr.bf16.mxu0 %v4148_v8 }
  0x50   : > { %3225 = vmatmul.mubr.bf16.vlgmr.msra.gmra.mrb[0].mxu1 %v3940_v45  ;;  %3370 = vmatprep.subr.bf16.mxu0 %v3691_v7 }
  0x51   : > { %3241 = vmatpush3.bf16.msra.mxu1 %v3688_v0  ;;  %3228 = vmatprep.mubr.bf16.mxu1 %v3956_v54  ;;  %v566_v0 = vrot.slane %v564_v58, 7 }
  0x52   : > { %3242 = vmatprep.subr.bf16.mxu1 %v3690_v6 }
  0x53   : > { %3371 = vmatpush3.bf16.msra.mxu0 %v3691_v7  ;;  %v569_v41 = vor.u32 %v567_v62, %v566_v0  ;;  %v4232_v44 = vsel %vm3916_vm2, %v566_v0, 0 }
  0x54   : > { %3372 = vmatprep.subr.bf16.mxu0 %v3693_v12  ;;  %v2193_v2 = vrot.slane %v4232_v44, 1 }
  0x55   : > { %3243 = vmatpush3.bf16.msra.mxu1 %v3690_v6  ;;  %v4240_v6 = vsel %vm3916_vm2, 0, %v569_v41 }
  0x56   : > { %3244 = vmatprep.subr.bf16.mxu1 %v3692_v9  ;;  %3357 = vmatmul.mubr.bf16.gmra.mrb[4].mxu0 %v4167_v18  ;;  %v2192_v7 = vrot.slane %v4240_v6, 1 }
  0x57   : > { %3373 = vmatpush3.bf16.msra.mxu0 %v3693_v12  ;;  %3360 = vmatprep.mubr.bf16.mxu0 %v4178_v34  ;;  %v3707_v12 = vld [vmem:[%s4459_s3 + $0x1c8] sm:$0xff]  }
  0x58   : > { %3229 = vmatmul.mubr.bf16.gmra.mrb[4].mxu1 %v3978_v16  ;;  %3374 = vmatprep.subr.bf16.mxu0 %v3695_v20  ;;  %v4251_v33 = vsel %vm1057_vm4, %v2192_v7, %v2193_v2 }
  0x59   : > { %3245 = vmatpush3.bf16.msra.mxu1 %v3692_v9  ;;  %3232 = vmatprep.mubr.bf16.mxu1 %v3993_v25  ;;  %v3704_v9 = vld [vmem:[%s4459_s3 + $0xc0] sm:$0xff]  }
  0x5a   : > { %3246 = vmatprep.subr.bf16.mxu1 %v3694_v15 }
  0x5b   : > { %3375 = vmatpush3.bf16.msra.mxu0 %v3695_v20  ;;  %v3712_v20 = vld [vmem:[%s4459_s3 + $0xe0] sm:$0xff]  }
  0x5c   : > { %3376 = vmatprep.subr.bf16.mxu0 %v3697_v27 }
  0x5d   : > { %3247 = vmatpush3.bf16.msra.mxu1 %v3694_v15  ;;  %v3711_v15 = vld [vmem:[%s4459_s3 + $0x1d8] sm:$0xff]  }
  0x5e   : > { %3248 = vmatprep.subr.bf16.mxu1 %v3696_v21  ;;  %3361 = vmatmul.mubr.bf16.gmra.mrb[8].mxu0 %v4196_v60 }
  0x5f   : > { %3377 = vmatpush3.bf16.msra.mxu0 %v3697_v27  ;;  %3364 = vmatprep.mubr.bf16.mxu0 %v4207_v17  ;;  %v3716_v27 = vld [vmem:[%s4459_s3 + $0xf0] sm:$0xff]  }
  0x60   : > { %3233 = vmatmul.mubr.bf16.gmra.mrb[8].mxu1 %v4021_v53  ;;  %3378 = vmatprep.subr.bf16.mxu0 %v3699_v39 }
  0x61   : > { %3249 = vmatpush3.bf16.msra.mxu1 %v3696_v21  ;;  %3236 = vmatprep.mubr.bf16.mxu1 %v4040_v3  ;;  %v3713_v21 = vld [vmem:[%s4459_s3 + $0x1e0] sm:$0xff]  }
  0x62   : > { %3250 = vmatprep.subr.bf16.mxu1 %v3698_v42 }
  0x63   : > { %3379 = vmatpush3.bf16.msra.mxu0 %v3699_v39 }
  0x64   : > { %3380 = vmatprep.subr.bf16.mxu0 %v3701_v56 }
  0x65   : > { %3251 = vmatpush3.bf16.msra.mxu1 %v3698_v42 }
  0x66   : > { %3252 = vmatprep.subr.bf16.mxu1 %v3700_v47  ;;  %3365 = vmatmul.mubr.bf16.gmra.mrb[12].mxu0 %v4222_v32 }
  0x67   : > { %3381 = vmatpush3.bf16.msra.mxu0 %v3701_v56  ;;  %3384 = vmatprep.mubr.bf16.mxu0 %v3956_v54 }
  0x68   : > { %3237 = vmatmul.mubr.bf16.gmra.mrb[12].mxu1 %v4064_v23  ;;  %3382 = vmatprep.subr.bf16.mxu0 %v3703_v1 }
  0x69   : > { %3253 = vmatpush3.bf16.msra.mxu1 %v3700_v47  ;;  %3256 = vmatprep.mubr.bf16.mxu1 %v1060_v4 }
  0x6a   : > { %3254 = vmatprep.subr.bf16.mxu1 %v3702_v52 }
  0x6b   : > { %3383 = vmatpush3.bf16.msra.mxu0 %v3703_v1 }
  0x6c   : > { %3400 = vmatprep.subr.bf16.mxu0 %v3705_v10 }
  0x6d   : > { %3255 = vmatpush3.bf16.msra.mxu1 %v3702_v52 }
  0x6e   : > { %3272 = vmatprep.subr.bf16.mxu1 %v3704_v9  ;;  %3385 = vmatmul.mubr.bf16.vlgmr.msra.gmra.mrb[0].mxu0 %v3978_v16 }
  0x6f   : > { %3401 = vmatpush3.bf16.msra.mxu0 %v3705_v10  ;;  %3388 = vmatprep.mubr.bf16.mxu0 %v3993_v25  ;;  %v4379_v10 = vld [vmem:[%s4460_s4] ss:$0 sm:$0xff] }
  0x70   : > { %3257 = vmatmul.mubr.bf16.vlgmr.msra.gmra.mrb[0].mxu1 %v4117_v63  ;;  %3402 = vmatprep.subr.bf16.mxu0 %v3707_v12  ;;  %v3710_v63 = vld [vmem:[%s4459_s3 + $0xd8] sm:$0xff]  }
  0x71   : > { %3273 = vmatpush3.bf16.msra.mxu1 %v3704_v9  ;;  %3260 = vmatprep.mubr.bf16.mxu1 %v4135_v5 }
  0x72   : > { %3274 = vmatprep.subr.bf16.mxu1 %v3706_v11 }
  0x73   : > { %3403 = vmatpush3.bf16.msra.mxu0 %v3707_v12 }
  0x74   : > { %3404 = vmatprep.subr.bf16.mxu0 %v3709_v14 }
  0x75   : > { %3275 = vmatpush3.bf16.msra.mxu1 %v3706_v11 }
  0x76   : > { %3276 = vmatprep.subr.bf16.mxu1 %v3708_v13  ;;  %3389 = vmatmul.mubr.bf16.gmra.mrb[4].mxu0 %v4021_v53 }
  0x77   : > { %3405 = vmatpush3.bf16.msra.mxu0 %v3709_v14  ;;  %3392 = vmatprep.mubr.bf16.mxu0 %v4040_v3 }
  0x78   : > { %3261 = vmatmul.mubr.bf16.gmra.mrb[4].mxu1 %v4148_v8  ;;  %3406 = vmatprep.subr.bf16.mxu0 %v3711_v15 }
  0x79   : > { %3277 = vmatpush3.bf16.msra.mxu1 %v3708_v13  ;;  %3264 = vmatprep.mubr.bf16.mxu1 %v4167_v18 }
  0x7a   : > { %3278 = vmatprep.subr.bf16.mxu1 %v3710_v63 }
  0x7b   : > { %3407 = vmatpush3.bf16.msra.mxu0 %v3711_v15 }
  0x7c   : > { %3408 = vmatprep.subr.bf16.mxu0 %v3713_v21 }
  0x7d   : > { %3279 = vmatpush3.bf16.msra.mxu1 %v3710_v63  ;;  %v4384_v63 = vld [vmem:[%s4461_s5] ss:$0 sm:$0xff] }
  0x7e   : > { %3280 = vmatprep.subr.bf16.mxu1 %v3712_v20  ;;  %3393 = vmatmul.mubr.bf16.gmra.mrb[8].mxu0 %v4064_v23 }
  0x7f   : > { %3409 = vmatpush3.bf16.msra.mxu0 %v3713_v21  ;;  %3396 = vmatprep.mubr.bf16.mxu0 %v4083_v38 }
  0x80   : > { %3265 = vmatmul.mubr.bf16.gmra.mrb[8].mxu1 %v4178_v34  ;;  %3410 = vmatprep.subr.bf16.mxu0 %v3715_v26 }
  0x81   : > { %3281 = vmatpush3.bf16.msra.mxu1 %v3712_v20  ;;  %3268 = vmatprep.mubr.bf16.mxu1 %v4196_v60 }
  0x82   : > { %3282 = vmatprep.subr.bf16.mxu1 %v3714_v22 }
  0x83   : > { %3411 = vmatpush3.bf16.msra.mxu0 %v3715_v26 }
  0x84   : > { %3412 = vmatprep.subr.bf16.mxu0 %v3717_v28 }
  0x85   : > { %3283 = vmatpush3.bf16.msra.mxu1 %v3714_v22 }
  0x86   : > { %3284 = vmatprep.subr.bf16.mxu1 %v3716_v27  ;;  %3397 = vmatmul.mubr.bf16.gmra.mrb[12].mxu0 %v4240_v6 }
  0x87   : > { %3413 = vmatpush3.bf16.msra.mxu0 %v3717_v28  ;;  %3416 = vmatprep.mubr.bf16.mxu0 %v3989_v24  ;;  %v2002_v24 = vshll.u32 %v4240_v6, 16 }
  0x88   : > { %3269 = vmatmul.mubr.bf16.gmra.mrb[12].mxu1 %v4207_v17  ;;  %3414 = vmatprep.subr.bf16.mxu0 %v3719_v31 }
  0x89   : > { %3285 = vmatpush3.bf16.msra.mxu1 %v3716_v27  ;;  %3288 = vmatprep.mubr.bf16.mxu1 %v3940_v45  ;;  %v3722_v45 = vld [vmem:[%s4459_s3 + $0x210] sm:$0xff]  }
  0x8a   : > { %3286 = vmatprep.subr.bf16.mxu1 %v3718_v29 }
  0x8b   : > { %3415 = vmatpush3.bf16.msra.mxu0 %v3719_v31 }
  0x8c   : > { %3432 = vmatprep.subr.bf16.mxu0 %v3720_v35 }
  0x8d   : > { %3287 = vmatpush3.bf16.msra.mxu1 %v3718_v29 }
  0x8e   : > { %3464 = vmatprep.subr.bf16.mxu1 %v3720_v35  ;;  %3417 = vmatmul.mubr.bf16.vlgmr.msra.gmra.mrb[0].mxu0 %v4014_v49  ;;  %v2000_v49 = vshrl.u32 %v4240_v6, 16 }
  0x8f   : > { %3433 = vmatpush3.bf16.msra.mxu0 %v3720_v35  ;;  %3420 = vmatprep.mubr.bf16.mxu0 %v4034_v61  ;;  %v2004_v61 = vrot.slane %v2002_v24, 1 }
  0x90   : > { %3289 = vmatmul.mubr.bf16.vlgmr.msra.gmra.mrb[0].mxu1 %v3956_v54  ;;  %3434 = vmatprep.subr.bf16.mxu0 %v3721_v36  ;;  %v3723_v54 = vld [vmem:[%s4459_s3 + $0x218] sm:$0xff]  }
  0x91   : > { %3472 = vmatpush3.bf16.msra.mxu1 %v3720_v35  ;;  %3292 = vmatprep.mubr.bf16.mxu1 %v3978_v16  ;;  %v3724_v16 = vld [vmem:[%s4459_s3 + $0x220] sm:$0xff]  }
  0x92   : > { %3465 = vmatprep.subr.bf16.mxu1 %v3721_v36 }
  0x93   : > { %3435 = vmatpush3.bf16.msra.mxu0 %v3721_v36 }
  0x94   : > { %3436 = vmatprep.subr.bf16.mxu0 %v3722_v45 }
  0x95   : > { %3473 = vmatpush3.bf16.msra.mxu1 %v3721_v36 }
  0x96   : > { %3466 = vmatprep.subr.bf16.mxu1 %v3722_v45  ;;  %3421 = vmatmul.mubr.bf16.gmra.mrb[4].mxu0 %v4058_v19  ;;  %v3725_v19 = vld [vmem:[%s4459_s3 + $0x228] sm:$0xff]  }
  0x97   : > { %3437 = vmatpush3.bf16.msra.mxu0 %v3722_v45  ;;  %3424 = vmatprep.mubr.bf16.mxu0 %v4072_v30 }
  0x98   : > { %3293 = vmatmul.mubr.bf16.gmra.mrb[4].mxu1 %v3993_v25  ;;  %3438 = vmatprep.subr.bf16.mxu0 %v3723_v54  ;;  %v2007_v25 = vshll.u32 %v4232_v44, 16 }
  0x99   : > { %3474 = vmatpush3.bf16.msra.mxu1 %v3722_v45  ;;  %3296 = vmatprep.mubr.bf16.mxu1 %v4021_v53  ;;  %v2005_v53 = vor.u32 %v2004_v61, %v2000_v49 }
  0x9a   : > { %3467 = vmatprep.subr.bf16.mxu1 %v3723_v54  ;;  %v2009_v30 = vrot.slane %v2007_v25, 1 }
  0x9b   : > { %3439 = vmatpush3.bf16.msra.mxu0 %v3723_v54 }
  0x9c   : > { %3440 = vmatprep.subr.bf16.mxu0 %v3724_v16 }
  0x9d   : > { %3475 = vmatpush3.bf16.msra.mxu1 %v3723_v54 }
  0x9e   : > { %3468 = vmatprep.subr.bf16.mxu1 %v3724_v16  ;;  %3425 = vmatmul.mubr.bf16.gmra.mrb[8].mxu0 %v4098_v51  ;;  %v3727_v51 = vld [vmem:[%s4459_s3 + $0x238] sm:$0xff]  }
  0x9f   : > { %3441 = vmatpush3.bf16.msra.mxu0 %v3724_v16  ;;  %3428 = vmatprep.mubr.bf16.mxu0 %v4107_v59 }
  0xa0   : > { %3297 = vmatmul.mubr.bf16.gmra.mrb[8].mxu1 %v4040_v3  ;;  %3442 = vmatprep.subr.bf16.mxu0 %v3725_v19  ;;  %v2010_v3 = vsel %vm629_vm3, %v2005_v53, %v2009_v30 }
  0xa1   : > { %3476 = vmatpush3.bf16.msra.mxu1 %v3724_v16  ;;  %3300 = vmatprep.mubr.bf16.mxu1 %v4064_v23 }
  0xa2   : > { %3469 = vmatprep.subr.bf16.mxu1 %v3725_v19 }
  0xa3   : > { %3443 = vmatpush3.bf16.msra.mxu0 %v3725_v19 }
  0xa4   : > { %3444 = vmatprep.subr.bf16.mxu0 %v3726_v40 }
  0xa5   : > { %3477 = vmatpush3.bf16.msra.mxu1 %v3725_v19 }
  0xa6   : > { %3470 = vmatprep.subr.bf16.mxu1 %v3726_v40  ;;  %3429 = vmatmul.mubr.bf16.gmra.mrb[12].mxu0 %v2010_v3 }
  0xa7   : > { %3445 = vmatpush3.bf16.msra.mxu0 %v3726_v40  ;;  %3448 = vmatprep.mubr.bf16.mxu0 %v4135_v5 }
  0xa8   : > { %3301 = vmatmul.mubr.bf16.gmra.mrb[12].mxu1 %v4083_v38  ;;  %3446 = vmatprep.subr.bf16.mxu0 %v3727_v51 }
  0xa9   : > { %3478 = vmatpush3.bf16.msra.mxu1 %v3726_v40  ;;  %3456 = vmatprep.mubr.bf16.mxu1 %v4196_v60 }
  0xaa   : > { %3471 = vmatprep.subr.bf16.mxu1 %v3727_v51 }
  0xab   : > { %3447 = vmatpush3.bf16.msra.mxu0 %v3727_v51 }
  0xad   : > { %3479 = vmatpush3.bf16.msra.mxu1 %v3727_v51 }
  0xae   : > { %3449 = vmatmul.mubr.bf16.vlgmr.msra.gmra.mrb[0].mxu0 %v4148_v8 }
  0xaf   : > { %3452 = vmatprep.mubr.bf16.mxu0 %v4167_v18 }
  0xb0   : > { %3457 = vmatmul.mubr.bf16.vlgmr.msra.gmra.mrb[16].mxu1 %v4207_v17 }
  0xb1   : > { %3460 = vmatprep.mubr.bf16.mxu1 %v4222_v32 }
  0xb6   : > { %3453 = vmatmul.mubr.bf16.gmra.mrb[4].mxu0 %v4178_v34 }
  0xb8   : > { %3461 = vmatmul.mubr.bf16.gmra.mrb[20].mxu1 %v4251_v33 }
 0x163   : > { %v3290_v23 = vpop.f32.mrb[0].mxu1 }
 0x164   : > { %v1367_v38 = vpop.f32.mrb[1].mxu1 }
 0x165   : > { %v3291_v59 = vpop.f32.mrb[2].mxu1 }
 0x166   : > { %v1370_v5 = vpop.f32.mrb[3].mxu1 }
 0x16b   : > { %v4360_v42 = vpop.f32.mrb[4].mxu1 }
 0x16c   : > { %v4362_v60 = vpop.f32.mrb[5].mxu1 }
 0x16d   : > { %v4364_v39 = vpop.f32.mrb[6].mxu1 }
 0x16e   : > { %v4366_v8 = vpop.f32.mrb[7].mxu1 }
 0x171   : > { %v3426_v18 = vpop.f32.mrb[8].mxu0 }
 0x172   : > { %v2143_v47 = vpop.f32.mrb[9].mxu0 }
 0x173   : > { %v3298_v43 = vpop.f32.mrb[8].mxu1  ;;  %v3427_v50 = vpop.f32.mrb[10].mxu0 }
 0x174   : > { %v3488_v46 = vadd.f32 %v3426_v18, %v3298_v43  ;;  %v1399_v17 = vpop.f32.mrb[9].mxu1  ;;  %v2146_v57 = vpop.f32.mrb[11].mxu0 }
 0x175   : > { %v3490_v34 = vadd.f32 %v2143_v47, %v1399_v17  ;;  %v3299_v48 = vpop.f32.mrb[10].mxu1 }
 0x176   : > { %v3492_v55 = vadd.f32 %v3427_v50, %v3299_v48  ;;  %v1402_v56 = vpop.f32.mrb[11].mxu1 }
 0x177   : > { %v3494_v58 = vadd.f32 %v2146_v57, %v1402_v56 }
 0x179   : > { %v3430_v37 = vpop.f32.mrb[12].mxu0 }
 0x17a   : > { %v2159_v52 = vpop.f32.mrb[13].mxu0 }
 0x17b   : > { %v3302_v62 = vpop.f32.mrb[12].mxu1  ;;  %v3431_v44 = vpop.f32.mrb[14].mxu0 }
 0x17c   : > { %v4368_v0 = vadd.f32 %v3430_v37, %v3302_v62  ;;  %v1415_v32 = vpop.f32.mrb[13].mxu1  ;;  %v2162_v6 = vpop.f32.mrb[15].mxu0 }
 0x17d   : > { %v4370_v1 = vadd.f32 %v2159_v52, %v1415_v32  ;;  %v3303_v41 = vpop.f32.mrb[14].mxu1 }
 0x17e   : > { %v4372_v2 = vadd.f32 %v3431_v44, %v3303_v41  ;;  %v1418_v4 = vpop.f32.mrb[15].mxu1 }
 0x17f   : > { %v4374_v7 = vadd.f32 %v2162_v6, %v1418_v4 }
 0x181   : > { %v3450_v9 = vpop.f32.mrb[0].mxu0 }
 0x182   : > { %v3480_v11 = vadd.f32 %v3450_v9, %v3290_v23  ;;  %v2295_v13 = vpop.f32.mrb[1].mxu0 }
 0x183   : > { %v3458_v33 = vpop.f32.mrb[16].mxu1  ;;  %v3481_v15 = vadd.f32 %v2295_v13, %v1367_v38  ;;  %v3451_v21 = vpop.f32.mrb[2].mxu0 }
 0x184   : > { %v3489_v12 = vadd.f32 %v3488_v46, %v3458_v33  ;;  %v2327_v14 = vpop.f32.mrb[17].mxu1  ;;  %v2383_v26 = vmul.f32 %v3480_v11, %v4379_v10  ;;  %v3482_v28 = vadd.f32 %v3451_v21, %v3291_v59  ;;  %v2298_v31 = vpop.f32.mrb[3].mxu0 }
 0x185   : > { %v3491_v20 = vadd.f32 %v3490_v34, %v2327_v14  ;;  %v3459_v22 = vpop.f32.mrb[18].mxu1  ;;  %v2381_v36 = vmul.f32 %v3481_v15, %v4379_v10  ;;  %v3483_v54 = vadd.f32 %v2298_v31, %v1370_v5 }
 0x186   : > { %v2391_v27 = vmul.f32 %v3489_v12, %v4379_v10  ;;  %v3493_v29 = vadd.f32 %v3492_v55, %v3459_v22  ;;  %v2330_v35 = vpop.f32.mrb[19].mxu1  ;;  %v2406_v16 = vadd.f32 %v4384_v63, %v2383_v26  ;;  %v2384_v61 = vmul.f32 %v3482_v28, %v4379_v10 }
 0x187   : > { %v2389_v45 = vmul.f32 %v3491_v20, %v4379_v10  ;;  %v3495_v24 = vadd.f32 %v3494_v58, %v2330_v35  ;;  %v2404_v19 = vadd.f32 %v4384_v63, %v2381_v36  ;;  %v2382_v30 = vmul.f32 %v3483_v54, %v4379_v10 }
 0x188   : > { %v2414_v49 = vadd.f32 %v4384_v63, %v2391_v27  ;;  %v2392_v25 = vmul.f32 %v3493_v29, %v4379_v10  ;;  %vm2422_vm5 = vcmp.ge.f32.partialorder %v2406_v16, 0.0  ;;  %v2438_v3 = vmul.f32 0.1, %v2406_v16 }
 0x189   : > { %v2412_v53 = vadd.f32 %v4384_v63, %v2389_v45  ;;  %v2390_v40 = vmul.f32 %v3495_v24, %v4379_v10  ;;  %vm2420_vm7 = vcmp.ge.f32.partialorder %v2404_v19, 0.0  ;;  %v2436_v23 = vmul.f32 0.1, %v2404_v19  ;;  %v3454_v46 = vpop.f32.mrb[4].mxu0 }
 0x18a   : > { %vm2430_vm6 = vcmp.ge.f32.partialorder %v2414_v49, 0.0  ;;  %v2446_v51 = vmul.f32 0.1, %v2414_v49  ;;  %v2454_v59 = vsel %vm2422_vm5, %v2406_v16, %v2438_v3  ;;  %v2407_v43 = vadd.f32 %v4384_v63, %v2384_v61  ;;  %v2311_v55 = vpop.f32.mrb[5].mxu0 }
 0x18b   : > { %vm2428_vm8 = vcmp.ge.f32.partialorder %v2412_v53, 0.0  ;;  %v2444_v38 = vmul.f32 0.1, %v2412_v53  ;;  %v2415_v18 = vadd.f32 %v4384_v63, %v2392_v25  ;;  %v3462_v17 = vpop.f32.mrb[20].mxu1  ;;  %v2452_v47 = vsel %vm2420_vm7, %v2404_v19, %v2436_v23  ;;  %v3455_v4 = vpop.f32.mrb[6].mxu0 }
 0x18c   : > { %v2462_v5 = vsel %vm2430_vm6, %v2414_v49, %v2446_v51  ;;  %v2405_v48 = vadd.f32 %v4384_v63, %v2382_v30  ;;  %v2413_v50 = vadd.f32 %v4384_v63, %v2390_v40  ;;  %v2343_v56 = vpop.f32.mrb[21].mxu1  ;;  %vm2423_vm9 = vcmp.ge.f32.partialorder %v2407_v43, 0.0  ;;  %v2314_v13 = vpop.f32.mrb[7].mxu0 }
 0x18d   : > { %v2460_v34 = vsel %vm2428_vm8, %v2412_v53, %v2444_v38  ;;  %v2439_v57 = vmul.f32 0.1, %v2407_v43  ;;  %vm2431_vm10 = vcmp.ge.f32.partialorder %v2415_v18, 0.0  ;;  %v2447_v58 = vmul.f32 0.1, %v2415_v18  ;;  %v3463_v6 = vpop.f32.mrb[22].mxu1 }
 0x18e   : > { %vm2421_vm11 = vcmp.ge.f32.partialorder %v2405_v48, 0.0  ;;  %v2437_v62 = vmul.f32 0.1, %v2405_v48  ;;  %vm2429_vm12 = vcmp.ge.f32.partialorder %v2413_v50, 0.0  ;;  %v2445_v37 = vmul.f32 0.1, %v2413_v50 }
 0x18f   : > { %v2455_v32 = vsel %vm2423_vm9, %v2407_v43, %v2439_v57  ;;  %v2463_v52 = vsel %vm2431_vm10, %v2415_v18, %v2447_v58  ;;  %v3484_v41 = vadd.f32 %v3454_v46, %v4360_v42  ;;  %v3497_v44 = vadd.f32 %v4368_v0, %v3462_v17  ;;  %v2346_v14 = vpop.f32.mrb[23].mxu1 }
 0x190   : > { %v2993_v9 = vpack.c.bf16 %v2455_v32, %v2454_v59  ;;  %v3013_v33 = vpack.c.bf16 %v2463_v52, %v2462_v5  ;;  %v2453_v11 = vsel %vm2421_vm11, %v2405_v48, %v2437_v62  ;;  %v2461_v12 = vsel %vm2429_vm12, %v2413_v50, %v2445_v37 }
 0x191   : > { %v2988_v15 = vpack.c.bf16 %v2453_v11, %v2452_v47  ;;  %v3008_v20 = vpack.c.bf16 %v2461_v12, %v2460_v34  ;;  %v2387_v21 = vmul.f32 %v3484_v41, %v4379_v10  ;;  %v2395_v22 = vmul.f32 %v3497_v44, %v4379_v10 }
 0x192   : > { %3025 = vst [vmem:[%s4407_s8 + $0x8] sm:$0xff] %v2993_v9   ;;  %3029 = vst [vmem:[%s4407_s8 + $0x28] sm:$0xff] %v3013_v33   ;;  %v3485_v42 = vadd.f32 %v2311_v55, %v4362_v60  ;;  %v3499_v0 = vadd.f32 %v4370_v1, %v2343_v56  ;;  %v3486_v26 = vadd.f32 %v3455_v4, %v4364_v39 }
 0x193   : > { %v3501_v27 = vadd.f32 %v4372_v2, %v3463_v6  ;;  %2989 = vst [vmem:[%s4407_s8] sm:$0xff] %v2988_v15   ;;  %3028 = vst [vmem:[%s4407_s8 + $0x20] sm:$0xff] %v3008_v20   ;;  %v2410_v28 = vadd.f32 %v4384_v63, %v2387_v21  ;;  %v2418_v29 = vadd.f32 %v4384_v63, %v2395_v22 }
 0x194   : > { %v3487_v31 = vadd.f32 %v2314_v13, %v4366_v8  ;;  %v3503_v35 = vadd.f32 %v4374_v7, %v2346_v14  ;;  %v2385_v36 = vmul.f32 %v3485_v42, %v4379_v10  ;;  %v2393_v60 = vmul.f32 %v3499_v0, %v4379_v10 }
 0x195   : > { %v2388_v1 = vmul.f32 %v3486_v26, %v4379_v10  ;;  %v2396_v39 = vmul.f32 %v3501_v27, %v4379_v10  ;;  %vm2426_vm13 = vcmp.ge.f32.partialorder %v2410_v28, 0.0  ;;  %v2442_v2 = vmul.f32 0.1, %v2410_v28 }
 0x196   : > { %vm2434_vm14 = vcmp.ge.f32.partialorder %v2418_v29, 0.0  ;;  %v2450_v45 = vmul.f32 0.1, %v2418_v29  ;;  %v2408_v54 = vadd.f32 %v4384_v63, %v2385_v36  ;;  %v2416_v7 = vadd.f32 %v4384_v63, %v2393_v60 }
 0x197   : > { %v2411_v24 = vadd.f32 %v4384_v63, %v2388_v1  ;;  %v2419_v8 = vadd.f32 %v4384_v63, %v2396_v39  ;;  %v2386_v16 = vmul.f32 %v3487_v31, %v4379_v10  ;;  %v2394_v49 = vmul.f32 %v3503_v35, %v4379_v10 }
 0x198   : > { %v2458_v61 = vsel %vm2426_vm13, %v2410_v28, %v2442_v2  ;;  %v2466_v25 = vsel %vm2434_vm14, %v2418_v29, %v2450_v45  ;;  %vm2424_vm1 = vcmp.ge.f32.partialorder %v2408_v54, 0.0  ;;  %v2440_v30 = vmul.f32 0.1, %v2408_v54 }
 0x199   : > { %vm2427_vm15 = vcmp.ge.f32.partialorder %v2411_v24, 0.0  ;;  %v2443_v19 = vmul.f32 0.1, %v2411_v24  ;;  %vm2435_vm0 = vcmp.ge.f32.partialorder %v2419_v8, 0.0  ;;  %v2451_v53 = vmul.f32 0.1, %v2419_v8 }
 0x19a   : > { %v2409_v40 = vadd.f32 %v4384_v63, %v2386_v16  ;;  %v2417_v3 = vadd.f32 %v4384_v63, %v2394_v49  ;;  %vm2432_vm2 = vcmp.ge.f32.partialorder %v2416_v7, 0.0  ;;  %v2448_v51 = vmul.f32 0.1, %v2416_v7 }
 0x19b   : > { %v2459_v23 = vsel %vm2427_vm15, %v2411_v24, %v2443_v19  ;;  %v2467_v38 = vsel %vm2435_vm0, %v2419_v8, %v2451_v53  ;;  %v2456_v18 = vsel %vm2424_vm1, %v2408_v54, %v2440_v30 }
 0x19c   : > { %v3003_v10 = vpack.c.bf16 %v2459_v23, %v2458_v61  ;;  %v3023_v59 = vpack.c.bf16 %v2467_v38, %v2466_v25  ;;  %vm2425_vm3 = vcmp.ge.f32.partialorder %v2409_v40, 0.0  ;;  %v2441_v5 = vmul.f32 0.1, %v2409_v40 }
 0x19d   : > { %vm2433_vm4 = vcmp.ge.f32.partialorder %v2417_v3, 0.0  ;;  %v2449_v43 = vmul.f32 0.1, %v2417_v3  ;;  %v2464_v17 = vsel %vm2432_vm2, %v2416_v7, %v2448_v51 }
 0x19e   : > { %3027 = vst [vmem:[%s4407_s8 + $0x18] sm:$0xff] %v3003_v10   ;;  %3031 = vst [vmem:[%s4407_s8 + $0x38] sm:$0xff] %v3023_v59   ;;  %v2457_v46 = vsel %vm2425_vm3, %v2409_v40, %v2441_v5 }
 0x19f   : > { %v2998_v47 = vpack.c.bf16 %v2457_v46, %v2456_v18  ;;  %v2465_v34 = vsel %vm2433_vm4, %v2417_v3, %v2449_v43 }
 0x1a0   : > { %v3018_v63 = vpack.c.bf16 %v2465_v34, %v2464_v17 }
 0x1a1   : > { %3026 = vst [vmem:[%s4407_s8 + $0x10] sm:$0xff] %v2998_v47  }
 0x1a2   : > { %3030 = vst [vmem:[%s4407_s8 + $0x30] sm:$0xff] %v3018_v63  }
 0x1a3 PF: > { %s16_s25 = sadd.s32 1, %s3766_s25   ;;  %s4466_s21 = smov %s3758_s23 }
 0x1a4   : > { %p13_p12 = scmp.ge.s32.totalorder %s16_s25, 6   ;;  %s4467_s22 = smov %s3762_s24 }
 0x1a5   : > { %s4468_s23 = smov %s4471_s26  ;;  %s4469_s24 = smov %s4475_s27 }
 0x1a6   :  { %15 = sbr.rel (!%p13_p12) target bundleno = 3 (0x3), region = 88 }

// kernel: matchnet2_forward.10
= control target key start
LH: loop header
LB: loop body
LE: loop exit
PB: predicated region body
PF: predicated region fallthrough
CT: control target
= control target key end

     0   :  { %s3757_s21 = smov 0   ;;  %s3759_s22 = smov 0   ;;  %s4434_s0 = inlined_call_operand.vmem [shape: bf16[2,16,16,128], index: 0, kind: input, shape index: {}, may-alias: {0,1,2}]   ;;  %s4435_s1 = inlined_call_operand.vmem [shape: bf16[2,16,16,128], index: 1, kind: input, shape index: {}, may-alias: {0,1,2}]   ;;  %s4436_s2 = inlined_call_operand.vmem [shape: bf16[2,16,16,128], index: 2, kind: input, shape index: {}, may-alias: {0,1,2}]   ;;  %s4437_s3 = inlined_call_operand.vmem [shape: bf16[3,3,128,96], index: 3, kind: input, shape index: {}]   ;;  %s4438_s4 = inlined_call_operand.vmem [shape: f32[1,96], index: 4, kind: input, shape index: {}]   ;;  %s4439_s5 = inlined_call_operand.vmem [shape: f32[1,96], index: 5, kind: input, shape index: {}]   ;;  %s4440_s6 = inlined_call_operand.vmem [shape: bf16[2,16,16,96], index: 6, kind: output, shape index: {}]  }
   0x1   :  { %s3761_s23 = smov 0   ;;  %s3763_s24 = smov 0  }
   0x2   :  { %s3765_s25 = smov 0  }
   0x3 LB: > { %s25_s26 = sadd.s32 1, %s3712_s23  ;;  %s28_s27 = sadd.s32 1, %s3716_s24  ;;  %s3720_s25 = sphi %s3765_s25, %s16_s25   ;;  %s3716_s24 = sphi %s3763_s24, %s4447_s24   ;;  %s3712_s23 = sphi %s3761_s23, %s4446_s23   ;;  %s3708_s22 = sphi %s3759_s22, %s4445_s22   ;;  %s3704_s21 = sphi %s3757_s21, %s4444_s21  }
   0x4   : > { %p26_p0 = scmp.ge.s32.totalorder %s25_s26, 2  ;;  %p2700_p1 = scmp.ge.s32.totalorder %s3720_s25, 1 }
   0x5   : > { %p298_p2 = scmp.lt.s32.totalorder %s3720_s25, 5 }
   0x6   : > { %s4449_s26 = smov (%p26_p0, %s25_s26), 0  ;;  %s4451_s27 = smov (!%p26_p0, %s28_s27), %s3716_s24 }
   0x7   : > { %p299_p3 = pnand %p2700_p1, %p298_p2  ;;  %p30_p4 = scmp.ge.s32.totalorder %s4451_s27, 2 }
   0x8   : > { %v3602_v0 = vld [vmem:[%s4437_s3 + $0x40] sm:$0xff] (!%p299_p3)   ;;  %s3795_s30 = sshll.u32 (!%p299_p3), %s3704_s21, 3  ;;  %v3604_v2 = vld [vmem:[%s4437_s3 + $0x48] sm:$0xff] (!%p299_p3)   ;;  %p368_p6 = scmp.lt.s32.totalorder (!%p299_p3), %s3708_s22, 1  ;;  %v3606_v4 = vld [vmem:[%s4437_s3 + $0x50] sm:$0xff] (!%p299_p3)   ;;  %vm590_vm0 = vcmask (!%p299_p3), 1040384  }
   0x9   : > { %s4453_s27 = smov (%p30_p4, %s4451_s27), 0  ;;  %302 = sbr.rel (%p299_p3) target bundleno = 423 (0x1a7), region = 44 }
   0xa   : > { %v3603_v1 = vld [vmem:[%s4437_s3 + $0x100] sm:$0xff] (!%p299_p3)   ;;  %s2702_s9 = sadd.s32 (!%p299_p3), 4294967295, %s3795_s30  ;;  %3130 = vmatprep.subr.bf16.mxu1 (!%p299_p3), %v3602_v0  ;;  %v3605_v3 = vld [vmem:[%s4437_s3 + $0x108] sm:$0xff] (!%p299_p3)   ;;  %v3607_v5 = vld [vmem:[%s4437_s3 + $0x110] sm:$0xff] (!%p299_p3)   ;;  %p384_p8 = scmp.lt.s32.totalorder (!%p299_p3), %s3795_s30, 15  ;;  %vm1057_vm4 = vcmask (!%p299_p3), 1046528  }
   0xb   : > { %p366_p5 = scmp.gt.s32.totalorder (!%p299_p3), %s2702_s9, 0  ;;  %3258 = vmatprep.subr.bf16.mxu0 (!%p299_p3), %v3603_v1  ;;  %3131 = vmatpush3.bf16.msra.mxu1 (!%p299_p3), %v3602_v0  ;;  %p2703_p7 = scmp.lt.s32.totalorder (!%p299_p3), %s2702_s9, 15  ;;  %v3608_v6 = vld [vmem:[%s4437_s3 + $0x58] sm:$0xff] (!%p299_p3)   ;;  %v3610_v8 = vld [vmem:[%s4437_s3 + $0x60] sm:$0xff] (!%p299_p3)   ;;  %v3612_v10 = vld [vmem:[%s4437_s3 + $0x68] sm:$0xff] (!%p299_p3)   ;;  %vm2532_vm5 = vcmask (!%p299_p3), 781312  }
   0xc   : > { %3259 = vmatpush3.bf16.msra.mxu0 (!%p299_p3), %v3603_v1  ;;  %3132 = vmatprep.subr.bf16.mxu1 (!%p299_p3), %v3604_v2  ;;  %v3609_v7 = vld [vmem:[%s4437_s3 + $0x118] sm:$0xff] (!%p299_p3)   ;;  %p421_p9 = scmp.lt.s32.totalorder (!%p299_p3), %s3704_s21, 1  ;;  %v3611_v9 = vld [vmem:[%s4437_s3 + $0x120] sm:$0xff] (!%p299_p3)   ;;  %v3613_v12 = vld [vmem:[%s4437_s3 + $0x128] sm:$0xff] (!%p299_p3)   ;;  %vm591_vm1 = vsmask.f32 (!%p299_p3), 256 }
   0xd   : > { %3260 = vmatprep.subr.bf16.mxu0 (!%p299_p3), %v3605_v3  ;;  %v3614_v15 = vld [vmem:[%s4437_s3 + $0x70] sm:$0xff] (!%p299_p3)   ;;  %v3616_v22 = vld [vmem:[%s4437_s3 + $0x78] sm:$0xff] (!%p299_p3)   ;;  %vm3870_vm2 = vmand (!%p299_p3), %vm590_vm0, %vm591_vm1  ;;  %vm629_vm3 = vsmask.f32 (!%p299_p3), 7424 }
   0xe   : > { %v3615_v16 = vld [vmem:[%s4437_s3 + $0x130] sm:$0xff] (!%p299_p3)   ;;  %v3617_v26 = vld [vmem:[%s4437_s3 + $0x138] sm:$0xff] (!%p299_p3)   ;;  %v3882_v39 = vld [vmem:[%s4437_s3] sm:$0xff] (!%p299_p3)  }
   0xf   : > { %3133 = vmatpush3.bf16.msra.mxu1 (!%p299_p3), %v3604_v2  ;;  %v3621_v51 = vld [vmem:[%s4437_s3 + $0x140] sm:$0xff] (!%p299_p3)  }
  0x10   : > { %s367_s16 = scalar_select %p366_p5, %s2702_s9, 0  ;;  %3261 = vmatpush3.bf16.msra.mxu0 %v3605_v3  ;;  %3134 = vmatprep.subr.bf16.mxu1 %v3606_v4 }
  0x11   : > { %s4455_s22 = smov (!%p368_p6, %s3708_s22), 1  ;;  %3262 = vmatprep.subr.bf16.mxu0 %v3607_v5 }
  0x12   : > { %s3815_s19 = sshll.u32 %s4455_s22, 5  ;;  %s4457_s16 = smov (!%p2703_p7, %s367_s16), 15 }
  0x13   : > { %s2708_s8 = sshll.u32 %s4457_s16, 1  ;;  %3135 = vmatpush3.bf16.msra.mxu1 %v3606_v4 }
  0x14   : > { %s374_s22 = sadd.s32 %s3815_s19, %s2708_s8  ;;  %3263 = vmatpush3.bf16.msra.mxu0 %v3607_v5  ;;  %3136 = vmatprep.subr.bf16.mxu1 %v3608_v6 }
  0x15   : > { %s2710_s11 = sshll.u32 %s374_s22, 2  ;;  %3264 = vmatprep.subr.bf16.mxu0 %v3609_v7 }
  0x16   : > { %s376_s16 = scalar_lea.vmem %s4434_s0, %s2710_s11 }
  0x17   : > { %s385_s17 = scalar_select %p384_p8, %s3795_s30, 15  ;;  %3137 = vmatpush3.bf16.msra.mxu1 %v3608_v6  ;;  %v2979_v11 = vld [vmem:[%s376_s16] sm:$0xff]  }
  0x18   : > { %s422_s18 = scalar_select %p421_p9, %s3704_s21, 1  ;;  %3265 = vmatpush3.bf16.msra.mxu0 %v3609_v7  ;;  %3138 = vmatprep.subr.bf16.mxu1 %v3610_v8  ;;  %v2980_v13 = vunpack.c.l.bf16 %v2979_v11  ;;  %v2981_v14 = vunpack.c.h.bf16 %v2979_v11  ;;  %v3622_v11 = vld [vmem:[%s4437_s3 + $0x8] sm:$0xff]  }
  0x19   : > { %s2712_s29 = sshll.u32 %s385_s17, 1  ;;  %3266 = vmatprep.subr.bf16.mxu0 %v3611_v9 }
  0x1a   : > { %s3844_s22 = sadd.s32 %s2712_s29, %s3815_s19  ;;  %s423_s9 = scvt.s32.f32 %s422_s18 }
  0x1b   : > { %s2714_s12 = sshll.u32 %s3844_s22, 2  ;;  %3139 = vmatpush3.bf16.msra.mxu1 %v3610_v8 }
  0x1c   : > { %s3858_s17 = scalar_lea.vmem %s4435_s1, %s2714_s12  ;;  %v432_v17 = vstv %s423_s9  ;;  %3267 = vmatpush3.bf16.msra.mxu0 %v3611_v9  ;;  %3140 = vmatprep.subr.bf16.mxu1 %v3612_v10  ;;  %s424_s9 = ssub.s32 1, %s3704_s21 }
  0x1d   : > { %v433_v18 = vmul.f32 %v2980_v13, %v432_v17  ;;  %v434_v19 = vmul.f32 %v2981_v14, %v432_v17  ;;  %v3618_v20 = vld [vmem:[%s3858_s17] sm:$0xff]   ;;  %3268 = vmatprep.subr.bf16.mxu0 %v3613_v12  ;;  %v3620_v21 = vld [vmem:[%s3858_s17 + $0x8] sm:$0xff]   ;;  %v3624_v32 = vld [vmem:[%s3858_s17 + $0x10] sm:$0xff]   ;;  %p425_p11 = scmp.lt.s32.totalorder %s424_s9, 1  ;;  %s4357_s8 = scalar_lea.vmem %s4440_s6, %s2714_s12 }
  0x1e   : > { %v508_v24 = vshrl.u32 %v3618_v20, 16  ;;  %v511_v25 = vshll.u32 %v3618_v20, 16  ;;  %v515_v27 = vshrl.u32 %v3620_v21, 16  ;;  %v518_v28 = vshll.u32 %v3620_v21, 16  ;;  %v3626_v47 = vld [vmem:[%s3858_s17 + $0x18] sm:$0xff]   ;;  %v3630_v4 = vld [vmem:[%s3858_s17 + $0x20] sm:$0xff]  }
  0x1f   : > { %v435_v23 = vpack.c.bf16 %v434_v19, %v433_v18  ;;  %3141 = vmatpush3.bf16.msra.mxu1 %v3612_v10  ;;  %v522_v42 = vshrl.u32 %v3624_v32, 16  ;;  %v525_v55 = vshll.u32 %v3624_v32, 16  ;;  %v529_v63 = vshrl.u32 %v3626_v47, 16  ;;  %s4463_s9 = smov (!%p425_p11, %s424_s9), 1 }
  0x20   : > { %3269 = vmatpush3.bf16.msra.mxu0 %v3613_v12  ;;  %3142 = vmatprep.subr.bf16.mxu1 %v3614_v15  ;;  %v510_v31 = vrot.slane %v508_v24, 7  ;;  %v517_v34 = vrot.slane %v515_v27, 7  ;;  %v532_v3 = vshll.u32 %v3626_v47, 16  ;;  %v3623_v12 = vld [vmem:[%s4437_s3 + $0x148] sm:$0xff]   ;;  %v536_v14 = vshrl.u32 %v3630_v4, 16  ;;  %s427_s7 = scvt.s32.f32 %s4463_s9 }
  0x21   : > { %v501_v29 = vshrl.u32 %v435_v23, 16  ;;  %v504_v30 = vshll.u32 %v435_v23, 16  ;;  %3270 = vmatprep.subr.bf16.mxu0 %v3615_v16  ;;  %v524_v62 = vrot.slane %v522_v42, 7  ;;  %v531_v8 = vrot.slane %v529_v63, 7  ;;  %v3632_v23 = vld [vmem:[%s3858_s17 + $0x28] sm:$0xff]  }
  0x22   : > { %v513_v36 = vor.u32 %v511_v25, %v510_v31  ;;  %v3876_v37 = vsel %vm3870_vm2, %v510_v31, 0  ;;  %v520_v40 = vor.u32 %v518_v28, %v517_v34  ;;  %v3886_v41 = vsel %vm3870_vm2, %v517_v34, 0 }
  0x23   : > { %v503_v35 = vrot.slane %v501_v29, 7  ;;  %3143 = vmatpush3.bf16.msra.mxu1 %v3614_v15  ;;  %v650_v38 = vshll.u32 %v3876_v37, 16  ;;  %v662_v46 = vshll.u32 %v3886_v41, 16  ;;  %v527_v6 = vor.u32 %v525_v55, %v524_v62 }
  0x24   : > { %3271 = vmatpush3.bf16.msra.mxu0 %v3615_v16  ;;  %3144 = vmatprep.subr.bf16.mxu1 %v3616_v22  ;;  %v3894_v45 = vsel %vm3870_vm2, 0, %v513_v36  ;;  %v3910_v54 = vsel %vm3870_vm2, 0, %v520_v40  ;;  %v3920_v7 = vsel %vm3870_vm2, %v524_v62, 0  ;;  %v534_v17 = vor.u32 %v532_v3, %v531_v8  ;;  %v3625_v40 = vld [vmem:[%s4437_s3 + $0x10] sm:$0xff]  }
  0x25   : > { %v506_v43 = vor.u32 %v504_v30, %v503_v35  ;;  %v3890_v44 = vsel %vm3870_vm2, %v503_v35, 0  ;;  %3272 = vmatprep.subr.bf16.mxu0 %v3617_v26  ;;  %v643_v49 = vshrl.u32 %v3894_v45, 16  ;;  %v645_v50 = vshll.u32 %v3894_v45, 16 }
  0x26   : > { %v638_v48 = vshll.u32 %v3890_v44, 16  ;;  %v652_v53 = vrot.slane %v650_v38, 1  ;;  %v664_v59 = vrot.slane %v662_v46, 1  ;;  %v655_v60 = vshrl.u32 %v3910_v54, 16 }
  0x27   : > { %v3906_v52 = vsel %vm3870_vm2, 0, %v506_v43  ;;  %3145 = vmatpush3.bf16.msra.mxu1 %v3616_v22  ;;  %v647_v58 = vrot.slane %v645_v50, 1  ;;  %v657_v61 = vshll.u32 %v3910_v54, 16  ;;  %v674_v13 = vshll.u32 %v3920_v7, 16 }
  0x28   : > { %v631_v56 = vshrl.u32 %v3906_v52, 16  ;;  %v633_v57 = vshll.u32 %v3906_v52, 16  ;;  %3273 = vmatpush3.bf16.msra.mxu0 %v3617_v26  ;;  %3162 = vmatprep.subr.bf16.mxu1 %v3882_v39  ;;  %v640_v1 = vrot.slane %v638_v48, 1  ;;  %v3932_v16 = vsel %vm3870_vm2, 0, %v527_v6  ;;  %v3636_v48 = vld [vmem:[%s3858_s17 + $0x30] sm:$0xff]  }
  0x29   : > { %v648_v2 = vor.u32 %v647_v58, %v643_v49  ;;  %3290 = vmatprep.subr.bf16.mxu0 %v3621_v51  ;;  %v659_v5 = vrot.slane %v657_v61, 1  ;;  %v3936_v18 = vsel %vm3870_vm2, %v531_v8, 0  ;;  %v667_v20 = vshrl.u32 %v3932_v16, 16 }
  0x2a   : > { %v635_v0 = vrot.slane %v633_v57, 1  ;;  %v669_v21 = vshll.u32 %v3932_v16, 16  ;;  %v676_v22 = vrot.slane %v674_v13, 1  ;;  %v3947_v25 = vsel %vm3870_vm2, 0, %v534_v17 }
  0x2b   : > { %v653_v10 = vsel %vm629_vm3, %v648_v2, %v652_v53  ;;  %v660_v15 = vor.u32 %v659_v5, %v655_v60  ;;  %v686_v26 = vshll.u32 %v3936_v18, 16  ;;  %v538_v27 = vrot.slane %v536_v14, 7 }
  0x2c   : > { %v636_v9 = vor.u32 %v635_v0, %v631_v56  ;;  %3274 = vmatprep.mubr.bf16.mxu0 %v653_v10  ;;  %v671_v28 = vrot.slane %v669_v21, 1  ;;  %v679_v29 = vshrl.u32 %v3947_v25, 16  ;;  %v681_v30 = vshll.u32 %v3947_v25, 16  ;;  %v3629_v56 = vld [vmem:[%s4437_s3 + $0x158] sm:$0xff]  }
  0x2d   : > { %v3943_v24 = vsel %vm629_vm3, %v660_v15, %v664_v59  ;;  %v539_v31 = vshll.u32 %v3630_v4, 16  ;;  %v688_v32 = vrot.slane %v686_v26, 1  ;;  %v3956_v34 = vsel %vm3870_vm2, %v538_v27, 0  ;;  %v3631_v4 = vld [vmem:[%s4437_s3 + $0x20] sm:$0xff]   ;;  %v3634_v26 = vld [vmem:[%s4437_s3 + $0x28] sm:$0xff]  }
  0x2e   : > { %v641_v19 = vsel %vm629_vm3, %v636_v9, %v640_v1  ;;  %3275 = vmatmul.mubr.bf16.vlgmr.msra.gmra.mrb[0].mxu0 %v3943_v24  ;;  %v543_v35 = vshrl.u32 %v3632_v23, 16  ;;  %v546_v36 = vshll.u32 %v3632_v23, 16  ;;  %v672_v38 = vor.u32 %v671_v28, %v667_v20  ;;  %v3638_v1 = vld [vmem:[%s3858_s17 + $0x38] sm:$0xff]   ;;  %s2961_s17 = sadd.s32 8, %s3795_s30 }
  0x2f   : > { %3146 = vmatprep.mubr.bf16.mxu1 %v641_v19  ;;  %3291 = vmatpush3.bf16.msra.mxu0 %v3621_v51  ;;  %v683_v42 = vrot.slane %v681_v30, 1  ;;  %v541_v43 = vor.u32 %v539_v31, %v538_v27  ;;  %v698_v46 = vshll.u32 %v3956_v34, 16  ;;  %v3628_v51 = vld [vmem:[%s4437_s3 + $0x18] sm:$0xff]   ;;  %v550_v63 = vshrl.u32 %v3636_v48, 16  ;;  %v3635_v31 = vld [vmem:[%s4437_s3 + $0x168] sm:$0xff]   ;;  %p4084_p10 = scmp.lt.s32.totalorder %s2961_s17, 15 }
  0x30   : > { %3147 = vmatmul.mubr.bf16.vlgmr.msra.gmra.mrb[0].mxu1 %v653_v10  ;;  %3292 = vmatprep.subr.bf16.mxu0 %v3623_v12  ;;  %v545_v47 = vrot.slane %v543_v35, 7  ;;  %v3968_v49 = vsel %vm629_vm3, %v672_v38, %v676_v22  ;;  %v553_v0 = vshll.u32 %v3636_v48, 16  ;;  %v560_v13 = vshll.u32 %v3638_v1, 16 }
  0x31   : > { %3163 = vmatpush3.bf16.msra.mxu1 %v3882_v39  ;;  %v3627_v39 = vld [vmem:[%s4437_s3 + $0x150] sm:$0xff]   ;;  %3150 = vmatprep.mubr.bf16.mxu1 %v3943_v24  ;;  %v684_v50 = vor.u32 %v683_v42, %v679_v29  ;;  %v3975_v53 = vsel %vm3870_vm2, 0, %v541_v43  ;;  %v700_v55 = vrot.slane %v698_v46, 1  ;;  %v552_v8 = vrot.slane %v550_v63, 7  ;;  %s4459_s17 = smov (!%p4084_p10, %s2961_s17), 15 }
  0x32   : > { %3164 = vmatprep.subr.bf16.mxu1 %v3622_v11  ;;  %v691_v57 = vshrl.u32 %v3975_v53, 16  ;;  %v693_v58 = vshll.u32 %v3975_v53, 16  ;;  %v548_v59 = vor.u32 %v546_v36, %v545_v47  ;;  %v3984_v60 = vsel %vm3870_vm2, %v545_v47, 0  ;;  %3278 = vmatprep.mubr.bf16.mxu0 %v3968_v49  ;;  %v3637_v42 = vld [vmem:[%s4437_s3 + $0x30] sm:$0xff]   ;;  %s4461_s17 = smov (!%p4084_p10, %s4459_s17), 15 }
  0x33   : > { %3293 = vmatpush3.bf16.msra.mxu0 %v3623_v12  ;;  %v3988_v61 = vsel %vm629_vm3, %v684_v50, %v688_v32  ;;  %v710_v62 = vshll.u32 %v3984_v60, 16  ;;  %v557_v12 = vshrl.u32 %v3638_v1, 16  ;;  %v555_v15 = vor.u32 %v553_v0, %v552_v8  ;;  %v3639_v47 = vld [vmem:[%s4437_s3 + $0x170] sm:$0xff]   ;;  %v3642_v0 = vld [vmem:[%s4437_s3 + $0x80] sm:$0xff]   ;;  %s2719_s13 = sshll.u32 %s4461_s17, 1 }
  0x34   : > { %3294 = vmatprep.subr.bf16.mxu0 %v3627_v39  ;;  %v695_v2 = vrot.slane %v693_v58, 1  ;;  %v3994_v3 = vsel %vm3870_vm2, 0, %v548_v59  ;;  %v4008_v17 = vsel %vm3870_vm2, %v552_v8, 0  ;;  %v3640_v58 = vld [vmem:[%s4437_s3 + $0x38] sm:$0xff]   ;;  %v1064_v1 = vrot.slane %v3910_v54, 1  ;;  %s402_s21 = sadd.s32 %s2719_s13, %s3815_s19 }
  0x35   : > { %3165 = vmatpush3.bf16.msra.mxu1 %v3622_v11  ;;  %v703_v5 = vshrl.u32 %v3994_v3, 16  ;;  %v705_v6 = vshll.u32 %v3994_v3, 16  ;;  %v712_v10 = vrot.slane %v710_v62, 1  ;;  %v3633_v11 = vld [vmem:[%s4437_s3 + $0x160] sm:$0xff]   ;;  %v722_v20 = vshll.u32 %v4008_v17, 16  ;;  %v3641_v62 = vld [vmem:[%s4437_s3 + $0x178] sm:$0xff]  }
  0x36   : > { %3166 = vmatprep.subr.bf16.mxu1 %v3625_v40  ;;  %3279 = vmatmul.mubr.bf16.gmra.mrb[4].mxu0 %v3988_v61  ;;  %v696_v9 = vor.u32 %v695_v2, %v691_v57  ;;  %v559_v21 = vrot.slane %v557_v12, 7  ;;  %v4018_v23 = vsel %vm3870_vm2, 0, %v555_v15  ;;  %v1067_v2 = vrot.slane %v3932_v16, 1  ;;  %v3647_v12 = vld [vmem:[%s4437_s3 + $0x190] sm:$0xff]   ;;  %v3648_v15 = vld [vmem:[%s4437_s3 + $0x98] sm:$0xff]   ;;  %s2721_s16 = sshll.u32 %s402_s21, 2 }
  0x37   : > { %3295 = vmatpush3.bf16.msra.mxu0 %v3627_v39  ;;  %v707_v14 = vrot.slane %v705_v6, 1  ;;  %v715_v27 = vshrl.u32 %v4018_v23, 16  ;;  %v717_v28 = vshll.u32 %v4018_v23, 16  ;;  %v724_v36 = vrot.slane %v722_v20, 1  ;;  %v3644_v6 = vld [vmem:[%s4437_s3 + $0x88] sm:$0xff]   ;;  %v3649_v20 = vld [vmem:[%s4437_s3 + $0x198] sm:$0xff]   ;;  %s404_s29 = scalar_lea.vmem %s4436_s2, %s2721_s16 }
  0x38   : > { %3151 = vmatmul.mubr.bf16.gmra.mrb[4].mxu1 %v3968_v49  ;;  %3296 = vmatprep.subr.bf16.mxu0 %v3629_v56  ;;  %v4012_v19 = vsel %vm629_vm3, %v696_v9, %v700_v55  ;;  %v562_v29 = vor.u32 %v560_v13, %v559_v21  ;;  %v4033_v32 = vsel %vm3870_vm2, %v559_v21, 0  ;;  %v1061_v55 = vrot.slane %v3894_v45, 1  ;;  %v3646_v9 = vld [vmem:[%s4437_s3 + $0x90] sm:$0xff]   ;;  %v3650_v21 = vld [vmem:[%s4437_s3 + $0xa0] sm:$0xff]  }
  0x39   : > { %3167 = vmatpush3.bf16.msra.mxu1 %v3625_v40  ;;  %3154 = vmatprep.mubr.bf16.mxu1 %v3988_v61  ;;  %v708_v22 = vor.u32 %v707_v14, %v703_v5  ;;  %v719_v35 = vrot.slane %v717_v28, 1  ;;  %v1454_v40 = vshll.u32 %v4033_v32, 16  ;;  %v1073_v13 = vrot.slane %v3975_v53, 1  ;;  %v2983_v28 = vld [vmem:[%s404_s29] sm:$0xff]  }
  0x3a   : > { %3168 = vmatprep.subr.bf16.mxu1 %v3628_v51  ;;  %3282 = vmatprep.mubr.bf16.mxu0 %v4012_v19  ;;  %v4037_v38 = vsel %vm3870_vm2, 0, %v562_v29  ;;  %v1074_v14 = vrot.slane %v3956_v34, 1  ;;  %v440_v29 = vstv %s427_s7 }
  0x3b   : > { %3297 = vmatpush3.bf16.msra.mxu0 %v3629_v56  ;;  %v4026_v30 = vsel %vm629_vm3, %v708_v22, %v712_v10  ;;  %v1447_v39 = vshrl.u32 %v4037_v38, 16  ;;  %v1449_v43 = vshll.u32 %v4037_v38, 16  ;;  %v720_v46 = vor.u32 %v719_v35, %v715_v27  ;;  %v3651_v27 = vld [vmem:[%s4437_s3 + $0x1a0] sm:$0xff]  }
  0x3c   : > { %3298 = vmatprep.subr.bf16.mxu0 %v3633_v11  ;;  %v1456_v50 = vrot.slane %v1454_v40, 1  ;;  %v1062_v56 = vrot.slane %v3876_v37, 1  ;;  %v1065_v37 = vrot.slane %v3886_v41, 1  ;;  %v3643_v41 = vld [vmem:[%s4437_s3 + $0x180] sm:$0xff]   ;;  %v1070_v10 = vrot.slane %v3947_v25, 1 }
  0x3d   : > { %3169 = vmatpush3.bf16.msra.mxu1 %v3628_v51  ;;  %v1451_v48 = vrot.slane %v1449_v43, 1  ;;  %v4052_v51 = vsel %vm629_vm3, %v720_v46, %v724_v36  ;;  %v4132_v34 = vsel %vm1057_vm4, %v1073_v13, %v1074_v14  ;;  %v1076_v22 = vrot.slane %v3994_v3, 1  ;;  %v3662_v13 = vld [vmem:[%s4437_s3 + $0xd0] sm:$0xff]  }
  0x3e   : > { %3170 = vmatprep.subr.bf16.mxu1 %v3631_v4  ;;  %3283 = vmatmul.mubr.bf16.gmra.mrb[8].mxu0 %v4026_v30  ;;  %v4071_v63 = vsel %vm1057_vm4, %v1061_v55, %v1062_v56  ;;  %v4089_v5 = vsel %vm1057_vm4, %v1064_v1, %v1065_v37  ;;  %v1080_v35 = vrot.slane %v4008_v17, 1  ;;  %v2984_v36 = vunpack.c.l.bf16 %v2983_v28  ;;  %v3655_v56 = vld [vmem:[%s4437_s3 + $0x1b0] sm:$0xff]   ;;  %v3657_v1 = vld [vmem:[%s4437_s3 + $0x1b8] sm:$0xff]  }
  0x3f   : > { %3299 = vmatpush3.bf16.msra.mxu0 %v3633_v11  ;;  %3286 = vmatprep.mubr.bf16.mxu0 %v4052_v51  ;;  %v1452_v57 = vor.u32 %v1451_v48, %v1447_v39  ;;  %v1071_v11 = vrot.slane %v3936_v18, 1  ;;  %v2985_v40 = vunpack.c.h.bf16 %v2983_v28  ;;  %v3653_v39 = vld [vmem:[%s4437_s3 + $0x1a8] sm:$0xff]   ;;  %v1640_v55 = vrot.slane %v4033_v32, 1  ;;  %v3663_v14 = vld [vmem:[%s4437_s3 + $0x1d0] sm:$0xff]  }
  0x40   : > { %3155 = vmatmul.mubr.bf16.gmra.mrb[8].mxu1 %v4012_v19  ;;  %3300 = vmatprep.subr.bf16.mxu0 %v3635_v31  ;;  %v441_v43 = vmul.f32 %v2984_v36, %v440_v29  ;;  %v1059_v37 = vrot.slane %v3890_v44, 1  ;;  %v3671_v28 = vld [vmem:[%s4437_s3 + $0x1f0] sm:$0xff]   ;;  %v3675_v36 = vld [vmem:[%s4437_s3 + $0x208] sm:$0xff]  }
  0x41   : > { %3171 = vmatpush3.bf16.msra.mxu1 %v3631_v4  ;;  %3158 = vmatprep.mubr.bf16.mxu1 %v4026_v30  ;;  %v4061_v59 = vsel %vm629_vm3, %v1452_v57, %v1456_v50  ;;  %v1068_v4 = vrot.slane %v3920_v7, 1  ;;  %v3645_v7 = vld [vmem:[%s4437_s3 + $0x188] sm:$0xff]   ;;  %v4121_v18 = vsel %vm1057_vm4, %v1070_v10, %v1071_v11  ;;  %v442_v46 = vmul.f32 %v2985_v40, %v440_v29  ;;  %v3659_v10 = vld [vmem:[%s4437_s3 + $0x1c0] sm:$0xff]   ;;  %v3672_v29 = vld [vmem:[%s4437_s3 + $0xf8] sm:$0xff]  }
  0x42   : > { %3172 = vmatprep.subr.bf16.mxu1 %v3634_v26  ;;  %v1639_v50 = vrot.slane %v4037_v38, 1  ;;  %v1058_v57 = vrot.slane %v3906_v52, 1  ;;  %v3660_v11 = vld [vmem:[%s4437_s3 + $0xc8] sm:$0xff]   ;;  %v3680_v40 = vld [vmem:[%s4437_s3 + $0x230] sm:$0xff]  }
  0x43   : > { %3301 = vmatpush3.bf16.msra.mxu0 %v3635_v31  ;;  %v4102_v8 = vsel %vm1057_vm4, %v1067_v2, %v1068_v4  ;;  %v1079_v31 = vrot.slane %v4018_v23, 1  ;;  %v443_v48 = vpack.c.bf16 %v442_v46, %v441_v43 }
  0x44   : > { %3302 = vmatprep.subr.bf16.mxu0 %v3639_v47  ;;  %v4176_v32 = vsel %vm1057_vm4, %v1639_v50, %v1640_v55  ;;  %v1060_v4 = vsel %vm1057_vm4, %v1058_v57, %v1059_v37 }
  0x45   : > { %3173 = vmatpush3.bf16.msra.mxu1 %v3634_v26  ;;  %v1077_v26 = vrot.slane %v3984_v60, 1  ;;  %v4161_v17 = vsel %vm1057_vm4, %v1079_v31, %v1080_v35  ;;  %v3673_v31 = vld [vmem:[%s4437_s3 + $0x1f8] sm:$0xff]   ;;  %v3674_v35 = vld [vmem:[%s4437_s3 + $0x200] sm:$0xff]  }
  0x46   : > { %3174 = vmatprep.subr.bf16.mxu1 %v3637_v42  ;;  %3287 = vmatmul.mubr.bf16.gmra.mrb[12].mxu0 %v4061_v59 }
  0x47   : > { %3303 = vmatpush3.bf16.msra.mxu0 %v3639_v47  ;;  %3306 = vmatprep.mubr.bf16.mxu0 %v4071_v63  ;;  %v4150_v60 = vsel %vm1057_vm4, %v1076_v22, %v1077_v26  ;;  %v3654_v47 = vld [vmem:[%s4437_s3 + $0xb0] sm:$0xff]   ;;  %v3668_v22 = vld [vmem:[%s4437_s3 + $0xe8] sm:$0xff]  }
  0x48   : > { %3159 = vmatmul.mubr.bf16.gmra.mrb[12].mxu1 %v4052_v51  ;;  %3304 = vmatprep.subr.bf16.mxu0 %v3641_v62  ;;  %v3669_v26 = vld [vmem:[%s4437_s3 + $0x1e8] sm:$0xff]  }
  0x49   : > { %3175 = vmatpush3.bf16.msra.mxu1 %v3637_v42  ;;  %3178 = vmatprep.mubr.bf16.mxu1 %v3906_v52  ;;  %v3652_v42 = vld [vmem:[%s4437_s3 + $0xa8] sm:$0xff]   ;;  %v3656_v52 = vld [vmem:[%s4437_s3 + $0xb8] sm:$0xff]  }
  0x4a   : > { %3176 = vmatprep.subr.bf16.mxu1 %v3640_v58 }
  0x4b   : > { %3305 = vmatpush3.bf16.msra.mxu0 %v3641_v62  ;;  %v567_v62 = vshll.u32 %v443_v48, 16 }
  0x4c   : > { %3322 = vmatprep.subr.bf16.mxu0 %v3643_v41 }
  0x4d   : > { %3177 = vmatpush3.bf16.msra.mxu1 %v3640_v58  ;;  %v564_v58 = vshrl.u32 %v443_v48, 16 }
  0x4e   : > { %3194 = vmatprep.subr.bf16.mxu1 %v3642_v0  ;;  %3307 = vmatmul.mubr.bf16.vlgmr.msra.gmra.mrb[0].mxu0 %v4089_v5 }
  0x4f   : > { %3323 = vmatpush3.bf16.msra.mxu0 %v3643_v41  ;;  %3310 = vmatprep.mubr.bf16.mxu0 %v4102_v8 }
  0x50   : > { %3179 = vmatmul.mubr.bf16.vlgmr.msra.gmra.mrb[0].mxu1 %v3894_v45  ;;  %3324 = vmatprep.subr.bf16.mxu0 %v3645_v7 }
  0x51   : > { %3195 = vmatpush3.bf16.msra.mxu1 %v3642_v0  ;;  %3182 = vmatprep.mubr.bf16.mxu1 %v3910_v54  ;;  %v566_v0 = vrot.slane %v564_v58, 7 }
  0x52   : > { %3196 = vmatprep.subr.bf16.mxu1 %v3644_v6 }
  0x53   : > { %3325 = vmatpush3.bf16.msra.mxu0 %v3645_v7  ;;  %v569_v41 = vor.u32 %v567_v62, %v566_v0  ;;  %v4186_v44 = vsel %vm3870_vm2, %v566_v0, 0 }
  0x54   : > { %3326 = vmatprep.subr.bf16.mxu0 %v3647_v12  ;;  %v2193_v2 = vrot.slane %v4186_v44, 1 }
  0x55   : > { %3197 = vmatpush3.bf16.msra.mxu1 %v3644_v6  ;;  %v4194_v6 = vsel %vm3870_vm2, 0, %v569_v41 }
  0x56   : > { %3198 = vmatprep.subr.bf16.mxu1 %v3646_v9  ;;  %3311 = vmatmul.mubr.bf16.gmra.mrb[4].mxu0 %v4121_v18  ;;  %v2192_v7 = vrot.slane %v4194_v6, 1 }
  0x57   : > { %3327 = vmatpush3.bf16.msra.mxu0 %v3647_v12  ;;  %3314 = vmatprep.mubr.bf16.mxu0 %v4132_v34  ;;  %v3661_v12 = vld [vmem:[%s4437_s3 + $0x1c8] sm:$0xff]  }
  0x58   : > { %3183 = vmatmul.mubr.bf16.gmra.mrb[4].mxu1 %v3932_v16  ;;  %3328 = vmatprep.subr.bf16.mxu0 %v3649_v20  ;;  %v4205_v33 = vsel %vm1057_vm4, %v2192_v7, %v2193_v2 }
  0x59   : > { %3199 = vmatpush3.bf16.msra.mxu1 %v3646_v9  ;;  %3186 = vmatprep.mubr.bf16.mxu1 %v3947_v25  ;;  %v3658_v9 = vld [vmem:[%s4437_s3 + $0xc0] sm:$0xff]  }
  0x5a   : > { %3200 = vmatprep.subr.bf16.mxu1 %v3648_v15 }
  0x5b   : > { %3329 = vmatpush3.bf16.msra.mxu0 %v3649_v20  ;;  %v3666_v20 = vld [vmem:[%s4437_s3 + $0xe0] sm:$0xff]  }
  0x5c   : > { %3330 = vmatprep.subr.bf16.mxu0 %v3651_v27 }
  0x5d   : > { %3201 = vmatpush3.bf16.msra.mxu1 %v3648_v15  ;;  %v3665_v15 = vld [vmem:[%s4437_s3 + $0x1d8] sm:$0xff]  }
  0x5e   : > { %3202 = vmatprep.subr.bf16.mxu1 %v3650_v21  ;;  %3315 = vmatmul.mubr.bf16.gmra.mrb[8].mxu0 %v4150_v60 }
  0x5f   : > { %3331 = vmatpush3.bf16.msra.mxu0 %v3651_v27  ;;  %3318 = vmatprep.mubr.bf16.mxu0 %v4161_v17  ;;  %v3670_v27 = vld [vmem:[%s4437_s3 + $0xf0] sm:$0xff]  }
  0x60   : > { %3187 = vmatmul.mubr.bf16.gmra.mrb[8].mxu1 %v3975_v53  ;;  %3332 = vmatprep.subr.bf16.mxu0 %v3653_v39 }
  0x61   : > { %3203 = vmatpush3.bf16.msra.mxu1 %v3650_v21  ;;  %3190 = vmatprep.mubr.bf16.mxu1 %v3994_v3  ;;  %v3667_v21 = vld [vmem:[%s4437_s3 + $0x1e0] sm:$0xff]  }
  0x62   : > { %3204 = vmatprep.subr.bf16.mxu1 %v3652_v42 }
  0x63   : > { %3333 = vmatpush3.bf16.msra.mxu0 %v3653_v39 }
  0x64   : > { %3334 = vmatprep.subr.bf16.mxu0 %v3655_v56 }
  0x65   : > { %3205 = vmatpush3.bf16.msra.mxu1 %v3652_v42 }
  0x66   : > { %3206 = vmatprep.subr.bf16.mxu1 %v3654_v47  ;;  %3319 = vmatmul.mubr.bf16.gmra.mrb[12].mxu0 %v4176_v32 }
  0x67   : > { %3335 = vmatpush3.bf16.msra.mxu0 %v3655_v56  ;;  %3338 = vmatprep.mubr.bf16.mxu0 %v3910_v54 }
  0x68   : > { %3191 = vmatmul.mubr.bf16.gmra.mrb[12].mxu1 %v4018_v23  ;;  %3336 = vmatprep.subr.bf16.mxu0 %v3657_v1 }
  0x69   : > { %3207 = vmatpush3.bf16.msra.mxu1 %v3654_v47  ;;  %3210 = vmatprep.mubr.bf16.mxu1 %v1060_v4 }
  0x6a   : > { %3208 = vmatprep.subr.bf16.mxu1 %v3656_v52 }
  0x6b   : > { %3337 = vmatpush3.bf16.msra.mxu0 %v3657_v1 }
  0x6c   : > { %3354 = vmatprep.subr.bf16.mxu0 %v3659_v10 }
  0x6d   : > { %3209 = vmatpush3.bf16.msra.mxu1 %v3656_v52 }
  0x6e   : > { %3226 = vmatprep.subr.bf16.mxu1 %v3658_v9  ;;  %3339 = vmatmul.mubr.bf16.vlgmr.msra.gmra.mrb[0].mxu0 %v3932_v16 }
  0x6f   : > { %3355 = vmatpush3.bf16.msra.mxu0 %v3659_v10  ;;  %3342 = vmatprep.mubr.bf16.mxu0 %v3947_v25  ;;  %v4333_v10 = vld [vmem:[%s4438_s4] ss:$0 sm:$0xff] }
  0x70   : > { %3211 = vmatmul.mubr.bf16.vlgmr.msra.gmra.mrb[0].mxu1 %v4071_v63  ;;  %3356 = vmatprep.subr.bf16.mxu0 %v3661_v12  ;;  %v3664_v63 = vld [vmem:[%s4437_s3 + $0xd8] sm:$0xff]  }
  0x71   : > { %3227 = vmatpush3.bf16.msra.mxu1 %v3658_v9  ;;  %3214 = vmatprep.mubr.bf16.mxu1 %v4089_v5 }
  0x72   : > { %3228 = vmatprep.subr.bf16.mxu1 %v3660_v11 }
  0x73   : > { %3357 = vmatpush3.bf16.msra.mxu0 %v3661_v12 }
  0x74   : > { %3358 = vmatprep.subr.bf16.mxu0 %v3663_v14 }
  0x75   : > { %3229 = vmatpush3.bf16.msra.mxu1 %v3660_v11 }
  0x76   : > { %3230 = vmatprep.subr.bf16.mxu1 %v3662_v13  ;;  %3343 = vmatmul.mubr.bf16.gmra.mrb[4].mxu0 %v3975_v53 }
  0x77   : > { %3359 = vmatpush3.bf16.msra.mxu0 %v3663_v14  ;;  %3346 = vmatprep.mubr.bf16.mxu0 %v3994_v3 }
  0x78   : > { %3215 = vmatmul.mubr.bf16.gmra.mrb[4].mxu1 %v4102_v8  ;;  %3360 = vmatprep.subr.bf16.mxu0 %v3665_v15 }
  0x79   : > { %3231 = vmatpush3.bf16.msra.mxu1 %v3662_v13  ;;  %3218 = vmatprep.mubr.bf16.mxu1 %v4121_v18 }
  0x7a   : > { %3232 = vmatprep.subr.bf16.mxu1 %v3664_v63 }
  0x7b   : > { %3361 = vmatpush3.bf16.msra.mxu0 %v3665_v15 }
  0x7c   : > { %3362 = vmatprep.subr.bf16.mxu0 %v3667_v21 }
  0x7d   : > { %3233 = vmatpush3.bf16.msra.mxu1 %v3664_v63  ;;  %v4338_v63 = vld [vmem:[%s4439_s5] ss:$0 sm:$0xff] }
  0x7e   : > { %3234 = vmatprep.subr.bf16.mxu1 %v3666_v20  ;;  %3347 = vmatmul.mubr.bf16.gmra.mrb[8].mxu0 %v4018_v23 }
  0x7f   : > { %3363 = vmatpush3.bf16.msra.mxu0 %v3667_v21  ;;  %3350 = vmatprep.mubr.bf16.mxu0 %v4037_v38 }
  0x80   : > { %3219 = vmatmul.mubr.bf16.gmra.mrb[8].mxu1 %v4132_v34  ;;  %3364 = vmatprep.subr.bf16.mxu0 %v3669_v26 }
  0x81   : > { %3235 = vmatpush3.bf16.msra.mxu1 %v3666_v20  ;;  %3222 = vmatprep.mubr.bf16.mxu1 %v4150_v60 }
  0x82   : > { %3236 = vmatprep.subr.bf16.mxu1 %v3668_v22 }
  0x83   : > { %3365 = vmatpush3.bf16.msra.mxu0 %v3669_v26 }
  0x84   : > { %3366 = vmatprep.subr.bf16.mxu0 %v3671_v28 }
  0x85   : > { %3237 = vmatpush3.bf16.msra.mxu1 %v3668_v22 }
  0x86   : > { %3238 = vmatprep.subr.bf16.mxu1 %v3670_v27  ;;  %3351 = vmatmul.mubr.bf16.gmra.mrb[12].mxu0 %v4194_v6 }
  0x87   : > { %3367 = vmatpush3.bf16.msra.mxu0 %v3671_v28  ;;  %3370 = vmatprep.mubr.bf16.mxu0 %v3943_v24  ;;  %v2002_v24 = vshll.u32 %v4194_v6, 16 }
  0x88   : > { %3223 = vmatmul.mubr.bf16.gmra.mrb[12].mxu1 %v4161_v17  ;;  %3368 = vmatprep.subr.bf16.mxu0 %v3673_v31 }
  0x89   : > { %3239 = vmatpush3.bf16.msra.mxu1 %v3670_v27  ;;  %3242 = vmatprep.mubr.bf16.mxu1 %v3894_v45  ;;  %v3676_v45 = vld [vmem:[%s4437_s3 + $0x210] sm:$0xff]  }
  0x8a   : > { %3240 = vmatprep.subr.bf16.mxu1 %v3672_v29 }
  0x8b   : > { %3369 = vmatpush3.bf16.msra.mxu0 %v3673_v31 }
  0x8c   : > { %3386 = vmatprep.subr.bf16.mxu0 %v3674_v35 }
  0x8d   : > { %3241 = vmatpush3.bf16.msra.mxu1 %v3672_v29 }
  0x8e   : > { %3418 = vmatprep.subr.bf16.mxu1 %v3674_v35  ;;  %3371 = vmatmul.mubr.bf16.vlgmr.msra.gmra.mrb[0].mxu0 %v3968_v49  ;;  %v2000_v49 = vshrl.u32 %v4194_v6, 16 }
  0x8f   : > { %3387 = vmatpush3.bf16.msra.mxu0 %v3674_v35  ;;  %3374 = vmatprep.mubr.bf16.mxu0 %v3988_v61  ;;  %v2004_v61 = vrot.slane %v2002_v24, 1 }
  0x90   : > { %3243 = vmatmul.mubr.bf16.vlgmr.msra.gmra.mrb[0].mxu1 %v3910_v54  ;;  %3388 = vmatprep.subr.bf16.mxu0 %v3675_v36  ;;  %v3677_v54 = vld [vmem:[%s4437_s3 + $0x218] sm:$0xff]  }
  0x91   : > { %3426 = vmatpush3.bf16.msra.mxu1 %v3674_v35  ;;  %3246 = vmatprep.mubr.bf16.mxu1 %v3932_v16  ;;  %v3678_v16 = vld [vmem:[%s4437_s3 + $0x220] sm:$0xff]  }
  0x92   : > { %3419 = vmatprep.subr.bf16.mxu1 %v3675_v36 }
  0x93   : > { %3389 = vmatpush3.bf16.msra.mxu0 %v3675_v36 }
  0x94   : > { %3390 = vmatprep.subr.bf16.mxu0 %v3676_v45 }
  0x95   : > { %3427 = vmatpush3.bf16.msra.mxu1 %v3675_v36 }
  0x96   : > { %3420 = vmatprep.subr.bf16.mxu1 %v3676_v45  ;;  %3375 = vmatmul.mubr.bf16.gmra.mrb[4].mxu0 %v4012_v19  ;;  %v3679_v19 = vld [vmem:[%s4437_s3 + $0x228] sm:$0xff]  }
  0x97   : > { %3391 = vmatpush3.bf16.msra.mxu0 %v3676_v45  ;;  %3378 = vmatprep.mubr.bf16.mxu0 %v4026_v30 }
  0x98   : > { %3247 = vmatmul.mubr.bf16.gmra.mrb[4].mxu1 %v3947_v25  ;;  %3392 = vmatprep.subr.bf16.mxu0 %v3677_v54  ;;  %v2007_v25 = vshll.u32 %v4186_v44, 16 }
  0x99   : > { %3428 = vmatpush3.bf16.msra.mxu1 %v3676_v45  ;;  %3250 = vmatprep.mubr.bf16.mxu1 %v3975_v53  ;;  %v2005_v53 = vor.u32 %v2004_v61, %v2000_v49 }
  0x9a   : > { %3421 = vmatprep.subr.bf16.mxu1 %v3677_v54  ;;  %v2009_v30 = vrot.slane %v2007_v25, 1 }
  0x9b   : > { %3393 = vmatpush3.bf16.msra.mxu0 %v3677_v54 }
  0x9c   : > { %3394 = vmatprep.subr.bf16.mxu0 %v3678_v16 }
  0x9d   : > { %3429 = vmatpush3.bf16.msra.mxu1 %v3677_v54 }
  0x9e   : > { %3422 = vmatprep.subr.bf16.mxu1 %v3678_v16  ;;  %3379 = vmatmul.mubr.bf16.gmra.mrb[8].mxu0 %v4052_v51  ;;  %v3681_v51 = vld [vmem:[%s4437_s3 + $0x238] sm:$0xff]  }
  0x9f   : > { %3395 = vmatpush3.bf16.msra.mxu0 %v3678_v16  ;;  %3382 = vmatprep.mubr.bf16.mxu0 %v4061_v59 }
  0xa0   : > { %3251 = vmatmul.mubr.bf16.gmra.mrb[8].mxu1 %v3994_v3  ;;  %3396 = vmatprep.subr.bf16.mxu0 %v3679_v19  ;;  %v2010_v3 = vsel %vm629_vm3, %v2005_v53, %v2009_v30 }
  0xa1   : > { %3430 = vmatpush3.bf16.msra.mxu1 %v3678_v16  ;;  %3254 = vmatprep.mubr.bf16.mxu1 %v4018_v23 }
  0xa2   : > { %3423 = vmatprep.subr.bf16.mxu1 %v3679_v19 }
  0xa3   : > { %3397 = vmatpush3.bf16.msra.mxu0 %v3679_v19 }
  0xa4   : > { %3398 = vmatprep.subr.bf16.mxu0 %v3680_v40 }
  0xa5   : > { %3431 = vmatpush3.bf16.msra.mxu1 %v3679_v19 }
  0xa6   : > { %3424 = vmatprep.subr.bf16.mxu1 %v3680_v40  ;;  %3383 = vmatmul.mubr.bf16.gmra.mrb[12].mxu0 %v2010_v3 }
  0xa7   : > { %3399 = vmatpush3.bf16.msra.mxu0 %v3680_v40  ;;  %3402 = vmatprep.mubr.bf16.mxu0 %v4089_v5 }
  0xa8   : > { %3255 = vmatmul.mubr.bf16.gmra.mrb[12].mxu1 %v4037_v38  ;;  %3400 = vmatprep.subr.bf16.mxu0 %v3681_v51 }
  0xa9   : > { %3432 = vmatpush3.bf16.msra.mxu1 %v3680_v40  ;;  %3410 = vmatprep.mubr.bf16.mxu1 %v4150_v60 }
  0xaa   : > { %3425 = vmatprep.subr.bf16.mxu1 %v3681_v51 }
  0xab   : > { %3401 = vmatpush3.bf16.msra.mxu0 %v3681_v51 }
  0xad   : > { %3433 = vmatpush3.bf16.msra.mxu1 %v3681_v51 }
  0xae   : > { %3403 = vmatmul.mubr.bf16.vlgmr.msra.gmra.mrb[0].mxu0 %v4102_v8 }
  0xaf   : > { %3406 = vmatprep.mubr.bf16.mxu0 %v4121_v18 }
  0xb0   : > { %3411 = vmatmul.mubr.bf16.vlgmr.msra.gmra.mrb[16].mxu1 %v4161_v17 }
  0xb1   : > { %3414 = vmatprep.mubr.bf16.mxu1 %v4176_v32 }
  0xb6   : > { %3407 = vmatmul.mubr.bf16.gmra.mrb[4].mxu0 %v4132_v34 }
  0xb8   : > { %3415 = vmatmul.mubr.bf16.gmra.mrb[20].mxu1 %v4205_v33 }
 0x163   : > { %v3244_v23 = vpop.f32.mrb[0].mxu1 }
 0x164   : > { %v1367_v38 = vpop.f32.mrb[1].mxu1 }
 0x165   : > { %v3245_v59 = vpop.f32.mrb[2].mxu1 }
 0x166   : > { %v1370_v5 = vpop.f32.mrb[3].mxu1 }
 0x16b   : > { %v4314_v42 = vpop.f32.mrb[4].mxu1 }
 0x16c   : > { %v4316_v60 = vpop.f32.mrb[5].mxu1 }
 0x16d   : > { %v4318_v39 = vpop.f32.mrb[6].mxu1 }
 0x16e   : > { %v4320_v8 = vpop.f32.mrb[7].mxu1 }
 0x171   : > { %v3380_v18 = vpop.f32.mrb[8].mxu0 }
 0x172   : > { %v2143_v47 = vpop.f32.mrb[9].mxu0 }
 0x173   : > { %v3252_v43 = vpop.f32.mrb[8].mxu1  ;;  %v3381_v50 = vpop.f32.mrb[10].mxu0 }
 0x174   : > { %v3442_v46 = vadd.f32 %v3380_v18, %v3252_v43  ;;  %v1399_v17 = vpop.f32.mrb[9].mxu1  ;;  %v2146_v57 = vpop.f32.mrb[11].mxu0 }
 0x175   : > { %v3444_v34 = vadd.f32 %v2143_v47, %v1399_v17  ;;  %v3253_v48 = vpop.f32.mrb[10].mxu1 }
 0x176   : > { %v3446_v55 = vadd.f32 %v3381_v50, %v3253_v48  ;;  %v1402_v56 = vpop.f32.mrb[11].mxu1 }
 0x177   : > { %v3448_v58 = vadd.f32 %v2146_v57, %v1402_v56 }
 0x179   : > { %v3384_v37 = vpop.f32.mrb[12].mxu0 }
 0x17a   : > { %v2159_v52 = vpop.f32.mrb[13].mxu0 }
 0x17b   : > { %v3256_v62 = vpop.f32.mrb[12].mxu1  ;;  %v3385_v44 = vpop.f32.mrb[14].mxu0 }
 0x17c   : > { %v4322_v0 = vadd.f32 %v3384_v37, %v3256_v62  ;;  %v1415_v32 = vpop.f32.mrb[13].mxu1  ;;  %v2162_v6 = vpop.f32.mrb[15].mxu0 }
 0x17d   : > { %v4324_v1 = vadd.f32 %v2159_v52, %v1415_v32  ;;  %v3257_v41 = vpop.f32.mrb[14].mxu1 }
 0x17e   : > { %v4326_v2 = vadd.f32 %v3385_v44, %v3257_v41  ;;  %v1418_v4 = vpop.f32.mrb[15].mxu1 }
 0x17f   : > { %v4328_v7 = vadd.f32 %v2162_v6, %v1418_v4 }
 0x181   : > { %v3404_v9 = vpop.f32.mrb[0].mxu0 }
 0x182   : > { %v3434_v11 = vadd.f32 %v3404_v9, %v3244_v23  ;;  %v2295_v13 = vpop.f32.mrb[1].mxu0 }
 0x183   : > { %v3412_v33 = vpop.f32.mrb[16].mxu1  ;;  %v3435_v15 = vadd.f32 %v2295_v13, %v1367_v38  ;;  %v3405_v21 = vpop.f32.mrb[2].mxu0 }
 0x184   : > { %v3443_v12 = vadd.f32 %v3442_v46, %v3412_v33  ;;  %v2327_v14 = vpop.f32.mrb[17].mxu1  ;;  %v2383_v26 = vmul.f32 %v3434_v11, %v4333_v10  ;;  %v3436_v28 = vadd.f32 %v3405_v21, %v3245_v59  ;;  %v2298_v31 = vpop.f32.mrb[3].mxu0 }
 0x185   : > { %v3445_v20 = vadd.f32 %v3444_v34, %v2327_v14  ;;  %v3413_v22 = vpop.f32.mrb[18].mxu1  ;;  %v2381_v36 = vmul.f32 %v3435_v15, %v4333_v10  ;;  %v3437_v54 = vadd.f32 %v2298_v31, %v1370_v5 }
 0x186   : > { %v2391_v27 = vmul.f32 %v3443_v12, %v4333_v10  ;;  %v3447_v29 = vadd.f32 %v3446_v55, %v3413_v22  ;;  %v2330_v35 = vpop.f32.mrb[19].mxu1  ;;  %v2406_v16 = vadd.f32 %v4338_v63, %v2383_v26  ;;  %v2384_v61 = vmul.f32 %v3436_v28, %v4333_v10 }
 0x187   : > { %v2389_v45 = vmul.f32 %v3445_v20, %v4333_v10  ;;  %v3449_v24 = vadd.f32 %v3448_v58, %v2330_v35  ;;  %v2404_v19 = vadd.f32 %v4338_v63, %v2381_v36  ;;  %v2382_v30 = vmul.f32 %v3437_v54, %v4333_v10 }
 0x188   : > { %v2414_v49 = vadd.f32 %v4338_v63, %v2391_v27  ;;  %v2392_v25 = vmul.f32 %v3447_v29, %v4333_v10  ;;  %vm2422_vm6 = vcmp.ge.f32.partialorder %v2406_v16, 0.0  ;;  %v2438_v3 = vmul.f32 0.1, %v2406_v16 }
 0x189   : > { %v2412_v53 = vadd.f32 %v4338_v63, %v2389_v45  ;;  %v2390_v40 = vmul.f32 %v3449_v24, %v4333_v10  ;;  %vm2420_vm8 = vcmp.ge.f32.partialorder %v2404_v19, 0.0  ;;  %v2436_v23 = vmul.f32 0.1, %v2404_v19  ;;  %v3408_v46 = vpop.f32.mrb[4].mxu0 }
 0x18a   : > { %vm2430_vm7 = vcmp.ge.f32.partialorder %v2414_v49, 0.0  ;;  %v2446_v51 = vmul.f32 0.1, %v2414_v49  ;;  %v2454_v59 = vsel %vm2422_vm6, %v2406_v16, %v2438_v3  ;;  %v2407_v43 = vadd.f32 %v4338_v63, %v2384_v61  ;;  %v2311_v55 = vpop.f32.mrb[5].mxu0 }
 0x18b   : > { %vm2428_vm9 = vcmp.ge.f32.partialorder %v2412_v53, 0.0  ;;  %v2444_v38 = vmul.f32 0.1, %v2412_v53  ;;  %v2415_v18 = vadd.f32 %v4338_v63, %v2392_v25  ;;  %v3416_v17 = vpop.f32.mrb[20].mxu1  ;;  %v2964_v47 = vpack.c.bf16 %v2454_v59, %v2454_v59  ;;  %v3409_v37 = vpop.f32.mrb[6].mxu0 }
 0x18c   : > { %v2462_v5 = vsel %vm2430_vm7, %v2414_v49, %v2446_v51  ;;  %v2452_v48 = vsel %vm2420_vm8, %v2404_v19, %v2436_v23  ;;  %v2343_v56 = vpop.f32.mrb[21].mxu1  ;;  %vm2423_vm10 = vcmp.ge.f32.partialorder %v2407_v43, 0.0  ;;  %v2439_v62 = vmul.f32 0.1, %v2407_v43  ;;  %v2314_v4 = vpop.f32.mrb[7].mxu0 }
 0x18d   : > { %v2972_v34 = vpack.c.bf16 %v2462_v5, %v2462_v5  ;;  %v2460_v50 = vsel %vm2428_vm9, %v2412_v53, %v2444_v38  ;;  %v2962_v57 = vpack.c.bf16 %v2452_v48, %v2452_v48  ;;  %v3417_v32 = vpop.f32.mrb[22].mxu1  ;;  %2535 = vst.msk [vmem:[%s4357_s8 + $0x8] sm:$0xf] %vm2532_vm5, %v2964_v47  ;;  %vm2431_vm11 = vcmp.ge.f32.partialorder %v2415_v18, 0.0 }
 0x18e   : > { %v2970_v58 = vpack.c.bf16 %v2460_v50, %v2460_v50  ;;  %v2447_v52 = vmul.f32 0.1, %v2415_v18  ;;  %v2405_v41 = vadd.f32 %v4338_v63, %v2382_v30  ;;  %v2413_v44 = vadd.f32 %v4338_v63, %v2390_v40  ;;  %v2346_v6 = vpop.f32.mrb[23].mxu1 }
 0x18f   : > { %2543 = vst.msk [vmem:[%s4357_s8 + $0x28] sm:$0xf] %vm2532_vm5, %v2972_v34  ;;  %2533 = vst.msk [vmem:[%s4357_s8] sm:$0xf] %vm2532_vm5, %v2962_v57  ;;  %v2455_v9 = vsel %vm2423_vm10, %v2407_v43, %v2439_v62  ;;  %v3438_v33 = vadd.f32 %v3408_v46, %v4314_v42  ;;  %v3451_v11 = vadd.f32 %v4322_v0, %v3416_v17 }
 0x190   : > { %2541 = vst.msk [vmem:[%s4357_s8 + $0x20] sm:$0xf] %vm2532_vm5, %v2970_v58  ;;  %v3439_v12 = vadd.f32 %v2311_v55, %v4316_v60  ;;  %v2965_v13 = vpack.c.bf16 %v2455_v9, %v2455_v9  ;;  %v2463_v14 = vsel %vm2431_vm11, %v2415_v18, %v2447_v52  ;;  %vm2421_vm12 = vcmp.ge.f32.partialorder %v2405_v41, 0.0 }
 0x191   : > { %v2437_v15 = vmul.f32 0.1, %v2405_v41  ;;  %v2973_v20 = vpack.c.bf16 %v2463_v14, %v2463_v14  ;;  %vm2429_vm13 = vcmp.ge.f32.partialorder %v2413_v44, 0.0  ;;  %v2445_v21 = vmul.f32 0.1, %v2413_v44 }
 0x192   : > { %v2387_v22 = vmul.f32 %v3438_v33, %v4333_v10  ;;  %2536 = vst.msk [vmem:[%s4357_s8 + $0xc] sm:$0xf] %vm2532_vm5, %v2965_v13  ;;  %v2395_v42 = vmul.f32 %v3451_v11, %v4333_v10  ;;  %v2385_v27 = vmul.f32 %v3439_v12, %v4333_v10  ;;  %v3453_v60 = vadd.f32 %v4324_v1, %v2343_v56 }
 0x193   : > { %v2453_v26 = vsel %vm2421_vm12, %v2405_v41, %v2437_v15  ;;  %2544 = vst.msk [vmem:[%s4357_s8 + $0x2c] sm:$0xf] %vm2532_vm5, %v2973_v20  ;;  %v2461_v28 = vsel %vm2429_vm13, %v2413_v44, %v2445_v21  ;;  %v3440_v31 = vadd.f32 %v3409_v37, %v4318_v39  ;;  %v3455_v16 = vadd.f32 %v4326_v2, %v3417_v32 }
 0x194   : > { %v2963_v0 = vpack.c.bf16 %v2453_v26, %v2453_v26  ;;  %v2410_v29 = vadd.f32 %v4338_v63, %v2387_v22  ;;  %v2971_v35 = vpack.c.bf16 %v2461_v28, %v2461_v28  ;;  %v2418_v36 = vadd.f32 %v4338_v63, %v2395_v42 }
 0x195   : > { %v2408_v45 = vadd.f32 %v4338_v63, %v2385_v27  ;;  %v2393_v54 = vmul.f32 %v3453_v60, %v4333_v10  ;;  %v2388_v1 = vmul.f32 %v3440_v31, %v4333_v10  ;;  %v2396_v53 = vmul.f32 %v3455_v16, %v4333_v10 }
 0x196   : > { %2534 = vst.msk [vmem:[%s4357_s8 + $0x4] sm:$0xf] %vm2532_vm5, %v2963_v0  ;;  %vm2426_vm14 = vcmp.ge.f32.partialorder %v2410_v29, 0.0  ;;  %v2442_v24 = vmul.f32 0.1, %v2410_v29  ;;  %vm2434_vm15 = vcmp.ge.f32.partialorder %v2418_v36, 0.0  ;;  %v3441_v2 = vadd.f32 %v2314_v4, %v4320_v8 }
 0x197   : > { %2542 = vst.msk [vmem:[%s4357_s8 + $0x24] sm:$0xf] %vm2532_vm5, %v2971_v35  ;;  %v2450_v39 = vmul.f32 0.1, %v2418_v36  ;;  %vm2424_vm0 = vcmp.ge.f32.partialorder %v2408_v45, 0.0  ;;  %v2416_v25 = vadd.f32 %v4338_v63, %v2393_v54  ;;  %v2411_v19 = vadd.f32 %v4338_v63, %v2388_v1 }
 0x198   : > { %v2440_v49 = vmul.f32 0.1, %v2408_v45  ;;  %v2458_v61 = vsel %vm2426_vm14, %v2410_v29, %v2442_v24  ;;  %v2419_v5 = vadd.f32 %v4338_v63, %v2396_v53  ;;  %v2386_v43 = vmul.f32 %v3441_v2, %v4333_v10 }
 0x199   : > { %v2968_v30 = vpack.c.bf16 %v2458_v61, %v2458_v61  ;;  %v2466_v40 = vsel %vm2434_vm15, %v2418_v36, %v2450_v39  ;;  %vm2432_vm1 = vcmp.ge.f32.partialorder %v2416_v25, 0.0  ;;  %v2448_v38 = vmul.f32 0.1, %v2416_v25 }
 0x19a   : > { %v2456_v3 = vsel %vm2424_vm0, %v2408_v45, %v2440_v49  ;;  %v2976_v51 = vpack.c.bf16 %v2466_v40, %v2466_v40  ;;  %vm2427_vm2 = vcmp.ge.f32.partialorder %v2411_v19, 0.0  ;;  %v2443_v59 = vmul.f32 0.1, %v2411_v19 }
 0x19b   : > { %v2966_v23 = vpack.c.bf16 %v2456_v3, %v2456_v3  ;;  %2539 = vst.msk [vmem:[%s4357_s8 + $0x18] sm:$0xf] %vm2532_vm5, %v2968_v30  ;;  %v2464_v18 = vsel %vm2432_vm1, %v2416_v25, %v2448_v38  ;;  %v3457_v8 = vadd.f32 %v4328_v7, %v2346_v6  ;;  %vm2435_vm3 = vcmp.ge.f32.partialorder %v2419_v5, 0.0 }
 0x19c   : > { %2547 = vst.msk [vmem:[%s4357_s8 + $0x38] sm:$0xf] %vm2532_vm5, %v2976_v51  ;;  %v2974_v46 = vpack.c.bf16 %v2464_v18, %v2464_v18  ;;  %v2459_v17 = vsel %vm2427_vm2, %v2411_v19, %v2443_v59  ;;  %v2451_v47 = vmul.f32 0.1, %v2419_v5  ;;  %v2409_v48 = vadd.f32 %v4338_v63, %v2386_v43 }
 0x19d   : > { %2537 = vst.msk [vmem:[%s4357_s8 + $0x10] sm:$0xf] %vm2532_vm5, %v2966_v23  ;;  %v2969_v34 = vpack.c.bf16 %v2459_v17, %v2459_v17  ;;  %v2394_v50 = vmul.f32 %v3457_v8, %v4333_v10 }
 0x19e   : > { %2545 = vst.msk [vmem:[%s4357_s8 + $0x30] sm:$0xf] %vm2532_vm5, %v2974_v46  ;;  %v2467_v55 = vsel %vm2435_vm3, %v2419_v5, %v2451_v47  ;;  %vm2425_vm4 = vcmp.ge.f32.partialorder %v2409_v48, 0.0  ;;  %v2441_v57 = vmul.f32 0.1, %v2409_v48 }
 0x19f   : > { %2540 = vst.msk [vmem:[%s4357_s8 + $0x1c] sm:$0xf] %vm2532_vm5, %v2969_v34  ;;  %v2977_v56 = vpack.c.bf16 %v2467_v55, %v2467_v55  ;;  %v2417_v7 = vadd.f32 %v4338_v63, %v2394_v50 }
 0x1a0   : > { %v2457_v58 = vsel %vm2425_vm4, %v2409_v48, %v2441_v57 }
 0x1a1   : > { %2548 = vst.msk [vmem:[%s4357_s8 + $0x3c] sm:$0xf] %vm2532_vm5, %v2977_v56  ;;  %vm2433_vm6 = vcmp.ge.f32.partialorder %v2417_v7, 0.0  ;;  %v2449_v62 = vmul.f32 0.1, %v2417_v7  ;;  %v2967_v37 = vpack.c.bf16 %v2457_v58, %v2457_v58 }
 0x1a3   : > { %v2465_v32 = vsel %vm2433_vm6, %v2417_v7, %v2449_v62  ;;  %2538 = vst.msk [vmem:[%s4357_s8 + $0x14] sm:$0xf] %vm2532_vm5, %v2967_v37 }
 0x1a4   : > { %v2975_v10 = vpack.c.bf16 %v2465_v32, %v2465_v32 }
 0x1a6   : > { %2546 = vst.msk [vmem:[%s4357_s8 + $0x34] sm:$0xf] %vm2532_vm5, %v2975_v10 }
 0x1a7 PF: > { %s16_s25 = sadd.s32 1, %s3720_s25   ;;  %s4444_s21 = smov %s3712_s23 }
 0x1a8   : > { %p13_p12 = scmp.ge.s32.totalorder %s16_s25, 6   ;;  %s4445_s22 = smov %s3716_s24 }
 0x1a9   : > { %s4446_s23 = smov %s4449_s26  ;;  %s4447_s24 = smov %s4453_s27 }
 0x1aa   :  { %15 = sbr.rel (!%p13_p12) target bundleno = 3 (0x3), region = 88 }

// kernel: matchnet2_forward.11
= control target key start
LH: loop header
LB: loop body
LE: loop exit
PB: predicated region body
PF: predicated region fallthrough
CT: control target
= control target key end

     0   :  { %s3620_s21 = smov 0   ;;  %s3622_s22 = smov 0   ;;  %s4323_s0 = inlined_call_operand.vmem [shape: bf16[2,16,16,96], index: 0, kind: input, shape index: {}, may-alias: {0,1,2}]   ;;  %s4324_s1 = inlined_call_operand.vmem [shape: bf16[2,16,16,96], index: 1, kind: input, shape index: {}, may-alias: {0,1,2}]   ;;  %s4325_s2 = inlined_call_operand.vmem [shape: bf16[2,16,16,96], index: 2, kind: input, shape index: {}, may-alias: {0,1,2}]   ;;  %s4326_s3 = inlined_call_operand.vmem [shape: bf16[3,3,96,64], index: 3, kind: input, shape index: {}]   ;;  %s4327_s4 = inlined_call_operand.vmem [shape: f32[1,64], index: 4, kind: input, shape index: {}]   ;;  %s4328_s5 = inlined_call_operand.vmem [shape: f32[1,64], index: 5, kind: input, shape index: {}]   ;;  %s4329_s6 = inlined_call_operand.vmem [shape: bf16[2,16,16,64], index: 6, kind: output, shape index: {}]  }
   0x1   :  { %s3624_s23 = smov 0   ;;  %s3626_s24 = smov 0  }
   0x2   :  { %s3628_s25 = smov 0  }
   0x3 LB: > { %s25_s26 = sadd.s32 1, %s3575_s23  ;;  %s28_s27 = sadd.s32 1, %s3579_s24  ;;  %s3583_s25 = sphi %s3628_s25, %s16_s25   ;;  %s3579_s24 = sphi %s3626_s24, %s4336_s24   ;;  %s3575_s23 = sphi %s3624_s23, %s4335_s23   ;;  %s3571_s22 = sphi %s3622_s22, %s4334_s22   ;;  %s3567_s21 = sphi %s3620_s21, %s4333_s21  }
   0x4   : > { %p26_p0 = scmp.ge.s32.totalorder %s25_s26, 2  ;;  %p2617_p1 = scmp.ge.s32.totalorder %s3583_s25, 1 }
   0x5   : > { %p298_p2 = scmp.lt.s32.totalorder %s3583_s25, 5 }
   0x6   : > { %s4338_s26 = smov (%p26_p0, %s25_s26), 0  ;;  %s4340_s27 = smov (!%p26_p0, %s28_s27), %s3579_s24 }
   0x7   : > { %p299_p3 = pnand %p2617_p1, %p298_p2  ;;  %p30_p4 = scmp.ge.s32.totalorder %s4340_s27, 2 }
   0x8   : > { %v3483_v0 = vld [vmem:[%s4326_s3 + $0xc0] sm:$0xff] (!%p299_p3)   ;;  %s3656_s30 = sshll.u32 (!%p299_p3), %s3567_s21, 3  ;;  %v3484_v1 = vld [vmem:[%s4326_s3 + $0xc8] sm:$0xff] (!%p299_p3)   ;;  %p368_p5 = scmp.lt.s32.totalorder (!%p299_p3), %s3571_s22, 1  ;;  %v3485_v2 = vld [vmem:[%s4326_s3 + $0x30] sm:$0xff] (!%p299_p3)   ;;  %vm590_vm0 = vcmask (!%p299_p3), 1040384  }
   0x9   : > { %s4342_s27 = smov (%p30_p4, %s4340_s27), 0  ;;  %302 = sbr.rel (%p299_p3) target bundleno = 419 (0x1a3), region = 44 }
   0xa   : > { %3163 = vmatprep.subr.bf16.mxu0 (!%p299_p3), %v3483_v0  ;;  %p384_p6 = scmp.lt.s32.totalorder (!%p299_p3), %s3656_s30, 15  ;;  %v3486_v3 = vld [vmem:[%s4326_s3 + $0xd0] sm:$0xff] (!%p299_p3)   ;;  %3051 = vmatprep.subr.bf16.mxu1 (!%p299_p3), %v3485_v2  ;;  %v3487_v4 = vld [vmem:[%s4326_s3 + $0x38] sm:$0xff] (!%p299_p3)   ;;  %v3489_v5 = vld [vmem:[%s4326_s3 + $0x40] sm:$0xff] (!%p299_p3)   ;;  %s2619_s12 = sadd.s32 (!%p299_p3), 4294967295, %s3656_s30  ;;  %vm771_vm4 = vcmask (!%p299_p3), 785408  }
   0xb   : > { %3164 = vmatpush3.bf16.msra.mxu0 (!%p299_p3), %v3483_v0  ;;  %3052 = vmatpush3.bf16.msra.mxu1 (!%p299_p3), %v3485_v2  ;;  %v3488_v6 = vld [vmem:[%s4326_s3 + $0xd8] sm:$0xff] (!%p299_p3)   ;;  %v3491_v7 = vld [vmem:[%s4326_s3 + $0x48] sm:$0xff] (!%p299_p3)   ;;  %p366_p7 = scmp.gt.s32.totalorder (!%p299_p3), %s2619_s12, 0  ;;  %v3490_v9 = vld [vmem:[%s4326_s3 + $0xe0] sm:$0xff] (!%p299_p3)   ;;  %vm591_vm1 = vsmask.f32 (!%p299_p3), 256 }
   0xc   : > { %3165 = vmatprep.subr.bf16.mxu0 (!%p299_p3), %v3484_v1  ;;  %3053 = vmatprep.subr.bf16.mxu1 (!%p299_p3), %v3487_v4  ;;  %v3492_v13 = vld [vmem:[%s4326_s3 + $0xe8] sm:$0xff] (!%p299_p3)   ;;  %v3493_v14 = vld [vmem:[%s4326_s3 + $0x50] sm:$0xff] (!%p299_p3)   ;;  %p2620_p8 = scmp.lt.s32.totalorder (!%p299_p3), %s2619_s12, 15  ;;  %vm625_vm2 = vsmask.f32 (!%p299_p3), 7424  ;;  %p421_p9 = scmp.lt.s32.totalorder (!%p299_p3), %s3567_s21, 1  ;;  %vm3709_vm3 = vmand (!%p299_p3), %vm590_vm0, %vm591_vm1 }
   0xd   : > { %v3496_v23 = vld [vmem:[%s4326_s3 + $0x58] sm:$0xff] (!%p299_p3)   ;;  %v3498_v31 = vld [vmem:[%s4326_s3 + $0xf0] sm:$0xff] (!%p299_p3)   ;;  %v3751_v42 = vld [vmem:[%s4326_s3] sm:$0xff] (!%p299_p3)   ;;  %vm1058_vm5 = vcmask (!%p299_p3), 1046528   ;;  %s2900_s14 = sadd.s32 (!%p299_p3), 8, %s3656_s30  ;;  %s424_s18 = ssub.s32 (!%p299_p3), 1, %s3567_s21 }
   0xe   : > { %v3502_v62 = vld [vmem:[%s4326_s3 + $0xf8] sm:$0xff] (!%p299_p3)   ;;  %p3931_p10 = scmp.lt.s32.totalorder (!%p299_p3), %s2900_s14, 15  ;;  %p425_p11 = scmp.lt.s32.totalorder (!%p299_p3), %s424_s18, 1  ;;  %vm2449_vm6 = vcmask (!%p299_p3), 519168  }
   0xf   : > { %3166 = vmatpush3.bf16.msra.mxu0 (!%p299_p3), %v3484_v1  ;;  %3054 = vmatpush3.bf16.msra.mxu1 (!%p299_p3), %v3487_v4 }
  0x10   : > { %s4344_s22 = smov (!%p368_p5, %s3571_s22), 1  ;;  %3167 = vmatprep.subr.bf16.mxu0 %v3486_v3  ;;  %3055 = vmatprep.subr.bf16.mxu1 %v3489_v5  ;;  %s4348_s14 = smov (!%p3931_p10, %s2900_s14), 15 }
  0x11   : > { %s385_s15 = scalar_select %p384_p6, %s3656_s30, 15 }
  0x12   : > { %s3672_s16 = sshll.u32 %s4344_s22, 5  ;;  %s4350_s14 = smov (!%p3931_p10, %s4348_s14), 15 }
  0x13   : > { %s2629_s19 = sshll.u32 %s385_s15, 1  ;;  %3168 = vmatpush3.bf16.msra.mxu0 %v3486_v3  ;;  %3056 = vmatpush3.bf16.msra.mxu1 %v3489_v5  ;;  %s4352_s18 = smov (!%p425_p11, %s424_s18), 1 }
  0x14   : > { %s3678_s20 = sadd.s32 %s2629_s19, %s3672_s16  ;;  %3169 = vmatprep.subr.bf16.mxu0 %v3488_v6  ;;  %3057 = vmatprep.subr.bf16.mxu1 %v3491_v7  ;;  %s2636_s8 = sshll.u32 %s4350_s14, 1 }
  0x15   : > { %s2631_s7 = sshll.u32 %s3678_s20, 2 }
  0x16   : > { %s3689_s9 = scalar_lea.vmem %s4324_s1, %s2631_s7  ;;  %s4236_s28 = scalar_lea.vmem %s4329_s6, %s2631_s7 }
  0x17   : > { %v3494_v8 = vld [vmem:[%s3689_s9] sm:$0xff]   ;;  %v3495_v12 = vld [vmem:[%s3689_s9 + $0x8] sm:$0xff]   ;;  %s367_s15 = scalar_select %p366_p7, %s2619_s12, 0  ;;  %3170 = vmatpush3.bf16.msra.mxu0 %v3488_v6  ;;  %3058 = vmatpush3.bf16.msra.mxu1 %v3491_v7  ;;  %v3499_v24 = vld [vmem:[%s3689_s9 + $0x10] sm:$0xff]  }
  0x18   : > { %v508_v10 = vshrl.u32 %v3494_v8, 16  ;;  %v511_v11 = vshll.u32 %v3494_v8, 16  ;;  %v515_v16 = vshrl.u32 %v3495_v12, 16  ;;  %v518_v17 = vshll.u32 %v3495_v12, 16  ;;  %3171 = vmatprep.subr.bf16.mxu0 %v3490_v9  ;;  %s422_s29 = scalar_select %p421_p9, %s3567_s21, 1  ;;  %3059 = vmatprep.subr.bf16.mxu1 %v3493_v14  ;;  %v3500_v32 = vld [vmem:[%s3689_s9 + $0x18] sm:$0xff]  }
  0x19   : > { %s4346_s15 = smov (!%p2620_p8, %s367_s15), 15  ;;  %v522_v36 = vshrl.u32 %v3499_v24, 16  ;;  %v525_v46 = vshll.u32 %v3499_v24, 16  ;;  %v529_v49 = vshrl.u32 %v3500_v32, 16  ;;  %v532_v50 = vshll.u32 %v3500_v32, 16  ;;  %v3503_v51 = vld [vmem:[%s3689_s9 + $0x20] sm:$0xff]  }
  0x1a   : > { %v510_v15 = vrot.slane %v508_v10, 7  ;;  %v517_v21 = vrot.slane %v515_v16, 7  ;;  %s2625_s10 = sshll.u32 %s4346_s15, 1  ;;  %s423_s12 = scvt.s32.f32 %s422_s29  ;;  %v536_v63 = vshrl.u32 %v3503_v51, 16  ;;  %v3504_v0 = vld [vmem:[%s3689_s9 + $0x28] sm:$0xff]   ;;  %v539_v4 = vshll.u32 %v3503_v51, 16 }
  0x1b   : > { %3172 = vmatpush3.bf16.msra.mxu0 %v3490_v9  ;;  %s374_s11 = sadd.s32 %s3672_s16, %s2625_s10  ;;  %3060 = vmatpush3.bf16.msra.mxu1 %v3493_v14  ;;  %v524_v45 = vrot.slane %v522_v36, 7  ;;  %v531_v59 = vrot.slane %v529_v49, 7  ;;  %v3505_v16 = vld [vmem:[%s4326_s3 + $0x100] sm:$0xff]   ;;  %v3510_v49 = vld [vmem:[%s3689_s9 + $0x38] sm:$0xff]   ;;  %s402_s10 = sadd.s32 %s2636_s8, %s3672_s16 }
  0x1c   : > { %v513_v19 = vor.u32 %v511_v11, %v510_v15  ;;  %v3715_v20 = vsel %vm3709_vm3, %v510_v15, 0  ;;  %v520_v26 = vor.u32 %v518_v17, %v517_v21  ;;  %v3729_v27 = vsel %vm3709_vm3, %v517_v21, 0  ;;  %3173 = vmatprep.subr.bf16.mxu0 %v3492_v13  ;;  %s2627_s13 = sshll.u32 %s374_s11, 2  ;;  %3061 = vmatprep.subr.bf16.mxu1 %v3496_v23  ;;  %s427_s11 = scvt.s32.f32 %s4352_s18 }
  0x1d   : > { %v646_v22 = vshll.u32 %v3715_v20, 16  ;;  %v658_v30 = vshll.u32 %v3729_v27, 16  ;;  %s376_s19 = scalar_lea.vmem %s4323_s0, %s2627_s13  ;;  %v432_v35 = vstv %s423_s12  ;;  %v527_v54 = vor.u32 %v525_v46, %v524_v45  ;;  %s2638_s12 = sshll.u32 %s402_s10, 2 }
  0x1e   : > { %v3725_v25 = vsel %vm3709_vm3, 0, %v513_v19  ;;  %v3741_v34 = vsel %vm3709_vm3, 0, %v520_v26  ;;  %v2918_v41 = vld [vmem:[%s376_s19] sm:$0xff]   ;;  %v3756_v55 = vsel %vm3709_vm3, %v524_v45, 0  ;;  %v534_v7 = vor.u32 %v532_v50, %v531_v59 }
  0x1f   : > { %v639_v28 = vshrl.u32 %v3725_v25, 16  ;;  %v641_v29 = vshll.u32 %v3725_v25, 16  ;;  %v648_v33 = vrot.slane %v646_v22, 1  ;;  %v651_v38 = vshrl.u32 %v3741_v34, 16  ;;  %3174 = vmatpush3.bf16.msra.mxu0 %v3492_v13  ;;  %3062 = vmatpush3.bf16.msra.mxu1 %v3496_v23 }
  0x20   : > { %v653_v39 = vshll.u32 %v3741_v34, 16  ;;  %v660_v40 = vrot.slane %v658_v30, 1  ;;  %v2919_v43 = vunpack.c.l.bf16 %v2918_v41  ;;  %v2920_v44 = vunpack.c.h.bf16 %v2918_v41  ;;  %3191 = vmatprep.subr.bf16.mxu0 %v3498_v31  ;;  %3079 = vmatprep.subr.bf16.mxu1 %v3751_v42 }
  0x21   : > { %v643_v37 = vrot.slane %v641_v29, 1  ;;  %v670_v58 = vshll.u32 %v3756_v55, 16  ;;  %v3767_v61 = vsel %vm3709_vm3, 0, %v527_v54  ;;  %v3782_v8 = vsel %vm3709_vm3, %v531_v59, 0  ;;  %v3507_v29 = vld [vmem:[%s4326_s3 + $0x108] sm:$0xff]   ;;  %v3511_v54 = vld [vmem:[%s4326_s3 + $0x110] sm:$0xff]  }
  0x22   : > { %v655_v48 = vrot.slane %v653_v39, 1  ;;  %v433_v52 = vmul.f32 %v2919_v43, %v432_v35  ;;  %v434_v53 = vmul.f32 %v2920_v44, %v432_v35  ;;  %v663_v2 = vshrl.u32 %v3767_v61, 16  ;;  %v3509_v35 = vld [vmem:[%s3689_s9 + $0x30] sm:$0xff]   ;;  %s404_s9 = scalar_lea.vmem %s4325_s2, %s2638_s12 }
  0x23   : > { %v644_v47 = vor.u32 %v643_v37, %v639_v28  ;;  %v665_v3 = vshll.u32 %v3767_v61, 16  ;;  %v672_v10 = vrot.slane %v670_v58, 1  ;;  %v682_v11 = vshll.u32 %v3782_v8, 16 }
  0x24   : > { %v656_v57 = vor.u32 %v655_v48, %v651_v38  ;;  %v435_v60 = vpack.c.bf16 %v434_v53, %v433_v52  ;;  %v538_v12 = vrot.slane %v536_v63, 7  ;;  %v3787_v14 = vsel %vm3709_vm3, 0, %v534_v7 }
  0x25   : > { %v3759_v56 = vsel %vm625_vm2, %v644_v47, %v648_v33  ;;  %v667_v9 = vrot.slane %v665_v3, 1  ;;  %v543_v15 = vshrl.u32 %v3504_v0, 16  ;;  %v675_v19 = vshrl.u32 %v3787_v14, 16  ;;  %v3501_v3 = vld [vmem:[%s4326_s3 + $0x8] sm:$0xff]  }
  0x26   : > { %3175 = vmatprep.mubr.msk.bf16.mxu0 %vm771_vm4, %v3759_v56  ;;  %v3774_v1 = vsel %vm625_vm2, %v656_v57, %v660_v40  ;;  %v501_v5 = vshrl.u32 %v435_v60, 16  ;;  %v504_v6 = vshll.u32 %v435_v60, 16  ;;  %v677_v21 = vshll.u32 %v3787_v14, 16 }
  0x27   : > { %3176 = vmatmul.mubr.msk.bf16.vlgmr.msra.gmra.mrb[0].mxu0 %vm771_vm4, %v3774_v1  ;;  %v668_v17 = vor.u32 %v667_v9, %v663_v2  ;;  %v546_v22 = vshll.u32 %v3504_v0, 16  ;;  %v541_v26 = vor.u32 %v539_v4, %v538_v12  ;;  %v3800_v28 = vsel %vm3709_vm3, %v538_v12, 0 }
  0x28   : > { %3192 = vmatpush3.bf16.msra.mxu0 %v3498_v31  ;;  %v503_v13 = vrot.slane %v501_v5, 7  ;;  %v679_v32 = vrot.slane %v677_v21, 1  ;;  %v684_v33 = vrot.slane %v682_v11, 1  ;;  %v694_v38 = vshll.u32 %v3800_v28, 16 }
  0x29   : > { %3193 = vmatprep.subr.bf16.mxu0 %v3502_v62  ;;  %v3807_v31 = vsel %vm625_vm2, %v668_v17, %v672_v10  ;;  %v3818_v37 = vsel %vm3709_vm3, 0, %v541_v26  ;;  %v545_v39 = vrot.slane %v543_v15, 7  ;;  %v550_v53 = vshrl.u32 %v3509_v35, 16  ;;  %v3513_v17 = vld [vmem:[%s4326_s3 + $0x118] sm:$0xff]  }
  0x2a   : > { %v506_v23 = vor.u32 %v504_v6, %v503_v13  ;;  %v3796_v24 = vsel %vm3709_vm3, %v503_v13, 0  ;;  %3179 = vmatprep.mubr.msk.bf16.mxu0 %vm771_vm4, %v3807_v31  ;;  %v680_v44 = vor.u32 %v679_v32, %v675_v19  ;;  %v687_v45 = vshrl.u32 %v3818_v37, 16 }
  0x2b   : > { %v634_v30 = vshll.u32 %v3796_v24, 16  ;;  %v689_v46 = vshll.u32 %v3818_v37, 16  ;;  %v696_v47 = vrot.slane %v694_v38, 1  ;;  %v548_v48 = vor.u32 %v546_v22, %v545_v39  ;;  %v3506_v22 = vld [vmem:[%s4326_s3 + $0x10] sm:$0xff]  }
  0x2c   : > { %3194 = vmatpush3.bf16.msra.mxu0 %v3502_v62  ;;  %v3812_v36 = vsel %vm3709_vm3, 0, %v506_v23  ;;  %v3827_v51 = vsel %vm625_vm2, %v680_v44, %v684_v33  ;;  %v3831_v52 = vsel %vm3709_vm3, %v545_v39, 0  ;;  %v553_v60 = vshll.u32 %v3509_v35, 16 }
  0x2d   : > { %3195 = vmatprep.subr.bf16.mxu0 %v3505_v16  ;;  %v627_v40 = vshrl.u32 %v3812_v36, 16  ;;  %v629_v41 = vshll.u32 %v3812_v36, 16  ;;  %v636_v43 = vrot.slane %v634_v30, 1  ;;  %v691_v57 = vrot.slane %v689_v46, 1 }
  0x2e   : > { %v3840_v58 = vsel %vm3709_vm3, 0, %v548_v48  ;;  %v706_v59 = vshll.u32 %v3831_v52, 16  ;;  %v552_v2 = vrot.slane %v550_v53, 7  ;;  %v557_v6 = vshrl.u32 %v3510_v49, 16  ;;  %v3512_v53 = vld [vmem:[%s4326_s3 + $0x20] sm:$0xff]  }
  0x2f   : > { %v631_v50 = vrot.slane %v629_v41, 1  ;;  %3180 = vmatmul.mubr.msk.bf16.gmra.mrb[4].mxu0 %vm771_vm4, %v3827_v51  ;;  %v699_v63 = vshrl.u32 %v3840_v58, 16  ;;  %v701_v0 = vshll.u32 %v3840_v58, 16  ;;  %v692_v4 = vor.u32 %v691_v57, %v687_v45 }
  0x30   : > { %3196 = vmatpush3.bf16.msra.mxu0 %v3505_v16  ;;  %v708_v5 = vrot.slane %v706_v59, 1  ;;  %v560_v7 = vshll.u32 %v3510_v49, 16  ;;  %v555_v11 = vor.u32 %v553_v60, %v552_v2  ;;  %v3851_v12 = vsel %vm3709_vm3, %v552_v2, 0 }
  0x31   : > { %3197 = vmatprep.subr.bf16.mxu0 %v3507_v29  ;;  %v632_v62 = vor.u32 %v631_v50, %v627_v40  ;;  %v703_v10 = vrot.slane %v701_v0, 1  ;;  %v3855_v13 = vsel %vm625_vm2, %v692_v4, %v696_v47  ;;  %v718_v15 = vshll.u32 %v3851_v12, 16  ;;  %v3508_v40 = vld [vmem:[%s4326_s3 + $0x18] sm:$0xff]   ;;  %v3515_v0 = vld [vmem:[%s4326_s3 + $0x60] sm:$0xff]  }
  0x32   : > { %v559_v16 = vrot.slane %v557_v6, 7  ;;  %3183 = vmatprep.mubr.msk.bf16.mxu0 %vm771_vm4, %v3855_v13  ;;  %v3867_v21 = vsel %vm3709_vm3, 0, %v555_v11  ;;  %v1063_v39 = vrot.slane %v3715_v20, 1  ;;  %v1062_v45 = vrot.slane %v3725_v25, 1 }
  0x33   : > { %v637_v9 = vsel %vm625_vm2, %v632_v62, %v636_v43  ;;  %v704_v19 = vor.u32 %v703_v10, %v699_v63  ;;  %v711_v23 = vshrl.u32 %v3867_v21, 16  ;;  %v720_v33 = vrot.slane %v718_v15, 1  ;;  %v3514_v62 = vld [vmem:[%s4326_s3 + $0x28] sm:$0xff]   ;;  %v3521_v10 = vld [vmem:[%s4326_s3 + $0x138] sm:$0xff]  }
  0x34   : > { %3198 = vmatpush3.bf16.msra.mxu0 %v3507_v29  ;;  %3063 = vmatprep.mubr.msk.bf16.mxu1 %vm771_vm4, %v637_v9  ;;  %v562_v26 = vor.u32 %v560_v7, %v559_v16  ;;  %v3882_v30 = vsel %vm3709_vm3, %v559_v16, 0  ;;  %v3911_v49 = vsel %vm1058_vm5, %v1062_v45, %v1063_v39  ;;  %v1065_v57 = vrot.slane %v3741_v34, 1  ;;  %v3518_v63 = vld [vmem:[%s4326_s3 + $0x128] sm:$0xff]   ;;  %v2922_v7 = vld [vmem:[%s404_s9] sm:$0xff]  }
  0x35   : > { %3199 = vmatprep.subr.bf16.mxu0 %v3511_v54  ;;  %3064 = vmatmul.mubr.msk.bf16.vlgmr.msra.gmra.mrb[0].mxu1 %vm771_vm4, %v3759_v56  ;;  %v713_v56 = vshll.u32 %v3867_v21, 16  ;;  %v3878_v29 = vsel %vm625_vm2, %v704_v19, %v708_v5  ;;  %v1441_v38 = vshll.u32 %v3882_v30, 16  ;;  %v1068_v59 = vrot.slane %v3767_v61, 1  ;;  %v3517_v19 = vld [vmem:[%s4326_s3 + $0x68] sm:$0xff]  }
  0x36   : > { %3080 = vmatpush3.bf16.msra.mxu1 %v3751_v42  ;;  %3067 = vmatprep.mubr.msk.bf16.mxu1 %vm771_vm4, %v3774_v1  ;;  %v3516_v42 = vld [vmem:[%s4326_s3 + $0x120] sm:$0xff]   ;;  %v3891_v35 = vsel %vm3709_vm3, 0, %v562_v26  ;;  %v1069_v60 = vrot.slane %v3756_v55, 1  ;;  %v1071_v2 = vrot.slane %v3787_v14, 1  ;;  %v1072_v4 = vrot.slane %v3782_v8, 1 }
  0x37   : > { %3081 = vmatprep.subr.bf16.mxu1 %v3501_v3  ;;  %3184 = vmatmul.mubr.msk.bf16.gmra.mrb[8].mxu0 %vm771_vm4, %v3878_v29  ;;  %v715_v32 = vrot.slane %v713_v56, 1  ;;  %v1434_v41 = vshrl.u32 %v3891_v35, 16  ;;  %v1436_v43 = vshll.u32 %v3891_v35, 16  ;;  %v1443_v47 = vrot.slane %v1441_v38, 1 }
  0x38   : > { %3200 = vmatpush3.bf16.msra.mxu0 %v3511_v54  ;;  %v1066_v54 = vrot.slane %v3729_v27, 1  ;;  %v3946_v55 = vsel %vm1058_vm5, %v1068_v59, %v1069_v60  ;;  %v1074_v5 = vrot.slane %v3818_v37, 1  ;;  %v1075_v6 = vrot.slane %v3800_v28, 1 }
  0x39   : > { %3201 = vmatprep.subr.bf16.mxu0 %v3513_v17  ;;  %v716_v44 = vor.u32 %v715_v32, %v711_v23  ;;  %v1438_v46 = vrot.slane %v1436_v43, 1  ;;  %v3974_v8 = vsel %vm1058_vm5, %v1071_v2, %v1072_v4  ;;  %v440_v9 = vstv %s427_s11  ;;  %v3523_v32 = vld [vmem:[%s4326_s3 + $0x140] sm:$0xff]  }
  0x3a   : > { %3082 = vmatpush3.bf16.msra.mxu1 %v3501_v3  ;;  %v3939_v27 = vsel %vm1058_vm5, %v1065_v57, %v1066_v54  ;;  %v3519_v3 = vld [vmem:[%s4326_s3 + $0x130] sm:$0xff]   ;;  %v3979_v28 = vsel %vm1058_vm5, %v1074_v5, %v1075_v6  ;;  %v2923_v11 = vunpack.c.l.bf16 %v2922_v7  ;;  %v2924_v15 = vunpack.c.h.bf16 %v2922_v7  ;;  %v3522_v54 = vld [vmem:[%s4326_s3 + $0x78] sm:$0xff]   ;;  %v3524_v2 = vld [vmem:[%s4326_s3 + $0x80] sm:$0xff]  }
  0x3b   : > { %3083 = vmatprep.subr.bf16.mxu1 %v3506_v22  ;;  %v3902_v48 = vsel %vm625_vm2, %v716_v44, %v720_v33  ;;  %v1439_v20 = vor.u32 %v1438_v46, %v1434_v41  ;;  %v1078_v23 = vrot.slane %v3831_v52, 1  ;;  %v1080_v56 = vrot.slane %v3867_v21, 1  ;;  %v3520_v41 = vld [vmem:[%s4326_s3 + $0x70] sm:$0xff]   ;;  %v3526_v5 = vld [vmem:[%s4326_s3 + $0x88] sm:$0xff]   ;;  %v3530_v6 = vld [vmem:[%s4326_s3 + $0x158] sm:$0xff]  }
  0x3c   : > { %3202 = vmatpush3.bf16.msra.mxu0 %v3513_v17  ;;  %3187 = vmatprep.mubr.msk.bf16.mxu0 %vm771_vm4, %v3902_v48  ;;  %v441_v16 = vmul.f32 %v2923_v11, %v440_v9  ;;  %v442_v17 = vmul.f32 %v2924_v15, %v440_v9  ;;  %v1081_v26 = vrot.slane %v3851_v12, 1  ;;  %v3525_v12 = vld [vmem:[%s4326_s3 + $0x148] sm:$0xff]   ;;  %v1612_v45 = vrot.slane %v3891_v35, 1  ;;  %v3528_v57 = vld [vmem:[%s4326_s3 + $0x150] sm:$0xff]   ;;  %v3529_v15 = vld [vmem:[%s4326_s3 + $0x98] sm:$0xff]  }
  0x3d   : > { %3219 = vmatprep.subr.bf16.mxu0 %v3516_v42  ;;  %3068 = vmatmul.mubr.msk.bf16.gmra.mrb[4].mxu1 %vm771_vm4, %v3807_v31  ;;  %v3914_v50 = vsel %vm625_vm2, %v1439_v20, %v1443_v47  ;;  %v1613_v46 = vrot.slane %v3882_v30, 1  ;;  %v1060_v7 = vrot.slane %v3796_v24, 1  ;;  %v1059_v9 = vrot.slane %v3812_v36, 1  ;;  %v3531_v24 = vld [vmem:[%s4326_s3 + $0x160] sm:$0xff]  }
  0x3e   : > { %3084 = vmatpush3.bf16.msra.mxu1 %v3506_v22  ;;  %3071 = vmatprep.mubr.msk.bf16.mxu1 %vm771_vm4, %v3827_v51  ;;  %v1077_v22 = vrot.slane %v3840_v58, 1  ;;  %v4006_v52 = vsel %vm1058_vm5, %v1080_v56, %v1081_v26  ;;  %v3538_v56 = vld [vmem:[%s4326_s3 + $0xb8] sm:$0xff]   ;;  %v3540_v26 = vld [vmem:[%s4326_s3 + $0x188] sm:$0xff]  }
  0x3f   : > { %3085 = vmatprep.subr.bf16.mxu1 %v3508_v40  ;;  %3188 = vmatmul.mubr.msk.bf16.gmra.mrb[12].mxu0 %vm771_vm4, %v3914_v50  ;;  %v4038_v18 = vsel %vm1058_vm5, %v1612_v45, %v1613_v46  ;;  %v1061_v11 = vsel %vm1058_vm5, %v1059_v9, %v1060_v7 }
  0x40   : > { %3203 = vmatprep.mubr.msk.bf16.mxu0 %vm771_vm4, %v3911_v49  ;;  %v4001_v39 = vsel %vm1058_vm5, %v1077_v22, %v1078_v23  ;;  %v3539_v22 = vld [vmem:[%s4326_s3 + $0x180] sm:$0xff]   ;;  %v3536_v23 = vld [vmem:[%s4326_s3 + $0xb0] sm:$0xff]  }
  0x42   : > { %3086 = vmatpush3.bf16.msra.mxu1 %v3508_v40 }
  0x43   : > { %3087 = vmatprep.subr.bf16.mxu1 %v3512_v53 }
  0x45   : > { %3072 = vmatmul.mubr.msk.bf16.gmra.mrb[8].mxu1 %vm771_vm4, %v3855_v13 }
  0x46   : > { %3088 = vmatpush3.bf16.msra.mxu1 %v3512_v53  ;;  %3075 = vmatprep.mubr.msk.bf16.mxu1 %vm771_vm4, %v3878_v29 }
  0x47   : > { %3089 = vmatprep.subr.bf16.mxu1 %v3514_v62  ;;  %3204 = vmatmul.mubr.msk.bf16.vlgmr.msra.gmra.mrb[0].mxu0 %vm771_vm4, %v3939_v27 }
  0x48   : > { %3207 = vmatprep.mubr.msk.bf16.mxu0 %vm771_vm4, %v3946_v55  ;;  %3220 = vmatpush3.bf16.msra.mxu0 %v3516_v42  ;;  %v443_v42 = vpack.c.bf16 %v442_v17, %v441_v16  ;;  %v3535_v16 = vld [vmem:[%s4326_s3 + $0x170] sm:$0xff]   ;;  %v3537_v17 = vld [vmem:[%s4326_s3 + $0x178] sm:$0xff]  }
  0x49   : > { %3221 = vmatprep.subr.bf16.mxu0 %v3518_v63 }
  0x4a   : > { %3090 = vmatpush3.bf16.msra.mxu1 %v3514_v62  ;;  %v564_v33 = vshrl.u32 %v443_v42, 16  ;;  %v567_v38 = vshll.u32 %v443_v42, 16 }
  0x4b   : > { %3107 = vmatprep.subr.bf16.mxu1 %v3515_v0 }
  0x4c   : > { %3222 = vmatpush3.bf16.msra.mxu0 %v3518_v63  ;;  %v566_v40 = vrot.slane %v564_v33, 7 }
  0x4d   : > { %3076 = vmatmul.mubr.msk.bf16.gmra.mrb[12].mxu1 %vm771_vm4, %v3902_v48  ;;  %3223 = vmatprep.subr.bf16.mxu0 %v3519_v3 }
  0x4e   : > { %3091 = vmatprep.mubr.msk.bf16.mxu1 %vm771_vm4, %v3812_v36  ;;  %v569_v43 = vor.u32 %v567_v38, %v566_v40  ;;  %v612_v44 = vsel %vm3709_vm3, %v566_v40, 0  ;;  %v3533_v36 = vld [vmem:[%s4326_s3 + $0x168] sm:$0xff]  }
  0x4f   : > { %3208 = vmatmul.mubr.msk.bf16.gmra.mrb[4].mxu0 %vm771_vm4, %v3974_v8  ;;  %v1952_v47 = vshll.u32 %v612_v44, 16  ;;  %v2124_v20 = vrot.slane %v612_v44, 1 }
  0x50   : > { %3211 = vmatprep.mubr.msk.bf16.mxu0 %vm771_vm4, %v3979_v28  ;;  %3224 = vmatpush3.bf16.msra.mxu0 %v3519_v3  ;;  %v4024_v53 = vsel %vm3709_vm3, 0, %v569_v43  ;;  %v4208_v43 = vld [vmem:[%s4327_s4] ss:$0 sm:$0xff] }
  0x51   : > { %3225 = vmatprep.subr.bf16.mxu0 %v3521_v10  ;;  %v1945_v30 = vshrl.u32 %v4024_v53, 16  ;;  %v1947_v59 = vshll.u32 %v4024_v53, 16  ;;  %v2123_v60 = vrot.slane %v4024_v53, 1  ;;  %v1954_v63 = vrot.slane %v1952_v47, 1  ;;  %v4215_v47 = vld [vmem:[%s4328_s5] ss:$0 sm:$0xff] }
  0x53   : > { %v1949_v62 = vrot.slane %v1947_v59, 1 }
  0x54   : > { %3226 = vmatpush3.bf16.msra.mxu0 %v3521_v10  ;;  %v3527_v10 = vld [vmem:[%s4326_s3 + $0x90] sm:$0xff]  }
  0x55   : > { %3092 = vmatmul.mubr.msk.bf16.vlgmr.msra.gmra.mrb[0].mxu1 %vm771_vm4, %v3725_v25  ;;  %3227 = vmatprep.subr.bf16.mxu0 %v3523_v32  ;;  %v1950_v3 = vor.u32 %v1949_v62, %v1945_v30 }
  0x56   : > { %3108 = vmatpush3.bf16.msra.mxu1 %v3515_v0  ;;  %3095 = vmatprep.mubr.msk.bf16.mxu1 %vm771_vm4, %v3741_v34  ;;  %v4041_v0 = vsel %vm1058_vm5, %v2123_v60, %v2124_v20 }
  0x57   : > { %3109 = vmatprep.subr.bf16.mxu1 %v3517_v19  ;;  %3212 = vmatmul.mubr.msk.bf16.gmra.mrb[8].mxu0 %vm771_vm4, %v4001_v39  ;;  %v4053_v4 = vsel %vm625_vm2, %v1950_v3, %v1954_v63 }
  0x58   : > { %3215 = vmatprep.mubr.msk.bf16.mxu0 %vm771_vm4, %v4006_v52  ;;  %3228 = vmatpush3.bf16.msra.mxu0 %v3523_v32 }
  0x59   : > { %3229 = vmatprep.subr.bf16.mxu0 %v3525_v12 }
  0x5a   : > { %3110 = vmatpush3.bf16.msra.mxu1 %v3517_v19  ;;  %v3532_v19 = vld [vmem:[%s4326_s3 + $0xa0] sm:$0xff]  }
  0x5b   : > { %3111 = vmatprep.subr.bf16.mxu1 %v3520_v41 }
  0x5c   : > { %3230 = vmatpush3.bf16.msra.mxu0 %v3525_v12 }
  0x5d   : > { %3096 = vmatmul.mubr.msk.bf16.gmra.mrb[4].mxu1 %vm771_vm4, %v3767_v61  ;;  %3247 = vmatprep.subr.bf16.mxu0 %v3528_v57 }
  0x5e   : > { %3112 = vmatpush3.bf16.msra.mxu1 %v3520_v41  ;;  %3099 = vmatprep.mubr.msk.bf16.mxu1 %vm771_vm4, %v3787_v14 }
  0x5f   : > { %3113 = vmatprep.subr.bf16.mxu1 %v3522_v54  ;;  %3216 = vmatmul.mubr.msk.bf16.gmra.mrb[12].mxu0 %vm771_vm4, %v4038_v18 }
  0x60   : > { %3231 = vmatprep.mubr.msk.bf16.mxu0 %vm771_vm4, %v3741_v34 }
  0x62   : > { %3114 = vmatpush3.bf16.msra.mxu1 %v3522_v54 }
  0x63   : > { %3115 = vmatprep.subr.bf16.mxu1 %v3524_v2 }
  0x65   : > { %3100 = vmatmul.mubr.msk.bf16.gmra.mrb[8].mxu1 %vm771_vm4, %v3818_v37 }
  0x66   : > { %3116 = vmatpush3.bf16.msra.mxu1 %v3524_v2  ;;  %3103 = vmatprep.mubr.msk.bf16.mxu1 %vm771_vm4, %v3840_v58 }
  0x67   : > { %3117 = vmatprep.subr.bf16.mxu1 %v3526_v5  ;;  %3232 = vmatmul.mubr.msk.bf16.vlgmr.msra.gmra.mrb[0].mxu0 %vm771_vm4, %v3767_v61 }
  0x68   : > { %3235 = vmatprep.mubr.msk.bf16.mxu0 %vm771_vm4, %v3787_v14  ;;  %3248 = vmatpush3.bf16.msra.mxu0 %v3528_v57 }
  0x69   : > { %3249 = vmatprep.subr.bf16.mxu0 %v3530_v6 }
  0x6a   : > { %3118 = vmatpush3.bf16.msra.mxu1 %v3526_v5 }
  0x6b   : > { %3135 = vmatprep.subr.bf16.mxu1 %v3527_v10 }
  0x6c   : > { %3250 = vmatpush3.bf16.msra.mxu0 %v3530_v6 }
  0x6d   : > { %3104 = vmatmul.mubr.msk.bf16.gmra.mrb[12].mxu1 %vm771_vm4, %v3867_v21  ;;  %3251 = vmatprep.subr.bf16.mxu0 %v3531_v24 }
  0x6e   : > { %3119 = vmatprep.mubr.msk.bf16.mxu1 %vm771_vm4, %v1061_v11 }
  0x6f   : > { %3236 = vmatmul.mubr.msk.bf16.gmra.mrb[4].mxu0 %vm771_vm4, %v3818_v37 }
  0x70   : > { %3239 = vmatprep.mubr.msk.bf16.mxu0 %vm771_vm4, %v3840_v58  ;;  %3252 = vmatpush3.bf16.msra.mxu0 %v3531_v24 }
  0x71   : > { %3253 = vmatprep.subr.bf16.mxu0 %v3533_v36 }
  0x74   : > { %3254 = vmatpush3.bf16.msra.mxu0 %v3533_v36 }
  0x75   : > { %3120 = vmatmul.mubr.msk.bf16.vlgmr.msra.gmra.mrb[0].mxu1 %vm771_vm4, %v3911_v49  ;;  %3255 = vmatprep.subr.bf16.mxu0 %v3535_v16  ;;  %v3534_v49 = vld [vmem:[%s4326_s3 + $0xa8] sm:$0xff]  }
  0x76   : > { %3136 = vmatpush3.bf16.msra.mxu1 %v3527_v10  ;;  %3123 = vmatprep.mubr.msk.bf16.mxu1 %vm771_vm4, %v3939_v27 }
  0x77   : > { %3137 = vmatprep.subr.bf16.mxu1 %v3529_v15  ;;  %3240 = vmatmul.mubr.msk.bf16.gmra.mrb[8].mxu0 %vm771_vm4, %v3867_v21 }
  0x78   : > { %3243 = vmatprep.mubr.msk.bf16.mxu0 %vm771_vm4, %v3891_v35  ;;  %3256 = vmatpush3.bf16.msra.mxu0 %v3535_v16 }
  0x79   : > { %3257 = vmatprep.subr.bf16.mxu0 %v3537_v17 }
  0x7a   : > { %3138 = vmatpush3.bf16.msra.mxu1 %v3529_v15 }
  0x7b   : > { %3139 = vmatprep.subr.bf16.mxu1 %v3532_v19 }
  0x7c   : > { %3258 = vmatpush3.bf16.msra.mxu0 %v3537_v17 }
  0x7d   : > { %3124 = vmatmul.mubr.msk.bf16.gmra.mrb[4].mxu1 %vm771_vm4, %v3946_v55  ;;  %3275 = vmatprep.subr.bf16.mxu0 %v3539_v22 }
  0x7e   : > { %3140 = vmatpush3.bf16.msra.mxu1 %v3532_v19  ;;  %3127 = vmatprep.mubr.msk.bf16.mxu1 %vm771_vm4, %v3974_v8 }
  0x7f   : > { %3141 = vmatprep.subr.bf16.mxu1 %v3534_v49  ;;  %3244 = vmatmul.mubr.msk.bf16.gmra.mrb[12].mxu0 %vm771_vm4, %v4024_v53 }
  0x80   : > { %3259 = vmatprep.mubr.msk.bf16.mxu0 %vm771_vm4, %v3774_v1  ;;  %v3541_v1 = vld [vmem:[%s4326_s3 + $0x190] sm:$0xff]  }
  0x82   : > { %3142 = vmatpush3.bf16.msra.mxu1 %v3534_v49 }
  0x83   : > { %3143 = vmatprep.subr.bf16.mxu1 %v3536_v23 }
  0x85   : > { %3128 = vmatmul.mubr.msk.bf16.gmra.mrb[8].mxu1 %vm771_vm4, %v3979_v28 }
  0x86   : > { %3144 = vmatpush3.bf16.msra.mxu1 %v3536_v23  ;;  %3131 = vmatprep.mubr.msk.bf16.mxu1 %vm771_vm4, %v4001_v39 }
  0x87   : > { %3145 = vmatprep.subr.bf16.mxu1 %v3538_v56  ;;  %3260 = vmatmul.mubr.msk.bf16.vlgmr.msra.gmra.mrb[0].mxu0 %vm771_vm4, %v3807_v31  ;;  %v3542_v31 = vld [vmem:[%s4326_s3 + $0x198] sm:$0xff]  }
  0x88   : > { %3263 = vmatprep.mubr.msk.bf16.mxu0 %vm771_vm4, %v3827_v51  ;;  %3276 = vmatpush3.bf16.msra.mxu0 %v3539_v22  ;;  %v3543_v51 = vld [vmem:[%s4326_s3 + $0x1a0] sm:$0xff]  }
  0x89   : > { %3277 = vmatprep.subr.bf16.mxu0 %v3540_v26 }
  0x8a   : > { %3146 = vmatpush3.bf16.msra.mxu1 %v3538_v56 }
  0x8b   : > { %3303 = vmatprep.subr.bf16.mxu1 %v3539_v22 }
  0x8c   : > { %3278 = vmatpush3.bf16.msra.mxu0 %v3540_v26 }
  0x8d   : > { %3132 = vmatmul.mubr.msk.bf16.gmra.mrb[12].mxu1 %vm771_vm4, %v4006_v52  ;;  %3279 = vmatprep.subr.bf16.mxu0 %v3541_v1 }
  0x8e   : > { %3147 = vmatprep.mubr.msk.bf16.mxu1 %vm771_vm4, %v3725_v25  ;;  %v3544_v25 = vld [vmem:[%s4326_s3 + $0x1a8] sm:$0xff]  }
  0x8f   : > { %3264 = vmatmul.mubr.msk.bf16.gmra.mrb[4].mxu0 %vm771_vm4, %v3855_v13 }
  0x90   : > { %3267 = vmatprep.mubr.msk.bf16.mxu0 %vm771_vm4, %v3878_v29  ;;  %3280 = vmatpush3.bf16.msra.mxu0 %v3541_v1 }
  0x91   : > { %3281 = vmatprep.subr.bf16.mxu0 %v3542_v31 }
  0x94   : > { %3282 = vmatpush3.bf16.msra.mxu0 %v3542_v31 }
  0x95   : > { %3148 = vmatmul.mubr.msk.bf16.vlgmr.msra.gmra.mrb[0].mxu1 %vm771_vm4, %v3741_v34  ;;  %3283 = vmatprep.subr.bf16.mxu0 %v3543_v51 }
  0x96   : > { %3309 = vmatpush3.bf16.msra.mxu1 %v3539_v22  ;;  %3151 = vmatprep.mubr.msk.bf16.mxu1 %vm771_vm4, %v3767_v61 }
  0x97   : > { %3304 = vmatprep.subr.bf16.mxu1 %v3540_v26  ;;  %3268 = vmatmul.mubr.msk.bf16.gmra.mrb[8].mxu0 %vm771_vm4, %v3902_v48 }
  0x98   : > { %3271 = vmatprep.mubr.msk.bf16.mxu0 %vm771_vm4, %v3914_v50  ;;  %3284 = vmatpush3.bf16.msra.mxu0 %v3543_v51 }
  0x99   : > { %3285 = vmatprep.subr.bf16.mxu0 %v3544_v25 }
  0x9a   : > { %3310 = vmatpush3.bf16.msra.mxu1 %v3540_v26 }
  0x9b   : > { %3305 = vmatprep.subr.bf16.mxu1 %v3541_v1 }
  0x9c   : > { %3286 = vmatpush3.bf16.msra.mxu0 %v3544_v25 }
  0x9d   : > { %3152 = vmatmul.mubr.msk.bf16.gmra.mrb[4].mxu1 %vm771_vm4, %v3787_v14 }
  0x9e   : > { %3311 = vmatpush3.bf16.msra.mxu1 %v3541_v1  ;;  %3155 = vmatprep.mubr.msk.bf16.mxu1 %vm771_vm4, %v3818_v37 }
  0x9f   : > { %3306 = vmatprep.subr.bf16.mxu1 %v3542_v31  ;;  %3272 = vmatmul.mubr.msk.bf16.gmra.mrb[12].mxu0 %vm771_vm4, %v4053_v4 }
  0xa0   : > { %3287 = vmatprep.mubr.msk.bf16.mxu0 %vm771_vm4, %v3939_v27 }
  0xa2   : > { %3312 = vmatpush3.bf16.msra.mxu1 %v3542_v31 }
  0xa3   : > { %3307 = vmatprep.subr.bf16.mxu1 %v3543_v51 }
  0xa5   : > { %3156 = vmatmul.mubr.msk.bf16.gmra.mrb[8].mxu1 %vm771_vm4, %v3840_v58 }
  0xa6   : > { %3313 = vmatpush3.bf16.msra.mxu1 %v3543_v51  ;;  %3159 = vmatprep.mubr.msk.bf16.mxu1 %vm771_vm4, %v3867_v21 }
  0xa7   : > { %3308 = vmatprep.subr.bf16.mxu1 %v3544_v25  ;;  %3288 = vmatmul.mubr.msk.bf16.vlgmr.msra.gmra.mrb[0].mxu0 %vm771_vm4, %v3946_v55 }
  0xa8   : > { %3291 = vmatprep.mubr.msk.bf16.mxu0 %vm771_vm4, %v3974_v8 }
  0xaa   : > { %3314 = vmatpush3.bf16.msra.mxu1 %v3544_v25 }
  0xad   : > { %3160 = vmatmul.mubr.msk.bf16.gmra.mrb[12].mxu1 %vm771_vm4, %v3891_v35 }
  0xae   : > { %3295 = vmatprep.mubr.msk.bf16.mxu1 %vm771_vm4, %v4001_v39 }
  0xaf   : > { %3292 = vmatmul.mubr.msk.bf16.gmra.mrb[4].mxu0 %vm771_vm4, %v3979_v28 }
  0xb5   : > { %3296 = vmatmul.mubr.msk.bf16.vlgmr.msra.gmra.mrb[16].mxu1 %vm771_vm4, %v4006_v52 }
  0xb6   : > { %3299 = vmatprep.mubr.msk.bf16.mxu1 %vm771_vm4, %v4038_v18 }
  0xbd   : > { %3300 = vmatmul.mubr.msk.bf16.gmra.mrb[20].mxu1 %vm771_vm4, %v4041_v0 }
 0x168   : > { %v3149_v34 = vpop.f32.mrb[0].mxu1 }
 0x169   : > { %v1355_v61 = vpop.f32.mrb[1].mxu1 }
 0x16a   : > { %v3150_v14 = vpop.f32.mrb[2].mxu1  ;;  %v3269_v58 = vpop.f32.mrb[8].mxu0 }
 0x16b   : > { %v1358_v37 = vpop.f32.mrb[3].mxu1  ;;  %v2074_v13 = vpop.f32.mrb[9].mxu0 }
 0x16c   : > { %v3270_v21 = vpop.f32.mrb[10].mxu0 }
 0x16d   : > { %v2077_v29 = vpop.f32.mrb[11].mxu0 }
 0x170   : > { %v3153_v35 = vpop.f32.mrb[4].mxu1 }
 0x171   : > { %v1371_v48 = vpop.f32.mrb[5].mxu1 }
 0x172   : > { %v4195_v50 = vpop.f32.mrb[6].mxu1  ;;  %v3273_v55 = vpop.f32.mrb[12].mxu0 }
 0x173   : > { %v4197_v27 = vpop.f32.mrb[7].mxu1  ;;  %v2090_v8 = vpop.f32.mrb[13].mxu0 }
 0x174   : > { %v3274_v28 = vpop.f32.mrb[14].mxu0 }
 0x175   : > { %v2093_v42 = vpop.f32.mrb[15].mxu0 }
 0x178   : > { %v3157_v32 = vpop.f32.mrb[8].mxu1 }
 0x179   : > { %v4199_v33 = vadd.f32 %v3269_v58, %v3157_v32  ;;  %v1387_v38 = vpop.f32.mrb[9].mxu1 }
 0x17a   : > { %v4201_v39 = vadd.f32 %v2074_v13, %v1387_v38  ;;  %v3158_v52 = vpop.f32.mrb[10].mxu1  ;;  %v3289_v41 = vpop.f32.mrb[0].mxu0 }
 0x17b   : > { %v4203_v12 = vadd.f32 %v3270_v21, %v3158_v52  ;;  %v1390_v40 = vpop.f32.mrb[11].mxu1  ;;  %v3315_v45 = vadd.f32 %v3289_v41, %v3149_v34  ;;  %v2212_v46 = vpop.f32.mrb[1].mxu0 }
 0x17c   : > { %v4210_v44 = vadd.f32 %v2077_v29, %v1390_v40  ;;  %v3316_v20 = vadd.f32 %v2212_v46, %v1355_v61  ;;  %v3290_v53 = vpop.f32.mrb[2].mxu0 }
 0x17d   : > { %v2300_v54 = vmul.f32 %v3315_v45, %v4208_v43  ;;  %v3317_v57 = vadd.f32 %v3290_v53, %v3150_v14  ;;  %v2215_v30 = vpop.f32.mrb[3].mxu0 }
 0x17e   : > { %v2298_v59 = vmul.f32 %v3316_v20, %v4208_v43  ;;  %v3318_v60 = vadd.f32 %v2215_v30, %v1358_v37 }
 0x17f   : > { %v2323_v62 = vadd.f32 %v4215_v47, %v2300_v54  ;;  %v2301_v63 = vmul.f32 %v3317_v57, %v4208_v43 }
 0x180   : > { %v3161_v18 = vpop.f32.mrb[12].mxu1  ;;  %v2321_v3 = vadd.f32 %v4215_v47, %v2298_v59  ;;  %v2299_v4 = vmul.f32 %v3318_v60, %v4208_v43 }
 0x181   : > { %v4221_v0 = vadd.f32 %v3273_v55, %v3161_v18  ;;  %v1403_v2 = vpop.f32.mrb[13].mxu1  ;;  %vm2339_vm7 = vcmp.ge.f32.partialorder %v2323_v62, 0.0  ;;  %v2355_v6 = vmul.f32 0.1, %v2323_v62  ;;  %v2324_v9 = vadd.f32 %v4215_v47, %v2301_v63 }
 0x182   : > { %v4225_v5 = vadd.f32 %v2090_v8, %v1403_v2  ;;  %v3162_v7 = vpop.f32.mrb[14].mxu1  ;;  %vm2337_vm8 = vcmp.ge.f32.partialorder %v2321_v3, 0.0  ;;  %v2353_v24 = vmul.f32 0.1, %v2321_v3  ;;  %v2322_v36 = vadd.f32 %v4215_v47, %v2299_v4  ;;  %v3293_v15 = vpop.f32.mrb[4].mxu0 }
 0x183   : > { %v4228_v10 = vadd.f32 %v3274_v28, %v3162_v7  ;;  %v1406_v11 = vpop.f32.mrb[15].mxu1  ;;  %v2371_v16 = vsel %vm2339_vm7, %v2323_v62, %v2355_v6  ;;  %vm2340_vm9 = vcmp.ge.f32.partialorder %v2324_v9, 0.0  ;;  %v2356_v19 = vmul.f32 0.1, %v2324_v9  ;;  %v2228_v49 = vpop.f32.mrb[5].mxu0 }
 0x184   : > { %v4238_v17 = vadd.f32 %v2093_v42, %v1406_v11  ;;  %v2903_v22 = vpack.c.bf16 %v2371_v16, %v2371_v16  ;;  %v2369_v23 = vsel %vm2337_vm8, %v2321_v3, %v2353_v24  ;;  %vm2338_vm10 = vcmp.ge.f32.partialorder %v2322_v36, 0.0  ;;  %v3294_v26 = vpop.f32.mrb[6].mxu0 }
 0x185   : > { %v2354_v56 = vmul.f32 0.1, %v2322_v36  ;;  %v2901_v1 = vpack.c.bf16 %v2369_v23, %v2369_v23  ;;  %v2372_v31 = vsel %vm2340_vm9, %v2324_v9, %v2356_v19  ;;  %v3319_v51 = vadd.f32 %v3293_v15, %v3153_v35  ;;  %v2231_v34 = vpop.f32.mrb[7].mxu0 }
 0x186   : > { %v3320_v25 = vadd.f32 %v2228_v49, %v1371_v48  ;;  %2452 = vst.msk [vmem:[%s4236_s28 + $0x8] sm:$0xf] %vm2449_vm6, %v2903_v22  ;;  %v2904_v61 = vpack.c.bf16 %v2372_v31, %v2372_v31  ;;  %v3321_v37 = vadd.f32 %v3294_v26, %v4195_v50  ;;  %v3322_v58 = vadd.f32 %v2231_v34, %v4197_v27 }
 0x187   : > { %v2370_v14 = vsel %vm2338_vm10, %v2322_v36, %v2354_v56  ;;  %2450 = vst.msk [vmem:[%s4236_s28] sm:$0xf] %vm2449_vm6, %v2901_v1  ;;  %v2304_v29 = vmul.f32 %v3319_v51, %v4208_v43 }
 0x188   : > { %v2902_v13 = vpack.c.bf16 %v2370_v14, %v2370_v14  ;;  %v3297_v21 = vpop.f32.mrb[16].mxu1  ;;  %v2302_v55 = vmul.f32 %v3320_v25, %v4208_v43  ;;  %2453 = vst.msk [vmem:[%s4236_s28 + $0xc] sm:$0xf] %vm2449_vm6, %v2904_v61  ;;  %v2305_v8 = vmul.f32 %v3321_v37, %v4208_v43  ;;  %v2303_v28 = vmul.f32 %v3322_v58, %v4208_v43 }
 0x189   : > { %v3324_v35 = vadd.f32 %v4199_v33, %v3297_v21  ;;  %v2244_v48 = vpop.f32.mrb[17].mxu1  ;;  %v2327_v50 = vadd.f32 %v4215_v47, %v2304_v29 }
 0x18a   : > { %2451 = vst.msk [vmem:[%s4236_s28 + $0x4] sm:$0xf] %vm2449_vm6, %v2902_v13  ;;  %v3326_v27 = vadd.f32 %v4201_v39, %v2244_v48  ;;  %v2325_v42 = vadd.f32 %v4215_v47, %v2302_v55  ;;  %v3298_v32 = vpop.f32.mrb[18].mxu1  ;;  %v2328_v33 = vadd.f32 %v4215_v47, %v2305_v8  ;;  %v2326_v41 = vadd.f32 %v4215_v47, %v2303_v28 }
 0x18b   : > { %v2308_v38 = vmul.f32 %v3324_v35, %v4208_v43  ;;  %v3328_v52 = vadd.f32 %v4203_v12, %v3298_v32  ;;  %v2247_v40 = vpop.f32.mrb[19].mxu1  ;;  %vm2343_vm11 = vcmp.ge.f32.partialorder %v2327_v50, 0.0  ;;  %v2359_v45 = vmul.f32 0.1, %v2327_v50 }
 0x18c   : > { %v2306_v46 = vmul.f32 %v3326_v27, %v4208_v43  ;;  %vm2341_vm12 = vcmp.ge.f32.partialorder %v2325_v42, 0.0  ;;  %v2357_v39 = vmul.f32 0.1, %v2325_v42  ;;  %vm2344_vm13 = vcmp.ge.f32.partialorder %v2328_v33, 0.0 }
 0x18d   : > { %v2331_v20 = vadd.f32 %v4215_v47, %v2308_v38  ;;  %v2309_v53 = vmul.f32 %v3328_v52, %v4208_v43  ;;  %v2375_v54 = vsel %vm2343_vm11, %v2327_v50, %v2359_v45  ;;  %v2360_v57 = vmul.f32 0.1, %v2328_v33 }
 0x18e   : > { %v2329_v12 = vadd.f32 %v4215_v47, %v2306_v46  ;;  %v3330_v30 = vadd.f32 %v4210_v44, %v2247_v40  ;;  %v2907_v60 = vpack.c.bf16 %v2375_v54, %v2375_v54  ;;  %v2373_v18 = vsel %vm2341_vm12, %v2325_v42, %v2357_v39 }
 0x18f   : > { %vm2347_vm14 = vcmp.ge.f32.partialorder %v2331_v20, 0.0  ;;  %v2363_v59 = vmul.f32 0.1, %v2331_v20  ;;  %v2905_v63 = vpack.c.bf16 %v2373_v18, %v2373_v18  ;;  %v2332_v2 = vadd.f32 %v4215_v47, %v2309_v53 }
 0x190   : > { %vm2345_vm15 = vcmp.ge.f32.partialorder %v2329_v12, 0.0  ;;  %v2361_v62 = vmul.f32 0.1, %v2329_v12  ;;  %v3301_v3 = vpop.f32.mrb[20].mxu1  ;;  %2456 = vst.msk [vmem:[%s4236_s28 + $0x18] sm:$0xf] %vm2449_vm6, %v2907_v60  ;;  %v2376_v6 = vsel %vm2344_vm13, %v2328_v33, %v2360_v57  ;;  %v2307_v7 = vmul.f32 %v3330_v30, %v4208_v43 }
 0x191   : > { %v2379_v4 = vsel %vm2347_vm14, %v2331_v20, %v2363_v59  ;;  %vm2342_vm0 = vcmp.ge.f32.partialorder %v2326_v41, 0.0  ;;  %v2260_v44 = vpop.f32.mrb[21].mxu1  ;;  %2454 = vst.msk [vmem:[%s4236_s28 + $0x10] sm:$0xf] %vm2449_vm6, %v2905_v63  ;;  %vm2348_vm1 = vcmp.ge.f32.partialorder %v2332_v2, 0.0  ;;  %v2908_v16 = vpack.c.bf16 %v2376_v6, %v2376_v6 }
 0x192   : > { %v2911_v9 = vpack.c.bf16 %v2379_v4, %v2379_v4  ;;  %v2377_v24 = vsel %vm2345_vm15, %v2329_v12, %v2361_v62  ;;  %v2364_v11 = vmul.f32 0.1, %v2332_v2  ;;  %v3302_v36 = vpop.f32.mrb[22].mxu1  ;;  %v2330_v19 = vadd.f32 %v4215_v47, %v2307_v7 }
 0x193   : > { %v2909_v15 = vpack.c.bf16 %v2377_v24, %v2377_v24  ;;  %v2358_v49 = vmul.f32 0.1, %v2326_v41  ;;  %v2263_v22 = vpop.f32.mrb[23].mxu1  ;;  %v3332_v56 = vadd.f32 %v4221_v0, %v3301_v3  ;;  %v3334_v26 = vadd.f32 %v4225_v5, %v2260_v44  ;;  %2457 = vst.msk [vmem:[%s4236_s28 + $0x1c] sm:$0xf] %vm2449_vm6, %v2908_v16 }
 0x194   : > { %2460 = vst.msk [vmem:[%s4236_s28 + $0x28] sm:$0xf] %vm2449_vm6, %v2911_v9  ;;  %v2380_v23 = vsel %vm2348_vm1, %v2332_v2, %v2364_v11  ;;  %v3336_v1 = vadd.f32 %v4228_v10, %v3302_v36  ;;  %vm2346_vm2 = vcmp.ge.f32.partialorder %v2330_v19, 0.0  ;;  %v2362_v51 = vmul.f32 0.1, %v2330_v19 }
 0x195   : > { %2458 = vst.msk [vmem:[%s4236_s28 + $0x20] sm:$0xf] %vm2449_vm6, %v2909_v15  ;;  %v2912_v31 = vpack.c.bf16 %v2380_v23, %v2380_v23  ;;  %v2374_v25 = vsel %vm2342_vm0, %v2326_v41, %v2358_v49  ;;  %v2312_v61 = vmul.f32 %v3332_v56, %v4208_v43  ;;  %v2310_v0 = vmul.f32 %v3334_v26, %v4208_v43 }
 0x196   : > { %v2906_v34 = vpack.c.bf16 %v2374_v25, %v2374_v25  ;;  %v2313_v5 = vmul.f32 %v3336_v1, %v4208_v43  ;;  %v2378_v10 = vsel %vm2346_vm2, %v2330_v19, %v2362_v51  ;;  %v3338_v14 = vadd.f32 %v4238_v17, %v2263_v22 }
 0x197   : > { %2461 = vst.msk [vmem:[%s4236_s28 + $0x2c] sm:$0xf] %vm2449_vm6, %v2912_v31  ;;  %v2910_v37 = vpack.c.bf16 %v2378_v10, %v2378_v10  ;;  %v2335_v58 = vadd.f32 %v4215_v47, %v2312_v61  ;;  %v2333_v13 = vadd.f32 %v4215_v47, %v2310_v0 }
 0x198   : > { %2455 = vst.msk [vmem:[%s4236_s28 + $0x14] sm:$0xf] %vm2449_vm6, %v2906_v34  ;;  %v2336_v21 = vadd.f32 %v4215_v47, %v2313_v5  ;;  %v2311_v29 = vmul.f32 %v3338_v14, %v4208_v43 }
 0x199   : > { %2459 = vst.msk [vmem:[%s4236_s28 + $0x24] sm:$0xf] %vm2449_vm6, %v2910_v37  ;;  %vm2351_vm3 = vcmp.ge.f32.partialorder %v2335_v58, 0.0  ;;  %v2367_v55 = vmul.f32 0.1, %v2335_v58  ;;  %vm2349_vm4 = vcmp.ge.f32.partialorder %v2333_v13, 0.0 }
 0x19a   : > { %v2365_v17 = vmul.f32 0.1, %v2333_v13  ;;  %vm2352_vm5 = vcmp.ge.f32.partialorder %v2336_v21, 0.0  ;;  %v2368_v35 = vmul.f32 0.1, %v2336_v21  ;;  %v2334_v48 = vadd.f32 %v4215_v47, %v2311_v29 }
 0x19b   : > { %v2383_v8 = vsel %vm2351_vm3, %v2335_v58, %v2367_v55 }
 0x19c   : > { %v2381_v28 = vsel %vm2349_vm4, %v2333_v13, %v2365_v17  ;;  %v2915_v50 = vpack.c.bf16 %v2383_v8, %v2383_v8  ;;  %v2384_v42 = vsel %vm2352_vm5, %v2336_v21, %v2368_v35  ;;  %vm2350_vm7 = vcmp.ge.f32.partialorder %v2334_v48, 0.0 }
 0x19d   : > { %v2913_v27 = vpack.c.bf16 %v2381_v28, %v2381_v28  ;;  %v2916_v43 = vpack.c.bf16 %v2384_v42, %v2384_v42  ;;  %v2366_v32 = vmul.f32 0.1, %v2334_v48 }
 0x19e   : > { %2464 = vst.msk [vmem:[%s4236_s28 + $0x38] sm:$0xf] %vm2449_vm6, %v2915_v50 }
 0x19f   : > { %2462 = vst.msk [vmem:[%s4236_s28 + $0x30] sm:$0xf] %vm2449_vm6, %v2913_v27  ;;  %2465 = vst.msk [vmem:[%s4236_s28 + $0x3c] sm:$0xf] %vm2449_vm6, %v2916_v43  ;;  %v2382_v38 = vsel %vm2350_vm7, %v2334_v48, %v2366_v32 }
 0x1a0   : > { %v2914_v52 = vpack.c.bf16 %v2382_v38, %v2382_v38 }
 0x1a2   : > { %2463 = vst.msk [vmem:[%s4236_s28 + $0x34] sm:$0xf] %vm2449_vm6, %v2914_v52 }
 0x1a3 PF: > { %s16_s25 = sadd.s32 1, %s3583_s25   ;;  %s4333_s21 = smov %s3575_s23 }
 0x1a4   : > { %p13_p12 = scmp.ge.s32.totalorder %s16_s25, 6   ;;  %s4334_s22 = smov %s3579_s24 }
 0x1a5   : > { %s4335_s23 = smov %s4338_s26  ;;  %s4336_s24 = smov %s4342_s27 }
 0x1a6   :  { %15 = sbr.rel (!%p13_p12) target bundleno = 3 (0x3), region = 88 }

// kernel: matchnet2_forward.12
= control target key start
LH: loop header
LB: loop body
LE: loop exit
PB: predicated region body
PF: predicated region fallthrough
CT: control target
= control target key end

     0   :  { %s3350_s21 = smov 0   ;;  %s3352_s22 = smov 0   ;;  %s3991_s0 = inlined_call_operand.vmem [shape: bf16[2,16,16,64], index: 0, kind: input, shape index: {}, may-alias: {0,1,2}]   ;;  %s3992_s1 = inlined_call_operand.vmem [shape: bf16[2,16,16,64], index: 1, kind: input, shape index: {}, may-alias: {0,1,2}]   ;;  %s3993_s2 = inlined_call_operand.vmem [shape: bf16[2,16,16,64], index: 2, kind: input, shape index: {}, may-alias: {0,1,2}]   ;;  %s3994_s3 = inlined_call_operand.vmem [shape: bf16[3,3,64,32], index: 3, kind: input, shape index: {}]   ;;  %s3995_s4 = inlined_call_operand.vmem [shape: f32[1,32], index: 4, kind: input, shape index: {}]   ;;  %s3996_s5 = inlined_call_operand.vmem [shape: f32[1,32], index: 5, kind: input, shape index: {}]   ;;  %s3997_s6 = inlined_call_operand.vmem [shape: bf16[2,16,16,32], index: 6, kind: output, shape index: {}]  }
   0x1   :  { %s3354_s23 = smov 0   ;;  %s3356_s24 = smov 0  }
   0x2   :  { %s3358_s25 = smov 0  }
   0x3 LB: > { %s25_s26 = sadd.s32 1, %s3305_s23  ;;  %s28_s27 = sadd.s32 1, %s3309_s24  ;;  %s3313_s25 = sphi %s3358_s25, %s16_s25   ;;  %s3309_s24 = sphi %s3356_s24, %s4004_s24   ;;  %s3305_s23 = sphi %s3354_s23, %s4003_s23   ;;  %s3301_s22 = sphi %s3352_s22, %s4002_s22   ;;  %s3297_s21 = sphi %s3350_s21, %s4001_s21  }
   0x4   : > { %p26_p0 = scmp.ge.s32.totalorder %s25_s26, 2  ;;  %p2473_p1 = scmp.ge.s32.totalorder %s3313_s25, 1 }
   0x5   : > { %p298_p2 = scmp.lt.s32.totalorder %s3313_s25, 5 }
   0x6   : > { %s4006_s26 = smov (%p26_p0, %s25_s26), 0  ;;  %s4008_s27 = smov (!%p26_p0, %s28_s27), %s3309_s24 }
   0x7   : > { %p299_p3 = pnand %p2473_p1, %p298_p2  ;;  %p30_p4 = scmp.ge.s32.totalorder %s4008_s27, 2 }
   0x8   : > { %v3385_v0 = vld [vmem:[%s3994_s3 + $0x80] sm:$0xff] (!%p299_p3)   ;;  %s3388_s30 = sshll.u32 (!%p299_p3), %s3297_s21, 3  ;;  %v3393_v1 = vld [vmem:[%s3994_s3 + $0x88] sm:$0xff] (!%p299_p3)   ;;  %p368_p5 = scmp.lt.s32.totalorder (!%p299_p3), %s3301_s22, 1  ;;  %v3404_v3 = vld [vmem:[%s3994_s3 + $0x90] sm:$0xff] (!%p299_p3)   ;;  %vm590_vm1 = vcmask (!%p299_p3), 1040384  }
   0x9   : > { %s4010_s27 = smov (%p30_p4, %s4008_s27), 0  ;;  %302 = sbr.rel (%p299_p3) target bundleno = 414 (0x19e), region = 44 }
   0xa   : > { %2935 = vmatprep.subr.bf16.mxu0 (!%p299_p3), %v3385_v0  ;;  %v3233_v2 = vld [vmem:[%s3994_s3 + $0x20] sm:$0xff] (!%p299_p3)   ;;  %p384_p6 = scmp.lt.s32.totalorder (!%p299_p3), %s3388_s30, 15  ;;  %v3235_v4 = vld [vmem:[%s3994_s3 + $0x28] sm:$0xff] (!%p299_p3)   ;;  %v3237_v5 = vld [vmem:[%s3994_s3 + $0x30] sm:$0xff] (!%p299_p3)   ;;  %vm591_vm0 = vsmask.f32 (!%p299_p3), 256 }
   0xb   : > { %2936 = vmatpush3.bf16.msra.mxu0 (!%p299_p3), %v3385_v0  ;;  %2839 = vmatprep.subr.bf16.mxu1 (!%p299_p3), %v3233_v2  ;;  %v3420_v6 = vld [vmem:[%s3994_s3 + $0x98] sm:$0xff] (!%p299_p3)   ;;  %s2475_s7 = sadd.s32 (!%p299_p3), 4294967295, %s3388_s30  ;;  %v3442_v11 = vld [vmem:[%s3994_s3 + $0xa0] sm:$0xff] (!%p299_p3)   ;;  %p421_p9 = scmp.lt.s32.totalorder (!%p299_p3), %s3297_s21, 1  ;;  %vm3456_vm2 = vmand (!%p299_p3), %vm590_vm1, %vm591_vm0  ;;  %vm621_vm3 = vsmask.f32 (!%p299_p3), 7424 }
   0xc   : > { %2937 = vmatprep.subr.bf16.mxu0 (!%p299_p3), %v3393_v1  ;;  %2840 = vmatpush3.bf16.msra.mxu1 (!%p299_p3), %v3233_v2  ;;  %p366_p7 = scmp.gt.s32.totalorder (!%p299_p3), %s2475_s7, 0  ;;  %p2476_p8 = scmp.lt.s32.totalorder (!%p299_p3), %s2475_s7, 15  ;;  %v3241_v12 = vld [vmem:[%s3994_s3 + $0x38] sm:$0xff] (!%p299_p3)   ;;  %v3450_v15 = vld [vmem:[%s3994_s3] sm:$0xff] (!%p299_p3)   ;;  %vm751_vm4 = vcmask (!%p299_p3), 523264   ;;  %v3242_v54 = vld [vmem:[%s3994_s3 + $0xa8] sm:$0xff] (!%p299_p3)  }
   0xd   : > { %2841 = vmatprep.subr.bf16.mxu1 (!%p299_p3), %v3235_v4  ;;  %vm1026_vm5 = vcmask (!%p299_p3), 1046528   ;;  %s2706_s28 = sadd.s32 (!%p299_p3), 8, %s3388_s30  ;;  %vm2305_vm7 = vcmask (!%p299_p3), 257024  }
   0xe   : > { %p3661_p10 = scmp.lt.s32.totalorder (!%p299_p3), %s2706_s28, 15 }
   0xf   : > { %2938 = vmatpush3.bf16.msra.mxu0 (!%p299_p3), %v3393_v1 }
  0x10   : > { %s4012_s22 = smov (!%p368_p5, %s3301_s22), 1  ;;  %2939 = vmatprep.subr.bf16.mxu0 %v3404_v3  ;;  %2842 = vmatpush3.bf16.msra.mxu1 %v3235_v4  ;;  %s4014_s7 = smov (!%p366_p7, %s2475_s7), 0 }
  0x11   : > { %s385_s15 = scalar_select %p384_p6, %s3388_s30, 15  ;;  %2843 = vmatprep.subr.bf16.mxu1 %v3237_v5 }
  0x12   : > { %s3411_s16 = sshll.u32 %s4012_s22, 5  ;;  %s4016_s7 = smov (!%p2476_p8, %s4014_s7), 15 }
  0x13   : > { %s2485_s19 = sshll.u32 %s385_s15, 1  ;;  %2940 = vmatpush3.bf16.msra.mxu0 %v3404_v3  ;;  %s2481_s18 = sshll.u32 %s4016_s7, 1 }
  0x14   : > { %s3423_s29 = sadd.s32 %s2485_s19, %s3411_s16  ;;  %2941 = vmatprep.subr.bf16.mxu0 %v3420_v6  ;;  %2844 = vmatpush3.bf16.msra.mxu1 %v3237_v5  ;;  %s374_s19 = sadd.s32 %s3411_s16, %s2481_s18 }
  0x15   : > { %s2487_s22 = sshll.u32 %s3423_s29, 2  ;;  %2845 = vmatprep.subr.bf16.mxu1 %v3241_v12  ;;  %s2483_s20 = sshll.u32 %s374_s19, 2 }
  0x16   : > { %s3433_s10 = scalar_lea.vmem %s3992_s1, %s2487_s22  ;;  %s376_s8 = scalar_lea.vmem %s3991_s0, %s2483_s20 }
  0x17   : > { %v3238_v7 = vld [vmem:[%s3433_s10] sm:$0xff]   ;;  %v3239_v8 = vld [vmem:[%s3433_s10 + $0x8] sm:$0xff]   ;;  %2942 = vmatpush3.bf16.msra.mxu0 %v3420_v6  ;;  %v3244_v21 = vld [vmem:[%s3433_s10 + $0x10] sm:$0xff]   ;;  %s422_s9 = scalar_select %p421_p9, %s3297_s21, 1 }
  0x18   : > { %v508_v9 = vshrl.u32 %v3238_v7, 16  ;;  %v511_v10 = vshll.u32 %v3238_v7, 16  ;;  %v515_v13 = vshrl.u32 %v3239_v8, 16  ;;  %v518_v14 = vshll.u32 %v3239_v8, 16  ;;  %2959 = vmatprep.subr.bf16.mxu0 %v3442_v11  ;;  %2846 = vmatpush3.bf16.msra.mxu1 %v3241_v12  ;;  %v3245_v28 = vld [vmem:[%s3433_s10 + $0x18] sm:$0xff]   ;;  %v2724_v32 = vld [vmem:[%s376_s8] sm:$0xff]  }
  0x19   : > { %2863 = vmatprep.subr.bf16.mxu1 %v3450_v15  ;;  %v522_v27 = vshrl.u32 %v3244_v21, 16  ;;  %v2725_v36 = vunpack.c.l.bf16 %v2724_v32  ;;  %s423_s11 = scvt.s32.f32 %s422_s9  ;;  %v2726_v38 = vunpack.c.h.bf16 %v2724_v32  ;;  %v525_v40 = vshll.u32 %v3244_v21, 16  ;;  %v3251_v57 = vld [vmem:[%s3433_s10 + $0x20] sm:$0xff]   ;;  %v3246_v12 = vld [vmem:[%s3994_s3 + $0xb0] sm:$0xff]   ;;  %s424_s7 = ssub.s32 1, %s3297_s21 }
  0x1a   : > { %v510_v16 = vrot.slane %v508_v9, 7  ;;  %v517_v18 = vrot.slane %v515_v13, 7  ;;  %v529_v43 = vshrl.u32 %v3245_v28, 16  ;;  %v532_v44 = vshll.u32 %v3245_v28, 16  ;;  %p425_p11 = scmp.lt.s32.totalorder %s424_s7, 1  ;;  %s4018_s28 = smov (!%p3661_p10, %s2706_s28), 15 }
  0x1b   : > { %v524_v39 = vrot.slane %v522_v27, 7  ;;  %v432_v46 = vstv %s423_s11  ;;  %v536_v13 = vshrl.u32 %v3251_v57, 16  ;;  %s4022_s28 = smov (!%p3661_p10, %s4018_s28), 15 }
  0x1c   : > { %v513_v19 = vor.u32 %v511_v10, %v510_v16  ;;  %v3462_v20 = vsel %vm3456_vm2, %v510_v16, 0  ;;  %v520_v23 = vor.u32 %v518_v14, %v517_v18  ;;  %v3470_v24 = vsel %vm3456_vm2, %v517_v18, 0  ;;  %s4020_s7 = smov (!%p425_p11, %s424_s7), 1  ;;  %s2492_s9 = sshll.u32 %s4022_s28, 1 }
  0x1d   : > { %v642_v22 = vshll.u32 %v3462_v20, 16  ;;  %v654_v26 = vshll.u32 %v3470_v24, 16  ;;  %v527_v47 = vor.u32 %v525_v40, %v524_v39  ;;  %v3495_v48 = vsel %vm3456_vm2, %v524_v39, 0  ;;  %s427_s11 = scvt.s32.f32 %s4020_s7  ;;  %s402_s12 = sadd.s32 %s2492_s9, %s3411_s16 }
  0x1e   : > { %v3474_v25 = vsel %vm3456_vm2, 0, %v513_v19  ;;  %v3486_v31 = vsel %vm3456_vm2, 0, %v520_v23  ;;  %v433_v50 = vmul.f32 %v2725_v36, %v432_v46  ;;  %v434_v51 = vmul.f32 %v2726_v38, %v432_v46  ;;  %s3918_s16 = scalar_lea.vmem %s3997_s6, %s2487_s22 }
  0x1f   : > { %v635_v29 = vshrl.u32 %v3474_v25, 16  ;;  %v637_v30 = vshll.u32 %v3474_v25, 16  ;;  %v644_v33 = vrot.slane %v642_v22, 1  ;;  %v647_v34 = vshrl.u32 %v3486_v31, 16 }
  0x20   : > { %v649_v35 = vshll.u32 %v3486_v31, 16  ;;  %v656_v42 = vrot.slane %v654_v26, 1  ;;  %v666_v52 = vshll.u32 %v3495_v48, 16  ;;  %v3506_v55 = vsel %vm3456_vm2, 0, %v527_v47 }
  0x21   : > { %v639_v37 = vrot.slane %v637_v30, 1  ;;  %v531_v56 = vrot.slane %v529_v43, 7  ;;  %v435_v59 = vpack.c.bf16 %v434_v51, %v433_v50  ;;  %v659_v60 = vshrl.u32 %v3506_v55, 16  ;;  %v3247_v30 = vld [vmem:[%s3994_s3 + $0xb8] sm:$0xff]  }
  0x22   : > { %v651_v41 = vrot.slane %v649_v35, 1  ;;  %v661_v61 = vshll.u32 %v3506_v55, 16  ;;  %v668_v62 = vrot.slane %v666_v52, 1  ;;  %v1031_v9 = vrot.slane %v3462_v20, 1  ;;  %v3255_v35 = vld [vmem:[%s3433_s10 + $0x30] sm:$0xff]  }
  0x23   : > { %v640_v45 = vor.u32 %v639_v37, %v635_v29  ;;  %v534_v63 = vor.u32 %v532_v44, %v531_v56  ;;  %v3520_v2 = vsel %vm3456_vm2, %v531_v56, 0  ;;  %v501_v4 = vshrl.u32 %v435_v59, 16 }
  0x24   : > { %v652_v49 = vor.u32 %v651_v41, %v647_v34  ;;  %v504_v5 = vshll.u32 %v435_v59, 16  ;;  %v663_v7 = vrot.slane %v661_v61, 1  ;;  %v678_v8 = vshll.u32 %v3520_v2, 16  ;;  %v3252_v34 = vld [vmem:[%s3433_s10 + $0x28] sm:$0xff]  }
  0x25   : > { %v3499_v53 = vsel %vm621_vm3, %v640_v45, %v644_v33  ;;  %v3527_v10 = vsel %vm3456_vm2, 0, %v534_v63  ;;  %v503_v14 = vrot.slane %v501_v4, 7  ;;  %v1030_v20 = vrot.slane %v3474_v25, 1  ;;  %v3248_v61 = vld [vmem:[%s3994_s3 + $0x8] sm:$0xff]  }
  0x26   : > { %2943 = vmatprep.mubr.msk.bf16.mxu0 %vm751_vm4, %v3499_v53  ;;  %v3512_v58 = vsel %vm621_vm3, %v652_v49, %v656_v42  ;;  %v671_v16 = vshrl.u32 %v3527_v10, 16  ;;  %v673_v18 = vshll.u32 %v3527_v10, 16  ;;  %v680_v19 = vrot.slane %v678_v8, 1  ;;  %v3250_v42 = vld [vmem:[%s3994_s3 + $0xc0] sm:$0xff]   ;;  %v3258_v8 = vld [vmem:[%s3433_s10 + $0x38] sm:$0xff]   ;;  %s2494_s10 = sshll.u32 %s402_s12, 2 }
  0x27   : > { %2944 = vmatmul.mubr.msk.bf16.vlgmr.msra.gmra.mrb[0].mxu0 %vm751_vm4, %v3512_v58  ;;  %v538_v21 = vrot.slane %v536_v13, 7  ;;  %v539_v22 = vshll.u32 %v3251_v57, 16  ;;  %v506_v23 = vor.u32 %v504_v5, %v503_v14  ;;  %v3537_v26 = vsel %vm3456_vm2, %v503_v14, 0  ;;  %s404_s15 = scalar_lea.vmem %s3993_s2, %s2494_s10 }
  0x28   : > { %2960 = vmatpush3.bf16.msra.mxu0 %v3442_v11  ;;  %v664_v11 = vor.u32 %v663_v7, %v659_v60  ;;  %v675_v28 = vrot.slane %v673_v18, 1  ;;  %v630_v29 = vshll.u32 %v3537_v26, 16  ;;  %v3557_v38 = vsel %vm1026_vm5, %v1030_v20, %v1031_v9  ;;  %v3254_v7 = vld [vmem:[%s3994_s3 + $0xc8] sm:$0xff]   ;;  %v3249_v9 = vld [vmem:[%s3994_s3 + $0x10] sm:$0xff]  }
  0x29   : > { %2961 = vmatprep.subr.bf16.mxu0 %v3242_v54  ;;  %v3550_v32 = vsel %vm3456_vm2, 0, %v506_v23  ;;  %v541_v39 = vor.u32 %v539_v22, %v538_v21  ;;  %v1034_v40 = vrot.slane %v3470_v24, 1  ;;  %v1033_v45 = vrot.slane %v3486_v31, 1  ;;  %v3257_v18 = vld [vmem:[%s3994_s3 + $0xd0] sm:$0xff]  }
  0x2a   : > { %v3540_v27 = vsel %vm621_vm3, %v664_v11, %v668_v62  ;;  %v676_v33 = vor.u32 %v675_v28, %v671_v16  ;;  %v623_v36 = vshrl.u32 %v3550_v32, 16  ;;  %v625_v37 = vshll.u32 %v3550_v32, 16  ;;  %v3253_v28 = vld [vmem:[%s3994_s3 + $0x18] sm:$0xff]  }
  0x2b   : > { %2947 = vmatprep.mubr.msk.bf16.mxu0 %vm751_vm4, %v3540_v27  ;;  %v632_v44 = vrot.slane %v630_v29, 1  ;;  %v1036_v46 = vrot.slane %v3506_v55, 1  ;;  %v3574_v24 = vsel %vm3456_vm2, %v538_v21, 0  ;;  %v543_v47 = vshrl.u32 %v3252_v34, 16 }
  0x2c   : > { %2962 = vmatpush3.bf16.msra.mxu0 %v3242_v54  ;;  %v3561_v41 = vsel %vm621_vm3, %v676_v33, %v680_v19  ;;  %v627_v43 = vrot.slane %v625_v37, 1  ;;  %v546_v49 = vshll.u32 %v3252_v34, 16  ;;  %v550_v50 = vshrl.u32 %v3255_v35, 16  ;;  %v3259_v37 = vld [vmem:[%s3994_s3 + $0xd8] sm:$0xff]  }
  0x2d   : > { %2963 = vmatprep.subr.bf16.mxu0 %v3246_v12  ;;  %v3578_v52 = vsel %vm3456_vm2, 0, %v541_v39  ;;  %v1037_v54 = vrot.slane %v3495_v48, 1  ;;  %v545_v56 = vrot.slane %v543_v47, 7  ;;  %v553_v59 = vshll.u32 %v3255_v35, 16 }
  0x2e   : > { %v628_v51 = vor.u32 %v627_v43, %v623_v36  ;;  %v552_v57 = vrot.slane %v550_v50, 7  ;;  %v690_v62 = vshll.u32 %v3574_v24, 16  ;;  %v3588_v63 = vsel %vm1026_vm5, %v1033_v45, %v1034_v40  ;;  %v3653_v45 = vld [vmem:[%s3994_s3 + $0x40] sm:$0xff]  }
  0x2f   : > { %2948 = vmatmul.mubr.msk.bf16.gmra.mrb[4].mxu0 %vm751_vm4, %v3561_v41  ;;  %v685_v48 = vshll.u32 %v3578_v52, 16  ;;  %v548_v4 = vor.u32 %v546_v49, %v545_v56  ;;  %v3594_v5 = vsel %vm1026_vm5, %v1036_v46, %v1037_v54  ;;  %v1039_v11 = vrot.slane %v3527_v10, 1 }
  0x30   : > { %2964 = vmatpush3.bf16.msra.mxu0 %v3246_v12  ;;  %2967 = vmatprep.mubr.msk.bf16.mxu0 %vm751_vm4, %v3557_v38  ;;  %v633_v60 = vsel %vm621_vm3, %v628_v51, %v632_v44  ;;  %v3612_v12 = vsel %vm3456_vm2, %v545_v56, 0  ;;  %v555_v13 = vor.u32 %v553_v59, %v552_v57  ;;  %v692_v14 = vrot.slane %v690_v62, 1  ;;  %v3670_v51 = vld [vmem:[%s3994_s3 + $0xe0] sm:$0xff]  }
  0x31   : > { %2965 = vmatprep.subr.bf16.mxu0 %v3247_v30  ;;  %2847 = vmatprep.mubr.msk.bf16.mxu1 %vm751_vm4, %v633_v60  ;;  %v687_v19 = vrot.slane %v685_v48, 1  ;;  %v1040_v20 = vrot.slane %v3520_v2, 1  ;;  %v1042_v21 = vrot.slane %v3578_v52, 1  ;;  %v1043_v22 = vrot.slane %v3574_v24, 1 }
  0x32   : > { %2848 = vmatmul.mubr.msk.bf16.vlgmr.msra.gmra.mrb[0].mxu1 %vm751_vm4, %v3499_v53  ;;  %v3608_v53 = vsel %vm3456_vm2, 0, %v548_v4  ;;  %v702_v23 = vshll.u32 %v3612_v12, 16  ;;  %v610_v29 = vsel %vm3456_vm2, %v552_v57, 0  ;;  %v560_v33 = vshll.u32 %v3258_v8, 16 }
  0x33   : > { %2864 = vmatpush3.bf16.msra.mxu1 %v3450_v15  ;;  %2851 = vmatprep.mubr.msk.bf16.mxu1 %vm751_vm4, %v3512_v58  ;;  %v683_v15 = vshrl.u32 %v3578_v52, 16  ;;  %v697_v16 = vshll.u32 %v3608_v53, 16  ;;  %v3635_v2 = vsel %vm3456_vm2, 0, %v555_v13  ;;  %v1046_v34 = vrot.slane %v3612_v12, 1 }
  0x34   : > { %2966 = vmatpush3.bf16.msra.mxu0 %v3247_v30  ;;  %2865 = vmatprep.subr.bf16.mxu1 %v3248_v61  ;;  %v557_v30 = vshrl.u32 %v3258_v8, 16  ;;  %v695_v35 = vshrl.u32 %v3608_v53, 16  ;;  %v3643_v39 = vsel %vm1026_vm5, %v1039_v11, %v1040_v20  ;;  %v714_v40 = vshll.u32 %v610_v29, 16 }
  0x35   : > { %2983 = vmatprep.subr.bf16.mxu0 %v3250_v42  ;;  %v699_v36 = vrot.slane %v697_v16, 1  ;;  %v704_v43 = vrot.slane %v702_v23, 1  ;;  %v3648_v44 = vsel %vm1026_vm5, %v1042_v21, %v1043_v22  ;;  %v688_v24 = vor.u32 %v687_v19, %v683_v15  ;;  %v2728_v15 = vld [vmem:[%s404_s15] sm:$0xff]  }
  0x36   : > { %v559_v46 = vrot.slane %v557_v30, 7  ;;  %v707_v47 = vshrl.u32 %v3635_v2, 16  ;;  %v709_v49 = vshll.u32 %v3635_v2, 16  ;;  %v1045_v54 = vrot.slane %v3608_v53, 1  ;;  %v3260_v30 = vld [vmem:[%s3994_s3 + $0x48] sm:$0xff]  }
  0x37   : > { %2968 = vmatmul.mubr.msk.bf16.vlgmr.msra.gmra.mrb[0].mxu0 %vm751_vm4, %v3588_v63  ;;  %2866 = vmatpush3.bf16.msra.mxu1 %v3248_v61  ;;  %v700_v50 = vor.u32 %v699_v36, %v695_v35  ;;  %v1048_v56 = vrot.slane %v3635_v2, 1  ;;  %v3679_v59 = vsel %vm621_vm3, %v688_v24, %v692_v14  ;;  %v440_v14 = vstv %s427_s11  ;;  %v3261_v24 = vld [vmem:[%s3994_s3 + $0x50] sm:$0xff]  }
  0x38   : > { %2971 = vmatprep.mubr.msk.bf16.mxu0 %vm751_vm4, %v3594_v5  ;;  %2984 = vmatpush3.bf16.msra.mxu0 %v3250_v42  ;;  %v1049_v42 = vrot.slane %v610_v29, 1  ;;  %v562_v57 = vor.u32 %v560_v33, %v559_v46  ;;  %v711_v60 = vrot.slane %v709_v49, 1  ;;  %v3688_v62 = vsel %vm1026_vm5, %v1045_v54, %v1046_v34  ;;  %v3266_v49 = vld [vmem:[%s3994_s3 + $0xf0] sm:$0xff]   ;;  %v3263_v54 = vld [vmem:[%s3994_s3 + $0x58] sm:$0xff]  }
  0x39   : > { %2985 = vmatprep.subr.bf16.mxu0 %v3254_v7  ;;  %2867 = vmatprep.subr.bf16.mxu1 %v3249_v9  ;;  %v3684_v61 = vsel %vm621_vm3, %v700_v50, %v704_v43  ;;  %v2729_v11 = vunpack.c.l.bf16 %v2728_v15  ;;  %v2730_v16 = vunpack.c.h.bf16 %v2728_v15 }
  0x3a   : > { %2852 = vmatmul.mubr.msk.bf16.gmra.mrb[4].mxu1 %vm751_vm4, %v3540_v27  ;;  %v3693_v48 = vsel %vm1026_vm5, %v1048_v56, %v1049_v42  ;;  %v3697_v4 = vsel %vm3456_vm2, 0, %v562_v57  ;;  %v712_v8 = vor.u32 %v711_v60, %v707_v47  ;;  %v3267_v56 = vld [vmem:[%s3994_s3 + $0xf8] sm:$0xff]   ;;  %v3265_v57 = vld [vmem:[%s3994_s3 + $0x60] sm:$0xff]  }
  0x3b   : > { %2855 = vmatprep.mubr.msk.bf16.mxu1 %vm751_vm4, %v3561_v41  ;;  %2868 = vmatpush3.bf16.msra.mxu1 %v3249_v9  ;;  %v716_v9 = vrot.slane %v714_v40, 1  ;;  %v1532_v12 = vrot.slane %v3697_v4, 1  ;;  %v441_v19 = vmul.f32 %v2729_v11, %v440_v14  ;;  %v442_v20 = vmul.f32 %v2730_v16, %v440_v14  ;;  %v3270_v60 = vld [vmem:[%s3994_s3 + $0x100] sm:$0xff]   ;;  %v3274_v11 = vld [vmem:[%s3994_s3 + $0x118] sm:$0xff]  }
  0x3c   : > { %2986 = vmatpush3.bf16.msra.mxu0 %v3254_v7  ;;  %2869 = vmatprep.subr.bf16.mxu1 %v3253_v28  ;;  %v3701_v7 = vsel %vm3456_vm2, %v559_v46, 0 }
  0x3d   : > { %2987 = vmatprep.subr.bf16.mxu0 %v3257_v18  ;;  %v1533_v13 = vrot.slane %v3701_v7, 1  ;;  %v443_v22 = vpack.c.bf16 %v442_v20, %v441_v19  ;;  %v1377_v14 = vshll.u32 %v3701_v7, 16 }
  0x3f   : > { %2972 = vmatmul.mubr.msk.bf16.gmra.mrb[4].mxu0 %vm751_vm4, %v3643_v39  ;;  %2870 = vmatpush3.bf16.msra.mxu1 %v3253_v28  ;;  %v3720_v21 = vsel %vm1026_vm5, %v1532_v12, %v1533_v13  ;;  %v564_v23 = vshrl.u32 %v443_v22, 16  ;;  %v567_v28 = vshll.u32 %v443_v22, 16  ;;  %v1372_v13 = vshll.u32 %v3697_v4, 16 }
  0x40   : > { %2975 = vmatprep.mubr.msk.bf16.mxu0 %vm751_vm4, %v3648_v44  ;;  %2988 = vmatpush3.bf16.msra.mxu0 %v3257_v18  ;;  %v3717_v18 = vsel %vm621_vm3, %v712_v8, %v716_v9  ;;  %v1028_v8 = vrot.slane %v3537_v26, 1  ;;  %v1027_v9 = vrot.slane %v3550_v32, 1  ;;  %v3268_v26 = vld [vmem:[%s3994_s3 + $0x68] sm:$0xff]   ;;  %v1379_v19 = vrot.slane %v1377_v14, 1 }
  0x41   : > { %2989 = vmatprep.subr.bf16.mxu0 %v3259_v37  ;;  %2887 = vmatprep.subr.bf16.mxu1 %v3653_v45  ;;  %v566_v29 = vrot.slane %v564_v23, 7  ;;  %v1374_v15 = vrot.slane %v1372_v13, 1 }
  0x42   : > { %2856 = vmatmul.mubr.msk.bf16.gmra.mrb[8].mxu1 %vm751_vm4, %v3679_v59  ;;  %v1029_v12 = vsel %vm1026_vm5, %v1027_v9, %v1028_v8 }
  0x43   : > { %2859 = vmatprep.mubr.msk.bf16.mxu1 %vm751_vm4, %v3684_v61  ;;  %v569_v33 = vor.u32 %v567_v28, %v566_v29  ;;  %v612_v34 = vsel %vm3456_vm2, %v566_v29, 0 }
  0x44   : > { %2990 = vmatpush3.bf16.msra.mxu0 %v3259_v37  ;;  %v1840_v35 = vshll.u32 %v612_v34, 16  ;;  %v1996_v36 = vrot.slane %v612_v34, 1  ;;  %v3264_v37 = vld [vmem:[%s3994_s3 + $0xe8] sm:$0xff]  }
  0x45   : > { %3007 = vmatprep.subr.bf16.mxu0 %v3670_v51  ;;  %v602_v40 = vsel %vm3456_vm2, 0, %v569_v33 }
  0x46   : > { %v1833_v42 = vshrl.u32 %v602_v40, 16  ;;  %v1835_v43 = vshll.u32 %v602_v40, 16  ;;  %v1995_v46 = vrot.slane %v602_v40, 1 }
  0x47   : > { %2976 = vmatmul.mubr.msk.bf16.gmra.mrb[8].mxu0 %vm751_vm4, %v3688_v62 }
  0x48   : > { %2979 = vmatprep.mubr.msk.bf16.mxu0 %vm751_vm4, %v3693_v48  ;;  %v1837_v17 = vrot.slane %v1835_v43, 1  ;;  %v3754_v47 = vsel %vm1026_vm5, %v1995_v46, %v1996_v36 }
  0x4a   : > { %2860 = vmatmul.mubr.msk.bf16.gmra.mrb[12].mxu1 %vm751_vm4, %v3717_v18  ;;  %v1838_v50 = vor.u32 %v1837_v17, %v1833_v42 }
  0x4b   : > { %2871 = vmatprep.mubr.msk.bf16.mxu1 %vm751_vm4, %v3550_v32  ;;  %v3272_v32 = vld [vmem:[%s3994_s3 + $0x108] sm:$0xff]  }
  0x4f   : > { %2980 = vmatmul.mubr.msk.bf16.gmra.mrb[12].mxu0 %vm751_vm4, %v3720_v21 }
  0x50   : > { %2991 = vmatprep.mubr.msk.bf16.mxu0 %vm751_vm4, %v3486_v31 }
  0x52   : > { %2872 = vmatmul.mubr.msk.bf16.vlgmr.msra.gmra.mrb[0].mxu1 %vm751_vm4, %v3474_v25 }
  0x53   : > { %2888 = vmatpush3.bf16.msra.mxu1 %v3653_v45  ;;  %2875 = vmatprep.mubr.msk.bf16.mxu1 %vm751_vm4, %v3486_v31  ;;  %v1842_v45 = vrot.slane %v1840_v35, 1 }
  0x54   : > { %2889 = vmatprep.subr.bf16.mxu1 %v3260_v30 }
  0x57   : > { %2992 = vmatmul.mubr.msk.bf16.vlgmr.msra.gmra.mrb[0].mxu0 %vm751_vm4, %v3506_v55  ;;  %2890 = vmatpush3.bf16.msra.mxu1 %v3260_v30 }
  0x58   : > { %2995 = vmatprep.mubr.msk.bf16.mxu0 %vm751_vm4, %v3527_v10  ;;  %3008 = vmatpush3.bf16.msra.mxu0 %v3670_v51  ;;  %v3763_v51 = vsel %vm621_vm3, %v1838_v50, %v1842_v45 }
  0x59   : > { %3009 = vmatprep.subr.bf16.mxu0 %v3264_v37  ;;  %2891 = vmatprep.subr.bf16.mxu1 %v3261_v24 }
  0x5a   : > { %2876 = vmatmul.mubr.msk.bf16.gmra.mrb[4].mxu1 %vm751_vm4, %v3506_v55 }
  0x5b   : > { %2879 = vmatprep.mubr.msk.bf16.mxu1 %vm751_vm4, %v3527_v10  ;;  %2892 = vmatpush3.bf16.msra.mxu1 %v3261_v24 }
  0x5c   : > { %3010 = vmatpush3.bf16.msra.mxu0 %v3264_v37  ;;  %2893 = vmatprep.subr.bf16.mxu1 %v3263_v54 }
  0x5d   : > { %3011 = vmatprep.subr.bf16.mxu0 %v3266_v49 }
  0x5f   : > { %2996 = vmatmul.mubr.msk.bf16.gmra.mrb[4].mxu0 %vm751_vm4, %v3578_v52  ;;  %2894 = vmatpush3.bf16.msra.mxu1 %v3263_v54 }
  0x60   : > { %2999 = vmatprep.mubr.msk.bf16.mxu0 %vm751_vm4, %v3608_v53  ;;  %3012 = vmatpush3.bf16.msra.mxu0 %v3266_v49 }
  0x61   : > { %3013 = vmatprep.subr.bf16.mxu0 %v3267_v56  ;;  %2911 = vmatprep.subr.bf16.mxu1 %v3265_v57 }
  0x62   : > { %2880 = vmatmul.mubr.msk.bf16.gmra.mrb[8].mxu1 %vm751_vm4, %v3578_v52 }
  0x63   : > { %2883 = vmatprep.mubr.msk.bf16.mxu1 %vm751_vm4, %v3608_v53 }
  0x64   : > { %3014 = vmatpush3.bf16.msra.mxu0 %v3267_v56 }
  0x65   : > { %3031 = vmatprep.subr.bf16.mxu0 %v3270_v60 }
  0x67   : > { %3000 = vmatmul.mubr.msk.bf16.gmra.mrb[8].mxu0 %vm751_vm4, %v3635_v2 }
  0x68   : > { %3003 = vmatprep.mubr.msk.bf16.mxu0 %vm751_vm4, %v3697_v4 }
  0x6a   : > { %2884 = vmatmul.mubr.msk.bf16.gmra.mrb[12].mxu1 %vm751_vm4, %v3635_v2 }
  0x6b   : > { %2895 = vmatprep.mubr.msk.bf16.mxu1 %vm751_vm4, %v1029_v12 }
  0x6f   : > { %3004 = vmatmul.mubr.msk.bf16.gmra.mrb[12].mxu0 %vm751_vm4, %v602_v40 }
  0x70   : > { %3015 = vmatprep.mubr.msk.bf16.mxu0 %vm751_vm4, %v3512_v58  ;;  %v3269_v58 = vld [vmem:[%s3994_s3 + $0x70] sm:$0xff]  }
  0x72   : > { %2896 = vmatmul.mubr.msk.bf16.vlgmr.msra.gmra.mrb[0].mxu1 %vm751_vm4, %v3557_v38  ;;  %v3273_v38 = vld [vmem:[%s3994_s3 + $0x110] sm:$0xff]  }
  0x73   : > { %2912 = vmatpush3.bf16.msra.mxu1 %v3265_v57  ;;  %2899 = vmatprep.mubr.msk.bf16.mxu1 %vm751_vm4, %v3588_v63 }
  0x74   : > { %2913 = vmatprep.subr.bf16.mxu1 %v3268_v26 }
  0x77   : > { %3016 = vmatmul.mubr.msk.bf16.vlgmr.msra.gmra.mrb[0].mxu0 %vm751_vm4, %v3540_v27  ;;  %2914 = vmatpush3.bf16.msra.mxu1 %v3268_v26  ;;  %v3271_v27 = vld [vmem:[%s3994_s3 + $0x78] sm:$0xff]  }
  0x78   : > { %3019 = vmatprep.mubr.msk.bf16.mxu0 %vm751_vm4, %v3561_v41  ;;  %3032 = vmatpush3.bf16.msra.mxu0 %v3270_v60  ;;  %v1370_v41 = vshrl.u32 %v3697_v4, 16 }
  0x79   : > { %3033 = vmatprep.subr.bf16.mxu0 %v3272_v32  ;;  %2915 = vmatprep.subr.bf16.mxu1 %v3269_v58 }
  0x7a   : > { %2900 = vmatmul.mubr.msk.bf16.gmra.mrb[4].mxu1 %vm751_vm4, %v3594_v5  ;;  %v1375_v16 = vor.u32 %v1374_v15, %v1370_v41 }
  0x7b   : > { %2903 = vmatprep.mubr.msk.bf16.mxu1 %vm751_vm4, %v3643_v39  ;;  %2916 = vmatpush3.bf16.msra.mxu1 %v3269_v58 }
  0x7c   : > { %3034 = vmatpush3.bf16.msra.mxu0 %v3272_v32  ;;  %2917 = vmatprep.subr.bf16.mxu1 %v3271_v27  ;;  %v1380_v7 = vsel %vm621_vm3, %v1375_v16, %v1379_v19 }
  0x7d   : > { %3035 = vmatprep.subr.bf16.mxu0 %v3273_v38 }
  0x7f   : > { %3020 = vmatmul.mubr.msk.bf16.gmra.mrb[4].mxu0 %vm751_vm4, %v3679_v59  ;;  %2918 = vmatpush3.bf16.msra.mxu1 %v3271_v27 }
  0x80   : > { %3023 = vmatprep.mubr.msk.bf16.mxu0 %vm751_vm4, %v3684_v61  ;;  %3036 = vmatpush3.bf16.msra.mxu0 %v3273_v38 }
  0x81   : > { %3037 = vmatprep.subr.bf16.mxu0 %v3274_v11  ;;  %3055 = vmatprep.subr.bf16.mxu1 %v3385_v0 }
  0x82   : > { %2904 = vmatmul.mubr.msk.bf16.gmra.mrb[8].mxu1 %vm751_vm4, %v3648_v44 }
  0x83   : > { %2907 = vmatprep.mubr.msk.bf16.mxu1 %vm751_vm4, %v3688_v62 }
  0x84   : > { %3038 = vmatpush3.bf16.msra.mxu0 %v3274_v11 }
  0x87   : > { %3024 = vmatmul.mubr.msk.bf16.gmra.mrb[8].mxu0 %vm751_vm4, %v3717_v18 }
  0x88   : > { %3027 = vmatprep.mubr.msk.bf16.mxu0 %vm751_vm4, %v1380_v7 }
  0x8a   : > { %2908 = vmatmul.mubr.msk.bf16.gmra.mrb[12].mxu1 %vm751_vm4, %v3693_v48 }
  0x8b   : > { %2919 = vmatprep.mubr.msk.bf16.mxu1 %vm751_vm4, %v3474_v25  ;;  %v3898_v25 = vld [vmem:[%s3995_s4] ss:$0 sm:$0xff] }
  0x8f   : > { %3028 = vmatmul.mubr.msk.bf16.gmra.mrb[12].mxu0 %vm751_vm4, %v3763_v51 }
  0x90   : > { %3039 = vmatprep.mubr.msk.bf16.mxu0 %vm751_vm4, %v3588_v63 }
  0x92   : > { %2920 = vmatmul.mubr.msk.bf16.vlgmr.msra.gmra.mrb[0].mxu1 %vm751_vm4, %v3486_v31 }
  0x93   : > { %3059 = vmatpush3.bf16.msra.mxu1 %v3385_v0  ;;  %2923 = vmatprep.mubr.msk.bf16.mxu1 %vm751_vm4, %v3506_v55 }
  0x94   : > { %3056 = vmatprep.subr.bf16.mxu1 %v3393_v1 }
  0x97   : > { %3040 = vmatmul.mubr.msk.bf16.vlgmr.msra.gmra.mrb[0].mxu0 %vm751_vm4, %v3594_v5  ;;  %3060 = vmatpush3.bf16.msra.mxu1 %v3393_v1 }
  0x98   : > { %3043 = vmatprep.mubr.msk.bf16.mxu0 %vm751_vm4, %v3643_v39  ;;  %3057 = vmatprep.subr.bf16.mxu1 %v3404_v3 }
  0x9a   : > { %2924 = vmatmul.mubr.msk.bf16.gmra.mrb[4].mxu1 %vm751_vm4, %v3527_v10 }
  0x9b   : > { %2927 = vmatprep.mubr.msk.bf16.mxu1 %vm751_vm4, %v3578_v52  ;;  %3061 = vmatpush3.bf16.msra.mxu1 %v3404_v3  ;;  %v3903_v52 = vld [vmem:[%s3996_s5] ss:$0 sm:$0xff] }
  0x9c   : > { %3058 = vmatprep.subr.bf16.mxu1 %v3420_v6 }
  0x9f   : > { %3044 = vmatmul.mubr.msk.bf16.gmra.mrb[4].mxu0 %vm751_vm4, %v3648_v44  ;;  %3062 = vmatpush3.bf16.msra.mxu1 %v3420_v6 }
  0xa0   : > { %3047 = vmatprep.mubr.msk.bf16.mxu0 %vm751_vm4, %v3688_v62 }
  0xa2   : > { %2928 = vmatmul.mubr.msk.bf16.gmra.mrb[8].mxu1 %vm751_vm4, %v3608_v53 }
  0xa3   : > { %2931 = vmatprep.mubr.msk.bf16.mxu1 %vm751_vm4, %v3635_v2 }
  0xa7   : > { %3048 = vmatmul.mubr.msk.bf16.gmra.mrb[8].mxu0 %vm751_vm4, %v3693_v48 }
  0xa8   : > { %3051 = vmatprep.mubr.msk.bf16.mxu0 %vm751_vm4, %v3720_v21 }
  0xaa   : > { %2932 = vmatmul.mubr.msk.bf16.gmra.mrb[12].mxu1 %vm751_vm4, %v3697_v4 }
  0xab   : > { %2951 = vmatprep.mubr.msk.bf16.mxu1 %vm751_vm4, %v3679_v59 }
  0xaf   : > { %3052 = vmatmul.mubr.msk.bf16.gmra.mrb[12].mxu0 %vm751_vm4, %v3754_v47 }
  0xb2   : > { %2952 = vmatmul.mubr.msk.bf16.vlgmr.msra.gmra.mrb[8].mxu1 %vm751_vm4, %v3684_v61 }
  0xb3   : > { %2955 = vmatprep.mubr.msk.bf16.mxu1 %vm751_vm4, %v3717_v18 }
  0xba   : > { %2956 = vmatmul.mubr.msk.bf16.gmra.mrb[12].mxu1 %vm751_vm4, %v1380_v7 }
 0x165   : > { %v2921_v0 = vpop.f32.mrb[0].mxu1 }
 0x166   : > { %v1291_v1 = vpop.f32.mrb[1].mxu1 }
 0x167   : > { %v2922_v3 = vpop.f32.mrb[2].mxu1 }
 0x168   : > { %v1294_v31 = vpop.f32.mrb[3].mxu1 }
 0x16a   : > { %v3041_v6 = vpop.f32.mrb[0].mxu0 }
 0x16b   : > { %v3063_v55 = vadd.f32 %v3041_v6, %v2921_v0  ;;  %v2068_v10 = vpop.f32.mrb[1].mxu0 }
 0x16c   : > { %v3064_v63 = vadd.f32 %v2068_v10, %v1291_v1  ;;  %v3042_v5 = vpop.f32.mrb[2].mxu0 }
 0x16d   : > { %v2156_v53 = vmul.f32 %v3063_v55, %v3898_v25  ;;  %v3065_v2 = vadd.f32 %v3042_v5, %v2922_v3  ;;  %v2071_v39 = vpop.f32.mrb[3].mxu0  ;;  %v2925_v48 = vpop.f32.mrb[4].mxu1 }
 0x16e   : > { %v2154_v44 = vmul.f32 %v3064_v63, %v3898_v25  ;;  %v3066_v59 = vadd.f32 %v2071_v39, %v1294_v31  ;;  %v1307_v20 = vpop.f32.mrb[5].mxu1 }
 0x16f   : > { %v2179_v61 = vadd.f32 %v3903_v52, %v2156_v53  ;;  %v2157_v62 = vmul.f32 %v3065_v2, %v3898_v25  ;;  %v2926_v23 = vpop.f32.mrb[6].mxu1 }
 0x170   : > { %v2177_v4 = vadd.f32 %v3903_v52, %v2154_v44  ;;  %v2155_v18 = vmul.f32 %v3066_v59, %v3898_v25  ;;  %v1310_v34 = vpop.f32.mrb[7].mxu1 }
 0x171   : > { %vm2195_vm6 = vcmp.ge.f32.partialorder %v2179_v61, 0.0  ;;  %v2211_v21 = vmul.f32 0.1, %v2179_v61  ;;  %v2180_v22 = vadd.f32 %v3903_v52, %v2157_v62 }
 0x172   : > { %vm2193_vm8 = vcmp.ge.f32.partialorder %v2177_v4, 0.0  ;;  %v2209_v28 = vmul.f32 0.1, %v2177_v4  ;;  %v2178_v29 = vadd.f32 %v3903_v52, %v2155_v18  ;;  %v3045_v30 = vpop.f32.mrb[4].mxu0 }
 0x173   : > { %v2227_v33 = vsel %vm2195_vm6, %v2179_v61, %v2211_v21  ;;  %vm2196_vm9 = vcmp.ge.f32.partialorder %v2180_v22, 0.0  ;;  %v2212_v35 = vmul.f32 0.1, %v2180_v22  ;;  %v3067_v36 = vadd.f32 %v3045_v30, %v2925_v48  ;;  %v2084_v37 = vpop.f32.mrb[5].mxu0 }
 0x174   : > { %v2709_v40 = vpack.c.bf16 %v2227_v33, %v2227_v33  ;;  %v2225_v42 = vsel %vm2193_vm8, %v2177_v4, %v2209_v28  ;;  %vm2194_vm10 = vcmp.ge.f32.partialorder %v2178_v29, 0.0  ;;  %v2210_v43 = vmul.f32 0.1, %v2178_v29  ;;  %v3046_v46 = vpop.f32.mrb[6].mxu0 }
 0x175   : > { %v2707_v24 = vpack.c.bf16 %v2225_v42, %v2225_v42  ;;  %v2228_v17 = vsel %vm2196_vm9, %v2180_v22, %v2212_v35  ;;  %v2160_v45 = vmul.f32 %v3067_v36, %v3898_v25  ;;  %v3068_v47 = vadd.f32 %v2084_v37, %v1307_v20  ;;  %v2087_v49 = vpop.f32.mrb[7].mxu0 }
 0x176   : > { %2308 = vst.msk [vmem:[%s3918_s16 + $0x8] sm:$0xf] %vm2305_vm7, %v2709_v40  ;;  %v2710_v50 = vpack.c.bf16 %v2228_v17, %v2228_v17  ;;  %v2226_v54 = vsel %vm2194_vm10, %v2178_v29, %v2210_v43  ;;  %v3069_v51 = vadd.f32 %v3046_v46, %v2926_v23  ;;  %v3070_v56 = vadd.f32 %v2087_v49, %v1310_v34 }
 0x177   : > { %2306 = vst.msk [vmem:[%s3918_s16] sm:$0xf] %vm2305_vm7, %v2707_v24  ;;  %v2708_v57 = vpack.c.bf16 %v2226_v54, %v2226_v54  ;;  %v2183_v60 = vadd.f32 %v3903_v52, %v2160_v45  ;;  %v2158_v8 = vmul.f32 %v3068_v47, %v3898_v25 }
 0x178   : > { %2309 = vst.msk [vmem:[%s3918_s16 + $0xc] sm:$0xf] %vm2305_vm7, %v2710_v50  ;;  %v2161_v9 = vmul.f32 %v3069_v51, %v3898_v25  ;;  %v2159_v12 = vmul.f32 %v3070_v56, %v3898_v25 }
 0x179   : > { %2307 = vst.msk [vmem:[%s3918_s16 + $0x4] sm:$0xf] %vm2305_vm7, %v2708_v57  ;;  %vm2199_vm11 = vcmp.ge.f32.partialorder %v2183_v60, 0.0  ;;  %v2215_v26 = vmul.f32 0.1, %v2183_v60  ;;  %v2181_v32 = vadd.f32 %v3903_v52, %v2158_v8 }
 0x17a   : > { %v2184_v58 = vadd.f32 %v3903_v52, %v2161_v9  ;;  %v2182_v38 = vadd.f32 %v3903_v52, %v2159_v12  ;;  %v3049_v13 = vpop.f32.mrb[8].mxu0 }
 0x17b   : > { %v2231_v27 = vsel %vm2199_vm11, %v2183_v60, %v2215_v26  ;;  %vm2197_vm12 = vcmp.ge.f32.partialorder %v2181_v32, 0.0  ;;  %v2213_v41 = vmul.f32 0.1, %v2181_v32  ;;  %v2100_v15 = vpop.f32.mrb[9].mxu0 }
 0x17c   : > { %v2713_v14 = vpack.c.bf16 %v2231_v27, %v2231_v27  ;;  %vm2200_vm13 = vcmp.ge.f32.partialorder %v2184_v58, 0.0  ;;  %v2216_v11 = vmul.f32 0.1, %v2184_v58  ;;  %vm2198_vm14 = vcmp.ge.f32.partialorder %v2182_v38, 0.0  ;;  %v3050_v16 = vpop.f32.mrb[10].mxu0 }
 0x17d   : > { %v2229_v19 = vsel %vm2197_vm12, %v2181_v32, %v2213_v41  ;;  %v2214_v7 = vmul.f32 0.1, %v2182_v38  ;;  %v2103_v0 = vpop.f32.mrb[11].mxu0 }
 0x17e   : > { %2312 = vst.msk [vmem:[%s3918_s16 + $0x18] sm:$0xf] %vm2305_vm7, %v2713_v14  ;;  %v2711_v1 = vpack.c.bf16 %v2229_v19, %v2229_v19  ;;  %v2232_v3 = vsel %vm2200_vm13, %v2184_v58, %v2216_v11 }
 0x17f   : > { %v2714_v6 = vpack.c.bf16 %v2232_v3, %v2232_v3  ;;  %v2230_v31 = vsel %vm2198_vm14, %v2182_v38, %v2214_v7 }
 0x180   : > { %2310 = vst.msk [vmem:[%s3918_s16 + $0x10] sm:$0xf] %vm2305_vm7, %v2711_v1  ;;  %v2712_v55 = vpack.c.bf16 %v2230_v31, %v2230_v31 }
 0x181   : > { %2313 = vst.msk [vmem:[%s3918_s16 + $0x1c] sm:$0xf] %vm2305_vm7, %v2714_v6 }
 0x182   : > { %2311 = vst.msk [vmem:[%s3918_s16 + $0x14] sm:$0xf] %vm2305_vm7, %v2712_v55  ;;  %v3053_v10 = vpop.f32.mrb[12].mxu0 }
 0x183   : > { %v2116_v63 = vpop.f32.mrb[13].mxu0 }
 0x184   : > { %v3054_v5 = vpop.f32.mrb[14].mxu0 }
 0x185   : > { %v2119_v53 = vpop.f32.mrb[15].mxu0  ;;  %v2953_v2 = vpop.f32.mrb[8].mxu1 }
 0x186   : > { %v3071_v39 = vadd.f32 %v3049_v13, %v2953_v2  ;;  %v1483_v44 = vpop.f32.mrb[9].mxu1 }
 0x187   : > { %v3072_v59 = vadd.f32 %v2100_v15, %v1483_v44  ;;  %v2954_v61 = vpop.f32.mrb[10].mxu1 }
 0x188   : > { %v2164_v62 = vmul.f32 %v3071_v39, %v3898_v25  ;;  %v3073_v48 = vadd.f32 %v3050_v16, %v2954_v61  ;;  %v1486_v4 = vpop.f32.mrb[11].mxu1 }
 0x189   : > { %v2162_v18 = vmul.f32 %v3072_v59, %v3898_v25  ;;  %v3074_v20 = vadd.f32 %v2103_v0, %v1486_v4 }
 0x18a   : > { %v2187_v21 = vadd.f32 %v3903_v52, %v2164_v62  ;;  %v2165_v22 = vmul.f32 %v3073_v48, %v3898_v25 }
 0x18b   : > { %v2185_v23 = vadd.f32 %v3903_v52, %v2162_v18  ;;  %v2163_v28 = vmul.f32 %v3074_v20, %v3898_v25 }
 0x18c   : > { %vm2203_vm15 = vcmp.ge.f32.partialorder %v2187_v21, 0.0  ;;  %v2219_v29 = vmul.f32 0.1, %v2187_v21  ;;  %v2188_v30 = vadd.f32 %v3903_v52, %v2165_v22 }
 0x18d   : > { %vm2201_vm0 = vcmp.ge.f32.partialorder %v2185_v23, 0.0  ;;  %v2217_v33 = vmul.f32 0.1, %v2185_v23  ;;  %v2186_v34 = vadd.f32 %v3903_v52, %v2163_v28  ;;  %v2957_v35 = vpop.f32.mrb[12].mxu1 }
 0x18e   : > { %v2235_v36 = vsel %vm2203_vm15, %v2187_v21, %v2219_v29  ;;  %vm2204_vm1 = vcmp.ge.f32.partialorder %v2188_v30, 0.0  ;;  %v2220_v37 = vmul.f32 0.1, %v2188_v30  ;;  %v3075_v40 = vadd.f32 %v3053_v10, %v2957_v35  ;;  %v1499_v42 = vpop.f32.mrb[13].mxu1 }
 0x18f   : > { %v2717_v43 = vpack.c.bf16 %v2235_v36, %v2235_v36  ;;  %v2233_v46 = vsel %vm2201_vm0, %v2185_v23, %v2217_v33  ;;  %vm2202_vm2 = vcmp.ge.f32.partialorder %v2186_v34, 0.0  ;;  %v2218_v24 = vmul.f32 0.1, %v2186_v34  ;;  %v2958_v17 = vpop.f32.mrb[14].mxu1 }
 0x190   : > { %v2715_v45 = vpack.c.bf16 %v2233_v46, %v2233_v46  ;;  %v2236_v47 = vsel %vm2204_vm1, %v2188_v30, %v2220_v37  ;;  %v2168_v49 = vmul.f32 %v3075_v40, %v3898_v25  ;;  %v3076_v50 = vadd.f32 %v2116_v63, %v1499_v42  ;;  %v1502_v54 = vpop.f32.mrb[15].mxu1 }
 0x191   : > { %2316 = vst.msk [vmem:[%s3918_s16 + $0x28] sm:$0xf] %vm2305_vm7, %v2717_v43  ;;  %v2718_v51 = vpack.c.bf16 %v2236_v47, %v2236_v47  ;;  %v2234_v56 = vsel %vm2202_vm2, %v2186_v34, %v2218_v24  ;;  %v3077_v57 = vadd.f32 %v3054_v5, %v2958_v17  ;;  %v3078_v60 = vadd.f32 %v2119_v53, %v1502_v54 }
 0x192   : > { %2314 = vst.msk [vmem:[%s3918_s16 + $0x20] sm:$0xf] %vm2305_vm7, %v2715_v45  ;;  %v2716_v8 = vpack.c.bf16 %v2234_v56, %v2234_v56  ;;  %v2191_v9 = vadd.f32 %v3903_v52, %v2168_v49  ;;  %v2166_v12 = vmul.f32 %v3076_v50, %v3898_v25 }
 0x193   : > { %2317 = vst.msk [vmem:[%s3918_s16 + $0x2c] sm:$0xf] %vm2305_vm7, %v2718_v51  ;;  %v2169_v26 = vmul.f32 %v3077_v57, %v3898_v25  ;;  %v2167_v32 = vmul.f32 %v3078_v60, %v3898_v25 }
 0x194   : > { %2315 = vst.msk [vmem:[%s3918_s16 + $0x24] sm:$0xf] %vm2305_vm7, %v2716_v8  ;;  %vm2207_vm3 = vcmp.ge.f32.partialorder %v2191_v9, 0.0  ;;  %v2223_v58 = vmul.f32 0.1, %v2191_v9  ;;  %v2189_v38 = vadd.f32 %v3903_v52, %v2166_v12 }
 0x195   : > { %v2192_v13 = vadd.f32 %v3903_v52, %v2169_v26  ;;  %v2190_v27 = vadd.f32 %v3903_v52, %v2167_v32 }
 0x196   : > { %v2239_v41 = vsel %vm2207_vm3, %v2191_v9, %v2223_v58  ;;  %vm2205_vm4 = vcmp.ge.f32.partialorder %v2189_v38, 0.0  ;;  %v2221_v15 = vmul.f32 0.1, %v2189_v38 }
 0x197   : > { %v2721_v14 = vpack.c.bf16 %v2239_v41, %v2239_v41  ;;  %vm2208_vm5 = vcmp.ge.f32.partialorder %v2192_v13, 0.0  ;;  %v2224_v25 = vmul.f32 0.1, %v2192_v13  ;;  %vm2206_vm6 = vcmp.ge.f32.partialorder %v2190_v27, 0.0 }
 0x198   : > { %v2237_v11 = vsel %vm2205_vm4, %v2189_v38, %v2221_v15  ;;  %v2222_v16 = vmul.f32 0.1, %v2190_v27 }
 0x199   : > { %2320 = vst.msk [vmem:[%s3918_s16 + $0x38] sm:$0xf] %vm2305_vm7, %v2721_v14  ;;  %v2719_v19 = vpack.c.bf16 %v2237_v11, %v2237_v11  ;;  %v2240_v7 = vsel %vm2208_vm5, %v2192_v13, %v2224_v25 }
 0x19a   : > { %v2722_v0 = vpack.c.bf16 %v2240_v7, %v2240_v7  ;;  %v2238_v1 = vsel %vm2206_vm6, %v2190_v27, %v2222_v16 }
 0x19b   : > { %2318 = vst.msk [vmem:[%s3918_s16 + $0x30] sm:$0xf] %vm2305_vm7, %v2719_v19  ;;  %v2720_v52 = vpack.c.bf16 %v2238_v1, %v2238_v1 }
 0x19c   : > { %2321 = vst.msk [vmem:[%s3918_s16 + $0x3c] sm:$0xf] %vm2305_vm7, %v2722_v0 }
 0x19d   : > { %2319 = vst.msk [vmem:[%s3918_s16 + $0x34] sm:$0xf] %vm2305_vm7, %v2720_v52 }
 0x19e PF: > { %s16_s25 = sadd.s32 1, %s3313_s25   ;;  %s4001_s21 = smov %s3305_s23 }
 0x19f   : > { %p13_p12 = scmp.ge.s32.totalorder %s16_s25, 6   ;;  %s4002_s22 = smov %s3309_s24 }
 0x1a0   : > { %s4003_s23 = smov %s4006_s26  ;;  %s4004_s24 = smov %s4010_s27 }
 0x1a1   :  { %15 = sbr.rel (!%p13_p12) target bundleno = 3 (0x3), region = 88 }

// kernel: matchnet2_forward.13
= control target key start
LH: loop header
LB: loop body
LE: loop exit
PB: predicated region body
PF: predicated region fallthrough
CT: control target
= control target key end

     0   :  { %s4054_s0 = inlined_call_operand.vmem [shape: bf16[2,16,16,32], index: 0, kind: input, shape index: {}, may-alias: {0,1,2}]   ;;  %s4055_s1 = inlined_call_operand.vmem [shape: bf16[2,16,16,32], index: 1, kind: input, shape index: {}, may-alias: {0,1,2}]   ;;  %s4056_s2 = inlined_call_operand.vmem [shape: bf16[2,16,16,32], index: 2, kind: input, shape index: {}, may-alias: {0,1,2}]   ;;  %s4057_s3 = inlined_call_operand.vmem [shape: f32[9,32], index: 3, kind: input, shape index: {}]   ;;  %s4058_s4 = inlined_call_operand.<no memory space> [shape: f32[1,1], index: 4, kind: input, shape index: {}]   ;;  %s4059_s5 = inlined_call_operand.hbm [shape: f32[2,16,16], index: 5, kind: output, shape index: {}]  }
   0x1   :  { %v10_v0 = vstv %s4058_s4 }
   0x2   :  { %11 = vst [vmem:[#allocation2] sm:$0x1] %v10_v0 }
   0x3   :  { %12 = vsyncpa [#allocation4], 0 }
   0x4   :  { %14 = vsyncpa [#allocation4 + $0x1], 0  ;;  %s2610_s20 = smov 0   ;;  %s2612_s21 = smov 0  }
   0x5   :  { %s2614_s22 = smov 0   ;;  %s2616_s23 = smov 0  }
   0x6   :  { %s2618_s24 = smov 0   ;;  %s2620_s25 = smov 0  }
   0x7   :  { %s2622_s26 = smov 0   ;;  %s2624_s27 = smov 0  }
   0x8 LB: > { %s2302_s4 = sadd.s32 4294967295, %s2573_s27   ;;  %s2303_s28 = sadd.s32 4294967294, %s2573_s27   ;;  %s2573_s27 = sphi %s2624_s27, %s20_s27   ;;  %s2569_s26 = sphi %s2622_s26, %s4070_s26   ;;  %s2565_s25 = sphi %s2620_s25, %s4069_s25   ;;  %s2561_s24 = sphi %s2618_s24, %s4068_s24   ;;  %s2557_s23 = sphi %s2616_s23, %s4067_s23   ;;  %s2553_s22 = sphi %s2614_s22, %s4066_s22   ;;  %s2549_s21 = sphi %s2612_s21, %s4065_s21   ;;  %s2545_s20 = sphi %s2610_s20, %s4064_s20  }
   0x9   : > { %s29_s29 = sadd.s32 1, %s2565_s25  ;;  %s32_s30 = sadd.s32 1, %s2569_s26 }
   0xa   : > { %p30_p0 = scmp.ge.s32.totalorder %s29_s29, 2  ;;  %p193_p1 = scmp.ne.s32.totalorder %s2553_s22, %s2549_s21 }
   0xb   : > { %p194_p2 = scmp.eq.s32.totalorder %s2302_s4, 3  ;;  %p199_p5 = scmp.ne.s32.totalorder %s2549_s21, %s2545_s20 }
   0xc   : > { %s4072_s29 = smov (%p30_p0, %s29_s29), 0  ;;  %s4074_s30 = smov (!%p30_p0, %s32_s30), %s2569_s26 }
   0xd   : > { %s179_s6 = ssub.s32 %s2565_s25, %s4072_s29  ;;  %p2661_p3 = por %p194_p2, %p193_p1 }
   0xe   : > { %p34_p4 = scmp.ge.s32.totalorder %s4074_s30, 2  ;;  %p200_p6 = scmp.eq.s32.totalorder %s2303_s28, 3 }
   0xf   : > { %p2312_p7 = scmp.ge.s32.totalorder %s2573_s27, 1  ;;  %p278_p9 = scmp.lt.s32.totalorder %s2573_s27, 5 }
  0x10   : > { %s4076_s30 = smov (%p34_p4, %s4074_s30), 0  ;;  %p2670_p8 = por %p200_p6, %p199_p5 }
  0x11   : > { %s178_s9 = ssub.s32 %s2569_s26, %s4076_s30  ;;  %s183_s10 = sadd.s32 1, %s2553_s22 }
  0x12   : > { %s180_s11 = sor.u32 %s179_s6, %s178_s9  ;;  %p279_p10 = pnand %p2312_p7, %p278_p9 }
  0x13   : > { %p181_p11 = scmp.eq.s32.totalorder %s180_s11, 0  ;;  %s2682_s13 = sshll.u32 (!%p279_p10), %s2557_s23, 3  ;;  %vm455_vm0 = vcmask (!%p279_p10), 1040384   ;;  %v2706_v10 = vld [vmem:[%s4057_s3] ss:$0 sm:$0xff] (!%p279_p10)  ;;  %vm557_vm1 = vcmask (!%p279_p10), 261120  }
  0x14   : > { %282 = sbr.rel (%p279_p10) target bundleno = 765 (0x2fd), region = 40  ;;  %p341_p12 = scmp.lt.s32.totalorder (!%p279_p10), %s2561_s24, 1  ;;  %vm651_vm2 = vcmask (!%p279_p10), 261121   ;;  %vm658_vm3 = vcmask (!%p279_p10), 253952   ;;  %vm851_vm4 = vcmask (!%p279_p10), 261122   ;;  %vm858_vm5 = vcmask (!%p279_p10), 254976  }
  0x15   : > { %s2679_s12 = scalar_select %p181_p11, %s2553_s22, %s183_s10  }
  0x16   : > { %p357_p13 = scmp.lt.s32.totalorder (!%p279_p10), %s2682_s13, 15  ;;  %s2315_s14 = sadd.s32 (!%p279_p10), 4294967295, %s2682_s13  ;;  %vm749_vm6 = vcmask (!%p279_p10), 1046528   ;;  %vm949_vm7 = vcmask (!%p279_p10), 1045504   ;;  %vm2081_vm8 = vcmask (!%p279_p10), 130112   ;;  %vm2146_vm9 = vcmask (!%p279_p10), 1041409  }
  0x17   : > { %p339_p0 = scmp.gt.s32.totalorder (!%p279_p10), %s2315_s14, 0  ;;  %p2316_p1 = scmp.lt.s32.totalorder (!%p279_p10), %s2315_s14, 15  ;;  %vm2148_vm10 = vcmask (!%p279_p10), 1042434   ;;  %vm2150_vm11 = vcmask (!%p279_p10), 1043459   ;;  %vm2152_vm12 = vcmask (!%p279_p10), 1044484   ;;  %vm2154_vm13 = vcmask (!%p279_p10), 1045509  }
  0x18   : > { %p382_p2 = scmp.lt.s32.totalorder (!%p279_p10), %s2557_s23, 1  ;;  %vm2156_vm14 = vcmask (!%p279_p10), 1046534   ;;  %vm2158_vm15 = vcmask (!%p279_p10), 1047559  }
  0x1b   : > { %s342_s15 = scalar_select %p341_p12, %s2561_s24, 1 }
  0x1c   : > { %s358_s16 = scalar_select %p357_p13, %s2682_s13, 15 }
  0x1d   : > { %s2689_s17 = sshll.u32 %s342_s15, 5 }
  0x1e   : > { %s2325_s18 = sshll.u32 %s358_s16, 1 }
  0x1f   : > { %s361_s19 = sadd.s32 %s2325_s18, %s2689_s17 }
  0x20   : > { %s2327_s4 = sshll.u32 %s361_s19, 2 }
  0x21   : > { %s2695_s9 = scalar_lea.vmem %s4055_s1, %s2327_s4 }
  0x22   : > { %v2398_v1 = vld [vmem:[%s2695_s9 + $0x8] sm:$0xff]   ;;  %v2367_v2 = vld [vmem:[%s2695_s9] sm:$0xff]   ;;  %v2399_v3 = vld [vmem:[%s2695_s9 + $0x10] sm:$0xff]   ;;  %s340_s10 = scalar_select %p339_p0, %s2315_s14, 0 }
  0x23   : > { %v2372_v4 = vunpack.c.l.bf16 %v2398_v1  ;;  %v2373_v5 = vunpack.c.h.bf16 %v2398_v1  ;;  %v2368_v6 = vunpack.c.l.bf16 %v2367_v2  ;;  %v2369_v7 = vunpack.c.h.bf16 %v2367_v2  ;;  %v2400_v8 = vld [vmem:[%s2695_s9 + $0x18] sm:$0xff]   ;;  %v2401_v9 = vld [vmem:[%s2695_s9 + $0x20] sm:$0xff]   ;;  %s2716_s16 = scalar_select %p382_p2, %s2557_s23, 1  ;;  %v2402_v48 = vld [vmem:[%s2695_s9 + $0x28] sm:$0xff]  }
  0x24   : > { %v2376_v11 = vunpack.c.l.bf16 %v2399_v3  ;;  %v2377_v12 = vunpack.c.h.bf16 %v2399_v3  ;;  %v2380_v13 = vunpack.c.l.bf16 %v2400_v8  ;;  %s4078_s10 = smov (!%p2316_p1, %s340_s10), 15  ;;  %v2381_v19 = vunpack.c.h.bf16 %v2400_v8  ;;  %v2403_v62 = vld [vmem:[%s2695_s9 + $0x30] sm:$0xff]  }
  0x25   : > { %v462_v14 = vrot.slane %v2372_v4, 7  ;;  %v2709_v15 = vrot.slane %v2373_v5, 7  ;;  %v459_v16 = vrot.slane %v2368_v6, 7  ;;  %v2711_v17 = vrot.slane %v2369_v7, 7  ;;  %s2321_s18 = sshll.u32 %s4078_s10, 1  ;;  %s384_s10 = scvt.s32.f32 %s2716_s16 }
  0x26   : > { %v465_v18 = vrot.slane %v2376_v11, 7  ;;  %v468_v20 = vrot.slane %v2380_v13, 7  ;;  %v2384_v21 = vunpack.c.l.bf16 %v2401_v9  ;;  %s347_s14 = sadd.s32 %s2689_s17, %s2321_s18  ;;  %v2385_v39 = vunpack.c.h.bf16 %v2401_v9  ;;  %s385_s18 = ssub.s32 1, %s2557_s23 }
  0x27   : > { %v2719_v22 = vsel %vm455_vm0, 0.0, %v462_v14  ;;  %v2722_v23 = vsel %vm455_vm0, 0.0, %v459_v16  ;;  %v2726_v24 = vsel %vm455_vm0, %v459_v16, %v2711_v17  ;;  %v2730_v25 = vsel %vm455_vm0, %v462_v14, %v2709_v15  ;;  %s2323_s19 = sshll.u32 %s347_s14, 2  ;;  %p3375_p5 = scmp.lt.s32.totalorder %s385_s18, 1 }
  0x28   : > { %v545_v26 = vmul.f32 %v2706_v10, %v2719_v22  ;;  %v543_v27 = vmul.f32 %v2706_v10, %v2722_v23  ;;  %v2738_v28 = vsel %vm455_vm0, 0.0, %v465_v18  ;;  %v544_v29 = vmul.f32 %v2706_v10, %v2726_v24  ;;  %s349_s6 = scalar_lea.vmem %s4054_s0, %s2323_s19 }
  0x29   : > { %v547_v30 = vmul.f32 %v2706_v10, %v2738_v28  ;;  %v2745_v31 = vsel %vm455_vm0, 0.0, %v468_v20  ;;  %v471_v32 = vrot.slane %v2384_v21, 7  ;;  %v546_v35 = vmul.f32 %v2706_v10, %v2730_v25  ;;  %v2359_v36 = vld [vmem:[%s349_s6] sm:$0xff]   ;;  %s4084_s18 = smov (!%p3375_p5, %s385_s18), 1 }
  0x2a   : > { %v570_v33 = vsel %vm557_vm1, %v545_v26, 0.0  ;;  %v564_v34 = vsel %vm557_vm1, %v543_v27, 0.0  ;;  %v567_v37 = vsel %vm557_vm1, %v544_v29, 0.0  ;;  %v549_v38 = vmul.f32 %v2706_v10, %v2745_v31  ;;  %s388_s6 = scvt.s32.f32 %s4084_s18 }
  0x2b   : > { %571 = vadd.xlane.f32.xlu0 %v570_v33  ;;  %565 = vadd.xlane.f32.xlu1 %v564_v34  ;;  %v2758_v40 = vrot.slane %v2377_v12, 7  ;;  %v576_v41 = vsel %vm557_vm1, %v547_v30, 0.0  ;;  %v2762_v42 = vsel %vm455_vm0, 0.0, %v471_v32  ;;  %v2764_v43 = vrot.slane %v2381_v19, 7 }
  0x2c   : > { %v2360_v44 = vunpack.c.l.bf16 %v2359_v36  ;;  %v2361_v46 = vunpack.c.h.bf16 %v2359_v36  ;;  %v393_v47 = vstv %s384_s10  ;;  %v573_v49 = vsel %vm557_vm1, %v546_v35, 0.0  ;;  %v2839_v36 = vld [vmem:[%s4057_s3 + $0x1] ss:$0 sm:$0xff]  ;;  %s2357_s10 = sadd.s32 8, %s2682_s13  ;;  %s2576_s13 = smov [#allocation3]  }
  0x2d   : > { %v2768_v45 = vsel %vm455_vm0, %v465_v18, %v2758_v40  ;;  %v582_v51 = vsel %vm557_vm1, %v549_v38, 0.0  ;;  %v551_v52 = vmul.f32 %v2706_v10, %v2762_v42  ;;  %v2775_v54 = vrot.slane %v2385_v39, 7  ;;  %p3313_p4 = scmp.lt.s32.totalorder %s2357_s10, 15  ;;  %s2483_s11 = sshll.u32 %s2576_s13, 4  ;;  %s2484_s11 = int_to_ptr.vmem [resolvable:$false] %s2483_s11 }
  0x2e   : > { %v394_v50 = vmul.f32 %v2360_v44, %v393_v47  ;;  %v395_v53 = vmul.f32 %v2361_v46, %v393_v47  ;;  %v548_v55 = vmul.f32 %v2706_v10, %v2768_v45  ;;  %v2781_v56 = vsel %vm455_vm0, %v468_v20, %v2764_v43  ;;  %s2485_s15 = scalar_lea.vmem %s2484_s11, 256 }
  0x2f   : > { %577 = vadd.xlane.f32.xlu0 %v576_v41  ;;  %568 = vadd.xlane.f32.xlu1 %v567_v37  ;;  %v2388_v58 = vunpack.c.l.bf16 %v2402_v48  ;;  %v2389_v60 = vunpack.c.h.bf16 %v2402_v48  ;;  %v588_v63 = vsel %vm557_vm1, %v551_v52, 0.0  ;;  %v550_v0 = vmul.f32 %v2706_v10, %v2781_v56  ;;  %s4080_s10 = smov (!%p3313_p4, %s2357_s10), 15 }
  0x30   : > { %v456_v57 = vrot.slane %v394_v50, 7  ;;  %v457_v59 = vrot.slane %v395_v53, 7  ;;  %v579_v1 = vsel %vm557_vm1, %v548_v55, 0.0  ;;  %v2795_v3 = vsel %vm455_vm0, %v471_v32, %v2775_v54  ;;  %s4082_s10 = smov (!%p3313_p4, %s4080_s10), 15 }
  0x31   : > { %v474_v4 = vrot.slane %v2388_v58, 7  ;;  %v2800_v6 = vrot.slane %v2389_v60, 7  ;;  %v2392_v7 = vunpack.c.l.bf16 %v2403_v62  ;;  %v2393_v8 = vunpack.c.h.bf16 %v2403_v62  ;;  %s2332_s16 = sshll.u32 %s4082_s10, 1 }
  0x32   : > { %v2784_v61 = vsel %vm455_vm0, 0.0, %v456_v57  ;;  %v2798_v5 = vsel %vm455_vm0, %v456_v57, %v457_v59  ;;  %v585_v9 = vsel %vm557_vm1, %v550_v0, 0.0  ;;  %v552_v12 = vmul.f32 %v2706_v10, %v2795_v3  ;;  %s375_s14 = sadd.s32 %s2332_s16, %s2689_s17  ;;  %s334_s16 = sand.u32 1, %s2549_s21  }
  0x33   : > { %583 = vadd.xlane.f32.xlu0 %v582_v51  ;;  %574 = vadd.xlane.f32.xlu1 %v573_v49  ;;  %v541_v2 = vmul.f32 %v2706_v10, %v2784_v61  ;;  %v542_v13 = vmul.f32 %v2706_v10, %v2798_v5  ;;  %v2810_v14 = vsel %vm455_vm0, %v474_v4, %v2800_v6  ;;  %v2813_v16 = vsel %vm455_vm0, 0.0, %v474_v4  ;;  %s3982_s18 = sshll.u32 %s334_s16, 3 }
  0x34   : > { %v477_v18 = vrot.slane %v2392_v7, 7  ;;  %v2815_v19 = vrot.slane %v2393_v8, 7  ;;  %v591_v20 = vsel %vm557_vm1, %v552_v12, 0.0  ;;  %v554_v26 = vmul.f32 %v2706_v10, %v2810_v14 }
  0x35   : > { %v558_v11 = vsel %vm557_vm1, %v541_v2, 0.0  ;;  %v561_v21 = vsel %vm557_vm1, %v542_v13, 0.0  ;;  %v553_v27 = vmul.f32 %v2706_v10, %v2813_v16  ;;  %v628_v39 = vmul.f32 %v2839_v36, %v2798_v5 }
  0x36   : > { %v2825_v29 = vsel %vm455_vm0, %v477_v18, %v2815_v19  ;;  %v2828_v30 = vsel %vm455_vm0, 0.0, %v477_v18  ;;  %v597_v32 = vsel %vm557_vm1, %v554_v26, 0.0  ;;  %v627_v41 = vmul.f32 %v2839_v36, %v2784_v61 }
  0x37   : > { %589 = vadd.xlane.f32.xlu0 %v588_v63  ;;  %580 = vadd.xlane.f32.xlu1 %v579_v1  ;;  %v594_v33 = vsel %vm557_vm1, %v553_v27, 0.0  ;;  %v556_v34 = vmul.f32 %v2706_v10, %v2825_v29  ;;  %v555_v35 = vmul.f32 %v2706_v10, %v2828_v30  ;;  %v2848_v10 = vsel %vm455_vm0, %v457_v59, 0.0 }
  0x38   : > { %v655_v44 = vsel %vm557_vm1, %v628_v39, 0.0  ;;  %v652_v46 = vsel %vm651_vm2, %v627_v41, 0.0  ;;  %v630_v47 = vmul.f32 %v2839_v36, %v2722_v23  ;;  %v629_v48 = vmul.f32 %v2839_v36, %v2848_v10 }
  0x39   : > { %v603_v37 = vsel %vm557_vm1, %v556_v34, 0.0  ;;  %v600_v38 = vsel %vm557_vm1, %v555_v35, 0.0  ;;  %v2858_v49 = vsel %vm455_vm0, %v2711_v17, 0.0  ;;  %v631_v53 = vmul.f32 %v2839_v36, %v2726_v24 }
  0x3a   : > { %v662_v50 = vsel %vm651_vm2, %v630_v47, 0.0  ;;  %v659_v51 = vsel %vm658_vm3, %v629_v48, 0.0  ;;  %v632_v52 = vmul.f32 %v2839_v36, %v2858_v49  ;;  %v634_v17 = vmul.f32 %v2839_v36, %v2730_v25 }
  0x3b   : > { %586 = vadd.xlane.f32.xlu1 %v585_v9  ;;  %559 = vadd.xlane.f32.xlu0 %v558_v11  ;;  %v665_v57 = vsel %vm557_vm1, %v631_v53, 0.0  ;;  %v633_v58 = vmul.f32 %v2839_v36, %v2719_v22  ;;  %v2874_v59 = vsel %vm455_vm0, %v2709_v15, 0.0  ;;  %v636_v63 = vmul.f32 %v2839_v36, %v2738_v28 }
  0x3c   : > { %v668_v55 = vsel %vm658_vm3, %v632_v52, 0.0  ;;  %v674_v60 = vsel %vm557_vm1, %v634_v17, 0.0  ;;  %v635_v0 = vmul.f32 %v2839_v36, %v2874_v59  ;;  %v2884_v1 = vsel %vm455_vm0, %v2758_v40, 0.0  ;;  %v2947_v52 = vld [vmem:[%s4057_s3 + $0x2] ss:$0 sm:$0xff] }
  0x3d   : > { %v671_v62 = vsel %vm651_vm2, %v633_v58, 0.0  ;;  %v680_v15 = vsel %vm651_vm2, %v636_v63, 0.0  ;;  %v638_v4 = vmul.f32 %v2839_v36, %v2884_v1  ;;  %v637_v7 = vmul.f32 %v2839_v36, %v2768_v45 }
  0x3e   : > { %v677_v2 = vsel %vm658_vm3, %v635_v0, 0.0  ;;  %v640_v40 = vmul.f32 %v2839_v36, %v2781_v56  ;;  %v639_v11 = vmul.f32 %v2839_v36, %v2745_v31  ;;  %v2900_v12 = vsel %vm455_vm0, %v2764_v43, 0.0 }
  0x3f   : > { %592 = vadd.xlane.f32.xlu1 %v591_v20  ;;  %562 = vadd.xlane.f32.xlu0 %v561_v21  ;;  %v686_v8 = vsel %vm658_vm3, %v638_v4, 0.0  ;;  %v683_v9 = vsel %vm557_vm1, %v637_v7, 0.0  ;;  %v642_v20 = vmul.f32 %v2839_v36, %v2762_v42  ;;  %v641_v21 = vmul.f32 %v2839_v36, %v2900_v12 }
  0x40   : > { %v692_v13 = vsel %vm557_vm1, %v640_v40, 0.0  ;;  %v689_v18 = vsel %vm651_vm2, %v639_v11, 0.0  ;;  %v2910_v26 = vsel %vm455_vm0, %v2775_v54, 0.0  ;;  %v646_v54 = vmul.f32 %v2839_v36, %v2810_v14 }
  0x41   : > { %v698_v43 = vsel %vm651_vm2, %v642_v20, 0.0  ;;  %v695_v27 = vsel %vm658_vm3, %v641_v21, 0.0  ;;  %v2936_v47 = vsel %vm455_vm0, %v2815_v19, 0.0  ;;  %v830_v58 = vmul.f32 %v2947_v52, %v2722_v23 }
  0x42   : > { %v710_v39 = vsel %vm557_vm1, %v646_v54, 0.0  ;;  %v831_v63 = vmul.f32 %v2947_v52, %v2726_v24 }
  0x43   : > { %598 = vadd.xlane.f32.xlu1 %v597_v32  ;;  %595 = vadd.xlane.f32.xlu0 %v594_v33  ;;  %v644_v32 = vmul.f32 %v2839_v36, %v2910_v26  ;;  %v643_v33 = vmul.f32 %v2839_v36, %v2795_v3 }
  0x45   : > { %v704_v34 = vsel %vm658_vm3, %v644_v32, 0.0  ;;  %v701_v35 = vsel %vm557_vm1, %v643_v33, 0.0 }
  0x47   : > { %604 = vadd.xlane.f32.xlu1 %v603_v37  ;;  %601 = vadd.xlane.f32.xlu0 %v600_v38  ;;  %v645_v37 = vmul.f32 %v2839_v36, %v2813_v16  ;;  %v2926_v38 = vsel %vm455_vm0, %v2800_v6, 0.0 }
  0x49   : > { %v707_v41 = vsel %vm651_vm2, %v645_v37, 0.0 }
  0x4b   : > { %656 = vadd.xlane.f32.xlu1 %v655_v44  ;;  %653 = vadd.xlane.f32.xlu0 %v652_v46  ;;  %v648_v44 = vmul.f32 %v2839_v36, %v2828_v30  ;;  %v647_v46 = vmul.f32 %v2839_v36, %v2926_v38 }
  0x4d   : > { %v716_v6 = vsel %vm651_vm2, %v648_v44, 0.0  ;;  %v713_v48 = vsel %vm658_vm3, %v647_v46, 0.0 }
  0x4f   : > { %663 = vadd.xlane.f32.xlu1 %v662_v50  ;;  %660 = vadd.xlane.f32.xlu0 %v659_v51  ;;  %v650_v50 = vmul.f32 %v2839_v36, %v2936_v47  ;;  %v649_v51 = vmul.f32 %v2839_v36, %v2825_v29 }
  0x51   : > { %v722_v19 = vsel %vm658_vm3, %v650_v50, 0.0  ;;  %v719_v53 = vsel %vm557_vm1, %v649_v51, 0.0 }
  0x53   : > { %669 = vadd.xlane.f32.xlu1 %v668_v55  ;;  %666 = vadd.xlane.f32.xlu0 %v665_v57  ;;  %v828_v55 = vmul.f32 %v2947_v52, %v2798_v5  ;;  %v827_v57 = vmul.f32 %v2947_v52, %v2784_v61  ;;  %v862_v5 = vsel %vm851_vm4, %v830_v58, 0.0  ;;  %v2338_v58 = vld [vmem:[%s4057_s3 + $0x3] ss:$0 sm:$0xff] }
  0x55   : > { %v855_v36 = vsel %vm557_vm1, %v828_v55, 0.0  ;;  %v852_v17 = vsel %vm851_vm4, %v827_v57, 0.0 }
  0x57   : > { %675 = vadd.xlane.f32.xlu1 %v674_v60  ;;  %672 = vadd.xlane.f32.xlu0 %v671_v62  ;;  %v829_v60 = vmul.f32 %v2947_v52, %v2848_v10  ;;  %v832_v62 = vmul.f32 %v2947_v52, %v2858_v49  ;;  %v834_v10 = vmul.f32 %v2947_v52, %v2730_v25 }
  0x59   : > { %v859_v61 = vsel %vm858_vm5, %v829_v60, 0.0  ;;  %v868_v0 = vsel %vm858_vm5, %v832_v62, 0.0  ;;  %v874_v4 = vsel %vm557_vm1, %v834_v10, 0.0  ;;  %v1027_v62 = vmul.f32 %v2338_v58, %v2722_v23 }
  0x5b   : > { %681 = vadd.xlane.f32.xlu1 %v680_v15  ;;  %678 = vadd.xlane.f32.xlu0 %v677_v2  ;;  %v865_v15 = vsel %vm557_vm1, %v831_v63, 0.0  ;;  %v833_v2 = vmul.f32 %v2947_v52, %v2719_v22 }
  0x5d   : > { %v871_v7 = vsel %vm851_vm4, %v833_v2, 0.0 }
  0x5f   : > { %687 = vadd.xlane.f32.xlu1 %v686_v8  ;;  %684 = vadd.xlane.f32.xlu0 %v683_v9  ;;  %v836_v8 = vmul.f32 %v2947_v52, %v2738_v28  ;;  %v835_v9 = vmul.f32 %v2947_v52, %v2874_v59 }
  0x61   : > { %v880_v40 = vsel %vm851_vm4, %v836_v8, 0.0  ;;  %v877_v11 = vsel %vm858_vm5, %v835_v9, 0.0 }
  0x63   : > { %693 = vadd.xlane.f32.xlu1 %v692_v13  ;;  %690 = vadd.xlane.f32.xlu0 %v689_v18  ;;  %v838_v13 = vmul.f32 %v2947_v52, %v2884_v1  ;;  %v837_v18 = vmul.f32 %v2947_v52, %v2768_v45 }
  0x65   : > { %v886_v20 = vsel %vm858_vm5, %v838_v13, 0.0  ;;  %v883_v21 = vsel %vm557_vm1, %v837_v18, 0.0  ;;  %v2404_v13 = vld [vmem:[%s2695_s9 + $0x38] sm:$0xff]   ;;  %s2334_s9 = sshll.u32 %s375_s14, 2  ;;  %s2346_s14 = sshll.u32 %s2561_s24, 1 }
  0x66   : > { %s377_s28 = scalar_lea.vmem %s4056_s2, %s2334_s9  ;;  %s2175_s19 = sadd.s32 %s2557_s23, %s2346_s14 }
  0x67   : > { %699 = vadd.xlane.f32.xlu1 %v698_v43  ;;  %696 = vadd.xlane.f32.xlu0 %v695_v27  ;;  %v840_v43 = vmul.f32 %v2947_v52, %v2781_v56  ;;  %v839_v27 = vmul.f32 %v2947_v52, %v2745_v31  ;;  %s2347_s24 = sshll.u32 %s2175_s19, 7  ;;  %s336_s9 = scalar_lea.vmem [#allocation3], %s3982_s18 }
  0x68   : > { %s2179_s23 = sshll.u32 %s336_s9, 4  ;;  %s4001_s23 = int_to_ptr.vmem [resolvable:$true] %s2179_s23 }
  0x69   : > { %v892_v32 = vsel %vm557_vm1, %v840_v43, 0.0  ;;  %v889_v33 = vsel %vm851_vm4, %v839_v27, 0.0  ;;  %v1035_v43 = vmul.f32 %v2338_v58, %v2762_v42  ;;  %v2396_v27 = vunpack.c.l.bf16 %v2404_v13  ;;  %s2479_s10 = scalar_lea.vmem %s4001_s23, 128  ;;  %p2486_p10 = scmp.lt.s32.totalorder %s4001_s23, %s2484_s11 }
  0x6a   : > { %p2480_p6 = scmp.ne.s32.totalorder %s4001_s23, %s2479_s10  ;;  %p2487_p11 = scmp.lt.s32.totalorder %s2485_s15, %s2479_s10 }
  0x6b   : > { %705 = vadd.xlane.f32.xlu1 %v704_v34  ;;  %702 = vadd.xlane.f32.xlu0 %v701_v35  ;;  %v842_v34 = vmul.f32 %v2947_v52, %v2762_v42  ;;  %v841_v35 = vmul.f32 %v2947_v52, %v2900_v12 }
  0x6c   : > { %p2481_p7 = pnand %p2480_p6, %p2661_p3  ;;  %p2488_p12 = por %p2487_p11, %p2486_p10 }
  0x6d   : > { %v898_v54 = vsel %vm851_vm4, %v842_v34, 0.0  ;;  %v895_v37 = vsel %vm858_vm5, %v841_v35, 0.0 }
  0x6e   : > { %p2482_p9 = pneg %p2481_p7 }
  0x6f   : > { %711 = vadd.xlane.f32.xlu1 %v710_v39  ;;  %708 = vadd.xlane.f32.xlu0 %v707_v41  ;;  %v844_v39 = vmul.f32 %v2947_v52, %v2910_v26  ;;  %v843_v41 = vmul.f32 %v2947_v52, %v2795_v3 }
  0x70   : > { %p2489_p13 = pnand %p2488_p12, %p2482_p9 }
  0x71   : > { %v904_v44 = vsel %vm858_vm5, %v844_v39, 0.0  ;;  %v901_v46 = vsel %vm557_vm1, %v843_v41, 0.0  ;;  %v1037_v39 = vmul.f32 %v2338_v58, %v2813_v16  ;;  %v480_v41 = vrot.slane %v2396_v27, 7 }
  0x73   : > { %717 = vadd.xlane.f32.xlu1 %v716_v6  ;;  %714 = vadd.xlane.f32.xlu0 %v713_v48  ;;  %v846_v6 = vmul.f32 %v2947_v52, %v2810_v14  ;;  %v845_v48 = vmul.f32 %v2947_v52, %v2813_v16 }
  0x75   : > { %v910_v50 = vsel %vm557_vm1, %v846_v6, 0.0  ;;  %v907_v51 = vsel %vm851_vm4, %v845_v48, 0.0 }
  0x77   : > { %723 = vadd.xlane.f32.xlu1 %v722_v19  ;;  %720 = vadd.xlane.f32.xlu0 %v719_v53  ;;  %v848_v19 = vmul.f32 %v2947_v52, %v2828_v30  ;;  %v847_v53 = vmul.f32 %v2947_v52, %v2926_v38 }
  0x79   : > { %v916_v55 = vsel %vm851_vm4, %v848_v19, 0.0  ;;  %v913_v57 = vsel %vm858_vm5, %v847_v53, 0.0  ;;  %v1039_v19 = vmul.f32 %v2338_v58, %v2828_v30 }
  0x7b   : > { %856 = vadd.xlane.f32.xlu1 %v855_v36  ;;  %853 = vadd.xlane.f32.xlu0 %v852_v17  ;;  %v850_v36 = vmul.f32 %v2947_v52, %v2936_v47  ;;  %v849_v17 = vmul.f32 %v2947_v52, %v2825_v29  ;;  %v1043_v52 = vsel %vm557_vm1, %v1027_v62, 0.0  ;;  %v3081_v62 = vld [vmem:[%s4057_s3 + $0x4] ss:$0 sm:$0xff] }
  0x7d   : > { %v922_v60 = vsel %vm858_vm5, %v850_v36, 0.0 }
  0x7f   : > { %863 = vadd.xlane.f32.xlu1 %v862_v5  ;;  %860 = vadd.xlane.f32.xlu0 %v859_v61  ;;  %v919_v5 = vsel %vm557_vm1, %v849_v17, 0.0  ;;  %v1028_v61 = vmul.f32 %v2338_v58, %v2726_v24 }
  0x81   : > { %v1046_v63 = vsel %vm557_vm1, %v1028_v61, 0.0 }
  0x83   : > { %869 = vadd.xlane.f32.xlu1 %v868_v0  ;;  %866 = vadd.xlane.f32.xlu0 %v865_v15  ;;  %v1030_v0 = vmul.f32 %v2338_v58, %v2730_v25  ;;  %v1029_v15 = vmul.f32 %v2338_v58, %v2719_v22 }
  0x85   : > { %v1052_v10 = vsel %vm557_vm1, %v1030_v0, 0.0  ;;  %v1049_v2 = vsel %vm557_vm1, %v1029_v15, 0.0 }
  0x87   : > { %875 = vadd.xlane.f32.xlu1 %v874_v4  ;;  %872 = vadd.xlane.f32.xlu0 %v871_v7  ;;  %v1032_v4 = vmul.f32 %v2338_v58, %v2768_v45  ;;  %v1031_v7 = vmul.f32 %v2338_v58, %v2738_v28 }
  0x89   : > { %v1058_v8 = vsel %vm557_vm1, %v1032_v4, 0.0  ;;  %v1055_v9 = vsel %vm557_vm1, %v1031_v7, 0.0 }
  0x8b   : > { %881 = vadd.xlane.f32.xlu1 %v880_v40  ;;  %878 = vadd.xlane.f32.xlu0 %v877_v11  ;;  %v1034_v40 = vmul.f32 %v2338_v58, %v2781_v56  ;;  %v1033_v11 = vmul.f32 %v2338_v58, %v2745_v31 }
  0x8d   : > { %v1064_v18 = vsel %vm557_vm1, %v1034_v40, 0.0  ;;  %v1114_v40 = vmul.f32 %v3081_v62, %v2858_v49 }
  0x8f   : > { %887 = vadd.xlane.f32.xlu1 %v886_v20  ;;  %884 = vadd.xlane.f32.xlu0 %v883_v21  ;;  %v1061_v20 = vsel %vm557_vm1, %v1033_v11, 0.0  ;;  %v1036_v21 = vmul.f32 %v2338_v58, %v2795_v3 }
  0x91   : > { %v1070_v35 = vsel %vm557_vm1, %v1036_v21, 0.0  ;;  %v1117_v21 = vmul.f32 %v3081_v62, %v2874_v59 }
  0x93   : > { %893 = vadd.xlane.f32.xlu1 %v892_v32  ;;  %890 = vadd.xlane.f32.xlu0 %v889_v33  ;;  %v2397_v32 = vunpack.c.h.bf16 %v2404_v13 }
  0x97   : > { %899 = vadd.xlane.f32.xlu1 %v898_v54  ;;  %896 = vadd.xlane.f32.xlu0 %v895_v37  ;;  %v1067_v54 = vsel %vm557_vm1, %v1035_v43, 0.0  ;;  %v1038_v37 = vmul.f32 %v2338_v58, %v2810_v14  ;;  %v1116_v43 = vmul.f32 %v3081_v62, %v2730_v25 }
  0x99   : > { %v1076_v48 = vsel %vm557_vm1, %v1038_v37, 0.0  ;;  %v1119_v37 = vmul.f32 %v3081_v62, %v2768_v45 }
  0x9b   : > { %905 = vadd.xlane.f32.xlu1 %v904_v44  ;;  %902 = vadd.xlane.f32.xlu0 %v901_v46  ;;  %v3053_v44 = vrot.slane %v2397_v32, 7 }
  0x9d   : > { %v3065_v53 = vsel %vm455_vm0, %v480_v41, %v3053_v44 }
  0x9f   : > { %911 = vadd.xlane.f32.xlu1 %v910_v50  ;;  %908 = vadd.xlane.f32.xlu0 %v907_v51  ;;  %v1073_v50 = vsel %vm557_vm1, %v1037_v39, 0.0  ;;  %v1040_v51 = vmul.f32 %v2338_v58, %v2825_v29  ;;  %v1118_v39 = vmul.f32 %v3081_v62, %v2738_v28 }
  0xa1   : > { %v1082_v17 = vsel %vm557_vm1, %v1040_v51, 0.0  ;;  %v1154_v51 = vsel %vm651_vm2, %v1118_v39, 0.0 }
  0xa3   : > { %917 = vadd.xlane.f32.xlu1 %v916_v55  ;;  %914 = vadd.xlane.f32.xlu0 %v913_v57  ;;  %v3068_v55 = vsel %vm455_vm0, 0.0, %v480_v41 }
  0xa4   : > { %v1041_v61 = vmul.f32 %v2338_v58, %v3068_v55 }
  0xa6   : > { %v1085_v15 = vsel %vm557_vm1, %v1041_v61, 0.0 }
  0xa7   : > { %923 = vadd.xlane.f32.xlu1 %v922_v60  ;;  %920 = vadd.xlane.f32.xlu0 %v919_v5  ;;  %v1079_v60 = vsel %vm557_vm1, %v1039_v19, 0.0  ;;  %v1042_v5 = vmul.f32 %v2338_v58, %v3065_v53  ;;  %v1112_v58 = vmul.f32 %v3081_v62, %v2722_v23  ;;  %v1121_v19 = vmul.f32 %v3081_v62, %v2745_v31 }
  0xa9   : > { %v1088_v0 = vsel %vm557_vm1, %v1042_v5, 0.0  ;;  %v1163_v61 = vsel %vm651_vm2, %v1121_v19, 0.0 }
  0xab   : > { %1047 = vadd.xlane.f32.xlu1 %v1046_v63  ;;  %1044 = vadd.xlane.f32.xlu0 %v1043_v52 }
  0xaf   : > { %1053 = vadd.xlane.f32.xlu1 %v1052_v10  ;;  %1050 = vadd.xlane.f32.xlu0 %v1049_v2  ;;  %v1113_v10 = vmul.f32 %v3081_v62, %v2726_v24 }
  0xb1   : > { %v1139_v7 = vsel %vm557_vm1, %v1113_v10, 0.0  ;;  %v1122_v10 = vmul.f32 %v3081_v62, %v2781_v56 }
  0xb3   : > { %1059 = vadd.xlane.f32.xlu1 %v1058_v8  ;;  %1056 = vadd.xlane.f32.xlu0 %v1055_v9  ;;  %v1136_v8 = vsel %vm651_vm2, %v1112_v58, 0.0  ;;  %v1115_v9 = vmul.f32 %v3081_v62, %v2719_v22 }
  0xb7   : > { %1065 = vadd.xlane.f32.xlu1 %v1064_v18  ;;  %1062 = vadd.xlane.f32.xlu0 %v1061_v20  ;;  %v1145_v18 = vsel %vm651_vm2, %v1115_v9, 0.0  ;;  %v1142_v20 = vsel %vm658_vm3, %v1114_v40, 0.0  ;;  %v1125_v9 = vmul.f32 %v3081_v62, %v2795_v3 }
  0xb8   : > { %v3045_v33 = vpop.xlane.xlu0 %571  ;;  %v3047_v34 = vpop.xlane.xlu1 %565 }
  0xbb   : > { %1071 = vadd.xlane.f32.xlu1 %v1070_v35  ;;  %1068 = vadd.xlane.f32.xlu0 %v1067_v54  ;;  %v1151_v35 = vsel %vm658_vm3, %v1117_v21, 0.0  ;;  %v1148_v54 = vsel %vm557_vm1, %v1116_v43, 0.0  ;;  %v1166_v21 = vsel %vm557_vm1, %v1122_v10, 0.0  ;;  %v1124_v43 = vmul.f32 %v3081_v62, %v2762_v42 }
  0xbc   : > { %v3055_v46 = vpop.xlane.xlu0 %577  ;;  %v3057_v6 = vpop.xlane.xlu1 %568 }
  0xbf   : > { %1077 = vadd.xlane.f32.xlu1 %v1076_v48  ;;  %1074 = vadd.xlane.f32.xlu0 %v1073_v50  ;;  %v1157_v50 = vsel %vm557_vm1, %v1119_v37, 0.0 }
  0xc0   : > { %v3070_v57 = vpop.xlane.xlu0 %583  ;;  %v3072_v36 = vpop.xlane.xlu1 %574 }
  0xc3   : > { %1083 = vadd.xlane.f32.xlu1 %v1082_v17  ;;  %1080 = vadd.xlane.f32.xlu0 %v1079_v60  ;;  %v1120_v17 = vmul.f32 %v3081_v62, %v2884_v1 }
  0xc4   : > { %v3083_v63 = vpop.xlane.xlu0 %589  ;;  %v3085_v52 = vpop.xlane.xlu1 %580 }
  0xc7   : > { %1089 = vadd.xlane.f32.xlu1 %v1088_v0  ;;  %1086 = vadd.xlane.f32.xlu0 %v1085_v15  ;;  %v1160_v0 = vsel %vm658_vm3, %v1120_v17, 0.0  ;;  %v1123_v15 = vmul.f32 %v3081_v62, %v2900_v12 }
  0xc8   : > { %v3093_v2 = vpop.xlane.xlu1 %586  ;;  %v560_v4 = vpop.xlane.xlu0 %559 }
  0xcb   : > { %1140 = vadd.xlane.f32.xlu1 %v1139_v7  ;;  %1137 = vadd.xlane.f32.xlu0 %v1136_v8 }
  0xcc   : > { %v3101_v11 = vpop.xlane.xlu1 %592  ;;  %v563_v13 = vpop.xlane.xlu0 %562 }
  0xcf   : > { %1146 = vadd.xlane.f32.xlu1 %v1145_v18  ;;  %1143 = vadd.xlane.f32.xlu0 %v1142_v20  ;;  %v1169_v20 = vsel %vm658_vm3, %v1123_v15, 0.0 }
  0xd0   : > { %v3109_v27 = vpop.xlane.xlu1 %598  ;;  %v3111_v32 = vpop.xlane.xlu0 %595 }
  0xd3   : > { %1152 = vadd.xlane.f32.xlu1 %v1151_v35  ;;  %1149 = vadd.xlane.f32.xlu0 %v1148_v54 }
  0xd4   : > { %v3119_v41 = vpop.xlane.xlu1 %604  ;;  %v3121_v48 = vpop.xlane.xlu0 %601 }
  0xd7   : > { %1158 = vadd.xlane.f32.xlu1 %v1157_v50  ;;  %1155 = vadd.xlane.f32.xlu0 %v1154_v51  ;;  %v1127_v50 = vmul.f32 %v3081_v62, %v2813_v16  ;;  %v1126_v51 = vmul.f32 %v3081_v62, %v2910_v26 }
  0xd8   : > { %v657_v60 = vpop.xlane.xlu1 %656  ;;  %v654_v5 = vpop.xlane.xlu0 %653 }
  0xd9   : > { %v751_v58 = vrot.slane %v657_v60, 1  ;;  %v750_v7 = vrot.slane %v654_v5, 1  ;;  %v1175_v60 = vsel %vm557_vm1, %v1125_v9, 0.0  ;;  %v1172_v5 = vsel %vm651_vm2, %v1124_v43, 0.0 }
  0xda   : > { %v1129_v9 = vmul.f32 %v3081_v62, %v2926_v38 }
  0xdb   : > { %v752_v8 = vsel %vm749_vm6, %v750_v7, %v751_v58  ;;  %1164 = vadd.xlane.f32.xlu1 %v1163_v61  ;;  %1161 = vadd.xlane.f32.xlu0 %v1160_v0  ;;  %v1178_v7 = vsel %vm658_vm3, %v1126_v51, 0.0 }
  0xdc   : > { %v664_v40 = vpop.xlane.xlu1 %663  ;;  %v661_v18 = vpop.xlane.xlu0 %660  ;;  %v3142_v35 = vadd.f32 %v752_v8, %v560_v4  ;;  %v1187_v51 = vsel %vm658_vm3, %v1129_v9, 0.0 }
  0xdd   : > { %v753_v54 = vrot.slane %v661_v18, 1  ;;  %v755_v37 = vrot.slane %v664_v40, 1 }
  0xdf   : > { %v754_v39 = vsel %vm749_vm6, %v751_v58, %v753_v54  ;;  %1170 = vadd.xlane.f32.xlu1 %v1169_v20  ;;  %1167 = vadd.xlane.f32.xlu0 %v1166_v21  ;;  %v1181_v58 = vsel %vm651_vm2, %v1127_v50, 0.0 }
  0xe0   : > { %v670_v19 = vpop.xlane.xlu1 %669  ;;  %v667_v17 = vpop.xlane.xlu0 %666  ;;  %v3151_v4 = vadd.f32 %v754_v39, %v563_v13  ;;  %v1128_v13 = vmul.f32 %v3081_v62, %v2810_v14 }
  0xe1   : > { %v758_v61 = vrot.slane %v670_v19, 1  ;;  %v756_v0 = vrot.slane %v667_v17, 1 }
  0xe2   : > { %v1184_v19 = vsel %vm557_vm1, %v1128_v13, 0.0 }
  0xe3   : > { %v757_v15 = vsel %vm749_vm6, %v755_v37, %v756_v0  ;;  %v759_v10 = vsel %vm749_vm6, %v756_v0, %v758_v61  ;;  %1176 = vadd.xlane.f32.xlu1 %v1175_v60  ;;  %1173 = vadd.xlane.f32.xlu0 %v1172_v5  ;;  %v1131_v37 = vmul.f32 %v3081_v62, %v2825_v29 }
  0xe4   : > { %v676_v8 = vpop.xlane.xlu1 %675  ;;  %v673_v40 = vpop.xlane.xlu0 %672  ;;  %v3162_v18 = vadd.f32 %v759_v10, %v3057_v6  ;;  %v3165_v20 = vadd.f32 %v757_v15, %v3047_v34  ;;  %v1130_v6 = vmul.f32 %v3081_v62, %v2828_v30  ;;  %v1133_v0 = vmul.f32 %v3081_v62, %v3068_v55 }
  0xe5   : > { %v761_v21 = vrot.slane %v676_v8, 1  ;;  %v760_v43 = vrot.slane %v673_v40, 1  ;;  %v1193_v61 = vsel %vm557_vm1, %v1131_v37, 0.0 }
  0xe7   : > { %v762_v54 = vsel %vm749_vm6, %v760_v43, %v761_v21  ;;  %1182 = vadd.xlane.f32.xlu1 %v1181_v58  ;;  %1179 = vadd.xlane.f32.xlu0 %v1178_v7  ;;  %v1190_v58 = vsel %vm651_vm2, %v1130_v6, 0.0  ;;  %v1132_v7 = vmul.f32 %v3081_v62, %v2936_v47  ;;  %v1199_v43 = vsel %vm651_vm2, %v1133_v0, 0.0 }
  0xe8   : > { %v682_v39 = vpop.xlane.xlu1 %681  ;;  %v679_v50 = vpop.xlane.xlu0 %678  ;;  %v3175_v34 = vadd.f32 %v762_v54, %v3045_v33  ;;  %v3186_v33 = vsel %vm455_vm0, %v3053_v44, 0.0 }
  0xe9   : > { %v763_v17 = vrot.slane %v679_v50, 1  ;;  %v765_v60 = vrot.slane %v682_v39, 1  ;;  %v1135_v54 = vmul.f32 %v3081_v62, %v3186_v33  ;;  %v1196_v44 = vsel %vm658_vm3, %v1132_v7, 0.0 }
  0xeb   : > { %v764_v5 = vsel %vm749_vm6, %v761_v21, %v763_v17  ;;  %1188 = vadd.xlane.f32.xlu1 %v1187_v51  ;;  %1185 = vadd.xlane.f32.xlu0 %v1184_v19  ;;  %v3208_v17 = vld [vmem:[%s4057_s3 + $0x5] ss:$0 sm:$0xff] }
  0xec   : > { %v688_v15 = vpop.xlane.xlu1 %687  ;;  %v685_v10 = vpop.xlane.xlu0 %684  ;;  %v3189_v8 = vadd.f32 %v764_v5, %v3072_v36  ;;  %v1134_v36 = vmul.f32 %v3081_v62, %v3065_v53  ;;  %v1205_v5 = vsel %vm658_vm3, %v1135_v54, 0.0  ;;  %v1309_v0 = vmul.f32 %v3208_v17, %v2722_v23 }
  0xed   : > { %v768_v40 = vrot.slane %v688_v15, 1  ;;  %v766_v9 = vrot.slane %v685_v10, 1  ;;  %v1311_v23 = vmul.f32 %v3208_v17, %v2858_v49 }
  0xef   : > { %v767_v13 = vsel %vm749_vm6, %v765_v60, %v766_v9  ;;  %v769_v21 = vsel %vm749_vm6, %v766_v9, %v768_v40  ;;  %1194 = vadd.xlane.f32.xlu1 %v1193_v61  ;;  %1191 = vadd.xlane.f32.xlu0 %v1190_v58  ;;  %v1312_v40 = vmul.f32 %v3208_v17, %v2719_v22  ;;  %v1339_v49 = vsel %vm858_vm5, %v1311_v23, 0.0 }
  0xf0   : > { %v694_v37 = vpop.xlane.xlu1 %693  ;;  %v691_v39 = vpop.xlane.xlu0 %690  ;;  %v3200_v50 = vadd.f32 %v769_v21, %v3085_v52  ;;  %v3203_v51 = vadd.f32 %v767_v13, %v3055_v46  ;;  %v1202_v52 = vsel %vm557_vm1, %v1134_v36, 0.0  ;;  %v1310_v46 = vmul.f32 %v3208_v17, %v2726_v24 }
  0xf1   : > { %v771_v19 = vrot.slane %v694_v37, 1  ;;  %v770_v6 = vrot.slane %v691_v39, 1  ;;  %v1333_v24 = vsel %vm851_vm4, %v1309_v0, 0.0  ;;  %v1314_v36 = vmul.f32 %v3208_v17, %v2874_v59 }
  0xf2   : > { %v1336_v21 = vsel %vm557_vm1, %v1310_v46, 0.0 }
  0xf3   : > { %v772_v60 = vsel %vm749_vm6, %v770_v6, %v771_v19  ;;  %1200 = vadd.xlane.f32.xlu1 %v1199_v43  ;;  %1197 = vadd.xlane.f32.xlu0 %v1196_v44  ;;  %v1342_v44 = vsel %vm851_vm4, %v1312_v40, 0.0  ;;  %v1348_v46 = vsel %vm858_vm5, %v1314_v36, 0.0 }
  0xf4   : > { %v700_v62 = vpop.xlane.xlu1 %699  ;;  %v697_v61 = vpop.xlane.xlu0 %696  ;;  %v3218_v15 = vadd.f32 %v772_v60, %v3070_v57 }
  0xf5   : > { %v773_v10 = vrot.slane %v697_v61, 1  ;;  %v775_v58 = vrot.slane %v700_v62, 1 }
  0xf7   : > { %v774_v7 = vsel %vm749_vm6, %v771_v19, %v773_v10  ;;  %1206 = vadd.xlane.f32.xlu1 %v1205_v5  ;;  %1203 = vadd.xlane.f32.xlu0 %v1202_v52 }
  0xf8   : > { %v706_v9 = vpop.xlane.xlu1 %705  ;;  %v703_v13 = vpop.xlane.xlu0 %702  ;;  %v3228_v57 = vadd.f32 %v774_v7, %v3093_v2  ;;  %v1313_v2 = vmul.f32 %v3208_v17, %v2730_v25  ;;  %v1316_v7 = vmul.f32 %v3208_v17, %v2768_v45 }
  0xf9   : > { %v778_v43 = vrot.slane %v706_v9, 1  ;;  %v776_v54 = vrot.slane %v703_v13, 1  ;;  %v1318_v9 = vmul.f32 %v3208_v17, %v2745_v31 }
  0xfb   : > { %v777_v37 = vsel %vm749_vm6, %v775_v58, %v776_v54  ;;  %v779_v39 = vsel %vm749_vm6, %v776_v54, %v778_v43  ;;  %1337 = vadd.xlane.f32.xlu1 %v1336_v21  ;;  %1334 = vadd.xlane.f32.xlu0 %v1333_v24  ;;  %v1345_v58 = vsel %vm557_vm1, %v1313_v2, 0.0  ;;  %v1317_v24 = vmul.f32 %v3208_v17, %v2884_v1 }
  0xfc   : > { %v712_v19 = vpop.xlane.xlu1 %711  ;;  %v709_v6 = vpop.xlane.xlu0 %708  ;;  %v3239_v60 = vadd.f32 %v779_v39, %v3101_v11  ;;  %v3242_v5 = vadd.f32 %v777_v37, %v3083_v63  ;;  %v1315_v11 = vmul.f32 %v3208_v17, %v2738_v28  ;;  %v1354_v54 = vsel %vm557_vm1, %v1316_v7, 0.0 }
  0xfd   : > { %v781_v62 = vrot.slane %v712_v19, 1  ;;  %v780_v61 = vrot.slane %v709_v6, 1  ;;  %v1360_v36 = vsel %vm851_vm4, %v1318_v9, 0.0  ;;  %v1320_v2 = vmul.f32 %v3208_v17, %v2900_v12 }
  0xfe   : > { %v1351_v37 = vsel %vm851_vm4, %v1315_v11, 0.0 }
  0xff   : > { %v782_v52 = vsel %vm749_vm6, %v780_v61, %v781_v62  ;;  %1343 = vadd.xlane.f32.xlu1 %v1342_v44  ;;  %1340 = vadd.xlane.f32.xlu0 %v1339_v49  ;;  %v1357_v49 = vsel %vm858_vm5, %v1317_v24, 0.0 }
 0x100   : > { %v718_v0 = vpop.xlane.xlu1 %717  ;;  %v715_v10 = vpop.xlane.xlu0 %714  ;;  %v3252_v63 = vadd.f32 %v782_v52, %v3111_v32 }
 0x101   : > { %v783_v40 = vrot.slane %v715_v10, 1  ;;  %v785_v13 = vrot.slane %v718_v0, 1 }
 0x103   : > { %v784_v21 = vsel %vm749_vm6, %v781_v62, %v783_v40  ;;  %1349 = vadd.xlane.f32.xlu1 %v1348_v46  ;;  %1346 = vadd.xlane.f32.xlu0 %v1345_v58  ;;  %v1366_v58 = vsel %vm858_vm5, %v1320_v2, 0.0  ;;  %v1326_v2 = vmul.f32 %v3208_v17, %v2926_v38 }
 0x104   : > { %v724_v23 = vpop.xlane.xlu1 %723  ;;  %v721_v43 = vpop.xlane.xlu0 %720  ;;  %v3262_v32 = vadd.f32 %v784_v21, %v3109_v27  ;;  %v1319_v27 = vmul.f32 %v3208_v17, %v2781_v56 }
 0x105   : > { %v788_v39 = vrot.slane %v724_v23, 1  ;;  %v786_v44 = vrot.slane %v721_v43, 1  ;;  %v1324_v23 = vmul.f32 %v3208_v17, %v2813_v16 }
 0x106   : > { %v1363_v9 = vsel %vm557_vm1, %v1319_v27, 0.0 }
 0x107   : > { %v787_v19 = vsel %vm749_vm6, %v785_v13, %v786_v44  ;;  %v789_v6 = vsel %vm749_vm6, %v786_v44, %v788_v39  ;;  %1355 = vadd.xlane.f32.xlu1 %v1354_v54  ;;  %1352 = vadd.xlane.f32.xlu0 %v1351_v37  ;;  %v1322_v13 = vmul.f32 %v3208_v17, %v2795_v3 }
 0x108   : > { %v857_v62 = vpop.xlane.xlu1 %856  ;;  %v854_v61 = vpop.xlane.xlu0 %853  ;;  %v3273_v52 = vadd.f32 %v789_v6, %v3119_v41  ;;  %v3276_v46 = vadd.f32 %v787_v19, %v3121_v48  ;;  %v1321_v41 = vmul.f32 %v3208_v17, %v2762_v42 }
 0x109   : > { %v951_v0 = vrot.slane %v857_v62, 2  ;;  %v950_v10 = vrot.slane %v854_v61, 2  ;;  %v1372_v39 = vsel %vm557_vm1, %v1322_v13, 0.0 }
 0x10a   : > { %v1369_v44 = vsel %vm851_vm4, %v1321_v41, 0.0 }
 0x10b   : > { %1361 = vadd.xlane.f32.xlu1 %v1360_v36  ;;  %1358 = vadd.xlane.f32.xlu0 %v1357_v49  ;;  %v952_v7 = vsel %vm949_vm7, %v950_v10, %v951_v0  ;;  %v1323_v36 = vmul.f32 %v3208_v17, %v2910_v26  ;;  %v1378_v49 = vsel %vm851_vm4, %v1324_v23, 0.0 }
 0x10c   : > { %v864_v11 = vpop.xlane.xlu1 %863  ;;  %v861_v40 = vpop.xlane.xlu0 %860  ;;  %v3286_v48 = vadd.f32 %v952_v7, %v3142_v35 }
 0x10d   : > { %v953_v21 = vrot.slane %v861_v40, 2  ;;  %v955_v24 = vrot.slane %v864_v11, 2  ;;  %v1375_v10 = vsel %vm858_vm5, %v1323_v36, 0.0 }
 0x10f   : > { %1367 = vadd.xlane.f32.xlu1 %v1366_v58  ;;  %1364 = vadd.xlane.f32.xlu0 %v1363_v9  ;;  %v954_v43 = vsel %vm949_vm7, %v951_v0, %v953_v21  ;;  %v1384_v9 = vsel %vm858_vm5, %v1326_v2, 0.0 }
 0x110   : > { %v870_v54 = vpop.xlane.xlu1 %869  ;;  %v867_v37 = vpop.xlane.xlu0 %866  ;;  %v3296_v35 = vadd.f32 %v954_v43, %v3151_v4  ;;  %v1325_v4 = vmul.f32 %v3208_v17, %v2810_v14 }
 0x111   : > { %v958_v19 = vrot.slane %v870_v54, 2  ;;  %v956_v6 = vrot.slane %v867_v37, 2  ;;  %v1330_v37 = vmul.f32 %v3208_v17, %v3068_v55 }
 0x113   : > { %1373 = vadd.xlane.f32.xlu1 %v1372_v39  ;;  %1370 = vadd.xlane.f32.xlu0 %v1369_v44  ;;  %v959_v62 = vsel %vm949_vm7, %v956_v6, %v958_v19  ;;  %v957_v61 = vsel %vm949_vm7, %v955_v24, %v956_v6  ;;  %v1327_v24 = vmul.f32 %v3208_v17, %v2828_v30 }
 0x114   : > { %v876_v27 = vpop.xlane.xlu1 %875  ;;  %v873_v0 = vpop.xlane.xlu0 %872  ;;  %v3308_v58 = vadd.f32 %v959_v62, %v3162_v18  ;;  %v3311_v7 = vadd.f32 %v957_v61, %v3165_v20  ;;  %v1381_v18 = vsel %vm557_vm1, %v1325_v4, 0.0  ;;  %v1328_v20 = vmul.f32 %v3208_v17, %v2825_v29 }
 0x115   : > { %v961_v11 = vrot.slane %v876_v27, 2  ;;  %v960_v40 = vrot.slane %v873_v0, 2  ;;  %v1329_v39 = vmul.f32 %v3208_v17, %v2936_v47  ;;  %v1387_v6 = vsel %vm851_vm4, %v1327_v24, 0.0 }
 0x116   : > { %v1390_v19 = vsel %vm557_vm1, %v1328_v20, 0.0  ;;  %v1396_v61 = vsel %vm851_vm4, %v1330_v37, 0.0 }
 0x117   : > { %1379 = vadd.xlane.f32.xlu1 %v1378_v49  ;;  %1376 = vadd.xlane.f32.xlu0 %v1375_v10  ;;  %v962_v13 = vsel %vm949_vm7, %v960_v40, %v961_v11  ;;  %v1393_v27 = vsel %vm858_vm5, %v1329_v39, 0.0  ;;  %v1331_v40 = vmul.f32 %v3208_v17, %v3065_v53 }
 0x118   : > { %v882_v41 = vpop.xlane.xlu1 %881  ;;  %v879_v21 = vpop.xlane.xlu0 %878  ;;  %v3325_v23 = vadd.f32 %v962_v13, %v3175_v34 }
 0x119   : > { %v963_v43 = vrot.slane %v879_v21, 2  ;;  %v965_v54 = vrot.slane %v882_v41, 2 }
 0x11b   : > { %1385 = vadd.xlane.f32.xlu1 %v1384_v9  ;;  %1382 = vadd.xlane.f32.xlu0 %v1381_v18  ;;  %v964_v44 = vsel %vm949_vm7, %v961_v11, %v963_v43  ;;  %v3355_v9 = vld [vmem:[%s4057_s3 + $0x6] ss:$0 sm:$0xff] }
 0x11c   : > { %v888_v36 = vpop.xlane.xlu1 %887  ;;  %v885_v34 = vpop.xlane.xlu0 %884  ;;  %v3339_v49 = vadd.f32 %v964_v44, %v3189_v8  ;;  %v1332_v8 = vmul.f32 %v3208_v17, %v3186_v33  ;;  %v1507_v17 = vmul.f32 %v3355_v9, %v2730_v25 }
 0x11d   : > { %v968_v2 = vrot.slane %v888_v36, 2  ;;  %v966_v62 = vrot.slane %v885_v34, 2 }
 0x11e   : > { %v1525_v36 = vsel %vm557_vm1, %v1507_v17, 0.0 }
 0x11f   : > { %1391 = vadd.xlane.f32.xlu1 %v1390_v19  ;;  %1388 = vadd.xlane.f32.xlu0 %v1387_v6  ;;  %v969_v0 = vsel %vm949_vm7, %v966_v62, %v968_v2  ;;  %v967_v10 = vsel %vm949_vm7, %v965_v54, %v966_v62  ;;  %v1402_v54 = vsel %vm858_vm5, %v1332_v8, 0.0  ;;  %v1508_v62 = vmul.f32 %v3355_v9, %v2738_v28 }
 0x120   : > { %v894_v4 = vpop.xlane.xlu1 %893  ;;  %v891_v11 = vpop.xlane.xlu0 %890  ;;  %v3358_v13 = vadd.f32 %v969_v0, %v3200_v50  ;;  %v3361_v41 = vadd.f32 %v967_v10, %v3203_v51  ;;  %v1399_v50 = vsel %vm557_vm1, %v1331_v40, 0.0  ;;  %v1506_v51 = vmul.f32 %v3355_v9, %v2719_v22 }
 0x121   : > { %v971_v21 = vrot.slane %v894_v4, 2  ;;  %v970_v18 = vrot.slane %v891_v11, 2  ;;  %v1511_v10 = vmul.f32 %v3355_v9, %v2781_v56  ;;  %v1510_v4 = vmul.f32 %v3355_v9, %v2745_v31 }
 0x122   : > { %v1522_v2 = vsel %vm557_vm1, %v1506_v51, 0.0 }
 0x123   : > { %1397 = vadd.xlane.f32.xlu1 %v1396_v61  ;;  %1394 = vadd.xlane.f32.xlu0 %v1393_v27  ;;  %v972_v20 = vsel %vm949_vm7, %v970_v18, %v971_v21  ;;  %v1528_v18 = vsel %vm557_vm1, %v1508_v62, 0.0  ;;  %v1534_v51 = vsel %vm557_vm1, %v1510_v4, 0.0  ;;  %v1515_v62 = vmul.f32 %v3355_v9, %v2810_v14 }
 0x124   : > { %v900_v24 = vpop.xlane.xlu1 %899  ;;  %v897_v43 = vpop.xlane.xlu0 %896  ;;  %v3373_v37 = vadd.f32 %v972_v20, %v3218_v15  ;;  %v1509_v15 = vmul.f32 %v3355_v9, %v2768_v45 }
 0x125   : > { %v973_v39 = vrot.slane %v897_v43, 2  ;;  %v975_v44 = vrot.slane %v900_v24, 2 }
 0x127   : > { %1403 = vadd.xlane.f32.xlu1 %v1402_v54  ;;  %1400 = vadd.xlane.f32.xlu0 %v1399_v50  ;;  %v974_v34 = vsel %vm949_vm7, %v971_v21, %v973_v39  ;;  %v1531_v21 = vsel %vm557_vm1, %v1509_v15, 0.0  ;;  %v2363_v54 = vld [vmem:[%s377_s28] sm:$0xff]   ;;  %v1537_v50 = vsel %vm557_vm1, %v1511_v10, 0.0  ;;  %v400_v15 = vstv %s388_s6  ;;  %s3999_s28 = scalar_lea.hbm %s4059_s5, %s2347_s24  ;;  %s2164_s6 = scalar_lea.sflag [#allocation4], %s334_s16 }
 0x128   : > { %v906_v19 = vpop.xlane.xlu1 %905  ;;  %v903_v6 = vpop.xlane.xlu0 %902  ;;  %v3387_v61 = vadd.f32 %v974_v34, %v3228_v57  ;;  %v2364_v34 = vunpack.c.l.bf16 %v2363_v54 }
 0x129   : > { %v978_v27 = vrot.slane %v906_v19, 2  ;;  %v976_v0 = vrot.slane %v903_v6, 2 }
 0x12b   : > { %1526 = vadd.xlane.f32.xlu1 %v1525_v36  ;;  %1523 = vadd.xlane.f32.xlu0 %v1522_v2  ;;  %v979_v57 = vsel %vm949_vm7, %v976_v0, %v978_v27  ;;  %v977_v11 = vsel %vm949_vm7, %v975_v44, %v976_v0  ;;  %v2365_v2 = vunpack.c.h.bf16 %v2363_v54  ;;  %v1514_v0 = vmul.f32 %v3355_v9, %v2813_v16 }
 0x12c   : > { %v912_v8 = vpop.xlane.xlu1 %911  ;;  %v909_v40 = vpop.xlane.xlu0 %908  ;;  %v3405_v17 = vadd.f32 %v979_v57, %v3239_v60  ;;  %v3408_v20 = vadd.f32 %v977_v11, %v3242_v5  ;;  %v1513_v60 = vmul.f32 %v3355_v9, %v2795_v3  ;;  %v1512_v5 = vmul.f32 %v3355_v9, %v2762_v42 }
 0x12d   : > { %v981_v24 = vrot.slane %v912_v8, 2  ;;  %v980_v43 = vrot.slane %v909_v40, 2  ;;  %v401_v8 = vmul.f32 %v2364_v34, %v400_v15  ;;  %v1549_v54 = vsel %vm557_vm1, %v1515_v62, 0.0 }
 0x12e   : > { %v1543_v11 = vsel %vm557_vm1, %v1513_v60, 0.0  ;;  %v2575_v62 = vmov 0  }
 0x12f   : > { %1532 = vadd.xlane.f32.xlu1 %v1531_v21  ;;  %1529 = vadd.xlane.f32.xlu0 %v1528_v18  ;;  %v982_v39 = vsel %vm949_vm7, %v980_v43, %v981_v24  ;;  %v3431_v43 = vmul.f32 %v2365_v2, %v400_v15  ;;  %v483_v60 = vrot.slane %v401_v8, 7 }
 0x130   : > { %v918_v44 = vpop.xlane.xlu1 %917  ;;  %v915_v36 = vpop.xlane.xlu0 %914  ;;  %v3419_v19 = vadd.f32 %v982_v39, %v3252_v63  ;;  %v1540_v63 = vsel %vm557_vm1, %v1512_v5, 0.0  ;;  %2477 = vset.pattern.permute.xlu0 %v2575_v62  ;;  %2478 = vset.pattern.permute.xlu1 %v2575_v62 }
 0x131   : > { %v983_v6 = vrot.slane %v915_v36, 2  ;;  %v985_v27 = vrot.slane %v918_v44, 2  ;;  %v1516_v36 = vmul.f32 %v3355_v9, %v2828_v30  ;;  %v484_v15 = vrot.slane %v3431_v43, 7 }
 0x133   : > { %1538 = vadd.xlane.f32.xlu1 %v1537_v50  ;;  %1535 = vadd.xlane.f32.xlu0 %v1534_v51  ;;  %v984_v10 = vsel %vm949_vm7, %v981_v24, %v983_v6  ;;  %v1546_v24 = vsel %vm557_vm1, %v1514_v0, 0.0  ;;  %v1517_v50 = vmul.f32 %v3355_v9, %v2825_v29 }
 0x134   : > { %v924_v4 = vpop.xlane.xlu1 %923  ;;  %v921_v57 = vpop.xlane.xlu0 %920  ;;  %v3429_v40 = vadd.f32 %v984_v10, %v3262_v32 }
 0x135   : > { %v988_v21 = vrot.slane %v924_v4, 2  ;;  %v986_v18 = vrot.slane %v921_v57, 2  ;;  %v3469_v57 = vsel %vm455_vm0, %v483_v60, %v484_v15 }
 0x137   : > { %1544 = vadd.xlane.f32.xlu1 %v1543_v11  ;;  %1541 = vadd.xlane.f32.xlu0 %v1540_v63  ;;  %v989_v51 = vsel %vm949_vm7, %v986_v18, %v988_v21  ;;  %v987_v39 = vsel %vm949_vm7, %v985_v27, %v986_v18  ;;  %v3472_v11 = vsel %vm455_vm0, 0.0, %v483_v60 }
 0x138   : > { %v1048_v44 = vpop.xlane.xlu1 %1047  ;;  %v1045_v32 = vpop.xlane.xlu0 %1044  ;;  %v3442_v5 = vadd.f32 %v989_v51, %v3273_v52  ;;  %v3445_v34 = vadd.f32 %v987_v39, %v3276_v46  ;;  %v1555_v52 = vsel %vm557_vm1, %v1517_v50, 0.0  ;;  %v1552_v46 = vsel %vm557_vm1, %v1516_v36, 0.0  ;;  %v3489_v50 = vld [vmem:[%s4057_s3 + $0x7] ss:$0 sm:$0xff] }
 0x139   : > { %v3448_v6 = vadd.f32 %v1048_v44, %v3296_v35  ;;  %v3451_v2 = vadd.f32 %v1045_v32, %v3286_v48  ;;  %v1519_v35 = vmul.f32 %v3355_v9, %v3065_v53  ;;  %v1518_v48 = vmul.f32 %v3355_v9, %v3068_v55 }
 0x13a   : > { %v1520_v18 = vmul.f32 %v3355_v9, %v3472_v11 }
 0x13b   : > { %1550 = vadd.xlane.f32.xlu1 %v1549_v54  ;;  %1547 = vadd.xlane.f32.xlu0 %v1546_v24  ;;  %v1561_v21 = vsel %vm557_vm1, %v1519_v35, 0.0 }
 0x13c   : > { %v1054_v27 = vpop.xlane.xlu1 %1053  ;;  %v1051_v0 = vpop.xlane.xlu0 %1050  ;;  %v1564_v32 = vsel %vm557_vm1, %v1520_v18, 0.0 }
 0x13d   : > { %v3461_v10 = vadd.f32 %v1054_v27, %v3308_v58  ;;  %v3464_v4 = vadd.f32 %v1051_v0, %v3311_v7  ;;  %v1558_v58 = vsel %vm557_vm1, %v1518_v48, 0.0  ;;  %v1521_v7 = vmul.f32 %v3355_v9, %v3469_v57 }
 0x13f   : > { %1556 = vadd.xlane.f32.xlu1 %v1555_v52  ;;  %1553 = vadd.xlane.f32.xlu0 %v1552_v46  ;;  %v1567_v44 = vsel %vm557_vm1, %v1521_v7, 0.0  ;;  %v1594_v52 = vmul.f32 %v3489_v50, %v2738_v28  ;;  %v1593_v46 = vmul.f32 %v3489_v50, %v2874_v59 }
 0x140   : > { %v1060_v63 = vpop.xlane.xlu1 %1059  ;;  %v1057_v8 = vpop.xlane.xlu0 %1056 }
 0x141   : > { %v3481_v54 = vadd.f32 %v1060_v63, %v3339_v49  ;;  %v3484_v24 = vadd.f32 %v1057_v8, %v3325_v23  ;;  %v1592_v49 = vmul.f32 %v3489_v50, %v2730_v25  ;;  %v1591_v23 = vmul.f32 %v3489_v50, %v2719_v22 }
 0x142   : > { %v1624_v63 = vsel %vm651_vm2, %v1594_v52, 0.0  ;;  %v1621_v8 = vsel %vm658_vm3, %v1593_v46, 0.0  ;;  %v1602_v52 = vmul.f32 %v3489_v50, %v2910_v26 }
 0x143   : > { %1562 = vadd.xlane.f32.xlu1 %v1561_v21  ;;  %1559 = vadd.xlane.f32.xlu0 %v1558_v58  ;;  %v1618_v27 = vsel %vm557_vm1, %v1592_v49, 0.0  ;;  %v1615_v0 = vsel %vm651_vm2, %v1591_v23, 0.0  ;;  %v1596_v21 = vmul.f32 %v3489_v50, %v2884_v1  ;;  %v1595_v58 = vmul.f32 %v3489_v50, %v2768_v45 }
 0x144   : > { %v1066_v51 = vpop.xlane.xlu1 %1065  ;;  %v1063_v39 = vpop.xlane.xlu0 %1062 }
 0x145   : > { %v3498_v9 = vadd.f32 %v1066_v51, %v3358_v13  ;;  %v3501_v36 = vadd.f32 %v1063_v39, %v3361_v41  ;;  %v1630_v51 = vsel %vm658_vm3, %v1596_v21, 0.0  ;;  %v1627_v39 = vsel %vm557_vm1, %v1595_v58, 0.0 }
 0x147   : > { %1568 = vadd.xlane.f32.xlu1 %v1567_v44  ;;  %1565 = vadd.xlane.f32.xlu0 %v1564_v32  ;;  %v1598_v44 = vmul.f32 %v3489_v50, %v2781_v56  ;;  %v1597_v32 = vmul.f32 %v3489_v50, %v2745_v31 }
 0x148   : > { %v1072_v60 = vpop.xlane.xlu1 %1071  ;;  %v1069_v62 = vpop.xlane.xlu0 %1068 }
 0x149   : > { %v3510_v13 = vadd.f32 %v1072_v60, %v3387_v61  ;;  %v3513_v41 = vadd.f32 %v1069_v62, %v3373_v37  ;;  %v1636_v60 = vsel %vm557_vm1, %v1598_v44, 0.0  ;;  %v1633_v62 = vsel %vm651_vm2, %v1597_v32, 0.0  ;;  %v3567_v32 = vld [vmem:[%s4057_s3 + $0x8] ss:$0 sm:$0xff] }
 0x14a   : > { %v1603_v44 = vmul.f32 %v3489_v50, %v2813_v16 }
 0x14b   : > { %1619 = vadd.xlane.f32.xlu1 %v1618_v27  ;;  %1616 = vadd.xlane.f32.xlu0 %v1615_v0  ;;  %v1600_v27 = vmul.f32 %v3489_v50, %v2762_v42  ;;  %v1599_v0 = vmul.f32 %v3489_v50, %v2900_v12 }
 0x14c   : > { %v1078_v35 = vpop.xlane.xlu1 %1077  ;;  %v1075_v48 = vpop.xlane.xlu0 %1074 }
 0x14d   : > { %v3522_v61 = vadd.f32 %v1078_v35, %v3405_v17  ;;  %v3525_v37 = vadd.f32 %v1075_v48, %v3408_v20  ;;  %v1642_v48 = vsel %vm651_vm2, %v1600_v27, 0.0 }
 0x14f   : > { %1625 = vadd.xlane.f32.xlu1 %v1624_v63  ;;  %1622 = vadd.xlane.f32.xlu0 %v1621_v8  ;;  %v1639_v63 = vsel %vm658_vm3, %v1599_v0, 0.0  ;;  %v1601_v8 = vmul.f32 %v3489_v50, %v2795_v3 }
 0x150   : > { %v1084_v7 = vpop.xlane.xlu1 %1083  ;;  %v1081_v18 = vpop.xlane.xlu0 %1080 }
 0x151   : > { %v3534_v17 = vadd.f32 %v1084_v7, %v3429_v40  ;;  %v3537_v20 = vadd.f32 %v1081_v18, %v3419_v19 }
 0x153   : > { %1631 = vadd.xlane.f32.xlu1 %v1630_v51  ;;  %1628 = vadd.xlane.f32.xlu0 %v1627_v39  ;;  %v1645_v51 = vsel %vm557_vm1, %v1601_v8, 0.0  ;;  %v1604_v39 = vmul.f32 %v3489_v50, %v2810_v14 }
 0x154   : > { %v1090_v49 = vpop.xlane.xlu1 %1089  ;;  %v1087_v23 = vpop.xlane.xlu0 %1086 }
 0x155   : > { %v3546_v40 = vadd.f32 %v1090_v49, %v3442_v5  ;;  %v3549_v19 = vadd.f32 %v1087_v23, %v3445_v34  ;;  %v1648_v34 = vsel %vm658_vm3, %v1602_v52, 0.0 }
 0x157   : > { %1637 = vadd.xlane.f32.xlu1 %v1636_v60  ;;  %1634 = vadd.xlane.f32.xlu0 %v1633_v62  ;;  %v1789_v62 = vmul.f32 %v3567_v32, %v2730_v25 }
 0x158   : > { %v1141_v46 = vpop.xlane.xlu1 %1140  ;;  %v1138_v35 = vpop.xlane.xlu0 %1137 }
 0x159   : > { %v1233_v21 = vrot.slane %v1141_v46, 1  ;;  %v1232_v5 = vrot.slane %v1138_v35, 1  ;;  %v1654_v46 = vsel %vm557_vm1, %v1604_v39, 0.0  ;;  %v1651_v35 = vsel %vm651_vm2, %v1603_v44, 0.0 }
 0x15a   : > { %v1815_v25 = vsel %vm557_vm1, %v1789_v62, 0.0 }
 0x15b   : > { %1643 = vadd.xlane.f32.xlu1 %v1642_v48  ;;  %1640 = vadd.xlane.f32.xlu0 %v1639_v63  ;;  %v1234_v58 = vsel %vm749_vm6, %v1232_v5, %v1233_v21  ;;  %v1788_v48 = vmul.f32 %v3567_v32, %v2719_v22 }
 0x15c   : > { %v1147_v7 = vpop.xlane.xlu1 %1146  ;;  %v1144_v18 = vpop.xlane.xlu0 %1143  ;;  %v3570_v49 = vadd.f32 %v1234_v58, %v3451_v2 }
 0x15d   : > { %v1235_v23 = vrot.slane %v1144_v18, 1  ;;  %v1237_v60 = vrot.slane %v1147_v7, 1  ;;  %v1812_v22 = vsel %vm851_vm4, %v1788_v48, 0.0 }
 0x15f   : > { %1649 = vadd.xlane.f32.xlu1 %v1648_v34  ;;  %1646 = vadd.xlane.f32.xlu0 %v1645_v51  ;;  %v1236_v27 = vsel %vm749_vm6, %v1233_v21, %v1235_v23  ;;  %v1791_v21 = vmul.f32 %v3567_v32, %v2738_v28 }
 0x160   : > { %v1153_v0 = vpop.xlane.xlu1 %1152  ;;  %v1150_v52 = vpop.xlane.xlu0 %1149  ;;  %v3580_v2 = vadd.f32 %v1236_v27, %v3448_v6  ;;  %v1790_v6 = vmul.f32 %v3567_v32, %v2874_v59  ;;  %v1793_v59 = vmul.f32 %v3567_v32, %v2884_v1 }
 0x161   : > { %v1240_v63 = vrot.slane %v1153_v0, 1  ;;  %v1238_v8 = vrot.slane %v1150_v52, 1  ;;  %v1821_v28 = vsel %vm851_vm4, %v1791_v21, 0.0 }
 0x162   : > { %v1818_v27 = vsel %vm858_vm5, %v1790_v6, 0.0  ;;  %v1796_v6 = vmul.f32 %v3567_v32, %v2900_v12 }
 0x163   : > { %1655 = vadd.xlane.f32.xlu1 %v1654_v46  ;;  %1652 = vadd.xlane.f32.xlu0 %v1651_v35  ;;  %v1241_v5 = vsel %vm749_vm6, %v1238_v8, %v1240_v63  ;;  %v1239_v34 = vsel %vm749_vm6, %v1237_v60, %v1238_v8  ;;  %v1794_v46 = vmul.f32 %v3567_v32, %v2745_v31  ;;  %v1827_v8 = vsel %vm858_vm5, %v1793_v59, 0.0 }
 0x164   : > { %v1159_v58 = vpop.xlane.xlu1 %1158  ;;  %v1156_v7 = vpop.xlane.xlu0 %1155  ;;  %v3591_v18 = vadd.f32 %v1241_v5, %v3461_v10  ;;  %v3594_v51 = vadd.f32 %v1239_v34, %v3464_v4  ;;  %v1792_v10 = vmul.f32 %v3567_v32, %v2768_v45  ;;  %v1605_v35 = vmul.f32 %v3489_v50, %v2926_v38 }
 0x165   : > { %v1243_v39 = vrot.slane %v1159_v58, 1  ;;  %v1242_v44 = vrot.slane %v1156_v7, 1  ;;  %v1830_v31 = vsel %vm851_vm4, %v1794_v46, 0.0 }
 0x166   : > { %v1824_v45 = vsel %vm557_vm1, %v1792_v10, 0.0  ;;  %v1657_v5 = vsel %vm658_vm3, %v1605_v35, 0.0 }
 0x167   : > { %1816 = vadd.xlane.f32.xlu1 %v1815_v25  ;;  %1813 = vadd.xlane.f32.xlu0 %v1812_v22  ;;  %v1244_v23 = vsel %vm749_vm6, %v1242_v44, %v1243_v39 }
 0x168   : > { %v1165_v60 = vpop.xlane.xlu1 %1164  ;;  %v1162_v62 = vpop.xlane.xlu0 %1161  ;;  %v3604_v4 = vadd.f32 %v1244_v23, %v3484_v24 }
 0x169   : > { %v1245_v0 = vrot.slane %v1162_v62, 1  ;;  %v1247_v52 = vrot.slane %v1165_v60, 1  ;;  %v1607_v60 = vmul.f32 %v3489_v50, %v2825_v29 }
 0x16b   : > { %1822 = vadd.xlane.f32.xlu1 %v1821_v28  ;;  %1819 = vadd.xlane.f32.xlu0 %v1818_v27  ;;  %v1246_v48 = vsel %vm749_vm6, %v1243_v39, %v1245_v0  ;;  %v1663_v0 = vsel %vm557_vm1, %v1607_v60, 0.0  ;;  %v1802_v60 = vmul.f32 %v3567_v32, %v2926_v38 }
 0x16c   : > { %v1171_v63 = vpop.xlane.xlu1 %1170  ;;  %v1168_v1 = vpop.xlane.xlu0 %1167  ;;  %v3614_v24 = vadd.f32 %v1246_v48, %v3481_v54  ;;  %v1795_v54 = vmul.f32 %v3567_v32, %v2781_v56  ;;  %v1836_v56 = vsel %vm858_vm5, %v1796_v6, 0.0 }
 0x16d   : > { %v1250_v25 = vrot.slane %v1171_v63, 1  ;;  %v1248_v21 = vrot.slane %v1168_v1, 1  ;;  %v1797_v63 = vmul.f32 %v3567_v32, %v2762_v42  ;;  %v1798_v42 = vmul.f32 %v3567_v32, %v2795_v3 }
 0x16f   : > { %1828 = vadd.xlane.f32.xlu1 %v1827_v8  ;;  %1825 = vadd.xlane.f32.xlu0 %v1824_v45  ;;  %v1251_v34 = vsel %vm749_vm6, %v1248_v21, %v1250_v25  ;;  %v1249_v58 = vsel %vm749_vm6, %v1247_v52, %v1248_v21  ;;  %v1839_v25 = vsel %vm851_vm4, %v1797_v63, 0.0 }
 0x170   : > { %v1177_v7 = vpop.xlane.xlu1 %1176  ;;  %v1174_v22 = vpop.xlane.xlu0 %1173  ;;  %v3625_v39 = vadd.f32 %v1251_v34, %v3498_v9  ;;  %v3628_v44 = vadd.f32 %v1249_v58, %v3501_v36  ;;  %v1833_v9 = vsel %vm557_vm1, %v1795_v54, 0.0  ;;  %v1606_v36 = vmul.f32 %v3489_v50, %v2828_v30 }
 0x171   : > { %v1253_v28 = vrot.slane %v1177_v7, 1  ;;  %v1252_v23 = vrot.slane %v1174_v22, 1  ;;  %v1842_v58 = vsel %vm557_vm1, %v1798_v42, 0.0  ;;  %v1610_v7 = vmul.f32 %v3489_v50, %v3065_v53 }
 0x172   : > { %v1660_v48 = vsel %vm651_vm2, %v1606_v36, 0.0  ;;  %v1609_v22 = vmul.f32 %v3489_v50, %v3068_v55  ;;  %v1801_v36 = vmul.f32 %v3567_v32, %v2810_v14 }
 0x173   : > { %1831 = vadd.xlane.f32.xlu1 %v1830_v31  ;;  %1658 = vadd.xlane.f32.xlu0 %v1657_v5  ;;  %v1254_v62 = vsel %vm749_vm6, %v1252_v23, %v1253_v28  ;;  %v1799_v31 = vmul.f32 %v3567_v32, %v2910_v26  ;;  %v1672_v6 = vsel %vm557_vm1, %v1610_v7, 0.0  ;;  %v1611_v23 = vmul.f32 %v3489_v50, %v3186_v33 }
 0x174   : > { %v3633_v27 = vpop.xlane.xlu1 %1182  ;;  %v1180_v12 = vpop.xlane.xlu0 %1179  ;;  %v3640_v59 = vadd.f32 %v1254_v62, %v3513_v41  ;;  %v1608_v41 = vmul.f32 %v3489_v50, %v2936_v47  ;;  %v1669_v54 = vsel %vm651_vm2, %v1609_v22, 0.0  ;;  %v1851_v38 = vsel %vm557_vm1, %v1801_v36, 0.0 }
 0x175   : > { %v1255_v10 = vrot.slane %v1180_v12, 1  ;;  %v1845_v34 = vsel %vm858_vm5, %v1799_v31, 0.0  ;;  %v535_v31 = vsel %vm455_vm0, %v484_v15, 0.0  ;;  %vm2161_vm0 = vcmask 130048  }
 0x176   : > { %v1666_v21 = vsel %vm658_vm3, %v1608_v41, 0.0  ;;  %v1613_v41 = vmul.f32 %v3489_v50, %v3469_v57 }
 0x177   : > { %1837 = vadd.xlane.f32.xlu1 %v1836_v56  ;;  %1834 = vadd.xlane.f32.xlu0 %v1833_v9  ;;  %v1256_v52 = vsel %vm749_vm6, %v1253_v28, %v1255_v10  ;;  %v1800_v28 = vmul.f32 %v3567_v32, %v2813_v16  ;;  %v1675_v9 = vsel %vm658_vm3, %v1611_v23, 0.0  ;;  %v1854_v16 = vsel %vm858_vm5, %v1802_v60, 0.0 }
 0x178   : > { %v3644_v46 = vpop.xlane.xlu1 %1188  ;;  %v3646_v35 = vpop.xlane.xlu0 %1185  ;;  %v3654_v1 = vadd.f32 %v1256_v52, %v3510_v13 }
 0x179   : > { %v1848_v56 = vsel %vm851_vm4, %v1800_v28, 0.0 }
 0x17b   : > { %1664 = vadd.xlane.f32.xlu1 %v1663_v0  ;;  %1661 = vadd.xlane.f32.xlu0 %v1660_v48 }
 0x17c   : > { %v3656_v8 = vpop.xlane.xlu1 %1194  ;;  %v3658_v45 = vpop.xlane.xlu0 %1191 }
 0x17f   : > { %1840 = vadd.xlane.f32.xlu1 %v1839_v25  ;;  %1667 = vadd.xlane.f32.xlu0 %v1666_v21  ;;  %v1612_v25 = vmul.f32 %v3489_v50, %v3472_v11 }
 0x180   : > { %v3666_v13 = vpop.xlane.xlu1 %1200  ;;  %v3668_v5 = vpop.xlane.xlu0 %1197 }
 0x183   : > { %1846 = vadd.xlane.f32.xlu1 %v1845_v34  ;;  %1843 = vadd.xlane.f32.xlu0 %v1842_v58  ;;  %v1803_v34 = vmul.f32 %v3567_v32, %v2828_v30  ;;  %v1805_v30 = vmul.f32 %v3567_v32, %v2936_v47 }
 0x184   : > { %v3676_v26 = vpop.xlane.xlu1 %1206  ;;  %v3678_v3 = vpop.xlane.xlu0 %1203 }
 0x185   : > { %v1857_v23 = vsel %vm851_vm4, %v1803_v34, 0.0  ;;  %v1863_v47 = vsel %vm858_vm5, %v1805_v30, 0.0 }
 0x187   : > { %1673 = vadd.xlane.f32.xlu1 %v1672_v6  ;;  %1670 = vadd.xlane.f32.xlu0 %v1669_v54  ;;  %v1681_v6 = vsel %vm557_vm1, %v1613_v41, 0.0  ;;  %v1614_v54 = vmul.f32 %v3489_v50, %v535_v31 }
 0x188   : > { %v1338_v62 = vpop.xlane.xlu1 %1337  ;;  %v1335_v12 = vpop.xlane.xlu0 %1334 }
 0x189   : > { %v1430_v10 = vrot.slane %v1338_v62, 2  ;;  %v1429_v0 = vrot.slane %v1335_v12, 2  ;;  %v1684_v50 = vsel %vm658_vm3, %v1614_v54, 0.0 }
 0x18b   : > { %1849 = vadd.xlane.f32.xlu1 %v1848_v56  ;;  %1676 = vadd.xlane.f32.xlu0 %v1675_v9  ;;  %v1431_v52 = vsel %vm949_vm7, %v1429_v0, %v1430_v10 }
 0x18c   : > { %v1344_v48 = vpop.xlane.xlu1 %1343  ;;  %v1341_v63 = vpop.xlane.xlu0 %1340  ;;  %v3700_v14 = vadd.f32 %v1431_v52, %v3570_v49  ;;  %v1678_v49 = vsel %vm651_vm2, %v1612_v25, 0.0  ;;  %v1809_v25 = vmul.f32 %v3567_v32, %v3472_v11 }
 0x18d   : > { %v1432_v21 = vrot.slane %v1341_v63, 2  ;;  %v1434_v42 = vrot.slane %v1344_v48, 2 }
 0x18e   : > { %v1875_v11 = vsel %vm851_vm4, %v1809_v25, 0.0 }
 0x18f   : > { %1855 = vadd.xlane.f32.xlu1 %v1854_v16  ;;  %1852 = vadd.xlane.f32.xlu0 %v1851_v38  ;;  %v1433_v58 = vsel %vm949_vm7, %v1430_v10, %v1432_v21  ;;  %v1808_v21 = vmul.f32 %v3567_v32, %v3186_v33 }
 0x190   : > { %v1350_v7 = vpop.xlane.xlu1 %1349  ;;  %v1347_v22 = vpop.xlane.xlu0 %1346  ;;  %v3712_v43 = vadd.f32 %v1433_v58, %v3580_v2  ;;  %v1804_v2 = vmul.f32 %v3567_v32, %v2825_v29  ;;  %v1807_v29 = vmul.f32 %v3567_v32, %v3065_v53 }
 0x191   : > { %v1437_v15 = vrot.slane %v1350_v7, 2  ;;  %v1435_v28 = vrot.slane %v1347_v22, 2 }
 0x192   : > { %v1860_v63 = vsel %vm557_vm1, %v1804_v2, 0.0  ;;  %v1869_v58 = vsel %vm557_vm1, %v1807_v29, 0.0 }
 0x193   : > { %1682 = vadd.xlane.f32.xlu1 %v1681_v6  ;;  %1679 = vadd.xlane.f32.xlu0 %v1678_v49  ;;  %v1438_v60 = vsel %vm949_vm7, %v1435_v28, %v1437_v15  ;;  %v1436_v62 = vsel %vm949_vm7, %v1434_v42, %v1435_v28  ;;  %v1872_v6 = vsel %vm858_vm5, %v1808_v21, 0.0  ;;  %v1811_v28 = vmul.f32 %v3567_v32, %v535_v31 }
 0x194   : > { %v1356_v12 = vpop.xlane.xlu1 %1355  ;;  %v1353_v56 = vpop.xlane.xlu0 %1352  ;;  %v3723_v9 = vadd.f32 %v1438_v60, %v3591_v18  ;;  %v3726_v36 = vadd.f32 %v1436_v62, %v3594_v51  ;;  %v1806_v18 = vmul.f32 %v3567_v32, %v3068_v55 }
 0x195   : > { %v1440_v10 = vrot.slane %v1356_v12, 2  ;;  %v1439_v0 = vrot.slane %v1353_v56, 2  ;;  %v1257_v12 = vrot.slane %v3633_v27, 1  ;;  %v1260_v56 = vrot.slane %v3644_v46, 1 }
 0x196   : > { %v1866_v55 = vsel %vm851_vm4, %v1806_v18, 0.0 }
 0x197   : > { %1858 = vadd.xlane.f32.xlu1 %v1857_v23  ;;  %1685 = vadd.xlane.f32.xlu0 %v1684_v50  ;;  %v1441_v16 = vsel %vm949_vm7, %v1439_v0, %v1440_v10  ;;  %v1258_v50 = vrot.slane %v3646_v35, 1  ;;  %v1263_v35 = vrot.slane %v3656_v8, 1  ;;  %v1262_v0 = vrot.slane %v3658_v45, 1 }
 0x198   : > { %v1362_v52 = vpop.xlane.xlu1 %1361  ;;  %v1359_v48 = vpop.xlane.xlu0 %1358  ;;  %v3736_v51 = vadd.f32 %v1441_v16, %v3604_v4 }
 0x199   : > { %v1442_v38 = vrot.slane %v1359_v48, 2  ;;  %v1444_v41 = vrot.slane %v1362_v52, 2  ;;  %v1261_v27 = vsel %vm749_vm6, %v1258_v50, %v1260_v56  ;;  %v1259_v46 = vsel %vm749_vm6, %v1257_v12, %v1258_v50 }
 0x19a   : > { %v1299_v18 = vadd.f32 %v1261_v27, %v3522_v61  ;;  %v1264_v25 = vsel %vm749_vm6, %v1262_v0, %v1263_v35  ;;  %v2344_v27 = vld [vmem:[#allocation2] ss:$0 sm:$0xff] }
 0x19b   : > { %1864 = vadd.xlane.f32.xlu1 %v1863_v47  ;;  %1861 = vadd.xlane.f32.xlu0 %v1860_v63  ;;  %v1443_v42 = vsel %vm949_vm7, %v1440_v10, %v1442_v38  ;;  %v1298_v38 = vadd.f32 %v1259_v46, %v3525_v37  ;;  %v1300_v61 = vadd.f32 %v1264_v25, %v3537_v20  ;;  %v1270_v37 = vrot.slane %v3676_v26, 1 }
 0x19c   : > { %v1368_v34 = vpop.xlane.xlu1 %1367  ;;  %v1365_v53 = vpop.xlane.xlu0 %1364  ;;  %v3746_v4 = vadd.f32 %v1443_v42, %v3614_v24  ;;  %v1810_v24 = vmul.f32 %v3567_v32, %v3469_v57  ;;  %v1881_v32 = vsel %vm858_vm5, %v1811_v28, 0.0 }
 0x19d   : > { %v1447_v7 = vrot.slane %v1368_v34, 2  ;;  %v1445_v22 = vrot.slane %v1365_v53, 2 }
 0x19f   : > { %1870 = vadd.xlane.f32.xlu1 %v1869_v58  ;;  %1867 = vadd.xlane.f32.xlu0 %v1866_v55  ;;  %v1448_v33 = vsel %vm949_vm7, %v1445_v22, %v1447_v7  ;;  %v1446_v49 = vsel %vm949_vm7, %v1444_v41, %v1445_v22  ;;  %v1265_v41 = vrot.slane %v3668_v5, 1  ;;  %v1267_v55 = vrot.slane %v3666_v13, 1 }
 0x1a0   : > { %v1374_v54 = vpop.xlane.xlu1 %1373  ;;  %v1371_v15 = vpop.xlane.xlu0 %1370  ;;  %v3756_v23 = vadd.f32 %v1448_v33, %v3625_v39  ;;  %v3759_v30 = vadd.f32 %v1446_v49, %v3628_v44  ;;  %v1878_v39 = vsel %vm557_vm1, %v1810_v24, 0.0  ;;  %v1268_v5 = vrot.slane %v3678_v3, 1 }
 0x1a1   : > { %v1450_v60 = vrot.slane %v1374_v54, 2  ;;  %v1449_v62 = vrot.slane %v1371_v15, 2  ;;  %v1266_v7 = vsel %vm749_vm6, %v1263_v35, %v1265_v41 }
 0x1a2   : > { %v1301_v54 = vadd.f32 %v1266_v7, %v3534_v17  ;;  %v1271_v13 = vsel %vm749_vm6, %v1268_v5, %v1270_v37  ;;  %v1269_v20 = vsel %vm749_vm6, %v1267_v55, %v1268_v5 }
 0x1a3   : > { %1876 = vadd.xlane.f32.xlu1 %v1875_v11  ;;  %1873 = vadd.xlane.f32.xlu0 %v1872_v6  ;;  %v1451_v31 = vsel %vm949_vm7, %v1449_v62, %v1450_v60  ;;  %v1303_v12 = vadd.f32 %v1271_v13, %v3546_v40  ;;  %v1302_v56 = vadd.f32 %v1269_v20, %v3549_v19 }
 0x1a4   : > { %v1380_v2 = vpop.xlane.xlu1 %1379  ;;  %v1377_v57 = vpop.xlane.xlu0 %1376  ;;  %v3768_v44 = vadd.f32 %v1451_v31, %v3640_v59 }
 0x1a5   : > { %v1452_v10 = vrot.slane %v1377_v57, 2  ;;  %v1454_v47 = vrot.slane %v1380_v2, 2 }
 0x1a7   : > { %1882 = vadd.xlane.f32.xlu1 %v1881_v32  ;;  %1879 = vadd.xlane.f32.xlu0 %v1878_v39  ;;  %v1453_v16 = vsel %vm949_vm7, %v1450_v60, %v1452_v10 }
 0x1a8   : > { %v1386_v52 = vpop.xlane.xlu1 %1385  ;;  %v1383_v48 = vpop.xlane.xlu0 %1382  ;;  %v1494_v63 = vadd.f32 %v1453_v16, %v3654_v1 }
 0x1a9   : > { %v1457_v59 = vrot.slane %v1386_v52, 2  ;;  %v1455_v29 = vrot.slane %v1383_v48, 2 }
 0x1ab   : > { %v1458_v8 = vsel %vm949_vm7, %v1455_v29, %v1457_v59  ;;  %v1456_v45 = vsel %vm949_vm7, %v1454_v47, %v1455_v29 }
 0x1ac   : > { %v1392_v21 = vpop.xlane.xlu1 %1391  ;;  %v1389_v42 = vpop.xlane.xlu0 %1388  ;;  %v1496_v34 = vadd.f32 %v1458_v8, %v1299_v18  ;;  %v1495_v53 = vadd.f32 %v1456_v45, %v1298_v38 }
 0x1ad   : > { %v1460_v58 = vrot.slane %v1392_v21, 2  ;;  %v1459_v1 = vrot.slane %v1389_v42, 2 }
 0x1af   : > { %v1461_v22 = vsel %vm949_vm7, %v1459_v1, %v1460_v58 }
 0x1b0   : > { %v1398_v11 = vpop.xlane.xlu1 %1397  ;;  %v1395_v6 = vpop.xlane.xlu0 %1394  ;;  %v1497_v33 = vadd.f32 %v1461_v22, %v1300_v61 }
 0x1b1   : > { %v1462_v49 = vrot.slane %v1395_v6, 2  ;;  %v1464_v15 = vrot.slane %v1398_v11, 2 }
 0x1b3   : > { %v1463_v28 = vsel %vm949_vm7, %v1460_v58, %v1462_v49 }
 0x1b4   : > { %v1404_v26 = vpop.xlane.xlu1 %1403  ;;  %v1401_v24 = vpop.xlane.xlu0 %1400  ;;  %v1498_v3 = vadd.f32 %v1463_v28, %v1301_v54 }
 0x1b5   : > { %v1467_v60 = vrot.slane %v1404_v26, 2  ;;  %v1465_v62 = vrot.slane %v1401_v24, 2 }
 0x1b7   : > { %v1468_v50 = vsel %vm949_vm7, %v1465_v62, %v1467_v60  ;;  %v1466_v17 = vsel %vm949_vm7, %v1464_v15, %v1465_v62 }
 0x1b8   : > { %v1527_v31 = vpop.xlane.xlu1 %1526  ;;  %v1524_v2 = vpop.xlane.xlu0 %1523  ;;  %v1500_v57 = vadd.f32 %v1468_v50, %v1303_v12  ;;  %v1499_v32 = vadd.f32 %v1466_v17, %v1302_v56 }
 0x1b9   : > { %v1571_v39 = vadd.f32 %v1527_v31, %v3712_v43  ;;  %v1570_v10 = vadd.f32 %v1524_v2, %v3700_v14 }
 0x1bc   : > { %v1533_v46 = vpop.xlane.xlu1 %1532  ;;  %v1530_v35 = vpop.xlane.xlu0 %1529 }
 0x1bd   : > { %v1573_v0 = vadd.f32 %v1533_v46, %v3723_v9  ;;  %v1572_v40 = vadd.f32 %v1530_v35, %v3726_v36  ;;  %1987 = vperm.xlu0 %2477, %v2344_v27  }
 0x1c0   : > { %v1539_v19 = vpop.xlane.xlu1 %1538  ;;  %v1536_v47 = vpop.xlane.xlu0 %1535 }
 0x1c1   : > { %v1575_v16 = vadd.f32 %v1539_v19, %v3746_v4  ;;  %v1574_v52 = vadd.f32 %v1536_v47, %v3736_v51 }
 0x1c4   : > { %v1545_v48 = vpop.xlane.xlu1 %1544  ;;  %v1542_v59 = vpop.xlane.xlu0 %1541 }
 0x1c5   : > { %v1577_v43 = vadd.f32 %v1545_v48, %v3756_v23  ;;  %v1576_v14 = vadd.f32 %v1542_v59, %v3759_v30 }
 0x1c8   : > { %v1551_v29 = vpop.xlane.xlu1 %1550  ;;  %v1548_v18 = vpop.xlane.xlu0 %1547 }
 0x1c9   : > { %v3804_v38 = vadd.f32 %v1551_v29, %v1494_v63  ;;  %v1578_v9 = vadd.f32 %v1548_v18, %v3768_v44 }
 0x1cc   : > { %v1557_v36 = vpop.xlane.xlu1 %1556  ;;  %v1554_v41 = vpop.xlane.xlu0 %1553 }
 0x1cd   : > { %v3807_v8 = vadd.f32 %v1557_v36, %v1496_v34  ;;  %v3809_v45 = vadd.f32 %v1554_v41, %v1495_v53 }
 0x1d0   : > { %v1563_v4 = vpop.xlane.xlu1 %1562  ;;  %v1560_v51 = vpop.xlane.xlu0 %1559 }
 0x1d1   : > { %v3811_v25 = vadd.f32 %v1563_v4, %v1498_v3  ;;  %v3813_v21 = vadd.f32 %v1560_v51, %v1497_v33 }
 0x1d4   : > { %v1569_v23 = vpop.xlane.xlu1 %1568  ;;  %v1566_v30 = vpop.xlane.xlu0 %1565 }
 0x1d5   : > { %v3815_v42 = vadd.f32 %v1569_v23, %v1500_v57  ;;  %v3817_v63 = vadd.f32 %v1566_v30, %v1499_v32 }
 0x1d8   : > { %v1620_v58 = vpop.xlane.xlu1 %1619  ;;  %v1617_v44 = vpop.xlane.xlu0 %1616 }
 0x1d9   : > { %v1712_v1 = vrot.slane %v1620_v58, 1  ;;  %v1711_v55 = vrot.slane %v1617_v44, 1 }
 0x1db   : > { %v1713_v34 = vsel %vm749_vm6, %v1711_v55, %v1712_v1 }
 0x1dc   : > { %v3820_v53 = vadd.f32 %v1713_v34, %v1570_v10  ;;  %v1626_v61 = vpop.xlane.xlu1 %1625  ;;  %v1623_v37 = vpop.xlane.xlu0 %1622 }
 0x1dd   : > { %v1714_v5 = vrot.slane %v1623_v37, 1  ;;  %v1716_v7 = vrot.slane %v1626_v61, 1 }
 0x1df   : > { %v1715_v22 = vsel %vm749_vm6, %v1712_v1, %v1714_v5 }
 0x1e0   : > { %v3823_v11 = vadd.f32 %v1715_v22, %v1571_v39  ;;  %v1632_v6 = vpop.xlane.xlu1 %1631  ;;  %v1629_v33 = vpop.xlane.xlu0 %1628 }
 0x1e1   : > { %v1719_v49 = vrot.slane %v1632_v6, 1  ;;  %v1717_v54 = vrot.slane %v1629_v33, 1 }
 0x1e3   : > { %v1718_v15 = vsel %vm749_vm6, %v1716_v7, %v1717_v54  ;;  %v1720_v28 = vsel %vm749_vm6, %v1717_v54, %v1719_v49 }
 0x1e4   : > { %v3827_v13 = vadd.f32 %v1718_v15, %v1572_v40  ;;  %v3829_v20 = vadd.f32 %v1720_v28, %v1573_v0  ;;  %v1638_v26 = vpop.xlane.xlu1 %1637  ;;  %v1635_v24 = vpop.xlane.xlu0 %1634 }
 0x1e5   : > { %v1722_v3 = vrot.slane %v1638_v26, 1  ;;  %v1721_v60 = vrot.slane %v1635_v24, 1 }
 0x1e7   : > { %v1723_v62 = vsel %vm749_vm6, %v1721_v60, %v1722_v3 }
 0x1e8   : > { %v3832_v12 = vadd.f32 %v1723_v62, %v1574_v52  ;;  %v1644_v56 = vpop.xlane.xlu1 %1643  ;;  %v1641_v50 = vpop.xlane.xlu0 %1640 }
 0x1e9   : > { %v1724_v17 = vrot.slane %v1641_v50, 1  ;;  %v1726_v31 = vrot.slane %v1644_v56, 1 }
 0x1eb   : > { %v1725_v2 = vsel %vm749_vm6, %v1722_v3, %v1724_v17 }
 0x1ec   : > { %v3835_v57 = vadd.f32 %v1725_v2, %v1575_v16  ;;  %v1650_v32 = vpop.xlane.xlu1 %1649  ;;  %v1647_v39 = vpop.xlane.xlu0 %1646 }
 0x1ed   : > { %v1729_v10 = vrot.slane %v1650_v32, 1  ;;  %v1727_v27 = vrot.slane %v1647_v39, 1 }
 0x1ef   : > { %v1728_v46 = vsel %vm749_vm6, %v1726_v31, %v1727_v27  ;;  %v1730_v35 = vsel %vm749_vm6, %v1727_v27, %v1729_v10 }
 0x1f0   : > { %v3839_v0 = vadd.f32 %v1728_v46, %v1576_v14  ;;  %v3841_v40 = vadd.f32 %v1730_v35, %v1577_v43  ;;  %v1656_v19 = vpop.xlane.xlu1 %1655  ;;  %v1653_v47 = vpop.xlane.xlu0 %1652 }
 0x1f1   : > { %v1732_v52 = vrot.slane %v1656_v19, 1  ;;  %v1731_v48 = vrot.slane %v1653_v47, 1 }
 0x1f3   : > { %v1733_v59 = vsel %vm749_vm6, %v1731_v48, %v1732_v52 }
 0x1f4   : > { %v1775_v16 = vadd.f32 %v1733_v59, %v1578_v9  ;;  %v1817_v29 = vpop.xlane.xlu1 %1816  ;;  %v1814_v18 = vpop.xlane.xlu0 %1813 }
 0x1f5   : > { %v1909_v10 = vrot.slane %v1817_v29, 2 }
 0x1f8   : > { %v3844_v36 = vpop.xlane.xlu1 %1822  ;;  %v1820_v41 = vpop.xlane.xlu0 %1819 }
 0x1f9   : > { %v1911_v19 = vrot.slane %v1820_v41, 2  ;;  %v1913_v41 = vrot.slane %v3844_v36, 2 }
 0x1fc   : > { %v3846_v4 = vpop.xlane.xlu1 %1828  ;;  %v3848_v51 = vpop.xlane.xlu0 %1825 }
 0x200   : > { %v3850_v14 = vpop.xlane.xlu1 %1831  ;;  %v1659_v43 = vpop.xlane.xlu0 %1658 }
 0x201   : > { %v1734_v23 = vrot.slane %v1659_v43, 1 }
 0x203   : > { %v1735_v30 = vsel %vm749_vm6, %v1732_v52, %v1734_v23 }
 0x204   : > { %v3854_v58 = vadd.f32 %v1735_v30, %v3804_v38  ;;  %v3856_v44 = vpop.xlane.xlu1 %1837  ;;  %v3858_v9 = vpop.xlane.xlu0 %1834 }
 0x208   : > { %v1665_v1 = vpop.xlane.xlu1 %1664  ;;  %v1662_v55 = vpop.xlane.xlu0 %1661 }
 0x209   : > { %v1737_v37 = vrot.slane %v1665_v1, 1  ;;  %v1736_v35 = vrot.slane %v1662_v55, 1  ;;  %v1912_v1 = vsel %vm949_vm7, %v1909_v10, %v1911_v19 }
 0x20b   : > { %v1738_v29 = vsel %vm749_vm6, %v1736_v35, %v1737_v37 }
 0x20c   : > { %v3860_v34 = vpop.xlane.xlu1 %1840  ;;  %v1668_v61 = vpop.xlane.xlu0 %1667 }
 0x20d   : > { %v1739_v5 = vrot.slane %v1668_v61, 1  ;;  %v1914_v61 = vrot.slane %v3848_v51, 2 }
 0x20f   : > { %v1740_v7 = vsel %vm749_vm6, %v1737_v37, %v1739_v5  ;;  %v1777_v37 = vadd.f32 %v1738_v29, %v3809_v45 }
 0x210   : > { %v3864_v22 = vadd.f32 %v1740_v7, %v3807_v8  ;;  %v3866_v6 = vpop.xlane.xlu1 %1846  ;;  %v3868_v38 = vpop.xlane.xlu0 %1843 }
 0x214   : > { %v1671_v33 = vpop.xlane.xlu0 %1670  ;;  %v1674_v49 = vpop.xlane.xlu1 %1673 }
 0x215   : > { %v1742_v15 = vrot.slane %v1674_v49, 1 }
 0x218   : > { %v1677_v54 = vpop.xlane.xlu0 %1676  ;;  %v1850_v26 = vpop.xlane.xlu1 %1849 }
 0x219   : > { %v1744_v28 = vrot.slane %v1677_v54, 1  ;;  %v1928_v27 = vrot.slane %v1850_v26, 2  ;;  %v1916_v26 = vrot.slane %v3846_v4, 2 }
 0x21b   : > { %v1745_v24 = vsel %vm749_vm6, %v1742_v15, %v1744_v28  ;;  %v1965_v28 = vadd.f32 %v1912_v1, %v3823_v11  ;;  %v1917_v19 = vsel %vm949_vm7, %v1914_v61, %v1916_v26 }
 0x21c   : > { %v3872_v3 = vadd.f32 %v1745_v24, %v3811_v25  ;;  %v3874_v60 = vpop.xlane.xlu0 %1852  ;;  %v3876_v8 = vpop.xlane.xlu1 %1855  ;;  %v1908_v25 = vrot.slane %v1814_v18, 2  ;;  %v1741_v18 = vrot.slane %v1671_v33, 1 }
 0x21d   : > { %v1929_v46 = vrot.slane %v3874_v60, 2 }
 0x21e   : > { %v1910_v47 = vsel %vm949_vm7, %v1908_v25, %v1909_v10  ;;  %v1743_v33 = vsel %vm749_vm6, %v1741_v18, %v1742_v15  ;;  %v1967_v18 = vadd.f32 %v1917_v19, %v3829_v20  ;;  %v1924_v20 = vrot.slane %v3868_v38, 2 }
 0x21f   : > { %v1930_v52 = vsel %vm949_vm7, %v1928_v27, %v1929_v46  ;;  %v1964_v30 = vadd.f32 %v1910_v47, %v3820_v53  ;;  %v1779_v25 = vadd.f32 %v1743_v33, %v3813_v21  ;;  %v1918_v47 = vrot.slane %v3850_v14, 2 }
 0x220   : > { %v1680_v62 = vpop.xlane.xlu0 %1679  ;;  %v3880_v50 = vpop.xlane.xlu1 %1682  ;;  %v1972_v55 = vadd.f32 %v1930_v52, %v1775_v16  ;;  %v1919_v52 = vrot.slane %v3858_v9, 2 }
 0x221   : > { %v1747_v16 = vrot.slane %v3880_v50, 1  ;;  %v1746_v51 = vrot.slane %v1680_v62, 1 }
 0x223   : > { %v1748_v4 = vsel %vm749_vm6, %v1746_v51, %v1747_v16 }
 0x224   : > { %v3878_v56 = vpop.xlane.xlu0 %1685  ;;  %v1859_v2 = vpop.xlane.xlu1 %1858 }
 0x225   : > { %v1933_v48 = vrot.slane %v1859_v2, 2  ;;  %v1749_v60 = vrot.slane %v3878_v56, 1 }
 0x228   : > { %v3882_v17 = vpop.xlane.xlu0 %1861  ;;  %v3886_v39 = vpop.xlane.xlu1 %1864 }
 0x229   : > { %v1934_v59 = vrot.slane %v3882_v17, 2  ;;  %v1750_v17 = vsel %vm749_vm6, %v1747_v16, %v1749_v60 }
 0x22a   : > { %v1782_v56 = vadd.f32 %v1750_v17, %v3815_v42 }
 0x22b   : > { %v1935_v5 = vsel %vm949_vm7, %v1933_v48, %v1934_v59  ;;  %v1781_v48 = vadd.f32 %v1748_v4, %v3817_v63 }
 0x22c   : > { %v1868_v31 = vpop.xlane.xlu0 %1867  ;;  %v3896_v23 = vpop.xlane.xlu1 %1870  ;;  %v1974_v24 = vadd.f32 %v1935_v5, %v1777_v37  ;;  %v1926_v5 = vrot.slane %v3866_v6, 2  ;;  %v1936_v6 = vrot.slane %v3886_v39, 2 }
 0x22d   : > { %v1939_v7 = vrot.slane %v3896_v23, 2  ;;  %v1938_v49 = vrot.slane %v1868_v31, 2  ;;  %v1915_v31 = vsel %vm949_vm7, %v1913_v41, %v1914_v61  ;;  %v1920_v41 = vsel %vm949_vm7, %v1918_v47, %v1919_v52 }
 0x22e   : > { %v1966_v27 = vadd.f32 %v1915_v31, %v3827_v13  ;;  %v1968_v1 = vadd.f32 %v1920_v41, %v3832_v12 }
 0x22f   : > { %v1940_v45 = vsel %vm949_vm7, %v1938_v49, %v1939_v7 }
 0x230   : > { %v3884_v32 = vpop.xlane.xlu0 %1873  ;;  %v1877_v2 = vpop.xlane.xlu1 %1876  ;;  %v1976_v35 = vadd.f32 %v1940_v45, %v1779_v25 }
 0x231   : > { %v1943_v10 = vrot.slane %v1877_v2, 2  ;;  %v1941_v51 = vrot.slane %v3884_v32, 2 }
 0x233   : > { %v1942_v39 = vsel %vm949_vm7, %v1939_v7, %v1941_v51 }
 0x234   : > { %v3894_v43 = vpop.xlane.xlu0 %1879  ;;  %v1977_v32 = vadd.f32 %v1942_v39, %v3872_v3  ;;  %v2070_v3 = vlaneseq }
 0x235   : > { %v1944_v15 = vrot.slane %v3894_v43, 2 }
 0x236   : > { %v2073_v4 = vshrl.u32 %v2070_v3, 7 }
 0x237   : > { %v1945_v21 = vsel %vm949_vm7, %v1943_v10, %v1944_v15 }
 0x238   : > { %v1978_v13 = vadd.f32 %v1945_v21, %v1781_v48 }
 0x23c   : > { %v3907_v54 = vpop.permute.xlu0 %1987 }
 0x23d   : > { %v1998_v53 = vadd.f32 %v3907_v54, %v1972_v55  ;;  %v1990_v36 = vadd.f32 %v3907_v54, %v1964_v30  ;;  %v2000_v62 = vadd.f32 %v3907_v54, %v1974_v24  ;;  %v1991_v11 = vadd.f32 %v3907_v54, %v1965_v28  ;;  %v1883_v28 = vpop.xlane.xlu1 %1882 }
 0x23e   : > { %v2002_v43 = vadd.f32 %v3907_v54, %v1976_v35  ;;  %v1992_v29 = vadd.f32 %v3907_v54, %v1966_v27  ;;  %v1921_v30 = vrot.slane %v3856_v44, 2  ;;  %v2004_v14 = vadd.f32 %v3907_v54, %v1978_v13 }
 0x23f   : > { %2047 = vperm.xlu0 %2477, %v1998_v53   ;;  %2023 = vperm.xlu1 %2478, %v1990_v36   ;;  %v1993_v9 = vadd.f32 %v3907_v54, %v1967_v18  ;;  %v1923_v55 = vrot.slane %v3860_v34, 2  ;;  %v1994_v61 = vadd.f32 %v3907_v54, %v1968_v1  ;;  %v1927_v53 = vsel %vm949_vm7, %v1924_v20, %v1926_v5 }
 0x240   : > { %v1922_v63 = vsel %vm949_vm7, %v1919_v52, %v1921_v30  ;;  %v1931_v34 = vrot.slane %v3876_v8, 2  ;;  %v1971_v36 = vadd.f32 %v1927_v53, %v3841_v40  ;;  %v1937_v8 = vsel %vm949_vm7, %v1934_v59, %v1936_v6 }
 0x241   : > { %v1969_v44 = vadd.f32 %v1922_v63, %v3835_v57  ;;  %v1925_v49 = vsel %vm949_vm7, %v1923_v55, %v1924_v20 }
 0x242   : > { %v1970_v12 = vadd.f32 %v1925_v49, %v3839_v0  ;;  %v1932_v57 = vsel %vm949_vm7, %v1929_v46, %v1931_v34  ;;  %v1997_v33 = vadd.f32 %v3907_v54, %v1971_v36  ;;  %v1975_v46 = vadd.f32 %v1937_v8, %v3864_v22 }
 0x243   : > { %2053 = vperm.xlu0 %2477, %v2000_v62   ;;  %2026 = vperm.xlu1 %2478, %v1991_v11   ;;  %v1995_v37 = vadd.f32 %v3907_v54, %v1969_v44  ;;  %v1973_v0 = vadd.f32 %v1932_v57, %v3854_v58  ;;  %v1946_v58 = vrot.slane %v1883_v28, 2  ;;  %v2003_v22 = vadd.f32 %v3907_v54, %v1977_v32 }
 0x244   : > { %v1996_v38 = vadd.f32 %v3907_v54, %v1970_v12  ;;  %v2001_v26 = vadd.f32 %v3907_v54, %v1975_v46 }
 0x245   : > { %v1999_v40 = vadd.f32 %v3907_v54, %v1973_v0  ;;  %v1947_v59 = vsel %vm949_vm7, %v1944_v15, %v1946_v58  ;;  %v2071_v15 = vand.u32 127, %v2070_v3 }
 0x246   : > { %v1979_v24 = vadd.f32 %v1947_v59, %v1782_v56 }
 0x247   : > { %2059 = vperm.xlu0 %2477, %v2002_v43   ;;  %2029 = vperm.xlu1 %2478, %v1992_v29   ;;  %v2076_v42 = vadd.s32 4294967288, %v2071_v15  ;;  %v2074_v35 = vsub.s32 %v2071_v15, %v2073_v4 }
 0x248   : > { %v2005_v23 = vadd.f32 %v3907_v54, %v1979_v24 }
 0x249   : > { %v2079_v54 = vsub.s32 %v2076_v42, %v2073_v4 }
 0x24b   : > { %2065 = vperm.xlu0 %2477, %v2004_v14   ;;  %2032 = vperm.xlu1 %2478, %v1993_v9  }
 0x24f   : > { %2035 = vperm.xlu1 %2478, %v1994_v61  }
 0x253   : > { %2038 = vperm.xlu1 %2478, %v1995_v37  }
 0x257   : > { %2041 = vperm.xlu1 %2478, %v1996_v38  }
 0x25b   : > { %2044 = vperm.xlu1 %2478, %v1997_v33  }
 0x25f   : > { %2050 = vperm.xlu1 %2478, %v1999_v40  }
 0x263   : > { %2056 = vperm.xlu1 %2478, %v2001_v26  }
 0x267   : > { %2062 = vperm.xlu1 %2478, %v2003_v22  }
 0x26b   : > { %2068 = vperm.xlu1 %2478, %v2005_v23  }
 0x2be   : > { %v2024_v7 = vpop.permute.xlu1 %2023  ;;  %v2048_v10 = vpop.permute.xlu0 %2047 }
 0x2bf   : > { %v2075_v30 = vrot.slane %v2024_v7, %v2074_v35  ;;  %v2113_v1 = vrot.slane %v2048_v10, %v2074_v35 }
 0x2c2   : > { %v2027_v2 = vpop.permute.xlu1 %2026  ;;  %v2054_v11 = vpop.permute.xlu0 %2053 }
 0x2c3   : > { %v2080_v48 = vrot.slane %v2027_v2, %v2079_v54  ;;  %v2122_v20 = vrot.slane %v2054_v11, %v2074_v35 }
 0x2c5   : > { %v2082_v61 = vsel %vm2081_vm8, %v2080_v48, %v2075_v30 }
 0x2c6   : > { %v2030_v31 = vpop.permute.xlu1 %2029  ;;  %v2060_v47 = vpop.permute.xlu0 %2059 }
 0x2c7   : > { %v2086_v43 = vrot.slane %v2030_v31, %v2074_v35  ;;  %v2131_v49 = vrot.slane %v2060_v47, %v2074_v35 }
 0x2ca   : > { %v2033_v50 = vpop.permute.xlu1 %2032  ;;  %v2066_v37 = vpop.permute.xlu0 %2065 }
 0x2cb   : > { %v2090_v19 = vrot.slane %v2033_v50, %v2079_v54  ;;  %v2140_v33 = vrot.slane %v2066_v37, %v2074_v35 }
 0x2cd   : > { %v2091_v41 = vsel %vm2081_vm8, %v2090_v19, %v2086_v43 }
 0x2ce   : > { %v2036_v16 = vpop.permute.xlu1 %2035  ;;  %v2147_v12 = vsel %vm2146_vm9, %v2091_v41, %v2082_v61 }
 0x2cf   : > { %v2095_v18 = vrot.slane %v2036_v16, %v2074_v35 }
 0x2d2   : > { %v2039_v45 = vpop.permute.xlu1 %2038 }
 0x2d3   : > { %v2099_v52 = vrot.slane %v2039_v45, %v2079_v54 }
 0x2d5   : > { %v2100_v63 = vsel %vm2081_vm8, %v2099_v52, %v2095_v18 }
 0x2d6   : > { %v2042_v25 = vpop.permute.xlu1 %2041  ;;  %v2149_v34 = vsel %vm2148_vm10, %v2100_v63, %v2147_v12 }
 0x2d7   : > { %v2104_v14 = vrot.slane %v2042_v25, %v2074_v35 }
 0x2da   : > { %v2045_v62 = vpop.permute.xlu1 %2044 }
 0x2db   : > { %v2108_v29 = vrot.slane %v2045_v62, %v2079_v54 }
 0x2dd   : > { %v2109_v44 = vsel %vm2081_vm8, %v2108_v29, %v2104_v14 }
 0x2de   : > { %v2051_v27 = vpop.permute.xlu1 %2050  ;;  %v2151_v36 = vsel %vm2150_vm11, %v2109_v44, %v2149_v34 }
 0x2df   : > { %v2117_v13 = vrot.slane %v2051_v27, %v2079_v54 }
 0x2e1   : > { %v2118_v53 = vsel %vm2081_vm8, %v2117_v13, %v2113_v1 }
 0x2e2   : > { %v2057_v21 = vpop.permute.xlu1 %2056  ;;  %v2153_v0 = vsel %vm2152_vm12, %v2118_v53, %v2151_v36 }
 0x2e3   : > { %v2126_v9 = vrot.slane %v2057_v21, %v2079_v54 }
 0x2e5   : > { %v2127_v38 = vsel %vm2081_vm8, %v2126_v9, %v2122_v20 }
 0x2e6   : > { %v2063_v55 = vpop.permute.xlu1 %2062  ;;  %v2155_v51 = vsel %vm2154_vm13, %v2127_v38, %v2153_v0 }
 0x2e7   : > { %v2135_v5 = vrot.slane %v2063_v55, %v2079_v54 }
 0x2e9   : > { %v2136_v57 = vsel %vm2081_vm8, %v2135_v5, %v2131_v49 }
 0x2ea   : > { %v2069_v6 = vpop.permute.xlu1 %2068  ;;  %v2157_v28 = vsel %vm2156_vm14, %v2136_v57, %v2155_v51 }
 0x2eb   : > { %v2144_v8 = vrot.slane %v2069_v6, %v2079_v54 }
 0x2ed   : > { %v2145_v40 = vsel %vm2081_vm8, %v2144_v8, %v2140_v33 }
 0x2ee   : > { %v2159_v60 = vsel %vm2158_vm15, %v2145_v40, %v2157_v28 }
 0x2ef   : > { %2162 = vst.msk [vmem:[%s336_s9] sm:$0xff] %vm2161_vm0, %v2159_v60 }
 0x2f0   : > { %2492 = shalt.err (!%p2489_p13)
}
 0x2f1   : > { %s2493_s16 = scalar_lea.hbm %s3999_s28, 128  ;;  %s2497_s19 = scalar_lea.hbm %s4059_s5, 512 }
 0x2f2   : > { %p2494_p0 = scmp.ne.s32.totalorder %s3999_s28, %s2493_s16  ;;  %p2498_p4 = scmp.lt.u32.totalorder %s3999_s28, %s4059_s5 }
 0x2f3   : > { %p2499_p5 = scmp.lt.u32.totalorder %s2497_s19, %s2493_s16  ;;  %p2501_p7 = scmp.lt.u32.totalorder %s2493_s16, %s3999_s28 }
 0x2f4   : > { %p2495_p1 = pnand %p2494_p0, %p2661_p3 }
 0x2f5   : > { %p2500_p6 = por %p2499_p5, %p2498_p4 }
 0x2f6   : > { %p2496_p2 = pneg %p2495_p1 }
 0x2f7   : > { %p2502_p9 = por %p2501_p7, %p2500_p6 }
 0x2f9   : > { %p2503_p10 = pnand %p2502_p9, %p2496_p2 }
 0x2fb   : > { %2506 = shalt.err (!%p2503_p10)
}
 0x2fc   : > { %2405 = dma.vmem_to_hbm [thread:$0]  (%p2661_p3), %s4001_s23, 128, %s3999_s28, %s2164_s6  }
 0x2fd PF: > { %p2411_p11 = scmp.ge.s32.totalorder %s2573_s27, 2  ;;  %s2191_s17 = sand.u32 1, %s2545_s20  }
 0x2fe   : > { %s2192_s4 = scalar_lea.sflag [#allocation4], %s2191_s17 }
 0x2ff   : > { %p2408_p12 = pnand %p2411_p11, %p2670_p8 }
 0x301   : > { %2540 = dma.done.wait (!%p2408_p12), %s2192_s4, 128  }
 0x302   : > { %2542 = vsyncadd (!%p2408_p12), %s2192_s4, 4294967168  ;;  %s20_s27 = sadd.s32 1, %s2573_s27   ;;  %s4064_s20 = smov %s2549_s21 }
 0x303   : > { %p17_p13 = scmp.ge.s32.totalorder %s20_s27, 6   ;;  %s4065_s21 = smov %s2553_s22 }
 0x304   : > { %s4066_s22 = smov %s2679_s12  ;;  %s4067_s23 = smov %s2565_s25 }
 0x305   : > { %s4068_s24 = smov %s2569_s26  ;;  %s4069_s25 = smov %s4072_s29 }
 0x306   : > { %s4070_s26 = smov %s4076_s30  ;;  %19 = sbr.rel (!%p17_p13) target bundleno = 8 (0x8), region = 81 }
 0x30d   :  { %2197 = vsyncpa [#allocation4], 1 }
 0x30e   :  { %2199 = vsyncpa [#allocation4 + $0x1], 1 }

</bundles_post_ra>
